<compile_context>
chip_gen: v6e
topology: v6e:2x2x1
jax: 0.10.0
libtpu: 0.0.40
codegen_flags: <defaults>
</compile_context>

<pallas_src>
import functools

import numpy as np
import jax
import jax.numpy as jnp
from jax import lax
from jax.experimental import pallas as pl
from jax.experimental.pallas import tpu as pltpu


def _round_up(x, m):
    return ((x + m - 1) // m) * m


def _pick_tm(M):
    """Row tile: large tiles for large M, else ~M/2 so 'parallel' grids have
    >= 2 steps (keeps both v7x TensorCores busy)."""
    if M >= 2048:
        return 512
    if M >= 512:
        return 256
    return max(8, _round_up((M + 1) // 2, 8))


# ----------------------------------------------------------------------------
# Pallas kernel 1: matmul + bias + optional ReLU, bf16 store (conv hot path).
# K and N are single full-extent blocks (K <= 1152, N <= 384 in this model).
# ----------------------------------------------------------------------------
def _mm_kernel(a_ref, b_ref, bias_ref, o_ref, *, relu):
    acc = jnp.dot(a_ref[...], b_ref[...], preferred_element_type=jnp.float32)
    acc = acc + bias_ref[...]
    if relu:
        acc = jnp.maximum(acc, 0.0)
    o_ref[...] = acc.astype(o_ref.dtype)


def pallas_matmul(a, b, bias, relu=True):
    """relu(a @ b + bias) -> bf16.  a:(M,K) bf16, b:(K,Np) bf16 (Np%128==0),
    bias:(1,Np) f32.  M is not padded; edge blocks use masked stores."""
    M, K = a.shape
    Kb, Np = b.shape
    assert K == Kb and Np % 128 == 0
    tm = _pick_tm(M)
    return pl.pallas_call(
        functools.partial(_mm_kernel, relu=relu),
        out_shape=jax.ShapeDtypeStruct((M, Np), jnp.bfloat16),
        grid=(pl.cdiv(M, tm),),
        in_specs=[pl.BlockSpec((tm, K), lambda i: (i, 0)),
                  pl.BlockSpec((K, Np), lambda i: (0, 0)),
                  pl.BlockSpec((1, Np), lambda i: (0, 0))],
        out_specs=pl.BlockSpec((tm, Np), lambda i: (i, 0)),
        compiler_params=pltpu.CompilerParams(
            dimension_semantics=("parallel",)),
    )(a, b, bias)


# ----------------------------------------------------------------------------
# Pallas kernel 2: matmul + bias + ReLU with fused channel-wise L2 norm
# (_normalize_tensor) as a second bf16 output.  Requires the full channel dim
# in one tile (true here: N <= 384); padded channels are zero so the norm is
# exact: y = x / sqrt(eps + sum_c x^2), matching the reference module.
# ----------------------------------------------------------------------------
def _mm_norm_kernel(a_ref, b_ref, bias_ref, o_ref, n_ref, *, eps):
    acc = jnp.dot(a_ref[...], b_ref[...], preferred_element_type=jnp.float32)
    acc = jnp.maximum(acc + bias_ref[...], 0.0)
    o_ref[...] = acc.astype(o_ref.dtype)
    inv = lax.rsqrt(eps + jnp.sum(acc * acc, axis=-1, keepdims=True))
    n_ref[...] = (acc * inv).astype(n_ref.dtype)


def pallas_matmul_norm(a, b, bias, eps=1e-8):
    M, K = a.shape
    Kb, Np = b.shape
    assert K == Kb and Np % 128 == 0
    tm = _pick_tm(M)
    return pl.pallas_call(
        functools.partial(_mm_norm_kernel, eps=eps),
        out_shape=(jax.ShapeDtypeStruct((M, Np), jnp.bfloat16),
                   jax.ShapeDtypeStruct((M, Np), jnp.bfloat16)),
        grid=(pl.cdiv(M, tm),),
        in_specs=[pl.BlockSpec((tm, K), lambda i: (i, 0)),
                  pl.BlockSpec((K, Np), lambda i: (0, 0)),
                  pl.BlockSpec((1, Np), lambda i: (0, 0))],
        out_specs=(pl.BlockSpec((tm, Np), lambda i: (i, 0)),
                   pl.BlockSpec((tm, Np), lambda i: (i, 0))),
        compiler_params=pltpu.CompilerParams(
            dimension_semantics=("parallel",)),
    )(a, b, bias)


# ----------------------------------------------------------------------------
# Pallas kernel 3: PuzzleSim similarity map.  sim = refs x img^T contracted
# over channels; running max over reference-row tiles (reduction grid axis,
# output block resident); tiled over output lanes ("parallel") -> (1,HW) f32.
# ----------------------------------------------------------------------------
def _maxsim_kernel(refs_ref, img_ref, o_ref, *, valid_rows, tr):
    r = pl.program_id(1)
    sim = lax.dot_general(refs_ref[...], img_ref[...],
                          dimension_numbers=(((1,), (1,)), ((), ())),
                          preferred_element_type=jnp.float32)   # (tr, tl)
    row_ids = lax.broadcasted_iota(jnp.int32, sim.shape, 0) + r * tr
    sim = jnp.where(row_ids < valid_rows, sim, -jnp.inf)        # mask pad rows
    blk = jnp.max(sim, axis=0, keepdims=True)                   # (1, tl)

    @pl.when(r == 0)
    def _():
        o_ref[...] = blk

    @pl.when(r > 0)
    def _():
        o_ref[...] = jnp.maximum(o_ref[...], blk)


def pallas_max_sim(img_feat, ref_feat):
    """img_feat:(1,H,W,Cp), ref_feat:(Nr,H,W,Cp) normalized bf16 -> (H,W) f32.
    Assumes a single query image (n_img == 1), like the PyTorch forward."""
    _, H, W, Cp = img_feat.shape
    Nr = ref_feat.shape[0]
    HW = H * W
    R = Nr * HW
    HWp = _round_up(HW, 128)
    tl = 128
    tr = min(512, _round_up(R, 8))
    Rp = _round_up(R, tr)
    img2d = jnp.pad(img_feat.reshape(HW, Cp), ((0, HWp - HW), (0, 0)))
    refs = jnp.pad(ref_feat.reshape(R, Cp), ((0, Rp - R), (0, 0)))
    out = pl.pallas_call(
        functools.partial(_maxsim_kernel, valid_rows=R, tr=tr),
        out_shape=jax.ShapeDtypeStruct((1, HWp), jnp.float32),
        grid=(HWp // tl, Rp // tr),
        in_specs=[pl.BlockSpec((tr, Cp), lambda l, r: (r, 0)),
                  pl.BlockSpec((tl, Cp), lambda l, r: (l, 0))],
        out_specs=pl.BlockSpec((1, tl), lambda l, r: (0, l)),
        compiler_params=pltpu.CompilerParams(
            dimension_semantics=("parallel", "arbitrary")),
    )(refs, img2d)
    return out[0, :HW].reshape(H, W)


# ----------------------------------------------------------------------------
# Glue ops (XLA): im2col patch extraction, ceil-mode max-pool, upsample.
# ----------------------------------------------------------------------------
def _im2col(x, ksize, stride, padding):
    """x:(N,H,W,C) -> (N*OH*OW, ksize*ksize*C), tap-major / channel-minor."""
    # TODO(synk): patch extraction is still XLA slices+concat; a direct-conv
    # Pallas kernel (in-kernel 9-tap accumulation) would remove this glue.
    N, H, W, C = x.shape
    if padding:
        x = jnp.pad(x, ((0, 0), (padding, padding), (padding, padding), (0, 0)))
    Hp, Wp = x.shape[1], x.shape[2]
    OH = (Hp - ksize) // stride + 1
    OW = (Wp - ksize) // stride + 1
    cols = [x[:, kh:kh + stride * OH:stride, kw:kw + stride * OW:stride, :]
            for kh in range(ksize) for kw in range(ksize)]
    a = jnp.concatenate(cols, axis=-1).reshape(N * OH * OW, ksize * ksize * C)
    return a, OH, OW


def maxpool3x3s2_ceil(x):
    """ceil_mode 3x3/2 max-pool.  Post-ReLU data is >= 0 and padded channels
    are 0, so zero padding is equivalent to PyTorch's implicit -inf padding."""
    # TODO(synk): max-pool stays as lax.reduce_window glue, not a Pallas kernel.
    k, s = 3, 2
    N, H, W, C = x.shape
    OH = -((H - k) // -s) + 1
    OW = -((W - k) // -s) + 1
    pad_h = max(0, (OH - 1) * s + k - H)
    pad_w = max(0, (OW - 1) * s + k - W)
    xp = jnp.pad(x, ((0, 0), (0, pad_h), (0, pad_w), (0, 0)))
    return lax.reduce_window(xp, jnp.zeros((), x.dtype), lax.max,
                             (1, k, k, 1), (1, s, s, 1), 'VALID')


def conv0_forward(x, p):
    """3x3 stride-2 conv + ReLU.  x:(N,H,W,3) bf16 -> (N,OH,OW,128) bf16."""
    N = x.shape[0]
    a, OH, OW = _im2col(x, 3, 2, 0)                       # (M, 27)
    Kp = p["w"].shape[0]
    a = jnp.pad(a, ((0, 0), (0, Kp - a.shape[1])))        # single K pad 27->128
    out = pallas_matmul(a, p["w"], p["b"], relu=True)
    return out.reshape(N, OH, OW, p["w"].shape[1])


def fire_forward(x, p, want_norm):
    """Fire: squeeze 1x1 + ReLU, then ONE combined expand matmul producing the
    concatenated [expand1x1 | expand3x3] block (optionally with fused L2 norm
    as a second output for the layers PuzzleSim consumes)."""
    N, H, W, Cp = x.shape
    Sp = p["w_sq"].shape[1]
    s = pallas_matmul(x.reshape(N * H * W, Cp), p["w_sq"], p["b_sq"], relu=True)
    s = s.reshape(N, H, W, Sp)
    a, OH, OW = _im2col(s, 3, 1, 1)                       # (M, 9*Sp)
    Np = p["w_ex"].shape[1]
    if want_norm:
        act, nrm = pallas_matmul_norm(a, p["w_ex"], p["b_ex"])
        return act.reshape(N, OH, OW, Np), nrm.reshape(N, OH, OW, Np)
    act = pallas_matmul(a, p["w_ex"], p["b_ex"], relu=True)
    return act.reshape(N, OH, OW, Np), None


# ----------------------------------------------------------------------------
# Truncated squeezenet1_1 features + fused normalization for layers (2,3,4).
# ----------------------------------------------------------------------------
LAYERS = (2, 3, 4)
WEIGHTS = (0.67, 0.2, 0.13)


def compute_features(x_nchw, P):
    """2x-1 rescale + ScalingLayer + squeezenet slices 1..5, with
    _normalize_tensor fused into the last matmul of slices 3/4/5."""
    shift = jnp.array([-0.030, -0.088, -0.188], jnp.float32).reshape(1, 3, 1, 1)
    scale = jnp.array([0.458, 0.448, 0.450], jnp.float32).reshape(1, 3, 1, 1)
    x = 2.0 * x_nchw - 1.0                       # normalize=True
    x = (x - shift) / scale                      # ScalingLayer
    x = jnp.transpose(x, (0, 2, 3, 1)).astype(jnp.bfloat16)   # NCHW -> NHWC
    f = P["fires"]
    h = conv0_forward(x, P["conv0"])             # slice1
    h = maxpool3x3s2_ceil(h)
    h, _ = fire_forward(h, f[0], False)
    h, _ = fire_forward(h, f[1], False)          # slice2
    h = maxpool3x3s2_ceil(h)
    h, _ = fire_forward(h, f[2], False)
    h, n2 = fire_forward(h, f[3], True)          # slice3 -> layer 2 (256 ch)
    h = maxpool3x3s2_ceil(h)
    h, n3 = fire_forward(h, f[4], True)          # slice4 -> layer 3 (384 ch)
    _, n4 = fire_forward(h, f[5], True)          # slice5 -> layer 4 (384 ch)
    return {2: n2, 3: n3, 4: n4}


def _interp_matrix(out_size, in_size):
    """Bilinear align_corners=True interpolation matrix (numpy constant)."""
    if in_size == 1:
        return jnp.ones((out_size, 1), jnp.float32)
    src = np.arange(out_size, dtype=np.float64) * (in_size - 1) / (out_size - 1)
    i0 = np.clip(np.floor(src).astype(np.int64), 0, in_size - 2)
    w1 = (src - i0).astype(np.float32)
    m = np.zeros((out_size, in_size), np.float32)
    m[np.arange(out_size), i0] += 1.0 - w1
    m[np.arange(out_size), i0 + 1] += w1
    return jnp.asarray(m)


def puzzle_sim_forward(img, reference, params):
    """PuzzleSim forward: layers=(2,3,4), weights=(0.67,0.2,0.13),
    reduction='sum'.  Single backbone pass over the img + reference batch."""
    n_img = img.shape[0]
    feats = compute_features(jnp.concatenate([img, reference], axis=0), params)
    H_out, W_out = img.shape[-2], img.shape[-1]
    total = jnp.zeros((H_out, W_out), jnp.float32)
    for i, layer in enumerate(LAYERS):
        fmap = feats[layer]
        sim_map = pallas_max_sim(fmap[:n_img], fmap[n_img:])   # (H, W) f32
        H, W = sim_map.shape
        A = _interp_matrix(H_out, H) * WEIGHTS[i]   # layer weight folded in
        B = _interp_matrix(W_out, W)
        total = total + A @ sim_map @ B.T           # align_corners=True upsample
    return total                                    # reduction='sum'


# ----------------------------------------------------------------------------
# Parameters: deterministic He-normal init (pretrained torchvision weights are
# not available in-script), then a ONE-TIME prep into padded bf16 matmul form.
# ----------------------------------------------------------------------------
FIRE_CFG = [(64, 16, 64, 64), (128, 16, 64, 64),
            (128, 32, 128, 128), (256, 32, 128, 128),
            (256, 48, 192, 192), (384, 48, 192, 192),
            (384, 64, 256, 256), (512, 64, 256, 256)]


def init_params(key):
    keys = jax.random.split(key, 1 + 3 * len(FIRE_CFG))
    ki = iter(keys)

    def conv_p(k, o, c, kh, kw):
        fan_in = c * kh * kw
        w = jax.random.normal(k, (o, c, kh, kw), jnp.float32) * (2.0 / fan_in) ** 0.5
        return {"w": w, "b": jnp.zeros((o,), jnp.float32)}

    params = {"conv0": conv_p(next(ki), 64, 3, 3, 3), "fires": []}
    for (cin, s, e1, e3) in FIRE_CFG:
        params["fires"].append({
            "squeeze": conv_p(next(ki), s, cin, 1, 1),
            "expand1": conv_p(next(ki), e1, s, 1, 1),
            "expand3": conv_p(next(ki), e3, s, 3, 3),
        })
    return params


def prepare_params(raw):
    """Pad weights to 128-channel multiples, cast to bf16 and build each
    fire's combined [expand1x1 | expand3x3] weight matrix.  Run once, eagerly."""
    prep = {}

    w, b = raw["conv0"]["w"], raw["conv0"]["b"]
    O, Cin, KH, KW = w.shape
    K = KH * KW * Cin
    Kp, Np = _round_up(K, 128), _round_up(O, 128)
    wm = jnp.transpose(w, (2, 3, 1, 0)).reshape(K, O)     # tap-major rows
    wm = jnp.pad(wm, ((0, Kp - K), (0, Np - O)))
    prep["conv0"] = {
        "w": wm.astype(jnp.bfloat16),
        "b": jnp.pad(b, (0, Np - O)).reshape(1, Np).astype(jnp.float32),
    }

    prep["fires"] = []
    for fp in raw["fires"][:6]:        # fires 7/8 are dead for layers (2,3,4)
        wsq, bsq = fp["squeeze"]["w"], fp["squeeze"]["b"]
        S, Cin = wsq.shape[0], wsq.shape[1]
        Cin_p, Sp = _round_up(Cin, 128), 128
        w_sq = jnp.pad(wsq.reshape(S, Cin).T, ((0, Cin_p - Cin), (0, Sp - S)))
        b_sq = jnp.pad(bsq, (0, Sp - S)).reshape(1, Sp)

        w1, b1 = fp["expand1"]["w"], fp["expand1"]["b"]
        w3, b3 = fp["expand3"]["w"], fp["expand3"]["b"]
        E1, E3 = w1.shape[0], w3.shape[0]
        Ne = E1 + E3
        Np_e = _round_up(Ne, 128)
        taps = []
        for kh in range(3):
            for kw in range(3):
                blk = jnp.zeros((Sp, Np_e), jnp.float32)
                blk = blk.at[:S, E1:Ne].set(w3[:, :, kh, kw].T)
                if kh == 1 and kw == 1:            # centre tap carries the 1x1
                    blk = blk.at[:S, :E1].set(w1[:, :, 0, 0].T)
                taps.append(blk)
        w_ex = jnp.concatenate(taps, axis=0)       # (9*Sp, Np_e)
        b_ex = jnp.pad(jnp.concatenate([b1, b3]), (0, Np_e - Ne)).reshape(1, Np_e)

        prep["fires"].append({
            "w_sq": w_sq.astype(jnp.bfloat16),
            "b_sq": b_sq.astype(jnp.float32),
            "w_ex": w_ex.astype(jnp.bfloat16),
            "b_ex": b_ex.astype(jnp.float32),
        })
    return prep


if __name__ == "__main__":
    key = jax.random.PRNGKey(0)
    k_ref, k_img, k_par = jax.random.split(key, 3)
    reference = jax.random.uniform(k_ref, (2, 3, 64, 64), jnp.float32)  # (N,C,H,W)
    img = jax.random.uniform(k_img, (1, 3, 64, 64), jnp.float32)        # (1,C,H,W)
    params = prepare_params(init_params(k_par))   # prepared once, outside jit

    fwd = jax.jit(puzzle_sim_forward)
    out = jax.block_until_ready(fwd(img, reference, params))
    assert out.shape == (64, 64)
    assert bool(jnp.all(jnp.isfinite(out)))
    print("KERNEL_OK")
</pallas_src>

<mosaic_0001>
module attributes {stable_mosaic.version = 11 : i64} {
  func.func @_mm_kernel(%arg0: i32, %arg1: memref<512x128xbf16, #tpu.memory_space<vmem>>, %arg2: memref<128x128xbf16, #tpu.memory_space<vmem>>, %arg3: memref<1x128xf32, #tpu.memory_space<vmem>>, %arg4: memref<512x128xbf16, #tpu.memory_space<vmem>>) attributes {dimension_semantics = [#tpu.dimension_semantics<parallel>], iteration_bounds = array<i64: 6>, scalar_prefetch = 0 : i64, scratch_operands = 0 : i64, tpu.core_type = #tpu.core_type<tc>, window_params = [{transform_indices = @transform_0, window_bounds = array<i64: 512, 128>}, {pipeline_mode = #tpu.pipeline_mode<synchronous>, transform_indices = @transform_1, window_bounds = array<i64: 128, 128>}, {pipeline_mode = #tpu.pipeline_mode<synchronous>, transform_indices = @transform_2, window_bounds = array<i64: 1, 128>}, {transform_indices = @transform_3, window_bounds = array<i64: 512, 128>}]} {
    %c0 = arith.constant 0 : index
    %c0_0 = arith.constant 0 : index
    %0 = vector.load %arg1[%c0, %c0_0] : memref<512x128xbf16, #tpu.memory_space<vmem>>, vector<512x128xbf16>
    %c0_1 = arith.constant 0 : index
    %c0_2 = arith.constant 0 : index
    %1 = vector.load %arg2[%c0_1, %c0_2] : memref<128x128xbf16, #tpu.memory_space<vmem>>, vector<128x128xbf16>
    %cst = arith.constant dense<0.000000e+00> : vector<512x128xf32>
    %2 = tpu.matmul %0, %1, %cst {dimension_numbers = #tpu.dot_dimension_numbers<[1], [0], [0], [1], [0, 0, 1, 1], [], []>} : vector<512x128xbf16>, vector<128x128xbf16>, vector<512x128xf32> -> vector<512x128xf32>
    %c0_3 = arith.constant 0 : index
    %c0_4 = arith.constant 0 : index
    %3 = vector.load %arg3[%c0_3, %c0_4] : memref<1x128xf32, #tpu.memory_space<vmem>>, vector<1x128xf32>
    %4 = vector.broadcast %3 : vector<1x128xf32> to vector<512x128xf32>
    %5 = arith.addf %2, %4 : vector<512x128xf32>
    %cst_5 = arith.constant 0.000000e+00 : f32
    %6 = vector.broadcast %cst_5 : f32 to vector<512x128xf32>
    %7 = arith.maximumf %5, %6 : vector<512x128xf32>
    %8 = arith.truncf %7 : vector<512x128xf32> to vector<512x128xbf16>
    %c0_6 = arith.constant 0 : index
    %c0_7 = arith.constant 0 : index
    %9 = vector.load %arg4[%c0_6, %c0_7] : memref<512x128xbf16, #tpu.memory_space<vmem>>, vector<512x128xbf16>
    tpu.vector_store %arg4[%c0_6, %c0_7], %8 {strides = array<i32>} : memref<512x128xbf16, #tpu.memory_space<vmem>>, vector<512x128xbf16>,
    return
  }
  func.func @transform_0(%arg0: i32) -> (i32, i32) {
    %c0_i32 = arith.constant 0 : i32
    %c0_i32_0 = arith.constant 0 : i32
    return %arg0, %c0_i32 : i32, i32
  }
  func.func @transform_1(%arg0: i32) -> (i32, i32) {
    %c0_i32 = arith.constant 0 : i32
    %c0_i32_0 = arith.constant 0 : i32
    %c0_i32_1 = arith.constant 0 : i32
    return %c0_i32, %c0_i32_0 : i32, i32
  }
  func.func @transform_2(%arg0: i32) -> (i32, i32) {
    %c0_i32 = arith.constant 0 : i32
    %c0_i32_0 = arith.constant 0 : i32
    %c0_i32_1 = arith.constant 0 : i32
    return %c0_i32, %c0_i32_0 : i32, i32
  }
  func.func @transform_3(%arg0: i32) -> (i32, i32) {
    %c0_i32 = arith.constant 0 : i32
    %c0_i32_0 = arith.constant 0 : i32
    return %arg0, %c0_i32 : i32, i32
  }
}

module attributes {stable_mosaic.version = 11 : i64} {
  func.func @_mm_kernel(%arg0: i32, %arg1: memref<256x128xbf16, #tpu.memory_space<vmem>>, %arg2: memref<128x128xbf16, #tpu.memory_space<vmem>>, %arg3: memref<1x128xf32, #tpu.memory_space<vmem>>, %arg4: memref<256x128xbf16, #tpu.memory_space<vmem>>) attributes {dimension_semantics = [#tpu.dimension_semantics<parallel>], iteration_bounds = array<i64: 3>, scalar_prefetch = 0 : i64, scratch_operands = 0 : i64, tpu.core_type = #tpu.core_type<tc>, window_params = [{transform_indices = @transform_0, window_bounds = array<i64: 256, 128>}, {pipeline_mode = #tpu.pipeline_mode<synchronous>, transform_indices = @transform_1, window_bounds = array<i64: 128, 128>}, {pipeline_mode = #tpu.pipeline_mode<synchronous>, transform_indices = @transform_2, window_bounds = array<i64: 1, 128>}, {transform_indices = @transform_3, window_bounds = array<i64: 256, 128>}]} {
    %c0 = arith.constant 0 : index
    %c0_0 = arith.constant 0 : index
    %0 = vector.load %arg1[%c0, %c0_0] : memref<256x128xbf16, #tpu.memory_space<vmem>>, vector<256x128xbf16>
    %c0_1 = arith.constant 0 : index
    %c0_2 = arith.constant 0 : index
    %1 = vector.load %arg2[%c0_1, %c0_2] : memref<128x128xbf16, #tpu.memory_space<vmem>>, vector<128x128xbf16>
    %cst = arith.constant dense<0.000000e+00> : vector<256x128xf32>
    %2 = tpu.matmul %0, %1, %cst {dimension_numbers = #tpu.dot_dimension_numbers<[1], [0], [0], [1], [0, 0, 1, 1], [], []>} : vector<256x128xbf16>, vector<128x128xbf16>, vector<256x128xf32> -> vector<256x128xf32>
    %c0_3 = arith.constant 0 : index
    %c0_4 = arith.constant 0 : index
    %3 = vector.load %arg3[%c0_3, %c0_4] : memref<1x128xf32, #tpu.memory_space<vmem>>, vector<1x128xf32>
    %4 = vector.broadcast %3 : vector<1x128xf32> to vector<256x128xf32>
    %5 = arith.addf %2, %4 : vector<256x128xf32>
    %cst_5 = arith.constant 0.000000e+00 : f32
    %6 = vector.broadcast %cst_5 : f32 to vector<256x128xf32>
    %7 = arith.maximumf %5, %6 : vector<256x128xf32>
    %8 = arith.truncf %7 : vector<256x128xf32> to vector<256x128xbf16>
    %c0_6 = arith.constant 0 : index
    %c0_7 = arith.constant 0 : index
    %9 = vector.load %arg4[%c0_6, %c0_7] : memref<256x128xbf16, #tpu.memory_space<vmem>>, vector<256x128xbf16>
    tpu.vector_store %arg4[%c0_6, %c0_7], %8 {strides = array<i32>} : memref<256x128xbf16, #tpu.memory_space<vmem>>, vector<256x128xbf16>,
    return
  }
  func.func @transform_0(%arg0: i32) -> (i32, i32) {
    %c0_i32 = arith.constant 0 : i32
    %c0_i32_0 = arith.constant 0 : i32
    return %arg0, %c0_i32 : i32, i32
  }
  func.func @transform_1(%arg0: i32) -> (i32, i32) {
    %c0_i32 = arith.constant 0 : i32
    %c0_i32_0 = arith.constant 0 : i32
    %c0_i32_1 = arith.constant 0 : i32
    return %c0_i32, %c0_i32_0 : i32, i32
  }
  func.func @transform_2(%arg0: i32) -> (i32, i32) {
    %c0_i32 = arith.constant 0 : i32
    %c0_i32_0 = arith.constant 0 : i32
    %c0_i32_1 = arith.constant 0 : i32
    return %c0_i32, %c0_i32_0 : i32, i32
  }
  func.func @transform_3(%arg0: i32) -> (i32, i32) {
    %c0_i32 = arith.constant 0 : i32
    %c0_i32_0 = arith.constant 0 : i32
    return %arg0, %c0_i32 : i32, i32
  }
}

module attributes {stable_mosaic.version = 11 : i64} {
  func.func @_mm_kernel(%arg0: i32, %arg1: memref<256x1152xbf16, #tpu.memory_space<vmem>>, %arg2: memref<1152x128xbf16, #tpu.memory_space<vmem>>, %arg3: memref<1x128xf32, #tpu.memory_space<vmem>>, %arg4: memref<256x128xbf16, #tpu.memory_space<vmem>>) attributes {dimension_semantics = [#tpu.dimension_semantics<parallel>], iteration_bounds = array<i64: 3>, scalar_prefetch = 0 : i64, scratch_operands = 0 : i64, tpu.core_type = #tpu.core_type<tc>, window_params = [{transform_indices = @transform_0, window_bounds = array<i64: 256, 1152>}, {pipeline_mode = #tpu.pipeline_mode<synchronous>, transform_indices = @transform_1, window_bounds = array<i64: 1152, 128>}, {pipeline_mode = #tpu.pipeline_mode<synchronous>, transform_indices = @transform_2, window_bounds = array<i64: 1, 128>}, {transform_indices = @transform_3, window_bounds = array<i64: 256, 128>}]} {
    %c0 = arith.constant 0 : index
    %c0_0 = arith.constant 0 : index
    %0 = vector.load %arg1[%c0, %c0_0] : memref<256x1152xbf16, #tpu.memory_space<vmem>>, vector<256x1152xbf16>
    %c0_1 = arith.constant 0 : index
    %c0_2 = arith.constant 0 : index
    %1 = vector.load %arg2[%c0_1, %c0_2] : memref<1152x128xbf16, #tpu.memory_space<vmem>>, vector<1152x128xbf16>
    %cst = arith.constant dense<0.000000e+00> : vector<256x128xf32>
    %2 = tpu.matmul %0, %1, %cst {dimension_numbers = #tpu.dot_dimension_numbers<[1], [0], [0], [1], [0, 0, 1, 1], [], []>} : vector<256x1152xbf16>, vector<1152x128xbf16>, vector<256x128xf32> -> vector<256x128xf32>
    %c0_3 = arith.constant 0 : index
    %c0_4 = arith.constant 0 : index
    %3 = vector.load %arg3[%c0_3, %c0_4] : memref<1x128xf32, #tpu.memory_space<vmem>>, vector<1x128xf32>
    %4 = vector.broadcast %3 : vector<1x128xf32> to vector<256x128xf32>
    %5 = arith.addf %2, %4 : vector<256x128xf32>
    %cst_5 = arith.constant 0.000000e+00 : f32
    %6 = vector.broadcast %cst_5 : f32 to vector<256x128xf32>
    %7 = arith.maximumf %5, %6 : vector<256x128xf32>
    %8 = arith.truncf %7 : vector<256x128xf32> to vector<256x128xbf16>
    %c0_6 = arith.constant 0 : index
    %c0_7 = arith.constant 0 : index
    %9 = vector.load %arg4[%c0_6, %c0_7] : memref<256x128xbf16, #tpu.memory_space<vmem>>, vector<256x128xbf16>
    tpu.vector_store %arg4[%c0_6, %c0_7], %8 {strides = array<i32>} : memref<256x128xbf16, #tpu.memory_space<vmem>>, vector<256x128xbf16>,
    return
  }
  func.func @transform_0(%arg0: i32) -> (i32, i32) {
    %c0_i32 = arith.constant 0 : i32
    %c0_i32_0 = arith.constant 0 : i32
    return %arg0, %c0_i32 : i32, i32
  }
  func.func @transform_1(%arg0: i32) -> (i32, i32) {
    %c0_i32 = arith.constant 0 : i32
    %c0_i32_0 = arith.constant 0 : i32
    %c0_i32_1 = arith.constant 0 : i32
    return %c0_i32, %c0_i32_0 : i32, i32
  }
  func.func @transform_2(%arg0: i32) -> (i32, i32) {
    %c0_i32 = arith.constant 0 : i32
    %c0_i32_0 = arith.constant 0 : i32
    %c0_i32_1 = arith.constant 0 : i32
    return %c0_i32, %c0_i32_0 : i32, i32
  }
  func.func @transform_3(%arg0: i32) -> (i32, i32) {
    %c0_i32 = arith.constant 0 : i32
    %c0_i32_0 = arith.constant 0 : i32
    return %arg0, %c0_i32 : i32, i32
  }
}

module attributes {stable_mosaic.version = 11 : i64} {
  func.func @_mm_kernel(%arg0: i32, %arg1: memref<80x128xbf16, #tpu.memory_space<vmem>>, %arg2: memref<128x128xbf16, #tpu.memory_space<vmem>>, %arg3: memref<1x128xf32, #tpu.memory_space<vmem>>, %arg4: memref<80x128xbf16, #tpu.memory_space<vmem>>) attributes {dimension_semantics = [#tpu.dimension_semantics<parallel>], iteration_bounds = array<i64: 2>, scalar_prefetch = 0 : i64, scratch_operands = 0 : i64, tpu.core_type = #tpu.core_type<tc>, window_params = [{transform_indices = @transform_0, window_bounds = array<i64: 80, 128>}, {pipeline_mode = #tpu.pipeline_mode<synchronous>, transform_indices = @transform_1, window_bounds = array<i64: 128, 128>}, {pipeline_mode = #tpu.pipeline_mode<synchronous>, transform_indices = @transform_2, window_bounds = array<i64: 1, 128>}, {transform_indices = @transform_3, window_bounds = array<i64: 80, 128>}]} {
    %c0 = arith.constant 0 : index
    %c0_0 = arith.constant 0 : index
    %0 = vector.load %arg1[%c0, %c0_0] : memref<80x128xbf16, #tpu.memory_space<vmem>>, vector<80x128xbf16>
    %c0_1 = arith.constant 0 : index
    %c0_2 = arith.constant 0 : index
    %1 = vector.load %arg2[%c0_1, %c0_2] : memref<128x128xbf16, #tpu.memory_space<vmem>>, vector<128x128xbf16>
    %cst = arith.constant dense<0.000000e+00> : vector<80x128xf32>
    %2 = tpu.matmul %0, %1, %cst {dimension_numbers = #tpu.dot_dimension_numbers<[1], [0], [0], [1], [0, 0, 1, 1], [], []>} : vector<80x128xbf16>, vector<128x128xbf16>, vector<80x128xf32> -> vector<80x128xf32>
    %c0_3 = arith.constant 0 : index
    %c0_4 = arith.constant 0 : index
    %3 = vector.load %arg3[%c0_3, %c0_4] : memref<1x128xf32, #tpu.memory_space<vmem>>, vector<1x128xf32>
    %4 = vector.broadcast %3 : vector<1x128xf32> to vector<80x128xf32>
    %5 = arith.addf %2, %4 : vector<80x128xf32>
    %cst_5 = arith.constant 0.000000e+00 : f32
    %6 = vector.broadcast %cst_5 : f32 to vector<80x128xf32>
    %7 = arith.maximumf %5, %6 : vector<80x128xf32>
    %8 = arith.truncf %7 : vector<80x128xf32> to vector<80x128xbf16>
    %c0_6 = arith.constant 0 : index
    %c0_7 = arith.constant 0 : index
    %9 = vector.load %arg4[%c0_6, %c0_7] : memref<80x128xbf16, #tpu.memory_space<vmem>>, vector<80x128xbf16>
    tpu.vector_store %arg4[%c0_6, %c0_7], %8 {strides = array<i32>} : memref<80x128xbf16, #tpu.memory_space<vmem>>, vector<80x128xbf16>,
    return
  }
  func.func @transform_0(%arg0: i32) -> (i32, i32) {
    %c0_i32 = arith.constant 0 : i32
    %c0_i32_0 = arith.constant 0 : i32
    return %arg0, %c0_i32 : i32, i32
  }
  func.func @transform_1(%arg0: i32) -> (i32, i32) {
    %c0_i32 = arith.constant 0 : i32
    %c0_i32_0 = arith.constant 0 : i32
    %c0_i32_1 = arith.constant 0 : i32
    return %c0_i32, %c0_i32_0 : i32, i32
  }
  func.func @transform_2(%arg0: i32) -> (i32, i32) {
    %c0_i32 = arith.constant 0 : i32
    %c0_i32_0 = arith.constant 0 : i32
    %c0_i32_1 = arith.constant 0 : i32
    return %c0_i32, %c0_i32_0 : i32, i32
  }
  func.func @transform_3(%arg0: i32) -> (i32, i32) {
    %c0_i32 = arith.constant 0 : i32
    %c0_i32_0 = arith.constant 0 : i32
    return %arg0, %c0_i32 : i32, i32
  }
}

module attributes {stable_mosaic.version = 11 : i64} {
  func.func @_mm_kernel(%arg0: i32, %arg1: memref<80x1152xbf16, #tpu.memory_space<vmem>>, %arg2: memref<1152x256xbf16, #tpu.memory_space<vmem>>, %arg3: memref<1x256xf32, #tpu.memory_space<vmem>>, %arg4: memref<80x256xbf16, #tpu.memory_space<vmem>>) attributes {dimension_semantics = [#tpu.dimension_semantics<parallel>], iteration_bounds = array<i64: 2>, scalar_prefetch = 0 : i64, scratch_operands = 0 : i64, tpu.core_type = #tpu.core_type<tc>, window_params = [{transform_indices = @transform_0, window_bounds = array<i64: 80, 1152>}, {pipeline_mode = #tpu.pipeline_mode<synchronous>, transform_indices = @transform_1, window_bounds = array<i64: 1152, 256>}, {pipeline_mode = #tpu.pipeline_mode<synchronous>, transform_indices = @transform_2, window_bounds = array<i64: 1, 256>}, {transform_indices = @transform_3, window_bounds = array<i64: 80, 256>}]} {
    %c0 = arith.constant 0 : index
    %c0_0 = arith.constant 0 : index
    %0 = vector.load %arg1[%c0, %c0_0] : memref<80x1152xbf16, #tpu.memory_space<vmem>>, vector<80x1152xbf16>
    %c0_1 = arith.constant 0 : index
    %c0_2 = arith.constant 0 : index
    %1 = vector.load %arg2[%c0_1, %c0_2] : memref<1152x256xbf16, #tpu.memory_space<vmem>>, vector<1152x256xbf16>
    %cst = arith.constant dense<0.000000e+00> : vector<80x256xf32>
    %2 = tpu.matmul %0, %1, %cst {dimension_numbers = #tpu.dot_dimension_numbers<[1], [0], [0], [1], [0, 0, 1, 1], [], []>} : vector<80x1152xbf16>, vector<1152x256xbf16>, vector<80x256xf32> -> vector<80x256xf32>
    %c0_3 = arith.constant 0 : index
    %c0_4 = arith.constant 0 : index
    %3 = vector.load %arg3[%c0_3, %c0_4] : memref<1x256xf32, #tpu.memory_space<vmem>>, vector<1x256xf32>
    %4 = vector.broadcast %3 : vector<1x256xf32> to vector<80x256xf32>
    %5 = arith.addf %2, %4 : vector<80x256xf32>
    %cst_5 = arith.constant 0.000000e+00 : f32
    %6 = vector.broadcast %cst_5 : f32 to vector<80x256xf32>
    %7 = arith.maximumf %5, %6 : vector<80x256xf32>
    %8 = arith.truncf %7 : vector<80x256xf32> to vector<80x256xbf16>
    %c0_6 = arith.constant 0 : index
    %c0_7 = arith.constant 0 : index
    %9 = vector.load %arg4[%c0_6, %c0_7] : memref<80x256xbf16, #tpu.memory_space<vmem>>, vector<80x256xbf16>
    tpu.vector_store %arg4[%c0_6, %c0_7], %8 {strides = array<i32>} : memref<80x256xbf16, #tpu.memory_space<vmem>>, vector<80x256xbf16>,
    return
  }
  func.func @transform_0(%arg0: i32) -> (i32, i32) {
    %c0_i32 = arith.constant 0 : i32
    %c0_i32_0 = arith.constant 0 : i32
    return %arg0, %c0_i32 : i32, i32
  }
  func.func @transform_1(%arg0: i32) -> (i32, i32) {
    %c0_i32 = arith.constant 0 : i32
    %c0_i32_0 = arith.constant 0 : i32
    %c0_i32_1 = arith.constant 0 : i32
    return %c0_i32, %c0_i32_0 : i32, i32
  }
  func.func @transform_2(%arg0: i32) -> (i32, i32) {
    %c0_i32 = arith.constant 0 : i32
    %c0_i32_0 = arith.constant 0 : i32
    %c0_i32_1 = arith.constant 0 : i32
    return %c0_i32, %c0_i32_0 : i32, i32
  }
  func.func @transform_3(%arg0: i32) -> (i32, i32) {
    %c0_i32 = arith.constant 0 : i32
    %c0_i32_0 = arith.constant 0 : i32
    return %arg0, %c0_i32 : i32, i32
  }
}

module attributes {stable_mosaic.version = 11 : i64} {
  func.func @_mm_kernel(%arg0: i32, %arg1: memref<80x256xbf16, #tpu.memory_space<vmem>>, %arg2: memref<256x128xbf16, #tpu.memory_space<vmem>>, %arg3: memref<1x128xf32, #tpu.memory_space<vmem>>, %arg4: memref<80x128xbf16, #tpu.memory_space<vmem>>) attributes {dimension_semantics = [#tpu.dimension_semantics<parallel>], iteration_bounds = array<i64: 2>, scalar_prefetch = 0 : i64, scratch_operands = 0 : i64, tpu.core_type = #tpu.core_type<tc>, window_params = [{transform_indices = @transform_0, window_bounds = array<i64: 80, 256>}, {pipeline_mode = #tpu.pipeline_mode<synchronous>, transform_indices = @transform_1, window_bounds = array<i64: 256, 128>}, {pipeline_mode = #tpu.pipeline_mode<synchronous>, transform_indices = @transform_2, window_bounds = array<i64: 1, 128>}, {transform_indices = @transform_3, window_bounds = array<i64: 80, 128>}]} {
    %c0 = arith.constant 0 : index
    %c0_0 = arith.constant 0 : index
    %0 = vector.load %arg1[%c0, %c0_0] : memref<80x256xbf16, #tpu.memory_space<vmem>>, vector<80x256xbf16>
    %c0_1 = arith.constant 0 : index
    %c0_2 = arith.constant 0 : index
    %1 = vector.load %arg2[%c0_1, %c0_2] : memref<256x128xbf16, #tpu.memory_space<vmem>>, vector<256x128xbf16>
    %cst = arith.constant dense<0.000000e+00> : vector<80x128xf32>
    %2 = tpu.matmul %0, %1, %cst {dimension_numbers = #tpu.dot_dimension_numbers<[1], [0], [0], [1], [0, 0, 1, 1], [], []>} : vector<80x256xbf16>, vector<256x128xbf16>, vector<80x128xf32> -> vector<80x128xf32>
    %c0_3 = arith.constant 0 : index
    %c0_4 = arith.constant 0 : index
    %3 = vector.load %arg3[%c0_3, %c0_4] : memref<1x128xf32, #tpu.memory_space<vmem>>, vector<1x128xf32>
    %4 = vector.broadcast %3 : vector<1x128xf32> to vector<80x128xf32>
    %5 = arith.addf %2, %4 : vector<80x128xf32>
    %cst_5 = arith.constant 0.000000e+00 : f32
    %6 = vector.broadcast %cst_5 : f32 to vector<80x128xf32>
    %7 = arith.maximumf %5, %6 : vector<80x128xf32>
    %8 = arith.truncf %7 : vector<80x128xf32> to vector<80x128xbf16>
    %c0_6 = arith.constant 0 : index
    %c0_7 = arith.constant 0 : index
    %9 = vector.load %arg4[%c0_6, %c0_7] : memref<80x128xbf16, #tpu.memory_space<vmem>>, vector<80x128xbf16>
    tpu.vector_store %arg4[%c0_6, %c0_7], %8 {strides = array<i32>} : memref<80x128xbf16, #tpu.memory_space<vmem>>, vector<80x128xbf16>,
    return
  }
  func.func @transform_0(%arg0: i32) -> (i32, i32) {
    %c0_i32 = arith.constant 0 : i32
    %c0_i32_0 = arith.constant 0 : i32
    return %arg0, %c0_i32 : i32, i32
  }
  func.func @transform_1(%arg0: i32) -> (i32, i32) {
    %c0_i32 = arith.constant 0 : i32
    %c0_i32_0 = arith.constant 0 : i32
    %c0_i32_1 = arith.constant 0 : i32
    return %c0_i32, %c0_i32_0 : i32, i32
  }
  func.func @transform_2(%arg0: i32) -> (i32, i32) {
    %c0_i32 = arith.constant 0 : i32
    %c0_i32_0 = arith.constant 0 : i32
    %c0_i32_1 = arith.constant 0 : i32
    return %c0_i32, %c0_i32_0 : i32, i32
  }
  func.func @transform_3(%arg0: i32) -> (i32, i32) {
    %c0_i32 = arith.constant 0 : i32
    %c0_i32_0 = arith.constant 0 : i32
    return %arg0, %c0_i32 : i32, i32
  }
}

module attributes {stable_mosaic.version = 11 : i64} {
  func.func @_mm_norm_kernel(%arg0: i32, %arg1: memref<80x1152xbf16, #tpu.memory_space<vmem>>, %arg2: memref<1152x256xbf16, #tpu.memory_space<vmem>>, %arg3: memref<1x256xf32, #tpu.memory_space<vmem>>, %arg4: memref<80x256xbf16, #tpu.memory_space<vmem>>, %arg5: memref<80x256xbf16, #tpu.memory_space<vmem>>) attributes {dimension_semantics = [#tpu.dimension_semantics<parallel>], iteration_bounds = array<i64: 2>, scalar_prefetch = 0 : i64, scratch_operands = 0 : i64, tpu.core_type = #tpu.core_type<tc>, window_params = [{transform_indices = @transform_0, window_bounds = array<i64: 80, 1152>}, {pipeline_mode = #tpu.pipeline_mode<synchronous>, transform_indices = @transform_1, window_bounds = array<i64: 1152, 256>}, {pipeline_mode = #tpu.pipeline_mode<synchronous>, transform_indices = @transform_2, window_bounds = array<i64: 1, 256>}, {transform_indices = @transform_3, window_bounds = array<i64: 80, 256>}, {transform_indices = @transform_4, window_bounds = array<i64: 80, 256>}]} {
    %c0 = arith.constant 0 : index
    %c0_0 = arith.constant 0 : index
    %0 = vector.load %arg1[%c0, %c0_0] : memref<80x1152xbf16, #tpu.memory_space<vmem>>, vector<80x1152xbf16>
    %c0_1 = arith.constant 0 : index
    %c0_2 = arith.constant 0 : index
    %1 = vector.load %arg2[%c0_1, %c0_2] : memref<1152x256xbf16, #tpu.memory_space<vmem>>, vector<1152x256xbf16>
    %cst = arith.constant dense<0.000000e+00> : vector<80x256xf32>
    %2 = tpu.matmul %0, %1, %cst {dimension_numbers = #tpu.dot_dimension_numbers<[1], [0], [0], [1], [0, 0, 1, 1], [], []>} : vector<80x1152xbf16>, vector<1152x256xbf16>, vector<80x256xf32> -> vector<80x256xf32>
    %c0_3 = arith.constant 0 : index
    %c0_4 = arith.constant 0 : index
    %3 = vector.load %arg3[%c0_3, %c0_4] : memref<1x256xf32, #tpu.memory_space<vmem>>, vector<1x256xf32>
    %4 = vector.broadcast %3 : vector<1x256xf32> to vector<80x256xf32>
    %5 = arith.addf %2, %4 : vector<80x256xf32>
    %cst_5 = arith.constant 0.000000e+00 : f32
    %6 = vector.broadcast %cst_5 : f32 to vector<80x256xf32>
    %7 = arith.maximumf %5, %6 : vector<80x256xf32>
    %8 = arith.truncf %7 : vector<80x256xf32> to vector<80x256xbf16>
    %c0_6 = arith.constant 0 : index
    %c0_7 = arith.constant 0 : index
    %9 = vector.load %arg4[%c0_6, %c0_7] : memref<80x256xbf16, #tpu.memory_space<vmem>>, vector<80x256xbf16>
    tpu.vector_store %arg4[%c0_6, %c0_7], %8 {strides = array<i32>} : memref<80x256xbf16, #tpu.memory_space<vmem>>, vector<80x256xbf16>,
    %10 = arith.mulf %7, %7 : vector<80x256xf32>
    %cst_8 = arith.constant dense<0.000000e+00> : vector<80xf32>
    %11 = vector.multi_reduction <add>, %10, %cst_8 [1] : vector<80x256xf32> to vector<80xf32>
    %12 = vector.shape_cast %11 : vector<80xf32> to vector<80x1xf32>
    %cst_9 = arith.constant 9.99999993E-9 : f32
    %13 = vector.broadcast %cst_9 : f32 to vector<80x1xf32>
    %14 = arith.addf %13, %12 : vector<80x1xf32>
    %15 = math.rsqrt %14 : vector<80x1xf32>
    %16 = vector.broadcast %15 : vector<80x1xf32> to vector<80x256xf32>
    %17 = arith.mulf %7, %16 : vector<80x256xf32>
    %18 = arith.truncf %17 : vector<80x256xf32> to vector<80x256xbf16>
    %c0_10 = arith.constant 0 : index
    %c0_11 = arith.constant 0 : index
    %19 = vector.load %arg5[%c0_10, %c0_11] : memref<80x256xbf16, #tpu.memory_space<vmem>>, vector<80x256xbf16>
    tpu.vector_store %arg5[%c0_10, %c0_11], %18 {strides = array<i32>} : memref<80x256xbf16, #tpu.memory_space<vmem>>, vector<80x256xbf16>,
    return
  }
  func.func @transform_0(%arg0: i32) -> (i32, i32) {
    %c0_i32 = arith.constant 0 : i32
    %c0_i32_0 = arith.constant 0 : i32
    return %arg0, %c0_i32 : i32, i32
  }
  func.func @transform_1(%arg0: i32) -> (i32, i32) {
    %c0_i32 = arith.constant 0 : i32
    %c0_i32_0 = arith.constant 0 : i32
    %c0_i32_1 = arith.constant 0 : i32
    return %c0_i32, %c0_i32_0 : i32, i32
  }
  func.func @transform_2(%arg0: i32) -> (i32, i32) {
    %c0_i32 = arith.constant 0 : i32
    %c0_i32_0 = arith.constant 0 : i32
    %c0_i32_1 = arith.constant 0 : i32
    return %c0_i32, %c0_i32_0 : i32, i32
  }
  func.func @transform_3(%arg0: i32) -> (i32, i32) {
    %c0_i32 = arith.constant 0 : i32
    %c0_i32_0 = arith.constant 0 : i32
    return %arg0, %c0_i32 : i32, i32
  }
  func.func @transform_4(%arg0: i32) -> (i32, i32) {
    %c0_i32 = arith.constant 0 : i32
    %c0_i32_0 = arith.constant 0 : i32
    return %arg0, %c0_i32 : i32, i32
  }
}

module attributes {stable_mosaic.version = 11 : i64} {
  func.func @_mm_kernel(%arg0: i32, %arg1: memref<16x256xbf16, #tpu.memory_space<vmem>>, %arg2: memref<256x128xbf16, #tpu.memory_space<vmem>>, %arg3: memref<1x128xf32, #tpu.memory_space<vmem>>, %arg4: memref<16x128xbf16, #tpu.memory_space<vmem>>) attributes {dimension_semantics = [#tpu.dimension_semantics<parallel>], iteration_bounds = array<i64: 2>, scalar_prefetch = 0 : i64, scratch_operands = 0 : i64, tpu.core_type = #tpu.core_type<tc>, window_params = [{transform_indices = @transform_0, window_bounds = array<i64: 16, 256>}, {pipeline_mode = #tpu.pipeline_mode<synchronous>, transform_indices = @transform_1, window_bounds = array<i64: 256, 128>}, {pipeline_mode = #tpu.pipeline_mode<synchronous>, transform_indices = @transform_2, window_bounds = array<i64: 1, 128>}, {transform_indices = @transform_3, window_bounds = array<i64: 16, 128>}]} {
    %c0 = arith.constant 0 : index
    %c0_0 = arith.constant 0 : index
    %0 = vector.load %arg1[%c0, %c0_0] : memref<16x256xbf16, #tpu.memory_space<vmem>>, vector<16x256xbf16>
    %c0_1 = arith.constant 0 : index
    %c0_2 = arith.constant 0 : index
    %1 = vector.load %arg2[%c0_1, %c0_2] : memref<256x128xbf16, #tpu.memory_space<vmem>>, vector<256x128xbf16>
    %cst = arith.constant dense<0.000000e+00> : vector<16x128xf32>
    %2 = tpu.matmul %0, %1, %cst {dimension_numbers = #tpu.dot_dimension_numbers<[1], [0], [0], [1], [0, 0, 1, 1], [], []>} : vector<16x256xbf16>, vector<256x128xbf16>, vector<16x128xf32> -> vector<16x128xf32>
    %c0_3 = arith.constant 0 : index
    %c0_4 = arith.constant 0 : index
    %3 = vector.load %arg3[%c0_3, %c0_4] : memref<1x128xf32, #tpu.memory_space<vmem>>, vector<1x128xf32>
    %4 = vector.broadcast %3 : vector<1x128xf32> to vector<16x128xf32>
    %5 = arith.addf %2, %4 : vector<16x128xf32>
    %cst_5 = arith.constant 0.000000e+00 : f32
    %6 = vector.broadcast %cst_5 : f32 to vector<16x128xf32>
    %7 = arith.maximumf %5, %6 : vector<16x128xf32>
    %8 = arith.truncf %7 : vector<16x128xf32> to vector<16x128xbf16>
    %c0_6 = arith.constant 0 : index
    %c0_7 = arith.constant 0 : index
    %9 = vector.load %arg4[%c0_6, %c0_7] : memref<16x128xbf16, #tpu.memory_space<vmem>>, vector<16x128xbf16>
    tpu.vector_store %arg4[%c0_6, %c0_7], %8 {strides = array<i32>} : memref<16x128xbf16, #tpu.memory_space<vmem>>, vector<16x128xbf16>,
    return
  }
  func.func @transform_0(%arg0: i32) -> (i32, i32) {
    %c0_i32 = arith.constant 0 : i32
    %c0_i32_0 = arith.constant 0 : i32
    return %arg0, %c0_i32 : i32, i32
  }
  func.func @transform_1(%arg0: i32) -> (i32, i32) {
    %c0_i32 = arith.constant 0 : i32
    %c0_i32_0 = arith.constant 0 : i32
    %c0_i32_1 = arith.constant 0 : i32
    return %c0_i32, %c0_i32_0 : i32, i32
  }
  func.func @transform_2(%arg0: i32) -> (i32, i32) {
    %c0_i32 = arith.constant 0 : i32
    %c0_i32_0 = arith.constant 0 : i32
    %c0_i32_1 = arith.constant 0 : i32
    return %c0_i32, %c0_i32_0 : i32, i32
  }
  func.func @transform_3(%arg0: i32) -> (i32, i32) {
    %c0_i32 = arith.constant 0 : i32
    %c0_i32_0 = arith.constant 0 : i32
    return %arg0, %c0_i32 : i32, i32
  }
}

module attributes {stable_mosaic.version = 11 : i64} {
  func.func @_mm_kernel(%arg0: i32, %arg1: memref<16x384xbf16, #tpu.memory_space<vmem>>, %arg2: memref<384x128xbf16, #tpu.memory_space<vmem>>, %arg3: memref<1x128xf32, #tpu.memory_space<vmem>>, %arg4: memref<16x128xbf16, #tpu.memory_space<vmem>>) attributes {dimension_semantics = [#tpu.dimension_semantics<parallel>], iteration_bounds = array<i64: 2>, scalar_prefetch = 0 : i64, scratch_operands = 0 : i64, tpu.core_type = #tpu.core_type<tc>, window_params = [{transform_indices = @transform_0, window_bounds = array<i64: 16, 384>}, {pipeline_mode = #tpu.pipeline_mode<synchronous>, transform_indices = @transform_1, window_bounds = array<i64: 384, 128>}, {pipeline_mode = #tpu.pipeline_mode<synchronous>, transform_indices = @transform_2, window_bounds = array<i64: 1, 128>}, {transform_indices = @transform_3, window_bounds = array<i64: 16, 128>}]} {
    %c0 = arith.constant 0 : index
    %c0_0 = arith.constant 0 : index
    %0 = vector.load %arg1[%c0, %c0_0] : memref<16x384xbf16, #tpu.memory_space<vmem>>, vector<16x384xbf16>
    %c0_1 = arith.constant 0 : index
    %c0_2 = arith.constant 0 : index
    %1 = vector.load %arg2[%c0_1, %c0_2] : memref<384x128xbf16, #tpu.memory_space<vmem>>, vector<384x128xbf16>
    %cst = arith.constant dense<0.000000e+00> : vector<16x128xf32>
    %2 = tpu.matmul %0, %1, %cst {dimension_numbers = #tpu.dot_dimension_numbers<[1], [0], [0], [1], [0, 0, 1, 1], [], []>} : vector<16x384xbf16>, vector<384x128xbf16>, vector<16x128xf32> -> vector<16x128xf32>
    %c0_3 = arith.constant 0 : index
    %c0_4 = arith.constant 0 : index
    %3 = vector.load %arg3[%c0_3, %c0_4] : memref<1x128xf32, #tpu.memory_space<vmem>>, vector<1x128xf32>
    %4 = vector.broadcast %3 : vector<1x128xf32> to vector<16x128xf32>
    %5 = arith.addf %2, %4 : vector<16x128xf32>
    %cst_5 = arith.constant 0.000000e+00 : f32
    %6 = vector.broadcast %cst_5 : f32 to vector<16x128xf32>
    %7 = arith.maximumf %5, %6 : vector<16x128xf32>
    %8 = arith.truncf %7 : vector<16x128xf32> to vector<16x128xbf16>
    %c0_6 = arith.constant 0 : index
    %c0_7 = arith.constant 0 : index
    %9 = vector.load %arg4[%c0_6, %c0_7] : memref<16x128xbf16, #tpu.memory_space<vmem>>, vector<16x128xbf16>
    tpu.vector_store %arg4[%c0_6, %c0_7], %8 {strides = array<i32>} : memref<16x128xbf16, #tpu.memory_space<vmem>>, vector<16x128xbf16>,
    return
  }
  func.func @transform_0(%arg0: i32) -> (i32, i32) {
    %c0_i32 = arith.constant 0 : i32
    %c0_i32_0 = arith.constant 0 : i32
    return %arg0, %c0_i32 : i32, i32
  }
  func.func @transform_1(%arg0: i32) -> (i32, i32) {
    %c0_i32 = arith.constant 0 : i32
    %c0_i32_0 = arith.constant 0 : i32
    %c0_i32_1 = arith.constant 0 : i32
    return %c0_i32, %c0_i32_0 : i32, i32
  }
  func.func @transform_2(%arg0: i32) -> (i32, i32) {
    %c0_i32 = arith.constant 0 : i32
    %c0_i32_0 = arith.constant 0 : i32
    %c0_i32_1 = arith.constant 0 : i32
    return %c0_i32, %c0_i32_0 : i32, i32
  }
  func.func @transform_3(%arg0: i32) -> (i32, i32) {
    %c0_i32 = arith.constant 0 : i32
    %c0_i32_0 = arith.constant 0 : i32
    return %arg0, %c0_i32 : i32, i32
  }
}

module attributes {stable_mosaic.version = 11 : i64} {
  func.func @_mm_norm_kernel(%arg0: i32, %arg1: memref<16x1152xbf16, #tpu.memory_space<vmem>>, %arg2: memref<1152x384xbf16, #tpu.memory_space<vmem>>, %arg3: memref<1x384xf32, #tpu.memory_space<vmem>>, %arg4: memref<16x384xbf16, #tpu.memory_space<vmem>>, %arg5: memref<16x384xbf16, #tpu.memory_space<vmem>>) attributes {dimension_semantics = [#tpu.dimension_semantics<parallel>], iteration_bounds = array<i64: 2>, scalar_prefetch = 0 : i64, scratch_operands = 0 : i64, tpu.core_type = #tpu.core_type<tc>, window_params = [{transform_indices = @transform_0, window_bounds = array<i64: 16, 1152>}, {pipeline_mode = #tpu.pipeline_mode<synchronous>, transform_indices = @transform_1, window_bounds = array<i64: 1152, 384>}, {pipeline_mode = #tpu.pipeline_mode<synchronous>, transform_indices = @transform_2, window_bounds = array<i64: 1, 384>}, {transform_indices = @transform_3, window_bounds = array<i64: 16, 384>}, {transform_indices = @transform_4, window_bounds = array<i64: 16, 384>}]} {
    %c0 = arith.constant 0 : index
    %c0_0 = arith.constant 0 : index
    %0 = vector.load %arg1[%c0, %c0_0] : memref<16x1152xbf16, #tpu.memory_space<vmem>>, vector<16x1152xbf16>
    %c0_1 = arith.constant 0 : index
    %c0_2 = arith.constant 0 : index
    %1 = vector.load %arg2[%c0_1, %c0_2] : memref<1152x384xbf16, #tpu.memory_space<vmem>>, vector<1152x384xbf16>
    %cst = arith.constant dense<0.000000e+00> : vector<16x384xf32>
    %2 = tpu.matmul %0, %1, %cst {dimension_numbers = #tpu.dot_dimension_numbers<[1], [0], [0], [1], [0, 0, 1, 1], [], []>} : vector<16x1152xbf16>, vector<1152x384xbf16>, vector<16x384xf32> -> vector<16x384xf32>
    %c0_3 = arith.constant 0 : index
    %c0_4 = arith.constant 0 : index
    %3 = vector.load %arg3[%c0_3, %c0_4] : memref<1x384xf32, #tpu.memory_space<vmem>>, vector<1x384xf32>
    %4 = vector.broadcast %3 : vector<1x384xf32> to vector<16x384xf32>
    %5 = arith.addf %2, %4 : vector<16x384xf32>
    %cst_5 = arith.constant 0.000000e+00 : f32
    %6 = vector.broadcast %cst_5 : f32 to vector<16x384xf32>
    %7 = arith.maximumf %5, %6 : vector<16x384xf32>
    %8 = arith.truncf %7 : vector<16x384xf32> to vector<16x384xbf16>
    %c0_6 = arith.constant 0 : index
    %c0_7 = arith.constant 0 : index
    %9 = vector.load %arg4[%c0_6, %c0_7] : memref<16x384xbf16, #tpu.memory_space<vmem>>, vector<16x384xbf16>
    tpu.vector_store %arg4[%c0_6, %c0_7], %8 {strides = array<i32>} : memref<16x384xbf16, #tpu.memory_space<vmem>>, vector<16x384xbf16>,
    %10 = arith.mulf %7, %7 : vector<16x384xf32>
    %cst_8 = arith.constant dense<0.000000e+00> : vector<16xf32>
    %11 = vector.multi_reduction <add>, %10, %cst_8 [1] : vector<16x384xf32> to vector<16xf32>
    %12 = vector.shape_cast %11 : vector<16xf32> to vector<16x1xf32>
    %cst_9 = arith.constant 9.99999993E-9 : f32
    %13 = vector.broadcast %cst_9 : f32 to vector<16x1xf32>
    %14 = arith.addf %13, %12 : vector<16x1xf32>
    %15 = math.rsqrt %14 : vector<16x1xf32>
    %16 = vector.broadcast %15 : vector<16x1xf32> to vector<16x384xf32>
    %17 = arith.mulf %7, %16 : vector<16x384xf32>
    %18 = arith.truncf %17 : vector<16x384xf32> to vector<16x384xbf16>
    %c0_10 = arith.constant 0 : index
    %c0_11 = arith.constant 0 : index
    %19 = vector.load %arg5[%c0_10, %c0_11] : memref<16x384xbf16, #tpu.memory_space<vmem>>, vector<16x384xbf16>
    tpu.vector_store %arg5[%c0_10, %c0_11], %18 {strides = array<i32>} : memref<16x384xbf16, #tpu.memory_space<vmem>>, vector<16x384xbf16>,
    return
  }
  func.func @transform_0(%arg0: i32) -> (i32, i32) {
    %c0_i32 = arith.constant 0 : i32
    %c0_i32_0 = arith.constant 0 : i32
    return %arg0, %c0_i32 : i32, i32
  }
  func.func @transform_1(%arg0: i32) -> (i32, i32) {
    %c0_i32 = arith.constant 0 : i32
    %c0_i32_0 = arith.constant 0 : i32
    %c0_i32_1 = arith.constant 0 : i32
    return %c0_i32, %c0_i32_0 : i32, i32
  }
  func.func @transform_2(%arg0: i32) -> (i32, i32) {
    %c0_i32 = arith.constant 0 : i32
    %c0_i32_0 = arith.constant 0 : i32
    %c0_i32_1 = arith.constant 0 : i32
    return %c0_i32, %c0_i32_0 : i32, i32
  }
  func.func @transform_3(%arg0: i32) -> (i32, i32) {
    %c0_i32 = arith.constant 0 : i32
    %c0_i32_0 = arith.constant 0 : i32
    return %arg0, %c0_i32 : i32, i32
  }
  func.func @transform_4(%arg0: i32) -> (i32, i32) {
    %c0_i32 = arith.constant 0 : i32
    %c0_i32_0 = arith.constant 0 : i32
    return %arg0, %c0_i32 : i32, i32
  }
}

module attributes {stable_mosaic.version = 11 : i64} {
  func.func @_mm_norm_kernel(%arg0: i32, %arg1: memref<16x1152xbf16, #tpu.memory_space<vmem>>, %arg2: memref<1152x384xbf16, #tpu.memory_space<vmem>>, %arg3: memref<1x384xf32, #tpu.memory_space<vmem>>, %arg4: memref<16x384xbf16, #tpu.memory_space<vmem>>, %arg5: memref<16x384xbf16, #tpu.memory_space<vmem>>) attributes {dimension_semantics = [#tpu.dimension_semantics<parallel>], iteration_bounds = array<i64: 2>, scalar_prefetch = 0 : i64, scratch_operands = 0 : i64, tpu.core_type = #tpu.core_type<tc>, window_params = [{transform_indices = @transform_0, window_bounds = array<i64: 16, 1152>}, {pipeline_mode = #tpu.pipeline_mode<synchronous>, transform_indices = @transform_1, window_bounds = array<i64: 1152, 384>}, {pipeline_mode = #tpu.pipeline_mode<synchronous>, transform_indices = @transform_2, window_bounds = array<i64: 1, 384>}, {transform_indices = @transform_3, window_bounds = array<i64: 16, 384>}, {transform_indices = @transform_4, window_bounds = array<i64: 16, 384>}]} {
    %c0 = arith.constant 0 : index
    %c0_0 = arith.constant 0 : index
    %0 = vector.load %arg1[%c0, %c0_0] : memref<16x1152xbf16, #tpu.memory_space<vmem>>, vector<16x1152xbf16>
    %c0_1 = arith.constant 0 : index
    %c0_2 = arith.constant 0 : index
    %1 = vector.load %arg2[%c0_1, %c0_2] : memref<1152x384xbf16, #tpu.memory_space<vmem>>, vector<1152x384xbf16>
    %cst = arith.constant dense<0.000000e+00> : vector<16x384xf32>
    %2 = tpu.matmul %0, %1, %cst {dimension_numbers = #tpu.dot_dimension_numbers<[1], [0], [0], [1], [0, 0, 1, 1], [], []>} : vector<16x1152xbf16>, vector<1152x384xbf16>, vector<16x384xf32> -> vector<16x384xf32>
    %c0_3 = arith.constant 0 : index
    %c0_4 = arith.constant 0 : index
    %3 = vector.load %arg3[%c0_3, %c0_4] : memref<1x384xf32, #tpu.memory_space<vmem>>, vector<1x384xf32>
    %4 = vector.broadcast %3 : vector<1x384xf32> to vector<16x384xf32>
    %5 = arith.addf %2, %4 : vector<16x384xf32>
    %cst_5 = arith.constant 0.000000e+00 : f32
    %6 = vector.broadcast %cst_5 : f32 to vector<16x384xf32>
    %7 = arith.maximumf %5, %6 : vector<16x384xf32>
    %8 = arith.truncf %7 : vector<16x384xf32> to vector<16x384xbf16>
    %c0_6 = arith.constant 0 : index
    %c0_7 = arith.constant 0 : index
    %9 = vector.load %arg4[%c0_6, %c0_7] : memref<16x384xbf16, #tpu.memory_space<vmem>>, vector<16x384xbf16>
    tpu.vector_store %arg4[%c0_6, %c0_7], %8 {strides = array<i32>} : memref<16x384xbf16, #tpu.memory_space<vmem>>, vector<16x384xbf16>,
    %10 = arith.mulf %7, %7 : vector<16x384xf32>
    %cst_8 = arith.constant dense<0.000000e+00> : vector<16xf32>
    %11 = vector.multi_reduction <add>, %10, %cst_8 [1] : vector<16x384xf32> to vector<16xf32>
    %12 = vector.shape_cast %11 : vector<16xf32> to vector<16x1xf32>
    %cst_9 = arith.constant 9.99999993E-9 : f32
    %13 = vector.broadcast %cst_9 : f32 to vector<16x1xf32>
    %14 = arith.addf %13, %12 : vector<16x1xf32>
    %15 = math.rsqrt %14 : vector<16x1xf32>
    %16 = vector.broadcast %15 : vector<16x1xf32> to vector<16x384xf32>
    %17 = arith.mulf %7, %16 : vector<16x384xf32>
    %18 = arith.truncf %17 : vector<16x384xf32> to vector<16x384xbf16>
    %c0_10 = arith.constant 0 : index
    %c0_11 = arith.constant 0 : index
    %19 = vector.load %arg5[%c0_10, %c0_11] : memref<16x384xbf16, #tpu.memory_space<vmem>>, vector<16x384xbf16>
    tpu.vector_store %arg5[%c0_10, %c0_11], %18 {strides = array<i32>} : memref<16x384xbf16, #tpu.memory_space<vmem>>, vector<16x384xbf16>,
    return
  }
  func.func @transform_0(%arg0: i32) -> (i32, i32) {
    %c0_i32 = arith.constant 0 : i32
    %c0_i32_0 = arith.constant 0 : i32
    return %arg0, %c0_i32 : i32, i32
  }
  func.func @transform_1(%arg0: i32) -> (i32, i32) {
    %c0_i32 = arith.constant 0 : i32
    %c0_i32_0 = arith.constant 0 : i32
    %c0_i32_1 = arith.constant 0 : i32
    return %c0_i32, %c0_i32_0 : i32, i32
  }
  func.func @transform_2(%arg0: i32) -> (i32, i32) {
    %c0_i32 = arith.constant 0 : i32
    %c0_i32_0 = arith.constant 0 : i32
    %c0_i32_1 = arith.constant 0 : i32
    return %c0_i32, %c0_i32_0 : i32, i32
  }
  func.func @transform_3(%arg0: i32) -> (i32, i32) {
    %c0_i32 = arith.constant 0 : i32
    %c0_i32_0 = arith.constant 0 : i32
    return %arg0, %c0_i32 : i32, i32
  }
  func.func @transform_4(%arg0: i32) -> (i32, i32) {
    %c0_i32 = arith.constant 0 : i32
    %c0_i32_0 = arith.constant 0 : i32
    return %arg0, %c0_i32 : i32, i32
  }
}

module attributes {stable_mosaic.version = 11 : i64} {
  func.func @_maxsim_kernel(%arg0: i32, %arg1: i32, %arg2: memref<104x256xbf16, #tpu.memory_space<vmem>>, %arg3: memref<128x256xbf16, #tpu.memory_space<vmem>>, %arg4: memref<1x128xf32, #tpu.memory_space<vmem>>) attributes {dimension_semantics = [#tpu.dimension_semantics<parallel>, #tpu.dimension_semantics<arbitrary>], iteration_bounds = array<i64: 1, 1>, scalar_prefetch = 0 : i64, scratch_operands = 0 : i64, tpu.core_type = #tpu.core_type<tc>, window_params = [{transform_indices = @transform_0, window_bounds = array<i64: 104, 256>}, {transform_indices = @transform_1, window_bounds = array<i64: 128, 256>}, {transform_indices = @transform_2, window_bounds = array<i64: 1, 128>}]} {
    %c0 = arith.constant 0 : index
    %c0_0 = arith.constant 0 : index
    %0 = vector.load %arg2[%c0, %c0_0] : memref<104x256xbf16, #tpu.memory_space<vmem>>, vector<104x256xbf16>
    %c0_1 = arith.constant 0 : index
    %c0_2 = arith.constant 0 : index
    %1 = vector.load %arg3[%c0_1, %c0_2] : memref<128x256xbf16, #tpu.memory_space<vmem>>, vector<128x256xbf16>
    %cst = arith.constant dense<0.000000e+00> : vector<104x128xf32>
    %2 = tpu.matmul %0, %1, %cst {dimension_numbers = #tpu.dot_dimension_numbers<[1], [1], [0], [0], [0, 0, 1, 0], [], []>} : vector<104x256xbf16>, vector<128x256xbf16>, vector<104x128xf32> -> vector<104x128xf32>
    %3 = tpu.iota {dimensions = array<i32: 0>} : vector<104x128xi32>
    %c104_i32 = arith.constant 104 : i32
    %4 = arith.muli %arg1, %c104_i32 : i32
    %5 = vector.broadcast %4 : i32 to vector<104x128xi32>
    %6 = arith.addi %3, %5 : vector<104x128xi32>
    %c98_i32 = arith.constant 98 : i32
    %7 = vector.broadcast %c98_i32 : i32 to vector<104x128xi32>
    %8 = arith.cmpi slt, %6, %7 : vector<104x128xi32>
    %cst_3 = arith.constant 0xFF800000 : f32
    %9 = vector.broadcast %cst_3 : f32 to vector<104x128xf32>
    %10 = arith.select %8, %2, %9 : vector<104x128xi1>, vector<104x128xf32>
    %cst_4 = arith.constant dense<0xFF800000> : vector<128xf32>
    %11 = vector.multi_reduction <maximumf>, %10, %cst_4 [0] : vector<104x128xf32> to vector<128xf32>
    %12 = vector.shape_cast %11 : vector<128xf32> to vector<1x128xf32>
    %c0_i32 = arith.constant 0 : i32
    %13 = arith.cmpi eq, %arg1, %c0_i32 : i32
    %14 = arith.extui %13 : i1 to i32
    %c0_i32_5 = arith.constant 0 : i32
    %15 = arith.cmpi ne, %14, %c0_i32_5 : i32
    scf.if %15 {
      %c0_8 = arith.constant 0 : index
      %c0_9 = arith.constant 0 : index
      %19 = vector.load %arg4[%c0_8, %c0_9] : memref<1x128xf32, #tpu.memory_space<vmem>>, vector<1x128xf32>
      tpu.vector_store %arg4[%c0_8, %c0_9], %12 {strides = array<i32>} : memref<1x128xf32, #tpu.memory_space<vmem>>, vector<1x128xf32>,
    } else {
    }
    %c0_i32_6 = arith.constant 0 : i32
    %16 = arith.cmpi sgt, %arg1, %c0_i32_6 : i32
    %17 = arith.extui %16 : i1 to i32
    %c0_i32_7 = arith.constant 0 : i32
    %18 = arith.cmpi ne, %17, %c0_i32_7 : i32
    scf.if %18 {
      %c0_8 = arith.constant 0 : index
      %c0_9 = arith.constant 0 : index
      %19 = vector.load %arg4[%c0_8, %c0_9] : memref<1x128xf32, #tpu.memory_space<vmem>>, vector<1x128xf32>
      %20 = arith.maximumf %19, %12 : vector<1x128xf32>
      %c0_10 = arith.constant 0 : index
      %c0_11 = arith.constant 0 : index
      %21 = vector.load %arg4[%c0_10, %c0_11] : memref<1x128xf32, #tpu.memory_space<vmem>>, vector<1x128xf32>
      tpu.vector_store %arg4[%c0_10, %c0_11], %20 {strides = array<i32>} : memref<1x128xf32, #tpu.memory_space<vmem>>, vector<1x128xf32>,
    } else {
    }
    return
  }
  func.func @transform_0(%arg0: i32, %arg1: i32) -> (i32, i32) {
    %c0_i32 = arith.constant 0 : i32
    %c0_i32_0 = arith.constant 0 : i32
    return %arg1, %c0_i32 : i32, i32
  }
  func.func @transform_1(%arg0: i32, %arg1: i32) -> (i32, i32) {
    %c0_i32 = arith.constant 0 : i32
    %c0_i32_0 = arith.constant 0 : i32
    return %arg0, %c0_i32 : i32, i32
  }
  func.func @transform_2(%arg0: i32, %arg1: i32) -> (i32, i32) {
    %c0_i32 = arith.constant 0 : i32
    %c0_i32_0 = arith.constant 0 : i32
    return %c0_i32, %arg0 : i32, i32
  }
}

module attributes {stable_mosaic.version = 11 : i64} {
  func.func @_maxsim_kernel(%arg0: i32, %arg1: i32, %arg2: memref<24x384xbf16, #tpu.memory_space<vmem>>, %arg3: memref<128x384xbf16, #tpu.memory_space<vmem>>, %arg4: memref<1x128xf32, #tpu.memory_space<vmem>>) attributes {dimension_semantics = [#tpu.dimension_semantics<parallel>, #tpu.dimension_semantics<arbitrary>], iteration_bounds = array<i64: 1, 1>, scalar_prefetch = 0 : i64, scratch_operands = 0 : i64, tpu.core_type = #tpu.core_type<tc>, window_params = [{transform_indices = @transform_0, window_bounds = array<i64: 24, 384>}, {transform_indices = @transform_1, window_bounds = array<i64: 128, 384>}, {transform_indices = @transform_2, window_bounds = array<i64: 1, 128>}]} {
    %c0 = arith.constant 0 : index
    %c0_0 = arith.constant 0 : index
    %0 = vector.load %arg2[%c0, %c0_0] : memref<24x384xbf16, #tpu.memory_space<vmem>>, vector<24x384xbf16>
    %c0_1 = arith.constant 0 : index
    %c0_2 = arith.constant 0 : index
    %1 = vector.load %arg3[%c0_1, %c0_2] : memref<128x384xbf16, #tpu.memory_space<vmem>>, vector<128x384xbf16>
    %cst = arith.constant dense<0.000000e+00> : vector<24x128xf32>
    %2 = tpu.matmul %0, %1, %cst {dimension_numbers = #tpu.dot_dimension_numbers<[1], [1], [0], [0], [0, 0, 1, 0], [], []>} : vector<24x384xbf16>, vector<128x384xbf16>, vector<24x128xf32> -> vector<24x128xf32>
    %3 = tpu.iota {dimensions = array<i32: 0>} : vector<24x128xi32>
    %c24_i32 = arith.constant 24 : i32
    %4 = arith.muli %arg1, %c24_i32 : i32
    %5 = vector.broadcast %4 : i32 to vector<24x128xi32>
    %6 = arith.addi %3, %5 : vector<24x128xi32>
    %c18_i32 = arith.constant 18 : i32
    %7 = vector.broadcast %c18_i32 : i32 to vector<24x128xi32>
    %8 = arith.cmpi slt, %6, %7 : vector<24x128xi32>
    %cst_3 = arith.constant 0xFF800000 : f32
    %9 = vector.broadcast %cst_3 : f32 to vector<24x128xf32>
    %10 = arith.select %8, %2, %9 : vector<24x128xi1>, vector<24x128xf32>
    %cst_4 = arith.constant dense<0xFF800000> : vector<128xf32>
    %11 = vector.multi_reduction <maximumf>, %10, %cst_4 [0] : vector<24x128xf32> to vector<128xf32>
    %12 = vector.shape_cast %11 : vector<128xf32> to vector<1x128xf32>
    %c0_i32 = arith.constant 0 : i32
    %13 = arith.cmpi eq, %arg1, %c0_i32 : i32
    %14 = arith.extui %13 : i1 to i32
    %c0_i32_5 = arith.constant 0 : i32
    %15 = arith.cmpi ne, %14, %c0_i32_5 : i32
    scf.if %15 {
      %c0_8 = arith.constant 0 : index
      %c0_9 = arith.constant 0 : index
      %19 = vector.load %arg4[%c0_8, %c0_9] : memref<1x128xf32, #tpu.memory_space<vmem>>, vector<1x128xf32>
      tpu.vector_store %arg4[%c0_8, %c0_9], %12 {strides = array<i32>} : memref<1x128xf32, #tpu.memory_space<vmem>>, vector<1x128xf32>,
    } else {
    }
    %c0_i32_6 = arith.constant 0 : i32
    %16 = arith.cmpi sgt, %arg1, %c0_i32_6 : i32
    %17 = arith.extui %16 : i1 to i32
    %c0_i32_7 = arith.constant 0 : i32
    %18 = arith.cmpi ne, %17, %c0_i32_7 : i32
    scf.if %18 {
      %c0_8 = arith.constant 0 : index
      %c0_9 = arith.constant 0 : index
      %19 = vector.load %arg4[%c0_8, %c0_9] : memref<1x128xf32, #tpu.memory_space<vmem>>, vector<1x128xf32>
      %20 = arith.maximumf %19, %12 : vector<1x128xf32>
      %c0_10 = arith.constant 0 : index
      %c0_11 = arith.constant 0 : index
      %21 = vector.load %arg4[%c0_10, %c0_11] : memref<1x128xf32, #tpu.memory_space<vmem>>, vector<1x128xf32>
      tpu.vector_store %arg4[%c0_10, %c0_11], %20 {strides = array<i32>} : memref<1x128xf32, #tpu.memory_space<vmem>>, vector<1x128xf32>,
    } else {
    }
    return
  }
  func.func @transform_0(%arg0: i32, %arg1: i32) -> (i32, i32) {
    %c0_i32 = arith.constant 0 : i32
    %c0_i32_0 = arith.constant 0 : i32
    return %arg1, %c0_i32 : i32, i32
  }
  func.func @transform_1(%arg0: i32, %arg1: i32) -> (i32, i32) {
    %c0_i32 = arith.constant 0 : i32
    %c0_i32_0 = arith.constant 0 : i32
    return %arg0, %c0_i32 : i32, i32
  }
  func.func @transform_2(%arg0: i32, %arg1: i32) -> (i32, i32) {
    %c0_i32 = arith.constant 0 : i32
    %c0_i32_0 = arith.constant 0 : i32
    return %c0_i32, %arg0 : i32, i32
  }
}

</mosaic_0001>

<bundles_post_ra>
// kernel: puzzle_sim_forward.16
= control target key start
LH: loop header
LB: loop body
LE: loop exit
PB: predicated region body
PF: predicated region fallthrough
CT: control target
= control target key end

     0   :  { %s2420_s12 = smov 0   ;;  %s2422_s13 = smov 0   ;;  %s2818_s0 = inlined_call_operand.vmem [shape: bf16[2883,128], index: 0, kind: input, shape index: {}]   ;;  %s2819_s1 = inlined_call_operand.vmem [shape: bf16[128,128], index: 1, kind: input, shape index: {}]   ;;  %s2820_s2 = inlined_call_operand.vmem [shape: f32[1,128], index: 2, kind: input, shape index: {}]   ;;  %s2821_s3 = inlined_call_operand.vmem [shape: bf16[2883,128], index: 3, kind: output, shape index: {}]  }
   0x1   :  { %s2424_s14 = smov 0  }
   0x2 LB: > { %s2433_s15 = sadd.s32 4294967295, %s2366_s14   ;;  %s2435_s16 = sadd.s32 1, %s2366_s14   ;;  %s2366_s14 = sphi %s2424_s14, %s2828_s14   ;;  %s2362_s13 = sphi %s2422_s13, %s2827_s13   ;;  %s2358_s12 = sphi %s2420_s12, %s2826_s12  }
   0x3   : > { %s85_s17 = ssub.s32 %s2366_s14, %s2435_s16  ;;  %s88_s18 = sadd.s32 1, %s2362_s13 }
   0x4   : > { %p86_p0 = scmp.eq.s32.totalorder %s85_s17, 0  ;;  %p98_p1 = scmp.ne.s32.totalorder %s2362_s13, %s2358_s12 }
   0x5   : > { %p99_p2 = scmp.eq.s32.totalorder %s2433_s15, 5  ;;  %p1664_p3 = scmp.ge.s32.totalorder %s2366_s14, 1 }
   0x6   : > { %s2443_s19 = scalar_select %p86_p0, %s2362_s13, %s88_s18  }
   0x7   : > { %p2445_p4 = por %p99_p2, %p98_p1  ;;  %p146_p5 = scmp.lt.s32.totalorder %s2366_s14, 7 }
   0x9   : > { %p147_p6 = pnand %p1664_p3, %p146_p5 }
   0xa   : > { %s2453_s23 = sshll.u32 (!%p147_p6), %s2433_s15, 6  ;;  %s170_s25 = sand.u32 (!%p147_p6), 1, %s2358_s12  }
   0xb   : > { %150 = sbr.rel (%p147_p6) target bundleno = 392 (0x188), region = 32  ;;  %p178_p7 = scmp.lt.s32.totalorder (!%p147_p6), %s2453_s23, 360 }
  0x10   : > { %v2272_v0 = vld [vmem:[%s2819_s1 + $0x38] sm:$0xff]   ;;  %v2273_v1 = vld [vmem:[%s2819_s1 + $0x30] sm:$0xff]   ;;  %s179_s26 = scalar_select %p178_p7, %s2453_s23, 360  ;;  %v2274_v2 = vld [vmem:[%s2819_s1 + $0x28] sm:$0xff]  }
  0x11   : > { %2088 = vmatprep.subr.bf16.mxu0 %v2272_v0  ;;  %2168 = vmatprep.subr.bf16.mxu1 %v2272_v0  ;;  %v2275_v3 = vld [vmem:[%s2819_s1 + $0x20] sm:$0xff]   ;;  %v2276_v6 = vld [vmem:[%s2819_s1 + $0x18] sm:$0xff]   ;;  %v2277_v7 = vld [vmem:[%s2819_s1 + $0x10] sm:$0xff]   ;;  %s1201_s27 = ssub.s32 (%p2445_p4), 361, %s2453_s23  ;;  %s1854_s28 = sshll.u32 (%p2445_p4), %s2433_s15, 8 }
  0x12   : > { %2089 = vmatpush3.bf16.msra.mxu0 %v2272_v0  ;;  %2176 = vmatpush3.bf16.msra.mxu1 %v2272_v0  ;;  %s1667_s29 = sshll.u32 %s179_s26, 2  ;;  %v2278_v8 = vld [vmem:[%s2819_s1 + $0x8] sm:$0xff]   ;;  %v2279_v9 = vld [vmem:[%s2819_s1] sm:$0xff]   ;;  %s1665_s26 = sshll.u32 %s170_s25, 8 }
  0x13   : > { %2090 = vmatprep.subr.bf16.mxu0 %v2273_v1  ;;  %2169 = vmatprep.subr.bf16.mxu1 %v2273_v1  ;;  %s2466_s5 = scalar_lea.vmem %s2818_s0, %s1667_s29  ;;  %v2518_v40 = vld [vmem:[%s2820_s2] ss:$0 sm:$0xff]  ;;  %s2531_s12 = scalar_lea.vmem [#allocation2], %s1665_s26  }
  0x14   : > { %v2280_v4 = vld [vmem:[%s2466_s5] sm:$0xff]   ;;  %v2282_v10 = vld [vmem:[%s2466_s5 + $0x8] sm:$0xff]   ;;  %v2284_v12 = vld [vmem:[%s2466_s5 + $0x10] sm:$0xff]   ;;  %p1202_p8 = scmp.lt.s32.totalorder (%p2445_p4), %s1201_s27, 64  ;;  %s2626_s4 = scalar_lea.vmem (%p2445_p4), %s2821_s3, %s1854_s28  }
  0x15   : > { %v2281_v5 = vld [vmem:[%s2466_s5 + $0x80] sm:$0xff]   ;;  %2104 = vmatprep.mubr.bf16.mxu0 %v2280_v4  ;;  %v2283_v11 = vld [vmem:[%s2466_s5 + $0x88] sm:$0xff]   ;;  %v2285_v13 = vld [vmem:[%s2466_s5 + $0x90] sm:$0xff]  }
  0x16   : > { %2091 = vmatpush3.bf16.msra.mxu0 %v2273_v1  ;;  %2177 = vmatpush3.bf16.msra.mxu1 %v2273_v1  ;;  %v2286_v14 = vld [vmem:[%s2466_s5 + $0x18] sm:$0xff]   ;;  %v2288_v16 = vld [vmem:[%s2466_s5 + $0x20] sm:$0xff]   ;;  %v2290_v18 = vld [vmem:[%s2466_s5 + $0x28] sm:$0xff]  }
  0x17   : > { %2092 = vmatprep.subr.bf16.mxu0 %v2274_v2  ;;  %2170 = vmatprep.subr.bf16.mxu1 %v2274_v2  ;;  %v2287_v15 = vld [vmem:[%s2466_s5 + $0x98] sm:$0xff]   ;;  %v2289_v17 = vld [vmem:[%s2466_s5 + $0xa0] sm:$0xff]   ;;  %v2291_v19 = vld [vmem:[%s2466_s5 + $0xa8] sm:$0xff]  }
  0x18   : > { %2136 = vmatprep.mubr.bf16.mxu1 %v2281_v5  ;;  %v2292_v20 = vld [vmem:[%s2466_s5 + $0x30] sm:$0xff]   ;;  %v2294_v22 = vld [vmem:[%s2466_s5 + $0x38] sm:$0xff]   ;;  %v2296_v24 = vld [vmem:[%s2466_s5 + $0x40] sm:$0xff]  }
  0x19   : > { %v2293_v21 = vld [vmem:[%s2466_s5 + $0xb0] sm:$0xff]   ;;  %v2295_v23 = vld [vmem:[%s2466_s5 + $0xb8] sm:$0xff]   ;;  %v2297_v25 = vld [vmem:[%s2466_s5 + $0xc0] sm:$0xff]  }
  0x1a   : > { %2093 = vmatpush3.bf16.msra.mxu0 %v2274_v2  ;;  %2178 = vmatpush3.bf16.msra.mxu1 %v2274_v2  ;;  %v2298_v26 = vld [vmem:[%s2466_s5 + $0x48] sm:$0xff]   ;;  %v2300_v28 = vld [vmem:[%s2466_s5 + $0x50] sm:$0xff]   ;;  %v2302_v30 = vld [vmem:[%s2466_s5 + $0x58] sm:$0xff]  }
  0x1b   : > { %2094 = vmatprep.subr.bf16.mxu0 %v2275_v3  ;;  %2171 = vmatprep.subr.bf16.mxu1 %v2275_v3  ;;  %v2299_v27 = vld [vmem:[%s2466_s5 + $0xc8] sm:$0xff]   ;;  %v2301_v29 = vld [vmem:[%s2466_s5 + $0xd0] sm:$0xff]   ;;  %v2303_v31 = vld [vmem:[%s2466_s5 + $0xd8] sm:$0xff]  }
  0x1c   : > { %v2304_v32 = vld [vmem:[%s2466_s5 + $0x60] sm:$0xff]   ;;  %v2306_v34 = vld [vmem:[%s2466_s5 + $0x68] sm:$0xff]   ;;  %v2308_v36 = vld [vmem:[%s2466_s5 + $0x70] sm:$0xff]  }
  0x1d   : > { %v2305_v33 = vld [vmem:[%s2466_s5 + $0xe0] sm:$0xff]   ;;  %v2307_v35 = vld [vmem:[%s2466_s5 + $0xe8] sm:$0xff]   ;;  %v2309_v37 = vld [vmem:[%s2466_s5 + $0xf0] sm:$0xff]  }
  0x1e   : > { %2095 = vmatpush3.bf16.msra.mxu0 %v2275_v3  ;;  %2179 = vmatpush3.bf16.msra.mxu1 %v2275_v3  ;;  %v2310_v38 = vld [vmem:[%s2466_s5 + $0x78] sm:$0xff]  }
  0x1f   : > { %2096 = vmatprep.subr.bf16.mxu0 %v2276_v6  ;;  %2172 = vmatprep.subr.bf16.mxu1 %v2276_v6  ;;  %v2311_v39 = vld [vmem:[%s2466_s5 + $0xf8] sm:$0xff]  }
  0x22   : > { %2097 = vmatpush3.bf16.msra.mxu0 %v2276_v6  ;;  %2180 = vmatpush3.bf16.msra.mxu1 %v2276_v6 }
  0x23   : > { %2098 = vmatprep.subr.bf16.mxu0 %v2277_v7  ;;  %2173 = vmatprep.subr.bf16.mxu1 %v2277_v7 }
  0x26   : > { %2099 = vmatpush3.bf16.msra.mxu0 %v2277_v7  ;;  %2181 = vmatpush3.bf16.msra.mxu1 %v2277_v7 }
  0x27   : > { %2100 = vmatprep.subr.bf16.mxu0 %v2278_v8  ;;  %2174 = vmatprep.subr.bf16.mxu1 %v2278_v8 }
  0x2a   : > { %2101 = vmatpush3.bf16.msra.mxu0 %v2278_v8  ;;  %2182 = vmatpush3.bf16.msra.mxu1 %v2278_v8 }
  0x2b   : > { %2102 = vmatprep.subr.bf16.mxu0 %v2279_v9  ;;  %2175 = vmatprep.subr.bf16.mxu1 %v2279_v9 }
  0x2e   : > { %2103 = vmatpush3.bf16.msra.mxu0 %v2279_v9  ;;  %2183 = vmatpush3.bf16.msra.mxu1 %v2279_v9 }
  0x31   : > { %2105 = vmatmul.mubr.bf16.vlgmr.msra.gmra.mxu0 %v2282_v10  ;;  %2137 = vmatmul.mubr.bf16.vlgmr.msra.gmra.mxu1 %v2283_v11 }
  0x32   : > { %2108 = vmatprep.mubr.bf16.mxu0 %v2284_v12  ;;  %2140 = vmatprep.mubr.bf16.mxu1 %v2285_v13 }
  0x39   : > { %2109 = vmatmul.mubr.bf16.gmra.mxu0 %v2286_v14  ;;  %2141 = vmatmul.mubr.bf16.gmra.mxu1 %v2287_v15 }
  0x3a   : > { %2112 = vmatprep.mubr.bf16.mxu0 %v2288_v16  ;;  %2144 = vmatprep.mubr.bf16.mxu1 %v2289_v17 }
  0x41   : > { %2113 = vmatmul.mubr.bf16.gmra.mxu0 %v2290_v18  ;;  %2145 = vmatmul.mubr.bf16.gmra.mxu1 %v2291_v19 }
  0x42   : > { %2116 = vmatprep.mubr.bf16.mxu0 %v2292_v20  ;;  %2148 = vmatprep.mubr.bf16.mxu1 %v2293_v21 }
  0x49   : > { %2117 = vmatmul.mubr.bf16.gmra.mxu0 %v2294_v22  ;;  %2149 = vmatmul.mubr.bf16.gmra.mxu1 %v2295_v23 }
  0x4a   : > { %2120 = vmatprep.mubr.bf16.mxu0 %v2296_v24  ;;  %2152 = vmatprep.mubr.bf16.mxu1 %v2297_v25 }
  0x51   : > { %2121 = vmatmul.mubr.bf16.gmra.mxu0 %v2298_v26  ;;  %2153 = vmatmul.mubr.bf16.gmra.mxu1 %v2299_v27 }
  0x52   : > { %2124 = vmatprep.mubr.bf16.mxu0 %v2300_v28  ;;  %2156 = vmatprep.mubr.bf16.mxu1 %v2301_v29 }
  0x59   : > { %2125 = vmatmul.mubr.bf16.gmra.mxu0 %v2302_v30  ;;  %2157 = vmatmul.mubr.bf16.gmra.mxu1 %v2303_v31 }
  0x5a   : > { %2128 = vmatprep.mubr.bf16.mxu0 %v2304_v32  ;;  %2160 = vmatprep.mubr.bf16.mxu1 %v2305_v33 }
  0x61   : > { %2129 = vmatmul.mubr.bf16.gmra.mxu0 %v2306_v34  ;;  %2161 = vmatmul.mubr.bf16.gmra.mxu1 %v2307_v35 }
  0x62   : > { %2132 = vmatprep.mubr.bf16.mxu0 %v2308_v36  ;;  %2164 = vmatprep.mubr.bf16.mxu1 %v2309_v37 }
  0x69   : > { %2133 = vmatmul.mubr.bf16.gmra.mxu0 %v2310_v38  ;;  %2165 = vmatmul.mubr.bf16.gmra.mxu1 %v2311_v39 }
  0xf1   : > { %v2106_v41 = vpop.f32.mrf.mxu0  ;;  %v2138_v42 = vpop.f32.mrf.mxu1 }
  0xf2   : > { %v563_v43 = vadd.f32 %v2106_v41, %v2518_v40  ;;  %v691_v44 = vadd.f32 %v2138_v42, %v2518_v40 }
  0xf3   : > { %v554_v45 = vpop.f32.mrf.mxu0  ;;  %v682_v46 = vpop.f32.mrf.mxu1 }
  0xf4   : > { %v555_v47 = vadd.f32 %v2518_v40, %v554_v45  ;;  %v683_v48 = vadd.f32 %v2518_v40, %v682_v46  ;;  %v811_v53 = vmax.f32 %v563_v43, 0.0  ;;  %v843_v54 = vmax.f32 %v691_v44, 0.0 }
  0xf5   : > { %v2107_v49 = vpop.f32.mrf.mxu0  ;;  %v2139_v50 = vpop.f32.mrf.mxu1 }
  0xf6   : > { %v566_v51 = vadd.f32 %v2107_v49, %v2518_v40  ;;  %v694_v52 = vadd.f32 %v2139_v50, %v2518_v40  ;;  %v809_v61 = vmax.f32 %v555_v47, 0.0  ;;  %v841_v62 = vmax.f32 %v683_v48, 0.0 }
  0xf7   : > { %v557_v55 = vpop.f32.mrf.mxu0  ;;  %v685_v56 = vpop.f32.mrf.mxu1 }
  0xf8   : > { %v812_v57 = vmax.f32 %v566_v51, 0.0  ;;  %v844_v58 = vmax.f32 %v694_v52, 0.0  ;;  %v558_v59 = vadd.f32 %v2518_v40, %v557_v55  ;;  %v686_v60 = vadd.f32 %v2518_v40, %v685_v56 }
  0xf9   : > { %v2110_v63 = vpop.f32.mrf.mxu0  ;;  %v2142_v0 = vpop.f32.mrf.mxu1 }
  0xfa   : > { %v1865_v1 = vpack.c.bf16 %v812_v57, %v811_v53  ;;  %v1945_v2 = vpack.c.bf16 %v844_v58, %v843_v54  ;;  %v810_v3 = vmax.f32 %v558_v59, 0.0  ;;  %v842_v4 = vmax.f32 %v686_v60, 0.0 }
  0xfb   : > { %v579_v5 = vadd.f32 %v2110_v63, %v2518_v40  ;;  %v707_v6 = vadd.f32 %v2142_v0, %v2518_v40  ;;  %v570_v7 = vpop.f32.mrf.mxu0  ;;  %v698_v8 = vpop.f32.mrf.mxu1 }
  0xfc   : > { %2017 = vst [vmem:[%s2531_s12 + $0x8] sm:$0xff] %v1865_v1   ;;  %2033 = vst [vmem:[%s2531_s12 + $0x88] sm:$0xff] %v1945_v2   ;;  %v1860_v9 = vpack.c.bf16 %v810_v3, %v809_v61  ;;  %v1940_v10 = vpack.c.bf16 %v842_v4, %v841_v62  ;;  %v571_v11 = vadd.f32 %v2518_v40, %v570_v7 }
  0xfd   : > { %v699_v12 = vadd.f32 %v2518_v40, %v698_v8  ;;  %v2111_v13 = vpop.f32.mrf.mxu0  ;;  %v2143_v14 = vpop.f32.mrf.mxu1  ;;  %v815_v17 = vmax.f32 %v579_v5, 0.0  ;;  %v847_v18 = vmax.f32 %v707_v6, 0.0 }
  0xfe   : > { %1861 = vst [vmem:[%s2531_s12] sm:$0xff] %v1860_v9   ;;  %2032 = vst [vmem:[%s2531_s12 + $0x80] sm:$0xff] %v1940_v10   ;;  %v582_v15 = vadd.f32 %v2111_v13, %v2518_v40  ;;  %v710_v16 = vadd.f32 %v2143_v14, %v2518_v40  ;;  %v813_v25 = vmax.f32 %v571_v11, 0.0 }
  0xff   : > { %v573_v19 = vpop.f32.mrf.mxu0  ;;  %v701_v20 = vpop.f32.mrf.mxu1  ;;  %v845_v26 = vmax.f32 %v699_v12, 0.0 }
 0x100   : > { %v816_v21 = vmax.f32 %v582_v15, 0.0  ;;  %v848_v22 = vmax.f32 %v710_v16, 0.0  ;;  %v574_v23 = vadd.f32 %v2518_v40, %v573_v19  ;;  %v702_v24 = vadd.f32 %v2518_v40, %v701_v20 }
 0x101   : > { %v2114_v27 = vpop.f32.mrf.mxu0  ;;  %v2146_v28 = vpop.f32.mrf.mxu1 }
 0x102   : > { %v1875_v29 = vpack.c.bf16 %v816_v21, %v815_v17  ;;  %v1955_v30 = vpack.c.bf16 %v848_v22, %v847_v18  ;;  %v814_v31 = vmax.f32 %v574_v23, 0.0  ;;  %v846_v32 = vmax.f32 %v702_v24, 0.0 }
 0x103   : > { %v595_v33 = vadd.f32 %v2114_v27, %v2518_v40  ;;  %v723_v34 = vadd.f32 %v2146_v28, %v2518_v40  ;;  %v586_v35 = vpop.f32.mrf.mxu0  ;;  %v714_v36 = vpop.f32.mrf.mxu1 }
 0x104   : > { %2019 = vst [vmem:[%s2531_s12 + $0x18] sm:$0xff] %v1875_v29   ;;  %2035 = vst [vmem:[%s2531_s12 + $0x98] sm:$0xff] %v1955_v30   ;;  %v1870_v37 = vpack.c.bf16 %v814_v31, %v813_v25  ;;  %v1950_v38 = vpack.c.bf16 %v846_v32, %v845_v26  ;;  %v587_v39 = vadd.f32 %v2518_v40, %v586_v35 }
 0x105   : > { %v715_v41 = vadd.f32 %v2518_v40, %v714_v36  ;;  %v2115_v42 = vpop.f32.mrf.mxu0  ;;  %v2147_v43 = vpop.f32.mrf.mxu1  ;;  %v819_v46 = vmax.f32 %v595_v33, 0.0  ;;  %v851_v47 = vmax.f32 %v723_v34, 0.0 }
 0x106   : > { %2018 = vst [vmem:[%s2531_s12 + $0x10] sm:$0xff] %v1870_v37   ;;  %2034 = vst [vmem:[%s2531_s12 + $0x90] sm:$0xff] %v1950_v38   ;;  %v598_v44 = vadd.f32 %v2115_v42, %v2518_v40  ;;  %v726_v45 = vadd.f32 %v2147_v43, %v2518_v40  ;;  %v817_v54 = vmax.f32 %v587_v39, 0.0 }
 0x107   : > { %v589_v48 = vpop.f32.mrf.mxu0  ;;  %v717_v49 = vpop.f32.mrf.mxu1  ;;  %v849_v55 = vmax.f32 %v715_v41, 0.0 }
 0x108   : > { %v820_v50 = vmax.f32 %v598_v44, 0.0  ;;  %v852_v51 = vmax.f32 %v726_v45, 0.0  ;;  %v590_v52 = vadd.f32 %v2518_v40, %v589_v48  ;;  %v718_v53 = vadd.f32 %v2518_v40, %v717_v49 }
 0x109   : > { %v2118_v56 = vpop.f32.mrf.mxu0  ;;  %v2150_v57 = vpop.f32.mrf.mxu1 }
 0x10a   : > { %v1885_v58 = vpack.c.bf16 %v820_v50, %v819_v46  ;;  %v1965_v59 = vpack.c.bf16 %v852_v51, %v851_v47  ;;  %v818_v60 = vmax.f32 %v590_v52, 0.0  ;;  %v850_v61 = vmax.f32 %v718_v53, 0.0 }
 0x10b   : > { %v611_v62 = vadd.f32 %v2118_v56, %v2518_v40  ;;  %v739_v63 = vadd.f32 %v2150_v57, %v2518_v40  ;;  %v602_v0 = vpop.f32.mrf.mxu0  ;;  %v730_v1 = vpop.f32.mrf.mxu1 }
 0x10c   : > { %2021 = vst [vmem:[%s2531_s12 + $0x28] sm:$0xff] %v1885_v58   ;;  %2037 = vst [vmem:[%s2531_s12 + $0xa8] sm:$0xff] %v1965_v59   ;;  %v1880_v2 = vpack.c.bf16 %v818_v60, %v817_v54  ;;  %v1960_v3 = vpack.c.bf16 %v850_v61, %v849_v55  ;;  %v603_v4 = vadd.f32 %v2518_v40, %v602_v0 }
 0x10d   : > { %v731_v5 = vadd.f32 %v2518_v40, %v730_v1  ;;  %v2119_v6 = vpop.f32.mrf.mxu0  ;;  %v2151_v7 = vpop.f32.mrf.mxu1  ;;  %v823_v10 = vmax.f32 %v611_v62, 0.0  ;;  %v855_v11 = vmax.f32 %v739_v63, 0.0 }
 0x10e   : > { %2020 = vst [vmem:[%s2531_s12 + $0x20] sm:$0xff] %v1880_v2   ;;  %2036 = vst [vmem:[%s2531_s12 + $0xa0] sm:$0xff] %v1960_v3   ;;  %v614_v8 = vadd.f32 %v2119_v6, %v2518_v40  ;;  %v742_v9 = vadd.f32 %v2151_v7, %v2518_v40  ;;  %v821_v18 = vmax.f32 %v603_v4, 0.0 }
 0x10f   : > { %v605_v12 = vpop.f32.mrf.mxu0  ;;  %v733_v13 = vpop.f32.mrf.mxu1  ;;  %v853_v19 = vmax.f32 %v731_v5, 0.0 }
 0x110   : > { %v824_v14 = vmax.f32 %v614_v8, 0.0  ;;  %v856_v15 = vmax.f32 %v742_v9, 0.0  ;;  %v606_v16 = vadd.f32 %v2518_v40, %v605_v12  ;;  %v734_v17 = vadd.f32 %v2518_v40, %v733_v13 }
 0x111   : > { %v2122_v20 = vpop.f32.mrf.mxu0  ;;  %v2154_v21 = vpop.f32.mrf.mxu1 }
 0x112   : > { %v1895_v22 = vpack.c.bf16 %v824_v14, %v823_v10  ;;  %v1975_v23 = vpack.c.bf16 %v856_v15, %v855_v11  ;;  %v822_v24 = vmax.f32 %v606_v16, 0.0  ;;  %v854_v25 = vmax.f32 %v734_v17, 0.0 }
 0x113   : > { %v627_v26 = vadd.f32 %v2122_v20, %v2518_v40  ;;  %v755_v27 = vadd.f32 %v2154_v21, %v2518_v40  ;;  %v618_v28 = vpop.f32.mrf.mxu0  ;;  %v746_v29 = vpop.f32.mrf.mxu1 }
 0x114   : > { %2023 = vst [vmem:[%s2531_s12 + $0x38] sm:$0xff] %v1895_v22   ;;  %2039 = vst [vmem:[%s2531_s12 + $0xb8] sm:$0xff] %v1975_v23   ;;  %v1890_v30 = vpack.c.bf16 %v822_v24, %v821_v18  ;;  %v1970_v31 = vpack.c.bf16 %v854_v25, %v853_v19  ;;  %v619_v32 = vadd.f32 %v2518_v40, %v618_v28 }
 0x115   : > { %v747_v33 = vadd.f32 %v2518_v40, %v746_v29  ;;  %v2123_v34 = vpop.f32.mrf.mxu0  ;;  %v2155_v35 = vpop.f32.mrf.mxu1  ;;  %v827_v38 = vmax.f32 %v627_v26, 0.0  ;;  %v859_v39 = vmax.f32 %v755_v27, 0.0 }
 0x116   : > { %2022 = vst [vmem:[%s2531_s12 + $0x30] sm:$0xff] %v1890_v30   ;;  %2038 = vst [vmem:[%s2531_s12 + $0xb0] sm:$0xff] %v1970_v31   ;;  %v630_v36 = vadd.f32 %v2123_v34, %v2518_v40  ;;  %v758_v37 = vadd.f32 %v2155_v35, %v2518_v40  ;;  %v825_v47 = vmax.f32 %v619_v32, 0.0 }
 0x117   : > { %v621_v41 = vpop.f32.mrf.mxu0  ;;  %v749_v42 = vpop.f32.mrf.mxu1  ;;  %v857_v48 = vmax.f32 %v747_v33, 0.0 }
 0x118   : > { %v828_v43 = vmax.f32 %v630_v36, 0.0  ;;  %v860_v44 = vmax.f32 %v758_v37, 0.0  ;;  %v622_v45 = vadd.f32 %v2518_v40, %v621_v41  ;;  %v750_v46 = vadd.f32 %v2518_v40, %v749_v42 }
 0x119   : > { %v2126_v49 = vpop.f32.mrf.mxu0  ;;  %v2158_v50 = vpop.f32.mrf.mxu1 }
 0x11a   : > { %v1905_v51 = vpack.c.bf16 %v828_v43, %v827_v38  ;;  %v1985_v52 = vpack.c.bf16 %v860_v44, %v859_v39  ;;  %v826_v53 = vmax.f32 %v622_v45, 0.0  ;;  %v858_v54 = vmax.f32 %v750_v46, 0.0 }
 0x11b   : > { %v643_v55 = vadd.f32 %v2126_v49, %v2518_v40  ;;  %v771_v56 = vadd.f32 %v2158_v50, %v2518_v40  ;;  %v634_v57 = vpop.f32.mrf.mxu0  ;;  %v762_v58 = vpop.f32.mrf.mxu1 }
 0x11c   : > { %2025 = vst [vmem:[%s2531_s12 + $0x48] sm:$0xff] %v1905_v51   ;;  %2041 = vst [vmem:[%s2531_s12 + $0xc8] sm:$0xff] %v1985_v52   ;;  %v1900_v59 = vpack.c.bf16 %v826_v53, %v825_v47  ;;  %v1980_v60 = vpack.c.bf16 %v858_v54, %v857_v48  ;;  %v635_v61 = vadd.f32 %v2518_v40, %v634_v57 }
 0x11d   : > { %v763_v62 = vadd.f32 %v2518_v40, %v762_v58  ;;  %v2127_v63 = vpop.f32.mrf.mxu0  ;;  %v2159_v0 = vpop.f32.mrf.mxu1  ;;  %v831_v3 = vmax.f32 %v643_v55, 0.0  ;;  %v863_v4 = vmax.f32 %v771_v56, 0.0 }
 0x11e   : > { %2024 = vst [vmem:[%s2531_s12 + $0x40] sm:$0xff] %v1900_v59   ;;  %2040 = vst [vmem:[%s2531_s12 + $0xc0] sm:$0xff] %v1980_v60   ;;  %v646_v1 = vadd.f32 %v2127_v63, %v2518_v40  ;;  %v774_v2 = vadd.f32 %v2159_v0, %v2518_v40  ;;  %v829_v11 = vmax.f32 %v635_v61, 0.0 }
 0x11f   : > { %v637_v5 = vpop.f32.mrf.mxu0  ;;  %v765_v6 = vpop.f32.mrf.mxu1  ;;  %v861_v12 = vmax.f32 %v763_v62, 0.0 }
 0x120   : > { %v832_v7 = vmax.f32 %v646_v1, 0.0  ;;  %v864_v8 = vmax.f32 %v774_v2, 0.0  ;;  %v638_v9 = vadd.f32 %v2518_v40, %v637_v5  ;;  %v766_v10 = vadd.f32 %v2518_v40, %v765_v6 }
 0x121   : > { %v2130_v13 = vpop.f32.mrf.mxu0  ;;  %v2162_v14 = vpop.f32.mrf.mxu1 }
 0x122   : > { %v1915_v15 = vpack.c.bf16 %v832_v7, %v831_v3  ;;  %v1995_v16 = vpack.c.bf16 %v864_v8, %v863_v4  ;;  %v830_v17 = vmax.f32 %v638_v9, 0.0  ;;  %v862_v18 = vmax.f32 %v766_v10, 0.0 }
 0x123   : > { %v659_v19 = vadd.f32 %v2130_v13, %v2518_v40  ;;  %v787_v20 = vadd.f32 %v2162_v14, %v2518_v40  ;;  %v650_v21 = vpop.f32.mrf.mxu0  ;;  %v778_v22 = vpop.f32.mrf.mxu1 }
 0x124   : > { %2027 = vst [vmem:[%s2531_s12 + $0x58] sm:$0xff] %v1915_v15   ;;  %2043 = vst [vmem:[%s2531_s12 + $0xd8] sm:$0xff] %v1995_v16   ;;  %v1910_v23 = vpack.c.bf16 %v830_v17, %v829_v11  ;;  %v1990_v24 = vpack.c.bf16 %v862_v18, %v861_v12  ;;  %v651_v25 = vadd.f32 %v2518_v40, %v650_v21 }
 0x125   : > { %v779_v26 = vadd.f32 %v2518_v40, %v778_v22  ;;  %v2131_v27 = vpop.f32.mrf.mxu0  ;;  %v2163_v28 = vpop.f32.mrf.mxu1  ;;  %v835_v31 = vmax.f32 %v659_v19, 0.0  ;;  %v867_v32 = vmax.f32 %v787_v20, 0.0 }
 0x126   : > { %2026 = vst [vmem:[%s2531_s12 + $0x50] sm:$0xff] %v1910_v23   ;;  %2042 = vst [vmem:[%s2531_s12 + $0xd0] sm:$0xff] %v1990_v24   ;;  %v662_v29 = vadd.f32 %v2131_v27, %v2518_v40  ;;  %v790_v30 = vadd.f32 %v2163_v28, %v2518_v40  ;;  %v833_v39 = vmax.f32 %v651_v25, 0.0 }
 0x127   : > { %v653_v33 = vpop.f32.mrf.mxu0  ;;  %v781_v34 = vpop.f32.mrf.mxu1  ;;  %v865_v41 = vmax.f32 %v779_v26, 0.0 }
 0x128   : > { %v836_v35 = vmax.f32 %v662_v29, 0.0  ;;  %v868_v36 = vmax.f32 %v790_v30, 0.0  ;;  %v654_v37 = vadd.f32 %v2518_v40, %v653_v33  ;;  %v782_v38 = vadd.f32 %v2518_v40, %v781_v34 }
 0x129   : > { %v2134_v42 = vpop.f32.mrf.mxu0  ;;  %v2166_v43 = vpop.f32.mrf.mxu1 }
 0x12a   : > { %v1925_v44 = vpack.c.bf16 %v836_v35, %v835_v31  ;;  %v2005_v45 = vpack.c.bf16 %v868_v36, %v867_v32  ;;  %v834_v46 = vmax.f32 %v654_v37, 0.0  ;;  %v866_v47 = vmax.f32 %v782_v38, 0.0 }
 0x12b   : > { %v675_v48 = vadd.f32 %v2134_v42, %v2518_v40  ;;  %v803_v49 = vadd.f32 %v2166_v43, %v2518_v40  ;;  %v666_v50 = vpop.f32.mrf.mxu0  ;;  %v794_v51 = vpop.f32.mrf.mxu1 }
 0x12c   : > { %2029 = vst [vmem:[%s2531_s12 + $0x68] sm:$0xff] %v1925_v44   ;;  %2045 = vst [vmem:[%s2531_s12 + $0xe8] sm:$0xff] %v2005_v45   ;;  %v1920_v52 = vpack.c.bf16 %v834_v46, %v833_v39  ;;  %v2000_v53 = vpack.c.bf16 %v866_v47, %v865_v41  ;;  %v667_v54 = vadd.f32 %v2518_v40, %v666_v50 }
 0x12d   : > { %v795_v55 = vadd.f32 %v2518_v40, %v794_v51  ;;  %v2135_v56 = vpop.f32.mrf.mxu0  ;;  %v2167_v57 = vpop.f32.mrf.mxu1  ;;  %v839_v60 = vmax.f32 %v675_v48, 0.0  ;;  %v871_v61 = vmax.f32 %v803_v49, 0.0 }
 0x12e   : > { %2028 = vst [vmem:[%s2531_s12 + $0x60] sm:$0xff] %v1920_v52   ;;  %2044 = vst [vmem:[%s2531_s12 + $0xe0] sm:$0xff] %v2000_v53   ;;  %v678_v58 = vadd.f32 %v2135_v56, %v2518_v40  ;;  %v806_v59 = vadd.f32 %v2167_v57, %v2518_v40  ;;  %v837_v4 = vmax.f32 %v667_v54, 0.0 }
 0x12f   : > { %v669_v62 = vpop.f32.mrf.mxu0  ;;  %v797_v63 = vpop.f32.mrf.mxu1  ;;  %v869_v5 = vmax.f32 %v795_v55, 0.0 }
 0x130   : > { %v840_v0 = vmax.f32 %v678_v58, 0.0  ;;  %v872_v1 = vmax.f32 %v806_v59, 0.0  ;;  %v670_v2 = vadd.f32 %v2518_v40, %v669_v62  ;;  %v798_v3 = vadd.f32 %v2518_v40, %v797_v63 }
 0x132   : > { %v1935_v6 = vpack.c.bf16 %v840_v0, %v839_v60  ;;  %v2015_v7 = vpack.c.bf16 %v872_v1, %v871_v61  ;;  %v838_v8 = vmax.f32 %v670_v2, 0.0  ;;  %v870_v9 = vmax.f32 %v798_v3, 0.0  ;;  %1199 = sbr.rel (!%p2445_p4) target bundleno = 392 (0x188), region = 36 }
 0x134   : > { %2031 = vst [vmem:[%s2531_s12 + $0x78] sm:$0xff] %v1935_v6   ;;  %2047 = vst [vmem:[%s2531_s12 + $0xf8] sm:$0xff] %v2015_v7   ;;  %v1930_v10 = vpack.c.bf16 %v838_v8, %v837_v4  ;;  %v2010_v11 = vpack.c.bf16 %v870_v9, %v869_v5 }
 0x136   : > { %2030 = vst [vmem:[%s2531_s12 + $0x70] sm:$0xff] %v1930_v10   ;;  %2046 = vst [vmem:[%s2531_s12 + $0xf0] sm:$0xff] %v2010_v11  }
 0x137   : > { %s2830_s27 = smov (!%p1202_p8, %s1201_s27), 64 }
 0x138   : > { %s1775_s5 = sshll.u32 %s2830_s27, 6 }
 0x139   : > { %p1778_p9 = scmp.eq.s32.totalorder %s1775_s5, 0 }
 0x13a   : > { %s2632_s6 = sshrl.u32 (!%p1778_p9), %s2830_s27, 6 }
 0x13b   : > { %1210 = sbr.rel (%p1778_p9) target bundleno = 392 (0x188), region = 40  ;;  %p1779_p10 = scmp.le.s32.totalorder (!%p1778_p9), %s2632_s6, 0 }
 0x140   : > { %1617 = sbr.rel (%p1779_p10) target bundleno = 375 (0x177), region = 112  ;;  %s2823_s15 = smov (!%p1779_p10), %s2626_s4 }
 0x141   : > { %s2824_s20 = smov (!%p1779_p10), %s2531_s12  ;;  %s2641_s23 = smov (!%p1779_p10), 0  }
 0x142   : > { %s2643_s7 = smov (!%p1779_p10), 0  }
 0x145 LB: >> { %v1227_v40 = vld [vmem:[%s2374_s20] sm:$0xf]  ;;  %v1229_v12 = vld [vmem:[%s2374_s20 + $0x4] sm:$0xf]  ;;  %v1231_v13 = vld [vmem:[%s2374_s20 + $0x8] sm:$0xf]  ;;  %s2382_s7 = sphi %s2643_s7, %s1221_s7   ;;  %s2378_s23 = sphi %s2641_s23, %s2825_s23   ;;  %s2374_s20 = sphi %s2824_s20, %s1360_s20   ;;  %s2370_s15 = sphi %s2823_s15, %s1361_s15  }
 0x146   : >> { %1228 = vst [vmem:[%s2370_s15] sm:$0xf] %v1227_v40  ;;  %1230 = vst [vmem:[%s2370_s15 + $0x4] sm:$0xf] %v1229_v12  ;;  %v1233_v14 = vld [vmem:[%s2374_s20 + $0xc] sm:$0xf]  ;;  %s1355_s8 = sadd.s32 1, %s2378_s23 }
 0x147   : >> { %1232 = vst [vmem:[%s2370_s15 + $0x8] sm:$0xf] %v1231_v13  ;;  %v1235_v15 = vld [vmem:[%s2374_s20 + $0x10] sm:$0xf]  ;;  %v1237_v16 = vld [vmem:[%s2374_s20 + $0x14] sm:$0xf]  ;;  %p1356_p11 = scmp.ge.s32.totalorder %s1355_s8, %s2632_s6 }
 0x148   : >> { %1234 = vst [vmem:[%s2370_s15 + $0xc] sm:$0xf] %v1233_v14  ;;  %1236 = vst [vmem:[%s2370_s15 + $0x10] sm:$0xf] %v1235_v15  ;;  %v1239_v17 = vld [vmem:[%s2374_s20 + $0x18] sm:$0xf] }
 0x149   : >> { %1238 = vst [vmem:[%s2370_s15 + $0x14] sm:$0xf] %v1237_v16  ;;  %v1241_v18 = vld [vmem:[%s2374_s20 + $0x1c] sm:$0xf]  ;;  %v1243_v19 = vld [vmem:[%s2374_s20 + $0x20] sm:$0xf] }
 0x14a   : >> { %1240 = vst [vmem:[%s2370_s15 + $0x18] sm:$0xf] %v1239_v17  ;;  %1242 = vst [vmem:[%s2370_s15 + $0x1c] sm:$0xf] %v1241_v18  ;;  %v1245_v20 = vld [vmem:[%s2374_s20 + $0x24] sm:$0xf] }
 0x14b   : >> { %1244 = vst [vmem:[%s2370_s15 + $0x20] sm:$0xf] %v1243_v19  ;;  %v1247_v21 = vld [vmem:[%s2374_s20 + $0x28] sm:$0xf]  ;;  %v1249_v22 = vld [vmem:[%s2374_s20 + $0x2c] sm:$0xf] }
 0x14c   : >> { %1246 = vst [vmem:[%s2370_s15 + $0x24] sm:$0xf] %v1245_v20  ;;  %1248 = vst [vmem:[%s2370_s15 + $0x28] sm:$0xf] %v1247_v21  ;;  %v1251_v23 = vld [vmem:[%s2374_s20 + $0x30] sm:$0xf] }
 0x14d   : >> { %1250 = vst [vmem:[%s2370_s15 + $0x2c] sm:$0xf] %v1249_v22  ;;  %v1253_v24 = vld [vmem:[%s2374_s20 + $0x34] sm:$0xf]  ;;  %v1255_v25 = vld [vmem:[%s2374_s20 + $0x38] sm:$0xf] }
 0x14e   : >> { %1252 = vst [vmem:[%s2370_s15 + $0x30] sm:$0xf] %v1251_v23  ;;  %1254 = vst [vmem:[%s2370_s15 + $0x34] sm:$0xf] %v1253_v24  ;;  %v1257_v26 = vld [vmem:[%s2374_s20 + $0x3c] sm:$0xf] }
 0x14f   : >> { %1256 = vst [vmem:[%s2370_s15 + $0x38] sm:$0xf] %v1255_v25  ;;  %v1259_v27 = vld [vmem:[%s2374_s20 + $0x40] sm:$0xf]  ;;  %v1261_v28 = vld [vmem:[%s2374_s20 + $0x44] sm:$0xf] }
 0x150   : >> { %1258 = vst [vmem:[%s2370_s15 + $0x3c] sm:$0xf] %v1257_v26  ;;  %1260 = vst [vmem:[%s2370_s15 + $0x40] sm:$0xf] %v1259_v27  ;;  %v1263_v29 = vld [vmem:[%s2374_s20 + $0x48] sm:$0xf] }
 0x151   : >> { %1262 = vst [vmem:[%s2370_s15 + $0x44] sm:$0xf] %v1261_v28  ;;  %v1265_v30 = vld [vmem:[%s2374_s20 + $0x4c] sm:$0xf]  ;;  %v1267_v31 = vld [vmem:[%s2374_s20 + $0x50] sm:$0xf] }
 0x152   : >> { %1264 = vst [vmem:[%s2370_s15 + $0x48] sm:$0xf] %v1263_v29  ;;  %1266 = vst [vmem:[%s2370_s15 + $0x4c] sm:$0xf] %v1265_v30  ;;  %v1269_v32 = vld [vmem:[%s2374_s20 + $0x54] sm:$0xf] }
 0x153   : >> { %1268 = vst [vmem:[%s2370_s15 + $0x50] sm:$0xf] %v1267_v31  ;;  %v1271_v33 = vld [vmem:[%s2374_s20 + $0x58] sm:$0xf]  ;;  %v1273_v34 = vld [vmem:[%s2374_s20 + $0x5c] sm:$0xf] }
 0x154   : >> { %1270 = vst [vmem:[%s2370_s15 + $0x54] sm:$0xf] %v1269_v32  ;;  %1272 = vst [vmem:[%s2370_s15 + $0x58] sm:$0xf] %v1271_v33  ;;  %v1275_v35 = vld [vmem:[%s2374_s20 + $0x60] sm:$0xf] }
 0x155   : >> { %1274 = vst [vmem:[%s2370_s15 + $0x5c] sm:$0xf] %v1273_v34  ;;  %v1277_v36 = vld [vmem:[%s2374_s20 + $0x64] sm:$0xf]  ;;  %v1279_v37 = vld [vmem:[%s2374_s20 + $0x68] sm:$0xf] }
 0x156   : >> { %1276 = vst [vmem:[%s2370_s15 + $0x60] sm:$0xf] %v1275_v35  ;;  %1278 = vst [vmem:[%s2370_s15 + $0x64] sm:$0xf] %v1277_v36  ;;  %v1281_v38 = vld [vmem:[%s2374_s20 + $0x6c] sm:$0xf] }
 0x157   : >> { %1280 = vst [vmem:[%s2370_s15 + $0x68] sm:$0xf] %v1279_v37  ;;  %v1283_v39 = vld [vmem:[%s2374_s20 + $0x70] sm:$0xf]  ;;  %v1285_v41 = vld [vmem:[%s2374_s20 + $0x74] sm:$0xf] }
 0x158   : >> { %1282 = vst [vmem:[%s2370_s15 + $0x6c] sm:$0xf] %v1281_v38  ;;  %1284 = vst [vmem:[%s2370_s15 + $0x70] sm:$0xf] %v1283_v39  ;;  %v1287_v42 = vld [vmem:[%s2374_s20 + $0x78] sm:$0xf] }
 0x159   : >> { %1286 = vst [vmem:[%s2370_s15 + $0x74] sm:$0xf] %v1285_v41  ;;  %v1289_v43 = vld [vmem:[%s2374_s20 + $0x7c] sm:$0xf]  ;;  %v1291_v44 = vld [vmem:[%s2374_s20 + $0x80] sm:$0xf] }
 0x15a   : >> { %1288 = vst [vmem:[%s2370_s15 + $0x78] sm:$0xf] %v1287_v42  ;;  %1290 = vst [vmem:[%s2370_s15 + $0x7c] sm:$0xf] %v1289_v43  ;;  %v1293_v45 = vld [vmem:[%s2374_s20 + $0x84] sm:$0xf] }
 0x15b   : >> { %1292 = vst [vmem:[%s2370_s15 + $0x80] sm:$0xf] %v1291_v44  ;;  %v1295_v46 = vld [vmem:[%s2374_s20 + $0x88] sm:$0xf]  ;;  %v1297_v47 = vld [vmem:[%s2374_s20 + $0x8c] sm:$0xf] }
 0x15c   : >> { %1294 = vst [vmem:[%s2370_s15 + $0x84] sm:$0xf] %v1293_v45  ;;  %1296 = vst [vmem:[%s2370_s15 + $0x88] sm:$0xf] %v1295_v46  ;;  %v1299_v48 = vld [vmem:[%s2374_s20 + $0x90] sm:$0xf] }
 0x15d   : >> { %1298 = vst [vmem:[%s2370_s15 + $0x8c] sm:$0xf] %v1297_v47  ;;  %v1301_v49 = vld [vmem:[%s2374_s20 + $0x94] sm:$0xf]  ;;  %v1303_v50 = vld [vmem:[%s2374_s20 + $0x98] sm:$0xf] }
 0x15e   : >> { %1300 = vst [vmem:[%s2370_s15 + $0x90] sm:$0xf] %v1299_v48  ;;  %1302 = vst [vmem:[%s2370_s15 + $0x94] sm:$0xf] %v1301_v49  ;;  %v1305_v51 = vld [vmem:[%s2374_s20 + $0x9c] sm:$0xf] }
 0x15f   : >> { %1304 = vst [vmem:[%s2370_s15 + $0x98] sm:$0xf] %v1303_v50  ;;  %v1307_v52 = vld [vmem:[%s2374_s20 + $0xa0] sm:$0xf]  ;;  %v1309_v53 = vld [vmem:[%s2374_s20 + $0xa4] sm:$0xf] }
 0x160   : >> { %1306 = vst [vmem:[%s2370_s15 + $0x9c] sm:$0xf] %v1305_v51  ;;  %1308 = vst [vmem:[%s2370_s15 + $0xa0] sm:$0xf] %v1307_v52  ;;  %v1311_v54 = vld [vmem:[%s2374_s20 + $0xa8] sm:$0xf] }
 0x161   : >> { %1310 = vst [vmem:[%s2370_s15 + $0xa4] sm:$0xf] %v1309_v53  ;;  %v1313_v55 = vld [vmem:[%s2374_s20 + $0xac] sm:$0xf]  ;;  %v1315_v56 = vld [vmem:[%s2374_s20 + $0xb0] sm:$0xf] }
 0x162   : >> { %1312 = vst [vmem:[%s2370_s15 + $0xa8] sm:$0xf] %v1311_v54  ;;  %1314 = vst [vmem:[%s2370_s15 + $0xac] sm:$0xf] %v1313_v55  ;;  %v1317_v57 = vld [vmem:[%s2374_s20 + $0xb4] sm:$0xf] }
 0x163   : >> { %1316 = vst [vmem:[%s2370_s15 + $0xb0] sm:$0xf] %v1315_v56  ;;  %v1319_v58 = vld [vmem:[%s2374_s20 + $0xb8] sm:$0xf]  ;;  %v1321_v59 = vld [vmem:[%s2374_s20 + $0xbc] sm:$0xf] }
 0x164   : >> { %1318 = vst [vmem:[%s2370_s15 + $0xb4] sm:$0xf] %v1317_v57  ;;  %1320 = vst [vmem:[%s2370_s15 + $0xb8] sm:$0xf] %v1319_v58  ;;  %v1323_v60 = vld [vmem:[%s2374_s20 + $0xc0] sm:$0xf] }
 0x165   : >> { %1322 = vst [vmem:[%s2370_s15 + $0xbc] sm:$0xf] %v1321_v59  ;;  %v1325_v61 = vld [vmem:[%s2374_s20 + $0xc4] sm:$0xf]  ;;  %v1327_v62 = vld [vmem:[%s2374_s20 + $0xc8] sm:$0xf] }
 0x166   : >> { %1324 = vst [vmem:[%s2370_s15 + $0xc0] sm:$0xf] %v1323_v60  ;;  %1326 = vst [vmem:[%s2370_s15 + $0xc4] sm:$0xf] %v1325_v61  ;;  %v1329_v63 = vld [vmem:[%s2374_s20 + $0xcc] sm:$0xf] }
 0x167   : >> { %1328 = vst [vmem:[%s2370_s15 + $0xc8] sm:$0xf] %v1327_v62  ;;  %v1331_v0 = vld [vmem:[%s2374_s20 + $0xd0] sm:$0xf]  ;;  %v1333_v1 = vld [vmem:[%s2374_s20 + $0xd4] sm:$0xf] }
 0x168   : >> { %1330 = vst [vmem:[%s2370_s15 + $0xcc] sm:$0xf] %v1329_v63  ;;  %1332 = vst [vmem:[%s2370_s15 + $0xd0] sm:$0xf] %v1331_v0  ;;  %v1335_v2 = vld [vmem:[%s2374_s20 + $0xd8] sm:$0xf] }
 0x169   : >> { %1334 = vst [vmem:[%s2370_s15 + $0xd4] sm:$0xf] %v1333_v1  ;;  %v1337_v3 = vld [vmem:[%s2374_s20 + $0xdc] sm:$0xf]  ;;  %v1339_v4 = vld [vmem:[%s2374_s20 + $0xe0] sm:$0xf] }
 0x16a   : >> { %1336 = vst [vmem:[%s2370_s15 + $0xd8] sm:$0xf] %v1335_v2  ;;  %1338 = vst [vmem:[%s2370_s15 + $0xdc] sm:$0xf] %v1337_v3  ;;  %v1341_v5 = vld [vmem:[%s2374_s20 + $0xe4] sm:$0xf] }
 0x16b   : >> { %1340 = vst [vmem:[%s2370_s15 + $0xe0] sm:$0xf] %v1339_v4  ;;  %v1343_v6 = vld [vmem:[%s2374_s20 + $0xe8] sm:$0xf]  ;;  %v1345_v7 = vld [vmem:[%s2374_s20 + $0xec] sm:$0xf] }
 0x16c   : >> { %1342 = vst [vmem:[%s2370_s15 + $0xe4] sm:$0xf] %v1341_v5  ;;  %1344 = vst [vmem:[%s2370_s15 + $0xe8] sm:$0xf] %v1343_v6  ;;  %v1347_v8 = vld [vmem:[%s2374_s20 + $0xf0] sm:$0xf] }
 0x16d   : >> { %1346 = vst [vmem:[%s2370_s15 + $0xec] sm:$0xf] %v1345_v7  ;;  %v1349_v9 = vld [vmem:[%s2374_s20 + $0xf4] sm:$0xf]  ;;  %v1351_v10 = vld [vmem:[%s2374_s20 + $0xf8] sm:$0xf] }
 0x16e   : >> { %1348 = vst [vmem:[%s2370_s15 + $0xf0] sm:$0xf] %v1347_v8  ;;  %1350 = vst [vmem:[%s2370_s15 + $0xf4] sm:$0xf] %v1349_v9  ;;  %v1353_v11 = vld [vmem:[%s2374_s20 + $0xfc] sm:$0xf] }
 0x16f   : >> { %1352 = vst [vmem:[%s2370_s15 + $0xf8] sm:$0xf] %v1351_v10  ;;  %1354 = vst [vmem:[%s2370_s15 + $0xfc] sm:$0xf] %v1353_v11  ;;  %s2832_s8 = smov (%p1356_p11, %s1355_s8), 0  ;;  %s1221_s7 = sadd.s32 1, %s2382_s7  }
 0x170   : >> { %s1780_s9 = sshll.u32 %s2832_s8, 8  ;;  %p1220_p12 = scmp.ge.s32.totalorder %s1221_s7, %s2632_s6 }
 0x171   : >> { %s1360_s20 = scalar_lea.vmem %s2531_s12, %s1780_s9 [#allocation2]   ;;  %s1361_s15 = scalar_lea.vmem %s2626_s4, %s1780_s9  }
 0x172   : >> { %s2825_s23 = smov %s2832_s8  ;;  %1223 = sbr.rel (!%p1220_p12) target bundleno = 325 (0x145), region = 118 }
 0x177 PF: > { %s2800_s10 = sand.u32 63, %s2830_s27   ;;  %s1855_s11 = sshll.u32 %s2632_s6, 8 }
 0x178   : > { %s1366_s14 = scalar_lea.vmem %s2531_s12, %s1855_s11 [#allocation2]   ;;  %s1368_s17 = scalar_lea.vmem %s2626_s4, %s1855_s11  }
 0x179   : > { %p1785_p13 = scmp.le.s32.totalorder %s2800_s10, 0 }
 0x17a   : > { %s2384_s18 = smov (!%p1785_p13), %s1368_s17   ;;  %s2388_s21 = smov (!%p1785_p13), %s1366_s14  }
 0x17b   : > { %1631 = sbr.rel (%p1785_p13) target bundleno = 392 (0x188), region = 123  ;;  %s2392_s22 = smov (!%p1785_p13), 0  }
 0x17c   : > { %s2396_s24 = smov (!%p1785_p13), 0  }
 0x180 LB: >> { %v1378_v40 = vld [vmem:[%s2390_s21] sm:$0xf]  ;;  %s1380_s25 = sadd.s32 1, %s2394_s22  ;;  %s1372_s24 = sadd.s32 1, %s2398_s24   ;;  %s2398_s24 = sphi %s2396_s24, %s1372_s24   ;;  %s2394_s22 = sphi %s2392_s22, %s2393_s22   ;;  %s2390_s21 = sphi %s2388_s21, %s1385_s21   ;;  %s2386_s18 = sphi %s2384_s18, %s1386_s18  }
 0x181   : >> { %1379 = vst [vmem:[%s2386_s18] sm:$0xf] %v1378_v40  ;;  %p1381_p0 = scmp.ge.s32.totalorder %s1380_s25, %s2800_s10  ;;  %p1371_p1 = scmp.ge.s32.totalorder %s1372_s24, %s2800_s10 }
 0x183   : >> { %s2834_s25 = smov (%p1381_p0, %s1380_s25), 0  ;;  %1374 = sbr.rel (!%p1371_p1) target bundleno = 384 (0x180), region = 129 }
 0x184   : >> { %s1786_s26 = sshll.u32 %s2834_s25, 2  ;;  %s2393_s22 = smov %s2834_s25  }
 0x185   : >> { %s1385_s21 = scalar_lea.vmem %s1366_s14, %s1786_s26 [#allocation2]   ;;  %s1386_s18 = scalar_lea.vmem %s1368_s17, %s1786_s26  }
 0x188 PF: > { %p10_p2 = scmp.ge.s32.totalorder %s2435_s16, 8   ;;  %s2826_s12 = smov %s2362_s13 }
 0x189   : > { %s2827_s13 = smov %s2443_s19  ;;  %s2828_s14 = smov %s2435_s16 }
 0x18a   :  { %12 = sbr.rel (!%p10_p2) target bundleno = 2 (0x2), region = 140 }

// kernel: puzzle_sim_forward.17
= control target key start
LH: loop header
LB: loop body
LE: loop exit
PB: predicated region body
PF: predicated region fallthrough
CT: control target
= control target key end

     0   :  { %s1604_s12 = smov 0   ;;  %s1606_s13 = smov 0   ;;  %s1874_s0 = inlined_call_operand.vmem [shape: bf16[675,128], index: 0, kind: input, shape index: {}]   ;;  %s1875_s1 = inlined_call_operand.vmem [shape: bf16[128,128], index: 1, kind: input, shape index: {}]   ;;  %s1876_s2 = inlined_call_operand.vmem [shape: f32[1,128], index: 2, kind: input, shape index: {}]   ;;  %s1877_s3 = inlined_call_operand.vmem [shape: bf16[675,128], index: 3, kind: output, shape index: {}]  }
   0x1   :  { %s1608_s14 = smov 0  }
   0x2 LB: > { %s1617_s15 = sadd.s32 4294967295, %s1550_s14   ;;  %s1619_s16 = sadd.s32 1, %s1550_s14   ;;  %s1550_s14 = sphi %s1608_s14, %s1884_s14   ;;  %s1546_s13 = sphi %s1606_s13, %s1883_s13   ;;  %s1542_s12 = sphi %s1604_s12, %s1882_s12  }
   0x3   : > { %s85_s17 = ssub.s32 %s1550_s14, %s1619_s16  ;;  %s88_s18 = sadd.s32 1, %s1546_s13 }
   0x4   : > { %p86_p0 = scmp.eq.s32.totalorder %s85_s17, 0  ;;  %p98_p1 = scmp.ne.s32.totalorder %s1546_s13, %s1542_s12 }
   0x5   : > { %p99_p2 = scmp.eq.s32.totalorder %s1617_s15, 2  ;;  %p1088_p3 = scmp.ge.s32.totalorder %s1550_s14, 1 }
   0x6   : > { %s1627_s19 = scalar_select %p86_p0, %s1546_s13, %s88_s18  }
   0x7   : > { %p1629_p4 = por %p99_p2, %p98_p1  ;;  %p146_p5 = scmp.lt.s32.totalorder %s1550_s14, 4 }
   0x9   : > { %p147_p6 = pnand %p1088_p3, %p146_p5 }
   0xa   : > { %s1637_s23 = sshll.u32 (!%p147_p6), %s1617_s15, 5  ;;  %s170_s25 = sand.u32 (!%p147_p6), 1, %s1542_s12  }
   0xb   : > { %150 = sbr.rel (%p147_p6) target bundleno = 339 (0x153), region = 32  ;;  %p178_p7 = scmp.lt.s32.totalorder (!%p147_p6), %s1637_s23, 84 }
  0x10   : > { %v1472_v0 = vld [vmem:[%s1875_s1 + $0x38] sm:$0xff]   ;;  %v1473_v1 = vld [vmem:[%s1875_s1 + $0x30] sm:$0xff]   ;;  %s179_s26 = scalar_select %p178_p7, %s1637_s23, 84  ;;  %v1474_v2 = vld [vmem:[%s1875_s1 + $0x28] sm:$0xff]  }
  0x11   : > { %1320 = vmatprep.subr.bf16.mxu0 %v1472_v0  ;;  %1368 = vmatprep.subr.bf16.mxu1 %v1472_v0  ;;  %v1475_v3 = vld [vmem:[%s1875_s1 + $0x20] sm:$0xff]   ;;  %v1476_v6 = vld [vmem:[%s1875_s1 + $0x18] sm:$0xff]   ;;  %v1477_v7 = vld [vmem:[%s1875_s1 + $0x10] sm:$0xff]   ;;  %s753_s27 = ssub.s32 (%p1629_p4), 85, %s1637_s23  ;;  %s1198_s28 = sshll.u32 (%p1629_p4), %s1617_s15, 7 }
  0x12   : > { %1321 = vmatpush3.bf16.msra.mxu0 %v1472_v0  ;;  %1376 = vmatpush3.bf16.msra.mxu1 %v1472_v0  ;;  %s1091_s29 = sshll.u32 %s179_s26, 2  ;;  %v1478_v8 = vld [vmem:[%s1875_s1 + $0x8] sm:$0xff]   ;;  %v1479_v9 = vld [vmem:[%s1875_s1] sm:$0xff]   ;;  %s1089_s26 = sshll.u32 %s170_s25, 7 }
  0x13   : > { %1322 = vmatprep.subr.bf16.mxu0 %v1473_v1  ;;  %1369 = vmatprep.subr.bf16.mxu1 %v1473_v1  ;;  %s1650_s5 = scalar_lea.vmem %s1874_s0, %s1091_s29  ;;  %v1686_v24 = vld [vmem:[%s1876_s2] ss:$0 sm:$0xff]  ;;  %s1699_s12 = scalar_lea.vmem [#allocation2], %s1089_s26  }
  0x14   : > { %v1480_v4 = vld [vmem:[%s1650_s5] sm:$0xff]   ;;  %v1482_v10 = vld [vmem:[%s1650_s5 + $0x8] sm:$0xff]   ;;  %v1484_v12 = vld [vmem:[%s1650_s5 + $0x10] sm:$0xff]   ;;  %p754_p8 = scmp.lt.s32.totalorder (%p1629_p4), %s753_s27, 32  ;;  %s1746_s4 = scalar_lea.vmem (%p1629_p4), %s1877_s3, %s1198_s28  }
  0x15   : > { %v1481_v5 = vld [vmem:[%s1650_s5 + $0x40] sm:$0xff]   ;;  %1336 = vmatprep.mubr.bf16.mxu0 %v1480_v4  ;;  %v1483_v11 = vld [vmem:[%s1650_s5 + $0x48] sm:$0xff]   ;;  %v1485_v13 = vld [vmem:[%s1650_s5 + $0x50] sm:$0xff]  }
  0x16   : > { %1323 = vmatpush3.bf16.msra.mxu0 %v1473_v1  ;;  %1377 = vmatpush3.bf16.msra.mxu1 %v1473_v1  ;;  %v1486_v14 = vld [vmem:[%s1650_s5 + $0x18] sm:$0xff]   ;;  %v1488_v16 = vld [vmem:[%s1650_s5 + $0x20] sm:$0xff]   ;;  %v1490_v18 = vld [vmem:[%s1650_s5 + $0x28] sm:$0xff]  }
  0x17   : > { %1324 = vmatprep.subr.bf16.mxu0 %v1474_v2  ;;  %1370 = vmatprep.subr.bf16.mxu1 %v1474_v2  ;;  %v1487_v15 = vld [vmem:[%s1650_s5 + $0x58] sm:$0xff]   ;;  %v1489_v17 = vld [vmem:[%s1650_s5 + $0x60] sm:$0xff]   ;;  %v1491_v19 = vld [vmem:[%s1650_s5 + $0x68] sm:$0xff]  }
  0x18   : > { %1352 = vmatprep.mubr.bf16.mxu1 %v1481_v5  ;;  %v1492_v20 = vld [vmem:[%s1650_s5 + $0x30] sm:$0xff]   ;;  %v1494_v22 = vld [vmem:[%s1650_s5 + $0x38] sm:$0xff]  }
  0x19   : > { %v1493_v21 = vld [vmem:[%s1650_s5 + $0x70] sm:$0xff]   ;;  %v1495_v23 = vld [vmem:[%s1650_s5 + $0x78] sm:$0xff]  }
  0x1a   : > { %1325 = vmatpush3.bf16.msra.mxu0 %v1474_v2  ;;  %1378 = vmatpush3.bf16.msra.mxu1 %v1474_v2 }
  0x1b   : > { %1326 = vmatprep.subr.bf16.mxu0 %v1475_v3  ;;  %1371 = vmatprep.subr.bf16.mxu1 %v1475_v3 }
  0x1e   : > { %1327 = vmatpush3.bf16.msra.mxu0 %v1475_v3  ;;  %1379 = vmatpush3.bf16.msra.mxu1 %v1475_v3 }
  0x1f   : > { %1328 = vmatprep.subr.bf16.mxu0 %v1476_v6  ;;  %1372 = vmatprep.subr.bf16.mxu1 %v1476_v6 }
  0x22   : > { %1329 = vmatpush3.bf16.msra.mxu0 %v1476_v6  ;;  %1380 = vmatpush3.bf16.msra.mxu1 %v1476_v6 }
  0x23   : > { %1330 = vmatprep.subr.bf16.mxu0 %v1477_v7  ;;  %1373 = vmatprep.subr.bf16.mxu1 %v1477_v7 }
  0x26   : > { %1331 = vmatpush3.bf16.msra.mxu0 %v1477_v7  ;;  %1381 = vmatpush3.bf16.msra.mxu1 %v1477_v7 }
  0x27   : > { %1332 = vmatprep.subr.bf16.mxu0 %v1478_v8  ;;  %1374 = vmatprep.subr.bf16.mxu1 %v1478_v8 }
  0x2a   : > { %1333 = vmatpush3.bf16.msra.mxu0 %v1478_v8  ;;  %1382 = vmatpush3.bf16.msra.mxu1 %v1478_v8 }
  0x2b   : > { %1334 = vmatprep.subr.bf16.mxu0 %v1479_v9  ;;  %1375 = vmatprep.subr.bf16.mxu1 %v1479_v9 }
  0x2e   : > { %1335 = vmatpush3.bf16.msra.mxu0 %v1479_v9  ;;  %1383 = vmatpush3.bf16.msra.mxu1 %v1479_v9 }
  0x31   : > { %1337 = vmatmul.mubr.bf16.vlgmr.msra.gmra.mxu0 %v1482_v10  ;;  %1353 = vmatmul.mubr.bf16.vlgmr.msra.gmra.mxu1 %v1483_v11 }
  0x32   : > { %1340 = vmatprep.mubr.bf16.mxu0 %v1484_v12  ;;  %1356 = vmatprep.mubr.bf16.mxu1 %v1485_v13 }
  0x39   : > { %1341 = vmatmul.mubr.bf16.gmra.mxu0 %v1486_v14  ;;  %1357 = vmatmul.mubr.bf16.gmra.mxu1 %v1487_v15 }
  0x3a   : > { %1344 = vmatprep.mubr.bf16.mxu0 %v1488_v16  ;;  %1360 = vmatprep.mubr.bf16.mxu1 %v1489_v17 }
  0x41   : > { %1345 = vmatmul.mubr.bf16.gmra.mxu0 %v1490_v18  ;;  %1361 = vmatmul.mubr.bf16.gmra.mxu1 %v1491_v19 }
  0x42   : > { %1348 = vmatprep.mubr.bf16.mxu0 %v1492_v20  ;;  %1364 = vmatprep.mubr.bf16.mxu1 %v1493_v21 }
  0x49   : > { %1349 = vmatmul.mubr.bf16.gmra.mxu0 %v1494_v22  ;;  %1365 = vmatmul.mubr.bf16.gmra.mxu1 %v1495_v23 }
  0xf1   : > { %v1338_v25 = vpop.f32.mrf.mxu0  ;;  %v1354_v26 = vpop.f32.mrf.mxu1 }
  0xf2   : > { %v435_v27 = vadd.f32 %v1338_v25, %v1686_v24  ;;  %v499_v28 = vadd.f32 %v1354_v26, %v1686_v24 }
  0xf3   : > { %v426_v29 = vpop.f32.mrf.mxu0  ;;  %v490_v30 = vpop.f32.mrf.mxu1 }
  0xf4   : > { %v427_v31 = vadd.f32 %v1686_v24, %v426_v29  ;;  %v491_v32 = vadd.f32 %v1686_v24, %v490_v30  ;;  %v555_v37 = vmax.f32 %v435_v27, 0.0  ;;  %v571_v38 = vmax.f32 %v499_v28, 0.0 }
  0xf5   : > { %v1339_v33 = vpop.f32.mrf.mxu0  ;;  %v1355_v34 = vpop.f32.mrf.mxu1 }
  0xf6   : > { %v438_v35 = vadd.f32 %v1339_v33, %v1686_v24  ;;  %v502_v36 = vadd.f32 %v1355_v34, %v1686_v24  ;;  %v553_v45 = vmax.f32 %v427_v31, 0.0  ;;  %v569_v46 = vmax.f32 %v491_v32, 0.0 }
  0xf7   : > { %v429_v39 = vpop.f32.mrf.mxu0  ;;  %v493_v40 = vpop.f32.mrf.mxu1 }
  0xf8   : > { %v556_v41 = vmax.f32 %v438_v35, 0.0  ;;  %v572_v42 = vmax.f32 %v502_v36, 0.0  ;;  %v430_v43 = vadd.f32 %v1686_v24, %v429_v39  ;;  %v494_v44 = vadd.f32 %v1686_v24, %v493_v40 }
  0xf9   : > { %v1342_v47 = vpop.f32.mrf.mxu0  ;;  %v1358_v48 = vpop.f32.mrf.mxu1 }
  0xfa   : > { %v1209_v49 = vpack.c.bf16 %v556_v41, %v555_v37  ;;  %v1249_v50 = vpack.c.bf16 %v572_v42, %v571_v38  ;;  %v554_v51 = vmax.f32 %v430_v43, 0.0  ;;  %v570_v52 = vmax.f32 %v494_v44, 0.0 }
  0xfb   : > { %v451_v53 = vadd.f32 %v1342_v47, %v1686_v24  ;;  %v515_v54 = vadd.f32 %v1358_v48, %v1686_v24  ;;  %v442_v55 = vpop.f32.mrf.mxu0  ;;  %v506_v56 = vpop.f32.mrf.mxu1 }
  0xfc   : > { %1281 = vst [vmem:[%s1699_s12 + $0x8] sm:$0xff] %v1209_v49   ;;  %1289 = vst [vmem:[%s1699_s12 + $0x48] sm:$0xff] %v1249_v50   ;;  %v1204_v57 = vpack.c.bf16 %v554_v51, %v553_v45  ;;  %v1244_v58 = vpack.c.bf16 %v570_v52, %v569_v46  ;;  %v443_v59 = vadd.f32 %v1686_v24, %v442_v55 }
  0xfd   : > { %v507_v60 = vadd.f32 %v1686_v24, %v506_v56  ;;  %v1343_v61 = vpop.f32.mrf.mxu0  ;;  %v1359_v62 = vpop.f32.mrf.mxu1  ;;  %v559_v1 = vmax.f32 %v451_v53, 0.0  ;;  %v575_v2 = vmax.f32 %v515_v54, 0.0 }
  0xfe   : > { %1205 = vst [vmem:[%s1699_s12] sm:$0xff] %v1204_v57   ;;  %1288 = vst [vmem:[%s1699_s12 + $0x40] sm:$0xff] %v1244_v58   ;;  %v454_v63 = vadd.f32 %v1343_v61, %v1686_v24  ;;  %v518_v0 = vadd.f32 %v1359_v62, %v1686_v24  ;;  %v557_v9 = vmax.f32 %v443_v59, 0.0 }
  0xff   : > { %v445_v3 = vpop.f32.mrf.mxu0  ;;  %v509_v4 = vpop.f32.mrf.mxu1  ;;  %v573_v10 = vmax.f32 %v507_v60, 0.0 }
 0x100   : > { %v560_v5 = vmax.f32 %v454_v63, 0.0  ;;  %v576_v6 = vmax.f32 %v518_v0, 0.0  ;;  %v446_v7 = vadd.f32 %v1686_v24, %v445_v3  ;;  %v510_v8 = vadd.f32 %v1686_v24, %v509_v4 }
 0x101   : > { %v1346_v11 = vpop.f32.mrf.mxu0  ;;  %v1362_v12 = vpop.f32.mrf.mxu1 }
 0x102   : > { %v1219_v13 = vpack.c.bf16 %v560_v5, %v559_v1  ;;  %v1259_v14 = vpack.c.bf16 %v576_v6, %v575_v2  ;;  %v558_v15 = vmax.f32 %v446_v7, 0.0  ;;  %v574_v16 = vmax.f32 %v510_v8, 0.0 }
 0x103   : > { %v467_v17 = vadd.f32 %v1346_v11, %v1686_v24  ;;  %v531_v18 = vadd.f32 %v1362_v12, %v1686_v24  ;;  %v458_v19 = vpop.f32.mrf.mxu0  ;;  %v522_v20 = vpop.f32.mrf.mxu1 }
 0x104   : > { %1283 = vst [vmem:[%s1699_s12 + $0x18] sm:$0xff] %v1219_v13   ;;  %1291 = vst [vmem:[%s1699_s12 + $0x58] sm:$0xff] %v1259_v14   ;;  %v1214_v21 = vpack.c.bf16 %v558_v15, %v557_v9  ;;  %v1254_v22 = vpack.c.bf16 %v574_v16, %v573_v10  ;;  %v459_v23 = vadd.f32 %v1686_v24, %v458_v19 }
 0x105   : > { %v523_v25 = vadd.f32 %v1686_v24, %v522_v20  ;;  %v1347_v26 = vpop.f32.mrf.mxu0  ;;  %v1363_v27 = vpop.f32.mrf.mxu1  ;;  %v563_v30 = vmax.f32 %v467_v17, 0.0  ;;  %v579_v31 = vmax.f32 %v531_v18, 0.0 }
 0x106   : > { %1282 = vst [vmem:[%s1699_s12 + $0x10] sm:$0xff] %v1214_v21   ;;  %1290 = vst [vmem:[%s1699_s12 + $0x50] sm:$0xff] %v1254_v22   ;;  %v470_v28 = vadd.f32 %v1347_v26, %v1686_v24  ;;  %v534_v29 = vadd.f32 %v1363_v27, %v1686_v24  ;;  %v561_v38 = vmax.f32 %v459_v23, 0.0 }
 0x107   : > { %v461_v32 = vpop.f32.mrf.mxu0  ;;  %v525_v33 = vpop.f32.mrf.mxu1  ;;  %v577_v39 = vmax.f32 %v523_v25, 0.0 }
 0x108   : > { %v564_v34 = vmax.f32 %v470_v28, 0.0  ;;  %v580_v35 = vmax.f32 %v534_v29, 0.0  ;;  %v462_v36 = vadd.f32 %v1686_v24, %v461_v32  ;;  %v526_v37 = vadd.f32 %v1686_v24, %v525_v33 }
 0x109   : > { %v1350_v40 = vpop.f32.mrf.mxu0  ;;  %v1366_v41 = vpop.f32.mrf.mxu1 }
 0x10a   : > { %v1229_v42 = vpack.c.bf16 %v564_v34, %v563_v30  ;;  %v1269_v43 = vpack.c.bf16 %v580_v35, %v579_v31  ;;  %v562_v44 = vmax.f32 %v462_v36, 0.0  ;;  %v578_v45 = vmax.f32 %v526_v37, 0.0 }
 0x10b   : > { %v483_v46 = vadd.f32 %v1350_v40, %v1686_v24  ;;  %v547_v47 = vadd.f32 %v1366_v41, %v1686_v24  ;;  %v474_v48 = vpop.f32.mrf.mxu0  ;;  %v538_v49 = vpop.f32.mrf.mxu1 }
 0x10c   : > { %1285 = vst [vmem:[%s1699_s12 + $0x28] sm:$0xff] %v1229_v42   ;;  %1293 = vst [vmem:[%s1699_s12 + $0x68] sm:$0xff] %v1269_v43   ;;  %v1224_v50 = vpack.c.bf16 %v562_v44, %v561_v38  ;;  %v1264_v51 = vpack.c.bf16 %v578_v45, %v577_v39  ;;  %v475_v52 = vadd.f32 %v1686_v24, %v474_v48 }
 0x10d   : > { %v539_v53 = vadd.f32 %v1686_v24, %v538_v49  ;;  %v1351_v54 = vpop.f32.mrf.mxu0  ;;  %v1367_v55 = vpop.f32.mrf.mxu1  ;;  %v567_v58 = vmax.f32 %v483_v46, 0.0  ;;  %v583_v59 = vmax.f32 %v547_v47, 0.0 }
 0x10e   : > { %1284 = vst [vmem:[%s1699_s12 + $0x20] sm:$0xff] %v1224_v50   ;;  %1292 = vst [vmem:[%s1699_s12 + $0x60] sm:$0xff] %v1264_v51   ;;  %v486_v56 = vadd.f32 %v1351_v54, %v1686_v24  ;;  %v550_v57 = vadd.f32 %v1367_v55, %v1686_v24  ;;  %v565_v2 = vmax.f32 %v475_v52, 0.0 }
 0x10f   : > { %v477_v60 = vpop.f32.mrf.mxu0  ;;  %v541_v61 = vpop.f32.mrf.mxu1  ;;  %v581_v3 = vmax.f32 %v539_v53, 0.0 }
 0x110   : > { %v568_v62 = vmax.f32 %v486_v56, 0.0  ;;  %v584_v63 = vmax.f32 %v550_v57, 0.0  ;;  %v478_v0 = vadd.f32 %v1686_v24, %v477_v60  ;;  %v542_v1 = vadd.f32 %v1686_v24, %v541_v61 }
 0x112   : > { %v1239_v4 = vpack.c.bf16 %v568_v62, %v567_v58  ;;  %v1279_v5 = vpack.c.bf16 %v584_v63, %v583_v59  ;;  %v566_v6 = vmax.f32 %v478_v0, 0.0  ;;  %v582_v7 = vmax.f32 %v542_v1, 0.0  ;;  %751 = sbr.rel (!%p1629_p4) target bundleno = 339 (0x153), region = 36 }
 0x114   : > { %1287 = vst [vmem:[%s1699_s12 + $0x38] sm:$0xff] %v1239_v4   ;;  %1295 = vst [vmem:[%s1699_s12 + $0x78] sm:$0xff] %v1279_v5   ;;  %v1234_v8 = vpack.c.bf16 %v566_v6, %v565_v2  ;;  %v1274_v9 = vpack.c.bf16 %v582_v7, %v581_v3 }
 0x116   : > { %1286 = vst [vmem:[%s1699_s12 + $0x30] sm:$0xff] %v1234_v8   ;;  %1294 = vst [vmem:[%s1699_s12 + $0x70] sm:$0xff] %v1274_v9  }
 0x117   : > { %s1886_s27 = smov (!%p754_p8, %s753_s27), 32 }
 0x118   : > { %s1151_s5 = sshll.u32 %s1886_s27, 6 }
 0x119   : > { %p1154_p9 = scmp.eq.s32.totalorder %s1151_s5, 0 }
 0x11a   : > { %s1752_s6 = sshrl.u32 (!%p1154_p9), %s1886_s27, 5 }
 0x11b   : > { %762 = sbr.rel (%p1154_p9) target bundleno = 339 (0x153), region = 40  ;;  %p1155_p10 = scmp.le.s32.totalorder (!%p1154_p9), %s1752_s6, 0 }
 0x120   : > { %1041 = sbr.rel (%p1155_p10) target bundleno = 322 (0x142), region = 112  ;;  %s1879_s15 = smov (!%p1155_p10), %s1746_s4 }
 0x121   : > { %s1880_s20 = smov (!%p1155_p10), %s1699_s12  ;;  %s1761_s23 = smov (!%p1155_p10), 0  }
 0x122   : > { %s1763_s7 = smov (!%p1155_p10), 0  }
 0x125 LB: >> { %v779_v24 = vld [vmem:[%s1558_s20] sm:$0xf]  ;;  %v781_v10 = vld [vmem:[%s1558_s20 + $0x4] sm:$0xf]  ;;  %v783_v11 = vld [vmem:[%s1558_s20 + $0x8] sm:$0xf]  ;;  %s1566_s7 = sphi %s1763_s7, %s773_s7   ;;  %s1562_s23 = sphi %s1761_s23, %s1881_s23   ;;  %s1558_s20 = sphi %s1880_s20, %s848_s20   ;;  %s1554_s15 = sphi %s1879_s15, %s849_s15  }
 0x126   : >> { %780 = vst [vmem:[%s1554_s15] sm:$0xf] %v779_v24  ;;  %782 = vst [vmem:[%s1554_s15 + $0x4] sm:$0xf] %v781_v10  ;;  %v785_v12 = vld [vmem:[%s1558_s20 + $0xc] sm:$0xf]  ;;  %s843_s8 = sadd.s32 1, %s1562_s23 }
 0x127   : >> { %784 = vst [vmem:[%s1554_s15 + $0x8] sm:$0xf] %v783_v11  ;;  %v787_v13 = vld [vmem:[%s1558_s20 + $0x10] sm:$0xf]  ;;  %v789_v14 = vld [vmem:[%s1558_s20 + $0x14] sm:$0xf]  ;;  %p844_p11 = scmp.ge.s32.totalorder %s843_s8, %s1752_s6 }
 0x128   : >> { %786 = vst [vmem:[%s1554_s15 + $0xc] sm:$0xf] %v785_v12  ;;  %788 = vst [vmem:[%s1554_s15 + $0x10] sm:$0xf] %v787_v13  ;;  %v791_v15 = vld [vmem:[%s1558_s20 + $0x18] sm:$0xf] }
 0x129   : >> { %790 = vst [vmem:[%s1554_s15 + $0x14] sm:$0xf] %v789_v14  ;;  %v793_v16 = vld [vmem:[%s1558_s20 + $0x1c] sm:$0xf]  ;;  %v795_v17 = vld [vmem:[%s1558_s20 + $0x20] sm:$0xf] }
 0x12a   : >> { %792 = vst [vmem:[%s1554_s15 + $0x18] sm:$0xf] %v791_v15  ;;  %794 = vst [vmem:[%s1554_s15 + $0x1c] sm:$0xf] %v793_v16  ;;  %v797_v18 = vld [vmem:[%s1558_s20 + $0x24] sm:$0xf] }
 0x12b   : >> { %796 = vst [vmem:[%s1554_s15 + $0x20] sm:$0xf] %v795_v17  ;;  %v799_v19 = vld [vmem:[%s1558_s20 + $0x28] sm:$0xf]  ;;  %v801_v20 = vld [vmem:[%s1558_s20 + $0x2c] sm:$0xf] }
 0x12c   : >> { %798 = vst [vmem:[%s1554_s15 + $0x24] sm:$0xf] %v797_v18  ;;  %800 = vst [vmem:[%s1554_s15 + $0x28] sm:$0xf] %v799_v19  ;;  %v803_v21 = vld [vmem:[%s1558_s20 + $0x30] sm:$0xf] }
 0x12d   : >> { %802 = vst [vmem:[%s1554_s15 + $0x2c] sm:$0xf] %v801_v20  ;;  %v805_v22 = vld [vmem:[%s1558_s20 + $0x34] sm:$0xf]  ;;  %v807_v23 = vld [vmem:[%s1558_s20 + $0x38] sm:$0xf] }
 0x12e   : >> { %804 = vst [vmem:[%s1554_s15 + $0x30] sm:$0xf] %v803_v21  ;;  %806 = vst [vmem:[%s1554_s15 + $0x34] sm:$0xf] %v805_v22  ;;  %v809_v25 = vld [vmem:[%s1558_s20 + $0x3c] sm:$0xf] }
 0x12f   : >> { %808 = vst [vmem:[%s1554_s15 + $0x38] sm:$0xf] %v807_v23  ;;  %v811_v26 = vld [vmem:[%s1558_s20 + $0x40] sm:$0xf]  ;;  %v813_v27 = vld [vmem:[%s1558_s20 + $0x44] sm:$0xf] }
 0x130   : >> { %810 = vst [vmem:[%s1554_s15 + $0x3c] sm:$0xf] %v809_v25  ;;  %812 = vst [vmem:[%s1554_s15 + $0x40] sm:$0xf] %v811_v26  ;;  %v815_v28 = vld [vmem:[%s1558_s20 + $0x48] sm:$0xf] }
 0x131   : >> { %814 = vst [vmem:[%s1554_s15 + $0x44] sm:$0xf] %v813_v27  ;;  %v817_v29 = vld [vmem:[%s1558_s20 + $0x4c] sm:$0xf]  ;;  %v819_v30 = vld [vmem:[%s1558_s20 + $0x50] sm:$0xf] }
 0x132   : >> { %816 = vst [vmem:[%s1554_s15 + $0x48] sm:$0xf] %v815_v28  ;;  %818 = vst [vmem:[%s1554_s15 + $0x4c] sm:$0xf] %v817_v29  ;;  %v821_v31 = vld [vmem:[%s1558_s20 + $0x54] sm:$0xf] }
 0x133   : >> { %820 = vst [vmem:[%s1554_s15 + $0x50] sm:$0xf] %v819_v30  ;;  %v823_v32 = vld [vmem:[%s1558_s20 + $0x58] sm:$0xf]  ;;  %v825_v33 = vld [vmem:[%s1558_s20 + $0x5c] sm:$0xf] }
 0x134   : >> { %822 = vst [vmem:[%s1554_s15 + $0x54] sm:$0xf] %v821_v31  ;;  %824 = vst [vmem:[%s1554_s15 + $0x58] sm:$0xf] %v823_v32  ;;  %v827_v34 = vld [vmem:[%s1558_s20 + $0x60] sm:$0xf] }
 0x135   : >> { %826 = vst [vmem:[%s1554_s15 + $0x5c] sm:$0xf] %v825_v33  ;;  %v829_v35 = vld [vmem:[%s1558_s20 + $0x64] sm:$0xf]  ;;  %v831_v36 = vld [vmem:[%s1558_s20 + $0x68] sm:$0xf] }
 0x136   : >> { %828 = vst [vmem:[%s1554_s15 + $0x60] sm:$0xf] %v827_v34  ;;  %830 = vst [vmem:[%s1554_s15 + $0x64] sm:$0xf] %v829_v35  ;;  %v833_v37 = vld [vmem:[%s1558_s20 + $0x6c] sm:$0xf] }
 0x137   : >> { %832 = vst [vmem:[%s1554_s15 + $0x68] sm:$0xf] %v831_v36  ;;  %v835_v38 = vld [vmem:[%s1558_s20 + $0x70] sm:$0xf]  ;;  %v837_v39 = vld [vmem:[%s1558_s20 + $0x74] sm:$0xf] }
 0x138   : >> { %834 = vst [vmem:[%s1554_s15 + $0x6c] sm:$0xf] %v833_v37  ;;  %836 = vst [vmem:[%s1554_s15 + $0x70] sm:$0xf] %v835_v38  ;;  %v839_v40 = vld [vmem:[%s1558_s20 + $0x78] sm:$0xf] }
 0x139   : >> { %838 = vst [vmem:[%s1554_s15 + $0x74] sm:$0xf] %v837_v39  ;;  %v841_v41 = vld [vmem:[%s1558_s20 + $0x7c] sm:$0xf]  ;;  %840 = vst [vmem:[%s1554_s15 + $0x78] sm:$0xf] %v839_v40 }
 0x13a   : >> { %842 = vst [vmem:[%s1554_s15 + $0x7c] sm:$0xf] %v841_v41  ;;  %s1888_s8 = smov (%p844_p11, %s843_s8), 0  ;;  %s773_s7 = sadd.s32 1, %s1566_s7  }
 0x13b   : >> { %s1156_s9 = sshll.u32 %s1888_s8, 7  ;;  %p772_p12 = scmp.ge.s32.totalorder %s773_s7, %s1752_s6 }
 0x13c   : >> { %s848_s20 = scalar_lea.vmem %s1699_s12, %s1156_s9 [#allocation2]   ;;  %s849_s15 = scalar_lea.vmem %s1746_s4, %s1156_s9  }
 0x13d   : >> { %s1881_s23 = smov %s1888_s8  ;;  %775 = sbr.rel (!%p772_p12) target bundleno = 293 (0x125), region = 118 }
 0x142 PF: > { %s1856_s10 = sand.u32 31, %s1886_s27   ;;  %s1199_s11 = sshll.u32 %s1752_s6, 7 }
 0x143   : > { %s854_s14 = scalar_lea.vmem %s1699_s12, %s1199_s11 [#allocation2]   ;;  %s856_s17 = scalar_lea.vmem %s1746_s4, %s1199_s11  }
 0x144   : > { %p1161_p13 = scmp.le.s32.totalorder %s1856_s10, 0 }
 0x145   : > { %s1568_s18 = smov (!%p1161_p13), %s856_s17   ;;  %s1572_s21 = smov (!%p1161_p13), %s854_s14  }
 0x146   : > { %1055 = sbr.rel (%p1161_p13) target bundleno = 339 (0x153), region = 123  ;;  %s1576_s22 = smov (!%p1161_p13), 0  }
 0x147   : > { %s1580_s24 = smov (!%p1161_p13), 0  }
 0x14b LB: >> { %v866_v42 = vld [vmem:[%s1574_s21] sm:$0xf]  ;;  %s868_s25 = sadd.s32 1, %s1578_s22  ;;  %s860_s24 = sadd.s32 1, %s1582_s24   ;;  %s1582_s24 = sphi %s1580_s24, %s860_s24   ;;  %s1578_s22 = sphi %s1576_s22, %s1577_s22   ;;  %s1574_s21 = sphi %s1572_s21, %s873_s21   ;;  %s1570_s18 = sphi %s1568_s18, %s874_s18  }
 0x14c   : >> { %867 = vst [vmem:[%s1570_s18] sm:$0xf] %v866_v42  ;;  %p869_p0 = scmp.ge.s32.totalorder %s868_s25, %s1856_s10  ;;  %p859_p1 = scmp.ge.s32.totalorder %s860_s24, %s1856_s10 }
 0x14e   : >> { %s1890_s25 = smov (%p869_p0, %s868_s25), 0  ;;  %862 = sbr.rel (!%p859_p1) target bundleno = 331 (0x14b), region = 129 }
 0x14f   : >> { %s1162_s26 = sshll.u32 %s1890_s25, 2  ;;  %s1577_s22 = smov %s1890_s25  }
 0x150   : >> { %s873_s21 = scalar_lea.vmem %s854_s14, %s1162_s26 [#allocation2]   ;;  %s874_s18 = scalar_lea.vmem %s856_s17, %s1162_s26  }
 0x153 PF: > { %p10_p2 = scmp.ge.s32.totalorder %s1619_s16, 5   ;;  %s1882_s12 = smov %s1546_s13 }
 0x154   : > { %s1883_s13 = smov %s1627_s19  ;;  %s1884_s14 = smov %s1619_s16 }
 0x155   :  { %12 = sbr.rel (!%p10_p2) target bundleno = 2 (0x2), region = 140 }

// kernel: puzzle_sim_forward.18
= control target key start
LH: loop header
LB: loop body
LE: loop exit
PB: predicated region body
PF: predicated region fallthrough
CT: control target
= control target key end

     0   :  { %s4433_s12 = smov 0   ;;  %s4435_s13 = smov 0   ;;  %s5434_s0 = inlined_call_operand.vmem [shape: bf16[675,1152], index: 0, kind: input, shape index: {}]   ;;  %s5435_s1 = inlined_call_operand.vmem [shape: bf16[1152,128], index: 1, kind: input, shape index: {}]   ;;  %s5436_s2 = inlined_call_operand.vmem [shape: f32[1,128], index: 2, kind: input, shape index: {}]   ;;  %s5437_s3 = inlined_call_operand.vmem [shape: bf16[675,128], index: 3, kind: output, shape index: {}]  }
   0x1   :  { %s4437_s14 = smov 0  }
   0x2 LB: > { %s4446_s15 = sadd.s32 4294967295, %s4379_s14   ;;  %s4448_s16 = sadd.s32 1, %s4379_s14   ;;  %s4379_s14 = sphi %s4437_s14, %s5464_s14   ;;  %s4375_s13 = sphi %s4435_s13, %s5463_s13   ;;  %s4371_s12 = sphi %s4433_s12, %s5462_s12  }
   0x3   : > { %s85_s17 = ssub.s32 %s4379_s14, %s4448_s16  ;;  %s88_s18 = sadd.s32 1, %s4375_s13 }
   0x4   : > { %p86_p0 = scmp.eq.s32.totalorder %s85_s17, 0  ;;  %p98_p1 = scmp.ne.s32.totalorder %s4375_s13, %s4371_s12 }
   0x5   : > { %p99_p2 = scmp.eq.s32.totalorder %s4446_s15, 2  ;;  %p3020_p3 = scmp.ge.s32.totalorder %s4379_s14, 1 }
   0x6   : > { %s4456_s19 = scalar_select %p86_p0, %s4375_s13, %s88_s18  }
   0x7   : > { %p4458_p4 = por %p99_p2, %p98_p1  ;;  %p149_p5 = scmp.lt.s32.totalorder %s4379_s14, 4 }
   0x9   : > { %p150_p6 = pnand %p3020_p3, %p149_p5 }
   0xb   : > { %153 = sbr.rel (%p150_p6) target bundleno = 599 (0x257), region = 32 }
  0x10   : > { %v4045_v0 = vld [vmem:[%s5435_s1 + $0x78] sm:$0xff]   ;;  %s4466_s23 = sshll.u32 %s4446_s15, 5  ;;  %v4047_v2 = vld [vmem:[%s5435_s1 + $0x70] sm:$0xff]   ;;  %v4049_v4 = vld [vmem:[%s5435_s1 + $0x68] sm:$0xff]   ;;  %s3322_s18 = sshll.u32 (%p4458_p4), %s4446_s15, 7 }
  0x11   : > { %v4046_v1 = vld [vmem:[%s5435_s1 + $0x38] sm:$0xff]   ;;  %3420 = vmatprep.subr.bf16.mxu0 %v4045_v0  ;;  %3940 = vmatprep.subr.bf16.mxu1 %v4045_v0  ;;  %p184_p7 = scmp.lt.s32.totalorder %s4466_s23, 84  ;;  %v4048_v3 = vld [vmem:[%s5435_s1 + $0x30] sm:$0xff]   ;;  %v4050_v5 = vld [vmem:[%s5435_s1 + $0x28] sm:$0xff]   ;;  %s2685_s17 = ssub.s32 (%p4458_p4), 85, %s4466_s23 }
  0x12   : > { %3421 = vmatpush3.bf16.msra.mxu0 %v4046_v1  ;;  %3948 = vmatpush3.bf16.msra.mxu1 %v4046_v1  ;;  %v4051_v6 = vld [vmem:[%s5435_s1 + $0x60] sm:$0xff]   ;;  %v4053_v8 = vld [vmem:[%s5435_s1 + $0x58] sm:$0xff]   ;;  %v4055_v10 = vld [vmem:[%s5435_s1 + $0x50] sm:$0xff]   ;;  %p2686_p8 = scmp.lt.s32.totalorder (%p4458_p4), %s2685_s17, 32  ;;  %s5306_s25 = scalar_lea.vmem (%p4458_p4), %s5437_s3, %s3322_s18  }
  0x13   : > { %3422 = vmatprep.subr.bf16.mxu0 %v4047_v2  ;;  %3941 = vmatprep.subr.bf16.mxu1 %v4047_v2  ;;  %s185_s5 = scalar_select %p184_p7, %s4466_s23, 84  ;;  %v4052_v7 = vld [vmem:[%s5435_s1 + $0x20] sm:$0xff]   ;;  %v4054_v9 = vld [vmem:[%s5435_s1 + $0x18] sm:$0xff]   ;;  %v4056_v13 = vld [vmem:[%s5435_s1 + $0x10] sm:$0xff]  }
  0x14   : > { %v4057_v14 = vld [vmem:[%s5435_s1 + $0x48] sm:$0xff]   ;;  %v4059_v16 = vld [vmem:[%s5435_s1 + $0x40] sm:$0xff]   ;;  %v4067_v18 = vld [vmem:[%s5435_s1 + $0xf8] sm:$0xff]  }
  0x15   : > { %s3956_s10 = smul.u32 36, %s185_s5  ;;  %v4058_v15 = vld [vmem:[%s5435_s1 + $0x8] sm:$0xff]   ;;  %v4060_v17 = vld [vmem:[%s5435_s1] sm:$0xff]   ;;  %v4070_v21 = vld [vmem:[%s5435_s1 + $0x178] sm:$0xff]  }
  0x16   : > { %3423 = vmatpush3.bf16.msra.mxu0 %v4048_v3  ;;  %3949 = vmatpush3.bf16.msra.mxu1 %v4048_v3  ;;  %v4068_v22 = vld [vmem:[%s5435_s1 + $0xb8] sm:$0xff]   ;;  %v4069_v23 = vld [vmem:[%s5435_s1 + $0xf0] sm:$0xff]   ;;  %v4079_v31 = vld [vmem:[%s5435_s1 + $0xe8] sm:$0xff]  }
  0x17   : > { %3424 = vmatprep.subr.bf16.mxu0 %v4049_v4  ;;  %3942 = vmatprep.subr.bf16.mxu1 %v4049_v4  ;;  %s4497_s24 = scalar_lea.vmem %s5434_s0, %s3956_s10  ;;  %v4072_v24 = vld [vmem:[%s5435_s1 + $0x138] sm:$0xff]   ;;  %v4071_v27 = vld [vmem:[%s5435_s1 + $0xb0] sm:$0xff]   ;;  %v4080_v32 = vld [vmem:[%s5435_s1 + $0xa8] sm:$0xff]  }
  0x18   : > { %v4063_v11 = vld [vmem:[%s4497_s24 + $0x4] ss:$36 sps:$4 sm:$0xff]   ;;  %v4073_v25 = vld [vmem:[%s4497_s24 + $0x4c] ss:$36 sps:$4 sm:$0xff]   ;;  %v4083_v35 = vld [vmem:[%s4497_s24 + $0x94] ss:$36 sps:$4 sm:$0xff]  }
  0x19   : > { %v4066_v12 = vld [vmem:[%s4497_s24 + $0x364] ss:$36 sps:$4 sm:$0xff]   ;;  %1712 = vmatprep.mubr.bf16.mxu0 %v4063_v11  ;;  %v4075_v26 = vld [vmem:[%s4497_s24 + $0x3ac] ss:$36 sps:$4 sm:$0xff]   ;;  %v4085_v36 = vld [vmem:[%s4497_s24 + $0x3f4] ss:$36 sps:$4 sm:$0xff]  }
  0x1a   : > { %3425 = vmatpush3.bf16.msra.mxu0 %v4050_v5  ;;  %3950 = vmatpush3.bf16.msra.mxu1 %v4050_v5  ;;  %v4061_v19 = vld [vmem:[%s4497_s24] ss:$36 sps:$4 sm:$0xff]   ;;  %v4090_v28 = vld [vmem:[%s5435_s1 + $0x170] sm:$0xff]   ;;  %v4077_v29 = vld [vmem:[%s4497_s24 + $0x48] ss:$36 sps:$4 sm:$0xff]  }
  0x1b   : > { %3426 = vmatprep.subr.bf16.mxu0 %v4051_v6  ;;  %3943 = vmatprep.subr.bf16.mxu1 %v4051_v6  ;;  %v4064_v20 = vld [vmem:[%s4497_s24 + $0x360] ss:$36 sps:$4 sm:$0xff]   ;;  %v4078_v30 = vld [vmem:[%s4497_s24 + $0x3a8] ss:$36 sps:$4 sm:$0xff]   ;;  %v4092_v33 = vld [vmem:[%s5435_s1 + $0x130] sm:$0xff]  }
  0x1c   : > { %1808 = vmatprep.mubr.bf16.mxu1 %v4066_v12  ;;  %v4081_v34 = vld [vmem:[%s5435_s1 + $0xe0] sm:$0xff]   ;;  %v4087_v38 = vld [vmem:[%s4497_s24 + $0x90] ss:$36 sps:$4 sm:$0xff]   ;;  %v4089_v40 = vld [vmem:[%s5435_s1 + $0xd8] sm:$0xff]  }
  0x1d   : > { %v4082_v37 = vld [vmem:[%s5435_s1 + $0xa0] sm:$0xff]   ;;  %v4088_v39 = vld [vmem:[%s4497_s24 + $0x3f0] ss:$36 sps:$4 sm:$0xff]   ;;  %v4091_v41 = vld [vmem:[%s5435_s1 + $0x98] sm:$0xff]  }
  0x1e   : > { %3427 = vmatpush3.bf16.msra.mxu0 %v4052_v7  ;;  %3951 = vmatpush3.bf16.msra.mxu1 %v4052_v7  ;;  %v4093_v42 = vld [vmem:[%s5435_s1 + $0xd0] sm:$0xff]   ;;  %v4104_v43 = vld [vmem:[%s5435_s1 + $0x168] sm:$0xff]   ;;  %v4095_v44 = vld [vmem:[%s4497_s24 + $0xdc] ss:$36 sps:$4 sm:$0xff]  }
  0x1f   : > { %3428 = vmatprep.subr.bf16.mxu0 %v4053_v8  ;;  %3944 = vmatprep.subr.bf16.mxu1 %v4053_v8  ;;  %v4097_v45 = vld [vmem:[%s4497_s24 + $0x43c] ss:$36 sps:$4 sm:$0xff]   ;;  %v4106_v46 = vld [vmem:[%s5435_s1 + $0x128] sm:$0xff]   ;;  %v4094_v47 = vld [vmem:[%s5435_s1 + $0x90] sm:$0xff]  }
  0x20   : > { %v4101_v48 = vld [vmem:[%s5435_s1 + $0xc8] sm:$0xff]   ;;  %v4099_v49 = vld [vmem:[%s4497_s24 + $0xd8] ss:$36 sps:$4 sm:$0xff]   ;;  %v4103_v52 = vld [vmem:[%s5435_s1 + $0xc0] sm:$0xff]  }
  0x21   : > { %v4100_v50 = vld [vmem:[%s4497_s24 + $0x438] ss:$36 sps:$4 sm:$0xff]   ;;  %v4102_v51 = vld [vmem:[%s5435_s1 + $0x88] sm:$0xff]   ;;  %v4121_v55 = vld [vmem:[%s5435_s1 + $0x160] sm:$0xff]  }
  0x22   : > { %3429 = vmatpush3.bf16.msra.mxu0 %v4054_v9  ;;  %3952 = vmatpush3.bf16.msra.mxu1 %v4054_v9  ;;  %v4107_v53 = vld [vmem:[%s4497_s24 + $0x124] ss:$36 sps:$4 sm:$0xff]   ;;  %v4111_v54 = vld [vmem:[%s4497_s24 + $0xc] ss:$36 sps:$4 sm:$0xff]   ;;  %v4113_v60 = vld [vmem:[%s5435_s1 + $0x1f8] sm:$0xff]  }
  0x23   : > { %3430 = vmatprep.subr.bf16.mxu0 %v4055_v10  ;;  %3945 = vmatprep.subr.bf16.mxu1 %v4055_v10  ;;  %v4122_v56 = vld [vmem:[%s5435_s1 + $0x120] sm:$0xff]   ;;  %v4109_v58 = vld [vmem:[%s4497_s24 + $0x8] ss:$36 sps:$4 sm:$0xff]   ;;  %v4114_v61 = vld [vmem:[%s5435_s1 + $0x1b8] sm:$0xff]  }
  0x24   : > { %v4105_v57 = vld [vmem:[%s5435_s1 + $0x80] sm:$0xff]   ;;  %v4115_v62 = vld [vmem:[%s4497_s24 + $0x16c] ss:$36 sps:$4 sm:$0xff]   ;;  %v4117_v63 = vld [vmem:[%s4497_s24 + $0x54] ss:$36 sps:$4 sm:$0xff]  }
  0x25   : > { %v4112_v59 = vld [vmem:[%s4497_s24 + $0x120] ss:$36 sps:$4 sm:$0xff]   ;;  %v4131_v0 = vld [vmem:[%s5435_s1 + $0x158] sm:$0xff]   ;;  %v4129_v1 = vld [vmem:[%s5435_s1 + $0x1f0] sm:$0xff]  }
  0x26   : > { %3431 = vmatpush3.bf16.msra.mxu0 %v4056_v13  ;;  %3953 = vmatpush3.bf16.msra.mxu1 %v4056_v13  ;;  %v4132_v2 = vld [vmem:[%s5435_s1 + $0x118] sm:$0xff]   ;;  %v4130_v3 = vld [vmem:[%s5435_s1 + $0x1b0] sm:$0xff]   ;;  %v4119_v4 = vld [vmem:[%s4497_s24 + $0x168] ss:$36 sps:$4 sm:$0xff]  }
  0x27   : > { %3432 = vmatprep.subr.bf16.mxu0 %v4057_v14  ;;  %3946 = vmatprep.subr.bf16.mxu1 %v4057_v14  ;;  %v4120_v5 = vld [vmem:[%s4497_s24 + $0x50] ss:$36 sps:$4 sm:$0xff]   ;;  %v4125_v7 = vld [vmem:[%s4497_s24 + $0x9c] ss:$36 sps:$4 sm:$0xff]   ;;  %v4146_v9 = vld [vmem:[%s5435_s1 + $0x1e8] sm:$0xff]  }
  0x28   : > { %v4123_v6 = vld [vmem:[%s4497_s24 + $0x1b4] ss:$36 sps:$4 sm:$0xff]   ;;  %v4148_v11 = vld [vmem:[%s5435_s1 + $0x1a8] sm:$0xff]   ;;  %v4133_v14 = vld [vmem:[%s4497_s24 + $0x1fc] ss:$36 sps:$4 sm:$0xff]  }
  0x29   : > { %v4145_v8 = vld [vmem:[%s5435_s1 + $0x150] sm:$0xff]   ;;  %v4128_v13 = vld [vmem:[%s4497_s24 + $0x98] ss:$36 sps:$4 sm:$0xff]  }
  0x2a   : > { %3433 = vmatpush3.bf16.msra.mxu0 %v4058_v15  ;;  %3954 = vmatpush3.bf16.msra.mxu1 %v4058_v15  ;;  %v4147_v10 = vld [vmem:[%s5435_s1 + $0x110] sm:$0xff]   ;;  %v4155_v15 = vld [vmem:[%s5435_s1 + $0x148] sm:$0xff]  }
  0x2b   : > { %3434 = vmatprep.subr.bf16.mxu0 %v4059_v16  ;;  %3947 = vmatprep.subr.bf16.mxu1 %v4059_v16  ;;  %v4127_v12 = vld [vmem:[%s4497_s24 + $0x1b0] ss:$36 sps:$4 sm:$0xff]   ;;  %v4156_v16 = vld [vmem:[%s5435_s1 + $0x108] sm:$0xff]  }
  0x2e   : > { %3435 = vmatpush3.bf16.msra.mxu0 %v4060_v17  ;;  %3955 = vmatpush3.bf16.msra.mxu1 %v4060_v17  ;;  %v4135_v17 = vld [vmem:[%s4497_s24 + $0xe4] ss:$36 sps:$4 sm:$0xff]  }
  0x2f   : > { %3532 = vmatprep.subr.bf16.mxu1 %v4067_v18  ;;  %3644 = vmatprep.subr.bf16.mxu0 %v4070_v21  ;;  %v4163_v18 = vld [vmem:[%s5435_s1 + $0x1e0] sm:$0xff]  }
  0x30   : > { %v4138_v21 = vld [vmem:[%s4497_s24 + $0xe0] ss:$36 sps:$4 sm:$0xff]  }
  0x31   : > { %1713 = vmatmul.mubr.bf16.vlgmr.msra.gmra.mxu0 %v4061_v19  ;;  %1809 = vmatmul.mubr.bf16.vlgmr.msra.gmra.mxu1 %v4064_v20  ;;  %v4164_v19 = vld [vmem:[%s5435_s1 + $0x1a0] sm:$0xff]   ;;  %v4137_v20 = vld [vmem:[%s4497_s24 + $0x1f8] ss:$36 sps:$4 sm:$0xff]  }
  0x32   : > { %3533 = vmatpush3.bf16.msra.mxu1 %v4068_v22  ;;  %3645 = vmatpush3.bf16.msra.mxu0 %v4072_v24  ;;  %v4139_v22 = vld [vmem:[%s4497_s24 + $0x244] ss:$36 sps:$4 sm:$0xff]  }
  0x33   : > { %3534 = vmatprep.subr.bf16.mxu1 %v4069_v23  ;;  %1720 = vmatprep.mubr.bf16.mxu0 %v4073_v25  ;;  %v4141_v23 = vld [vmem:[%s4497_s24 + $0x12c] ss:$36 sps:$4 sm:$0xff]   ;;  %v4171_v24 = vld [vmem:[%s5435_s1 + $0x140] sm:$0xff]  }
  0x34   : > { %1816 = vmatprep.mubr.bf16.mxu1 %v4075_v26  ;;  %3646 = vmatprep.subr.bf16.mxu0 %v4090_v28  ;;  %v4172_v25 = vld [vmem:[%s5435_s1 + $0x100] sm:$0xff]   ;;  %v4179_v26 = vld [vmem:[%s5435_s1 + $0x1d8] sm:$0xff]  }
  0x35   : > { %v4180_v28 = vld [vmem:[%s5435_s1 + $0x198] sm:$0xff]  }
  0x36   : > { %3535 = vmatpush3.bf16.msra.mxu1 %v4071_v27  ;;  %3647 = vmatpush3.bf16.msra.mxu0 %v4092_v33  ;;  %v4143_v27 = vld [vmem:[%s4497_s24 + $0x240] ss:$36 sps:$4 sm:$0xff]   ;;  %v4194_v33 = vld [vmem:[%s5435_s1 + $0x1d0] sm:$0xff]  }
  0x37   : > { %3536 = vmatprep.subr.bf16.mxu1 %v4079_v31  ;;  %3648 = vmatprep.subr.bf16.mxu0 %v4104_v43  ;;  %v4149_v31 = vld [vmem:[%s4497_s24 + $0x28c] ss:$36 sps:$4 sm:$0xff]   ;;  %v4165_v43 = vld [vmem:[%s4497_s24 + $0x31c] ss:$36 sps:$4 sm:$0xff]  }
  0x39   : > { %1721 = vmatmul.mubr.bf16.gmra.mxu0 %v4077_v29  ;;  %1817 = vmatmul.mubr.bf16.gmra.mxu1 %v4078_v30  ;;  %v4181_v29 = vld [vmem:[%s5435_s1 + $0x238] sm:$0xff]   ;;  %v4144_v30 = vld [vmem:[%s4497_s24 + $0x128] ss:$36 sps:$4 sm:$0xff]  }
  0x3a   : > { %3537 = vmatpush3.bf16.msra.mxu1 %v4080_v32  ;;  %1728 = vmatprep.mubr.bf16.mxu0 %v4083_v35  ;;  %v4151_v32 = vld [vmem:[%s4497_s24 + $0x174] ss:$36 sps:$4 sm:$0xff]  }
  0x3b   : > { %3538 = vmatprep.subr.bf16.mxu1 %v4081_v34  ;;  %1824 = vmatprep.mubr.bf16.mxu1 %v4085_v36  ;;  %v4153_v34 = vld [vmem:[%s4497_s24 + $0x288] ss:$36 sps:$4 sm:$0xff]   ;;  %v4195_v35 = vld [vmem:[%s5435_s1 + $0x190] sm:$0xff]  }
  0x3c   : > { %3649 = vmatpush3.bf16.msra.mxu0 %v4106_v46  ;;  %v4154_v36 = vld [vmem:[%s4497_s24 + $0x170] ss:$36 sps:$4 sm:$0xff]   ;;  %v4170_v46 = vld [vmem:[%s4497_s24 + $0x200] ss:$36 sps:$4 sm:$0xff]  }
  0x3d   : > { %3650 = vmatprep.subr.bf16.mxu0 %v4121_v55  ;;  %v4196_v55 = vld [vmem:[%s5435_s1 + $0x230] sm:$0xff]  }
  0x3e   : > { %3539 = vmatpush3.bf16.msra.mxu1 %v4082_v37  ;;  %v4157_v37 = vld [vmem:[%s4497_s24 + $0x2d4] ss:$36 sps:$4 sm:$0xff]  }
  0x3f   : > { %3540 = vmatprep.subr.bf16.mxu1 %v4089_v40  ;;  %v4162_v40 = vld [vmem:[%s4497_s24 + $0x1b8] ss:$36 sps:$4 sm:$0xff]  }
  0x40   : > { %3651 = vmatpush3.bf16.msra.mxu0 %v4122_v56  ;;  %v4211_v56 = vld [vmem:[%s5435_s1 + $0x228] sm:$0xff]  }
  0x41   : > { %1729 = vmatmul.mubr.bf16.gmra.mxu0 %v4087_v38  ;;  %1825 = vmatmul.mubr.bf16.gmra.mxu1 %v4088_v39  ;;  %v4159_v38 = vld [vmem:[%s4497_s24 + $0x1bc] ss:$36 sps:$4 sm:$0xff]   ;;  %v4161_v39 = vld [vmem:[%s4497_s24 + $0x2d0] ss:$36 sps:$4 sm:$0xff]  }
  0x42   : > { %3541 = vmatpush3.bf16.msra.mxu1 %v4091_v41  ;;  %1736 = vmatprep.mubr.bf16.mxu0 %v4095_v44  ;;  %v4209_v41 = vld [vmem:[%s5435_s1 + $0x1c8] sm:$0xff]  }
  0x43   : > { %3542 = vmatprep.subr.bf16.mxu1 %v4093_v42  ;;  %1832 = vmatprep.mubr.bf16.mxu1 %v4097_v45  ;;  %v4210_v42 = vld [vmem:[%s5435_s1 + $0x188] sm:$0xff]   ;;  %v4169_v45 = vld [vmem:[%s4497_s24 + $0x318] ss:$36 sps:$4 sm:$0xff]  }
  0x44   : > { %3652 = vmatprep.subr.bf16.mxu0 %v4131_v0  ;;  %v4167_v44 = vld [vmem:[%s4497_s24 + $0x204] ss:$36 sps:$4 sm:$0xff]  }
  0x45   : > { %3653 = vmatpush3.bf16.msra.mxu0 %v4132_v2  ;;  %v4193_v0 = vld [vmem:[%s4497_s24 + $0xa0] ss:$36 sps:$4 sm:$0xff]   ;;  %v4199_v2 = vld [vmem:[%s4497_s24 + $0xec] ss:$36 sps:$4 sm:$0xff]  }
  0x46   : > { %3543 = vmatpush3.bf16.msra.mxu1 %v4094_v47  ;;  %3654 = vmatprep.subr.bf16.mxu0 %v4145_v8  ;;  %v4224_v47 = vld [vmem:[%s5435_s1 + $0x1c0] sm:$0xff]   ;;  %v4205_v8 = vld [vmem:[%s4497_s24 + $0x134] ss:$36 sps:$4 sm:$0xff]  }
  0x47   : > { %3544 = vmatprep.subr.bf16.mxu1 %v4101_v48  ;;  %v4225_v48 = vld [vmem:[%s5435_s1 + $0x180] sm:$0xff]  }
  0x49   : > { %1737 = vmatmul.mubr.bf16.gmra.mxu0 %v4099_v49  ;;  %1833 = vmatmul.mubr.bf16.gmra.mxu1 %v4100_v50  ;;  %v4173_v49 = vld [vmem:[%s4497_s24 + $0x24c] ss:$36 sps:$4 sm:$0xff]   ;;  %v4177_v50 = vld [vmem:[%s4497_s24 + $0x14] ss:$36 sps:$4 sm:$0xff]  }
  0x4a   : > { %3545 = vmatpush3.bf16.msra.mxu1 %v4102_v51  ;;  %1744 = vmatprep.mubr.bf16.mxu0 %v4107_v53  ;;  %v4175_v51 = vld [vmem:[%s4497_s24 + $0x10] ss:$36 sps:$4 sm:$0xff]  }
  0x4b   : > { %3546 = vmatprep.subr.bf16.mxu1 %v4103_v52  ;;  %1873 = vmatprep.mubr.bf16.mxu1 %v4111_v54  ;;  %v4178_v52 = vld [vmem:[%s4497_s24 + $0x248] ss:$36 sps:$4 sm:$0xff]   ;;  %v4182_v53 = vld [vmem:[%s4497_s24 + $0x294] ss:$36 sps:$4 sm:$0xff]   ;;  %v4184_v54 = vld [vmem:[%s4497_s24 + $0x5c] ss:$36 sps:$4 sm:$0xff]  }
  0x4c   : > { %3655 = vmatpush3.bf16.msra.mxu0 %v4147_v10  ;;  %v4207_v10 = vld [vmem:[%s4497_s24 + $0x368] ss:$36 sps:$4 sm:$0xff]  }
  0x4d   : > { %3656 = vmatprep.subr.bf16.mxu0 %v4155_v15  ;;  %v4217_v15 = vld [vmem:[%s4497_s24 + $0x178] ss:$36 sps:$4 sm:$0xff]  }
  0x4e   : > { %3547 = vmatpush3.bf16.msra.mxu1 %v4105_v57  ;;  %v4186_v57 = vld [vmem:[%s4497_s24 + $0x290] ss:$36 sps:$4 sm:$0xff]  }
  0x4f   : > { %3756 = vmatprep.subr.bf16.mxu1 %v4113_v60  ;;  %v4190_v60 = vld [vmem:[%s4497_s24 + $0xa4] ss:$36 sps:$4 sm:$0xff]  }
  0x50   : > { %3657 = vmatpush3.bf16.msra.mxu0 %v4156_v16  ;;  %v4218_v16 = vld [vmem:[%s4497_s24 + $0x3fc] ss:$36 sps:$4 sm:$0xff]  }
  0x51   : > { %1745 = vmatmul.mubr.bf16.gmra.mxu0 %v4112_v59  ;;  %1874 = vmatmul.mubr.bf16.vlgmr.msra.gmra.mxu1 %v4109_v58  ;;  %v4187_v58 = vld [vmem:[%s4497_s24 + $0x58] ss:$36 sps:$4 sm:$0xff]  }
  0x52   : > { %3757 = vmatpush3.bf16.msra.mxu1 %v4114_v61  ;;  %1752 = vmatprep.mubr.bf16.mxu0 %v4115_v62  ;;  %v4188_v59 = vld [vmem:[%s4497_s24 + $0x2dc] ss:$36 sps:$4 sm:$0xff]  }
  0x53   : > { %1881 = vmatprep.mubr.bf16.mxu1 %v4117_v63  ;;  %3758 = vmatprep.subr.bf16.mxu1 %v4129_v1  ;;  %v4226_v61 = vld [vmem:[%s5435_s1 + $0x220] sm:$0xff]   ;;  %v4192_v62 = vld [vmem:[%s4497_s24 + $0x2d8] ss:$36 sps:$4 sm:$0xff]  }
  0x54   : > { %3658 = vmatprep.subr.bf16.mxu0 %v4171_v24  ;;  %v4239_v63 = vld [vmem:[%s5435_s1 + $0x218] sm:$0xff]   ;;  %v4197_v1 = vld [vmem:[%s4497_s24 + $0x324] ss:$36 sps:$4 sm:$0xff]  }
  0x55   : > { %3659 = vmatpush3.bf16.msra.mxu0 %v4172_v25  ;;  %v4233_v24 = vld [vmem:[%s4497_s24 + $0x254] ss:$36 sps:$4 sm:$0xff]   ;;  %v4237_v25 = vld [vmem:[%s4497_s24 + $0x1c] ss:$36 sps:$4 sm:$0xff]  }
  0x56   : > { %3759 = vmatpush3.bf16.msra.mxu1 %v4130_v3  ;;  %3892 = vmatprep.subr.bf16.mxu0 %v4181_v29  ;;  %v4252_v3 = vld [vmem:[%s5435_s1 + $0x210] sm:$0xff]  }
  0x57   : > { %3760 = vmatprep.subr.bf16.mxu1 %v4146_v9  ;;  %v4278_v9 = vld [vmem:[%s5435_s1 + $0x200] sm:$0xff]  }
  0x59   : > { %1753 = vmatmul.mubr.bf16.gmra.mxu0 %v4119_v4  ;;  %1882 = vmatmul.mubr.bf16.gmra.mxu1 %v4120_v5  ;;  %v4201_v4 = vld [vmem:[%s4497_s24 + $0x320] ss:$36 sps:$4 sm:$0xff]   ;;  %v4265_v5 = vld [vmem:[%s5435_s1 + $0x208] sm:$0xff]  }
  0x5a   : > { %1760 = vmatprep.mubr.bf16.mxu0 %v4123_v6  ;;  %1889 = vmatprep.mubr.bf16.mxu1 %v4125_v7  ;;  %v4202_v6 = vld [vmem:[%s4497_s24 + $0xe8] ss:$36 sps:$4 sm:$0xff]  }
  0x5b   : > { %3761 = vmatpush3.bf16.msra.mxu1 %v4148_v11  ;;  %v4203_v7 = vld [vmem:[%s4497_s24 + $0x36c] ss:$36 sps:$4 sm:$0xff]  }
  0x5c   : > { %3762 = vmatprep.subr.bf16.mxu1 %v4163_v18  ;;  %v4208_v11 = vld [vmem:[%s4497_s24 + $0x130] ss:$36 sps:$4 sm:$0xff]   ;;  %v4222_v18 = vld [vmem:[%s4497_s24 + $0x3f8] ss:$36 sps:$4 sm:$0xff]  }
  0x5f   : > { %3763 = vmatpush3.bf16.msra.mxu1 %v4164_v19  ;;  %v4223_v19 = vld [vmem:[%s4497_s24 + $0x1c0] ss:$36 sps:$4 sm:$0xff]  }
  0x60   : > { %3764 = vmatprep.subr.bf16.mxu1 %v4179_v26  ;;  %v4235_v26 = vld [vmem:[%s4497_s24 + $0x18] ss:$36 sps:$4 sm:$0xff]  }
  0x61   : > { %1761 = vmatmul.mubr.bf16.gmra.mxu0 %v4127_v12  ;;  %1890 = vmatmul.mubr.bf16.gmra.mxu1 %v4128_v13  ;;  %v4212_v12 = vld [vmem:[%s4497_s24 + $0x3b4] ss:$36 sps:$4 sm:$0xff]   ;;  %v4214_v13 = vld [vmem:[%s4497_s24 + $0x17c] ss:$36 sps:$4 sm:$0xff]  }
  0x62   : > { %1768 = vmatprep.mubr.bf16.mxu0 %v4133_v14  ;;  %1897 = vmatprep.mubr.bf16.mxu1 %v4135_v17  ;;  %v4216_v14 = vld [vmem:[%s4497_s24 + $0x3b0] ss:$36 sps:$4 sm:$0xff]   ;;  %v4220_v17 = vld [vmem:[%s4497_s24 + $0x1c4] ss:$36 sps:$4 sm:$0xff]  }
  0x63   : > { %3765 = vmatpush3.bf16.msra.mxu1 %v4180_v28  ;;  %v4240_v28 = vld [vmem:[%s4497_s24 + $0x29c] ss:$36 sps:$4 sm:$0xff]  }
  0x64   : > { %3766 = vmatprep.subr.bf16.mxu1 %v4194_v33  ;;  %v4248_v33 = vld [vmem:[%s4497_s24 + $0xac] ss:$36 sps:$4 sm:$0xff]  }
  0x67   : > { %3767 = vmatpush3.bf16.msra.mxu1 %v4195_v35  ;;  %v4251_v35 = vld [vmem:[%s4497_s24 + $0xa8] ss:$36 sps:$4 sm:$0xff]  }
  0x68   : > { %3768 = vmatprep.subr.bf16.mxu1 %v4209_v41  ;;  %v4261_v41 = vld [vmem:[%s4497_s24 + $0x13c] ss:$36 sps:$4 sm:$0xff]  }
  0x69   : > { %1769 = vmatmul.mubr.bf16.gmra.mxu0 %v4137_v20  ;;  %1898 = vmatmul.mubr.bf16.gmra.mxu1 %v4138_v21  ;;  %v4227_v20 = vld [vmem:[%s4497_s24 + $0x444] ss:$36 sps:$4 sm:$0xff]   ;;  %v4229_v21 = vld [vmem:[%s4497_s24 + $0x20c] ss:$36 sps:$4 sm:$0xff]  }
  0x6a   : > { %1776 = vmatprep.mubr.bf16.mxu0 %v4139_v22  ;;  %1905 = vmatprep.mubr.bf16.mxu1 %v4141_v23  ;;  %v4231_v22 = vld [vmem:[%s4497_s24 + $0x440] ss:$36 sps:$4 sm:$0xff]   ;;  %v4232_v23 = vld [vmem:[%s4497_s24 + $0x208] ss:$36 sps:$4 sm:$0xff]  }
  0x6b   : > { %3769 = vmatpush3.bf16.msra.mxu1 %v4210_v42  ;;  %v4263_v42 = vld [vmem:[%s4497_s24 + $0x370] ss:$36 sps:$4 sm:$0xff]  }
  0x6c   : > { %3770 = vmatprep.subr.bf16.mxu1 %v4224_v47 }
  0x6f   : > { %3771 = vmatpush3.bf16.msra.mxu1 %v4225_v48 }
  0x71   : > { %1777 = vmatmul.mubr.bf16.gmra.mxu0 %v4143_v27  ;;  %1906 = vmatmul.mubr.bf16.gmra.mxu1 %v4144_v30  ;;  %v4238_v27 = vld [vmem:[%s4497_s24 + $0x250] ss:$36 sps:$4 sm:$0xff]   ;;  %v4244_v30 = vld [vmem:[%s4497_s24 + $0x298] ss:$36 sps:$4 sm:$0xff]  }
  0x72   : > { %1784 = vmatprep.mubr.bf16.mxu0 %v4149_v31  ;;  %1913 = vmatprep.mubr.bf16.mxu1 %v4151_v32  ;;  %v4245_v31 = vld [vmem:[%s4497_s24 + $0x60] ss:$36 sps:$4 sm:$0xff]  }
  0x73   : > { %v4246_v32 = vld [vmem:[%s4497_s24 + $0x2e4] ss:$36 sps:$4 sm:$0xff]  }
  0x79   : > { %1785 = vmatmul.mubr.bf16.gmra.mxu0 %v4153_v34  ;;  %1914 = vmatmul.mubr.bf16.gmra.mxu1 %v4154_v36  ;;  %v4250_v34 = vld [vmem:[%s4497_s24 + $0x2e0] ss:$36 sps:$4 sm:$0xff]   ;;  %v4253_v36 = vld [vmem:[%s4497_s24 + $0x32c] ss:$36 sps:$4 sm:$0xff]  }
  0x7a   : > { %1792 = vmatprep.mubr.bf16.mxu0 %v4157_v37  ;;  %1921 = vmatprep.mubr.bf16.mxu1 %v4159_v38  ;;  %v4255_v37 = vld [vmem:[%s4497_s24 + $0xf4] ss:$36 sps:$4 sm:$0xff]   ;;  %v4257_v38 = vld [vmem:[%s4497_s24 + $0x328] ss:$36 sps:$4 sm:$0xff]  }
  0x81   : > { %1793 = vmatmul.mubr.bf16.gmra.mxu0 %v4161_v39  ;;  %1922 = vmatmul.mubr.bf16.gmra.mxu1 %v4162_v40  ;;  %v4258_v39 = vld [vmem:[%s4497_s24 + $0xf0] ss:$36 sps:$4 sm:$0xff]  }
  0x82   : > { %1800 = vmatprep.mubr.bf16.mxu0 %v4165_v43  ;;  %1929 = vmatprep.mubr.bf16.mxu1 %v4167_v44  ;;  %v4259_v40 = vld [vmem:[%s4497_s24 + $0x374] ss:$36 sps:$4 sm:$0xff]   ;;  %v4266_v44 = vld [vmem:[%s4497_s24 + $0x3bc] ss:$36 sps:$4 sm:$0xff]  }
  0x83   : > { %v4264_v43 = vld [vmem:[%s4497_s24 + $0x138] ss:$36 sps:$4 sm:$0xff]  }
  0x89   : > { %1801 = vmatmul.mubr.bf16.gmra.mxu0 %v4169_v45  ;;  %1930 = vmatmul.mubr.bf16.gmra.mxu1 %v4170_v46  ;;  %v4268_v45 = vld [vmem:[%s4497_s24 + $0x184] ss:$36 sps:$4 sm:$0xff]  }
  0x8a   : > { %1937 = vmatprep.mubr.bf16.mxu1 %v4173_v49  ;;  %2034 = vmatprep.mubr.bf16.mxu0 %v4177_v50 }
  0x91   : > { %1938 = vmatmul.mubr.bf16.gmra.mxu1 %v4178_v52  ;;  %2035 = vmatmul.mubr.bf16.vlgmr.msra.gmra.mxu0 %v4175_v51 }
  0x92   : > { %3893 = vmatpush3.bf16.msra.mxu0 %v4181_v29  ;;  %1945 = vmatprep.mubr.bf16.mxu1 %v4182_v53  ;;  %v4242_v29 = vld [vmem:[%s4497_s24 + $0x64] ss:$36 sps:$4 sm:$0xff]  }
  0x93   : > { %2042 = vmatprep.mubr.bf16.mxu0 %v4184_v54  ;;  %3894 = vmatprep.subr.bf16.mxu0 %v4196_v55  ;;  %v4270_v54 = vld [vmem:[%s4497_s24 + $0x3b8] ss:$36 sps:$4 sm:$0xff]  }
  0x96   : > { %3895 = vmatpush3.bf16.msra.mxu0 %v4196_v55  ;;  %v4271_v55 = vld [vmem:[%s4497_s24 + $0x180] ss:$36 sps:$4 sm:$0xff]  }
  0x97   : > { %3896 = vmatprep.subr.bf16.mxu0 %v4211_v56 }
  0x99   : > { %1946 = vmatmul.mubr.bf16.gmra.mxu1 %v4186_v57  ;;  %2043 = vmatmul.mubr.bf16.gmra.mxu0 %v4187_v58  ;;  %v4274_v57 = vld [vmem:[%s4497_s24 + $0x1cc] ss:$36 sps:$4 sm:$0xff]  }
  0x9a   : > { %1953 = vmatprep.mubr.bf16.mxu1 %v4188_v59  ;;  %2050 = vmatprep.mubr.bf16.mxu0 %v4190_v60 }
  0x9b   : > { %3897 = vmatpush3.bf16.msra.mxu0 %v4211_v56  ;;  %v4272_v56 = vld [vmem:[%s4497_s24 + $0x404] ss:$36 sps:$4 sm:$0xff]  }
  0x9c   : > { %3898 = vmatprep.subr.bf16.mxu0 %v4226_v61 }
  0x9f   : > { %3899 = vmatpush3.bf16.msra.mxu0 %v4226_v61 }
  0xa0   : > { %3900 = vmatprep.subr.bf16.mxu0 %v4239_v63 }
  0xa1   : > { %1954 = vmatmul.mubr.bf16.gmra.mxu1 %v4192_v62  ;;  %2051 = vmatmul.mubr.bf16.gmra.mxu0 %v4193_v0 }
  0xa2   : > { %1961 = vmatprep.mubr.bf16.mxu1 %v4197_v1  ;;  %2058 = vmatprep.mubr.bf16.mxu0 %v4199_v2 }
  0xa3   : > { %3901 = vmatpush3.bf16.msra.mxu0 %v4239_v63 }
  0xa4   : > { %3902 = vmatprep.subr.bf16.mxu0 %v4252_v3 }
  0xa7   : > { %3903 = vmatpush3.bf16.msra.mxu0 %v4252_v3 }
  0xa8   : > { %3904 = vmatprep.subr.bf16.mxu0 %v4265_v5 }
  0xa9   : > { %1962 = vmatmul.mubr.bf16.gmra.mxu1 %v4201_v4  ;;  %2059 = vmatmul.mubr.bf16.gmra.mxu0 %v4202_v6  ;;  %v4276_v6 = vld [vmem:[%s4497_s24 + $0x400] ss:$36 sps:$4 sm:$0xff]  }
  0xaa   : > { %1969 = vmatprep.mubr.bf16.mxu1 %v4203_v7  ;;  %2066 = vmatprep.mubr.bf16.mxu0 %v4205_v8  ;;  %v4277_v7 = vld [vmem:[%s4497_s24 + $0x1c8] ss:$36 sps:$4 sm:$0xff]  }
  0xab   : > { %3905 = vmatpush3.bf16.msra.mxu0 %v4265_v5  ;;  %v4279_v8 = vld [vmem:[%s4497_s24 + $0x44c] ss:$36 sps:$4 sm:$0xff]  }
  0xac   : > { %3906 = vmatprep.subr.bf16.mxu0 %v4278_v9 }
  0xaf   : > { %3907 = vmatpush3.bf16.msra.mxu0 %v4278_v9  ;;  %v4281_v9 = vld [vmem:[%s4497_s24 + $0x214] ss:$36 sps:$4 sm:$0xff]  }
  0xb1   : > { %1970 = vmatmul.mubr.bf16.gmra.mxu1 %v4207_v10  ;;  %2067 = vmatmul.mubr.bf16.gmra.mxu0 %v4208_v11 }
  0xb2   : > { %1977 = vmatprep.mubr.bf16.mxu1 %v4212_v12  ;;  %2074 = vmatprep.mubr.bf16.mxu0 %v4214_v13 }
  0xb9   : > { %1978 = vmatmul.mubr.bf16.gmra.mxu1 %v4216_v14  ;;  %2075 = vmatmul.mubr.bf16.gmra.mxu0 %v4217_v15 }
  0xba   : > { %1985 = vmatprep.mubr.bf16.mxu1 %v4218_v16  ;;  %2082 = vmatprep.mubr.bf16.mxu0 %v4220_v17 }
  0xc1   : > { %1986 = vmatmul.mubr.bf16.gmra.mxu1 %v4222_v18  ;;  %2083 = vmatmul.mubr.bf16.gmra.mxu0 %v4223_v19 }
  0xc2   : > { %1993 = vmatprep.mubr.bf16.mxu1 %v4227_v20  ;;  %2090 = vmatprep.mubr.bf16.mxu0 %v4229_v21 }
  0xc9   : > { %1994 = vmatmul.mubr.bf16.gmra.mxu1 %v4231_v22  ;;  %2091 = vmatmul.mubr.bf16.gmra.mxu0 %v4232_v23  ;;  %v4283_v22 = vld [vmem:[%s4497_s24 + $0x448] ss:$36 sps:$4 sm:$0xff]   ;;  %v4284_v23 = vld [vmem:[%s4497_s24 + $0x210] ss:$36 sps:$4 sm:$0xff]  }
  0xca   : > { %2098 = vmatprep.mubr.bf16.mxu0 %v4233_v24  ;;  %2195 = vmatprep.mubr.bf16.mxu1 %v4237_v25  ;;  %v4287_v24 = vld [vmem:[%s4497_s24 + $0x25c] ss:$36 sps:$4 sm:$0xff]  }
  0xcb   : > { %v4288_v25 = vld [vmem:[%s4497_s24 + $0x20] ss:$36 sps:$4 sm:$0xff]  }
  0xd1   : > { %2099 = vmatmul.mubr.bf16.gmra.mxu0 %v4238_v27  ;;  %2196 = vmatmul.mubr.bf16.vlgmr.msra.gmra.mxu1 %v4235_v26 }
  0xd2   : > { %2106 = vmatprep.mubr.bf16.mxu0 %v4240_v28  ;;  %2203 = vmatprep.mubr.bf16.mxu1 %v4242_v29 }
  0xd9   : > { %2107 = vmatmul.mubr.bf16.gmra.mxu0 %v4244_v30  ;;  %2204 = vmatmul.mubr.bf16.gmra.mxu1 %v4245_v31 }
  0xda   : > { %2114 = vmatprep.mubr.bf16.mxu0 %v4246_v32  ;;  %2211 = vmatprep.mubr.bf16.mxu1 %v4248_v33 }
  0xe1   : > { %2115 = vmatmul.mubr.bf16.gmra.mxu0 %v4250_v34  ;;  %2212 = vmatmul.mubr.bf16.gmra.mxu1 %v4251_v35 }
  0xe2   : > { %2122 = vmatprep.mubr.bf16.mxu0 %v4253_v36  ;;  %2219 = vmatprep.mubr.bf16.mxu1 %v4255_v37 }
  0xe9   : > { %2123 = vmatmul.mubr.bf16.gmra.mxu0 %v4257_v38  ;;  %2220 = vmatmul.mubr.bf16.gmra.mxu1 %v4258_v39  ;;  %v4285_v38 = vld [vmem:[%s4497_s24 + $0x258] ss:$36 sps:$4 sm:$0xff]   ;;  %v4289_v39 = vld [vmem:[%s4497_s24 + $0x68] ss:$36 sps:$4 sm:$0xff]  }
  0xea   : > { %2130 = vmatprep.mubr.bf16.mxu0 %v4259_v40  ;;  %2227 = vmatprep.mubr.bf16.mxu1 %v4261_v41  ;;  %v4292_v40 = vld [vmem:[%s4497_s24 + $0x2a4] ss:$36 sps:$4 sm:$0xff]   ;;  %v4293_v41 = vld [vmem:[%s4497_s24 + $0xb0] ss:$36 sps:$4 sm:$0xff]  }
  0xf1   : > { %v3436_v46 = vpop.f32.mrf.mxu0  ;;  %v3508_v47 = vpop.f32.mrf.mxu1  ;;  %2131 = vmatmul.mubr.bf16.gmra.mxu0 %v4263_v42  ;;  %2228 = vmatmul.mubr.bf16.gmra.mxu1 %v4264_v43 }
  0xf2   : > { %2138 = vmatprep.mubr.bf16.mxu0 %v4266_v44  ;;  %2235 = vmatprep.mubr.bf16.mxu1 %v4268_v45 }
  0xf3   : > { %v3437_v48 = vpop.f32.mrf.mxu0  ;;  %v3509_v49 = vpop.f32.mrf.mxu1 }
  0xf4   : > { %v4790_v50 = vadd.f32 %v3437_v48, %v3436_v46  ;;  %v4792_v51 = vadd.f32 %v3509_v49, %v3508_v47  ;;  %v4841_v48 = vld [vmem:[%s5436_s2] ss:$0 sm:$0xff] }
  0xf5   : > { %v3439_v52 = vpop.f32.mrf.mxu0  ;;  %v3511_v53 = vpop.f32.mrf.mxu1 }
  0xf7   : > { %v3440_v58 = vpop.f32.mrf.mxu0  ;;  %v3512_v59 = vpop.f32.mrf.mxu1 }
  0xf8   : > { %v4798_v60 = vadd.f32 %v3440_v58, %v3439_v52  ;;  %v4800_v61 = vadd.f32 %v3512_v59, %v3511_v53  ;;  %v1715_v53 = vadd.f32 %v4790_v50, %v4841_v48  ;;  %v4290_v58 = vld [vmem:[%s4497_s24 + $0x2a0] ss:$36 sps:$4 sm:$0xff]   ;;  %v4294_v59 = vld [vmem:[%s4497_s24 + $0xf8] ss:$36 sps:$4 sm:$0xff]  }
  0xf9   : > { %v3442_v62 = vpop.f32.mrf.mxu0  ;;  %v3514_v63 = vpop.f32.mrf.mxu1  ;;  %2139 = vmatmul.mubr.bf16.gmra.mxu0 %v4270_v54  ;;  %2236 = vmatmul.mubr.bf16.gmra.mxu1 %v4271_v55 }
  0xfa   : > { %2146 = vmatprep.mubr.bf16.mxu0 %v4272_v56  ;;  %2243 = vmatprep.mubr.bf16.mxu1 %v4274_v57 }
  0xfb   : > { %v3443_v0 = vpop.f32.mrf.mxu0  ;;  %v3515_v1 = vpop.f32.mrf.mxu1 }
  0xfc   : > { %v4802_v2 = vadd.f32 %v3443_v0, %v3442_v62  ;;  %v4804_v3 = vadd.f32 %v3515_v1, %v3514_v63  ;;  %v4297_v63 = vld [vmem:[%s4497_s24 + $0x2ec] ss:$36 sps:$4 sm:$0xff]   ;;  %v4298_v0 = vld [vmem:[%s4497_s24 + $0x140] ss:$36 sps:$4 sm:$0xff]  }
  0xfd   : > { %v3445_v4 = vpop.f32.mrf.mxu0  ;;  %v3517_v5 = vpop.f32.mrf.mxu1 }
  0xff   : > { %v3446_v10 = vpop.f32.mrf.mxu0  ;;  %v3518_v11 = vpop.f32.mrf.mxu1 }
 0x100   : > { %v4810_v12 = vadd.f32 %v3446_v10, %v3445_v4  ;;  %v4812_v13 = vadd.f32 %v3518_v11, %v3517_v5  ;;  %v1718_v5 = vadd.f32 %v4798_v60, %v4841_v48  ;;  %v1723_v60 = vadd.f32 %v4802_v2, %v4841_v48 }
 0x101   : > { %v3448_v14 = vpop.f32.mrf.mxu0  ;;  %v3520_v15 = vpop.f32.mrf.mxu1  ;;  %2147 = vmatmul.mubr.bf16.gmra.mxu0 %v4276_v6  ;;  %2244 = vmatmul.mubr.bf16.gmra.mxu1 %v4277_v7 }
 0x102   : > { %2154 = vmatprep.mubr.bf16.mxu0 %v4279_v8  ;;  %2251 = vmatprep.mubr.bf16.mxu1 %v4281_v9 }
 0x103   : > { %v3449_v16 = vpop.f32.mrf.mxu0  ;;  %v3521_v17 = vpop.f32.mrf.mxu1 }
 0x104   : > { %v4814_v18 = vadd.f32 %v3449_v16, %v3448_v14  ;;  %v4816_v19 = vadd.f32 %v3521_v17, %v3520_v15 }
 0x105   : > { %v3451_v20 = vpop.f32.mrf.mxu0  ;;  %v3523_v21 = vpop.f32.mrf.mxu1 }
 0x107   : > { %v3452_v26 = vpop.f32.mrf.mxu0  ;;  %v3524_v27 = vpop.f32.mrf.mxu1 }
 0x108   : > { %v4822_v28 = vadd.f32 %v3452_v26, %v3451_v20  ;;  %v4824_v29 = vadd.f32 %v3524_v27, %v3523_v21  ;;  %v4295_v20 = vld [vmem:[%s4497_s24 + $0x2e8] ss:$36 sps:$4 sm:$0xff]   ;;  %v1726_v27 = vadd.f32 %v4810_v12, %v4841_v48  ;;  %v1731_v12 = vadd.f32 %v4814_v18, %v4841_v48 }
 0x109   : > { %v3454_v30 = vpop.f32.mrf.mxu0  ;;  %v3526_v31 = vpop.f32.mrf.mxu1  ;;  %2155 = vmatmul.mubr.bf16.gmra.mxu0 %v4283_v22  ;;  %2252 = vmatmul.mubr.bf16.gmra.mxu1 %v4284_v23  ;;  %v4299_v21 = vld [vmem:[%s4497_s24 + $0x188] ss:$36 sps:$4 sm:$0xff]   ;;  %v4302_v23 = vld [vmem:[%s4497_s24 + $0x334] ss:$36 sps:$4 sm:$0xff]  }
 0x10a   : > { %2259 = vmatprep.mubr.bf16.mxu1 %v4287_v24  ;;  %3908 = vmatprep.mubr.bf16.mxu0 %v4288_v25  ;;  %v4303_v24 = vld [vmem:[%s4497_s24 + $0x1d0] ss:$36 sps:$4 sm:$0xff]  }
 0x10b   : > { %v3455_v32 = vpop.f32.mrf.mxu0  ;;  %v3527_v33 = vpop.f32.mrf.mxu1 }
 0x10c   : > { %v4826_v34 = vadd.f32 %v3455_v32, %v3454_v30  ;;  %v4828_v35 = vadd.f32 %v3527_v33, %v3526_v31 }
 0x10d   : > { %v3457_v36 = vpop.f32.mrf.mxu0  ;;  %v3529_v37 = vpop.f32.mrf.mxu1 }
 0x10f   : > { %v3458_v42 = vpop.f32.mrf.mxu0  ;;  %v3530_v43 = vpop.f32.mrf.mxu1 }
 0x110   : > { %v4834_v44 = vadd.f32 %v3458_v42, %v3457_v36  ;;  %v4836_v45 = vadd.f32 %v3530_v43, %v3529_v37  ;;  %v4300_v42 = vld [vmem:[%s4497_s24 + $0x330] ss:$36 sps:$4 sm:$0xff]   ;;  %v4304_v43 = vld [vmem:[%s4497_s24 + $0x218] ss:$36 sps:$4 sm:$0xff]  }
 0x111   : > { %v3460_v46 = vpop.f32.mrf.mxu0  ;;  %v3548_v47 = vpop.f32.mrf.mxu1  ;;  %2260 = vmatmul.mubr.bf16.gmra.mxu1 %v4285_v38  ;;  %3909 = vmatmul.mubr.bf16.vlgmr.msra.gmra.mxu0 %v4289_v39 }
 0x112   : > { %2267 = vmatprep.mubr.bf16.mxu1 %v4292_v40  ;;  %3912 = vmatprep.mubr.bf16.mxu0 %v4293_v41 }
 0x113   : > { %v3461_v49 = vpop.f32.mrf.mxu0  ;;  %v3549_v52 = vpop.f32.mrf.mxu1 }
 0x114   : > { %v4845_v54 = vadd.f32 %v3461_v49, %v3460_v46  ;;  %v3550_v55 = vadd.f32 %v3549_v52, %v3548_v47  ;;  %v4307_v47 = vld [vmem:[%s4497_s24 + $0x37c] ss:$36 sps:$4 sm:$0xff]  }
 0x115   : > { %v3463_v56 = vpop.f32.mrf.mxu0  ;;  %v3551_v57 = vpop.f32.mrf.mxu1  ;;  %v4308_v49 = vld [vmem:[%s4497_s24 + $0x260] ss:$36 sps:$4 sm:$0xff]  }
 0x116   : > { %v4849_v62 = vadd.f32 %v3550_v55, %v1715_v53  ;;  %v1734_v55 = vadd.f32 %v4822_v28, %v4841_v48  ;;  %v1739_v28 = vadd.f32 %v4826_v34, %v4841_v48 }
 0x117   : > { %v3464_v1 = vpop.f32.mrf.mxu0  ;;  %v3552_v4 = vpop.f32.mrf.mxu1 }
 0x118   : > { %v4855_v6 = vadd.f32 %v3464_v1, %v3463_v56  ;;  %v3553_v50 = vadd.f32 %v3552_v4, %v3551_v57 }
 0x119   : > { %v3466_v7 = vpop.f32.mrf.mxu0  ;;  %v3554_v8 = vpop.f32.mrf.mxu1  ;;  %2268 = vmatmul.mubr.bf16.gmra.mxu1 %v4290_v58  ;;  %3913 = vmatmul.mubr.bf16.gmra.mxu0 %v4294_v59 }
 0x11a   : > { %v4857_v9 = vadd.f32 %v3553_v50, %v1718_v5  ;;  %2275 = vmatprep.mubr.bf16.mxu1 %v4297_v63  ;;  %3916 = vmatprep.mubr.bf16.mxu0 %v4298_v0 }
 0x11b   : > { %v3467_v10 = vpop.f32.mrf.mxu0  ;;  %v3555_v11 = vpop.f32.mrf.mxu1 }
 0x11c   : > { %v4861_v14 = vadd.f32 %v3467_v10, %v3466_v7  ;;  %v3556_v15 = vadd.f32 %v3555_v11, %v3554_v8  ;;  %v4305_v7 = vld [vmem:[%s4497_s24 + $0x378] ss:$36 sps:$4 sm:$0xff]   ;;  %v4309_v8 = vld [vmem:[%s4497_s24 + $0x2a8] ss:$36 sps:$4 sm:$0xff]  }
 0x11d   : > { %v3469_v16 = vpop.f32.mrf.mxu0  ;;  %v3557_v17 = vpop.f32.mrf.mxu1  ;;  %v4312_v11 = vld [vmem:[%s4497_s24 + $0x3c4] ss:$36 sps:$4 sm:$0xff]  }
 0x11e   : > { %v4865_v22 = vadd.f32 %v3556_v15, %v1723_v60  ;;  %v4313_v60 = vld [vmem:[%s4497_s24 + $0x2f0] ss:$36 sps:$4 sm:$0xff]  }
 0x11f   : > { %v3470_v25 = vpop.f32.mrf.mxu0  ;;  %v3558_v26 = vpop.f32.mrf.mxu1 }
 0x120   : > { %v4871_v30 = vadd.f32 %v3470_v25, %v3469_v16  ;;  %v3559_v2 = vadd.f32 %v3558_v26, %v3557_v17  ;;  %v1742_v17 = vadd.f32 %v4834_v44, %v4841_v48  ;;  %v1747_v44 = vadd.f32 %v4845_v54, %v4841_v48 }
 0x121   : > { %v3472_v31 = vpop.f32.mrf.mxu0  ;;  %v3560_v32 = vpop.f32.mrf.mxu1  ;;  %2276 = vmatmul.mubr.bf16.gmra.mxu1 %v4295_v20  ;;  %3917 = vmatmul.mubr.bf16.gmra.mxu0 %v4299_v21 }
 0x122   : > { %v4873_v33 = vadd.f32 %v3559_v2, %v1726_v27  ;;  %2283 = vmatprep.mubr.bf16.mxu1 %v4302_v23  ;;  %3920 = vmatprep.mubr.bf16.mxu0 %v4303_v24 }
 0x123   : > { %v3473_v36 = vpop.f32.mrf.mxu0  ;;  %v3561_v37 = vpop.f32.mrf.mxu1 }
 0x124   : > { %v4877_v38 = vadd.f32 %v3473_v36, %v3472_v31  ;;  %v3562_v39 = vadd.f32 %v3561_v37, %v3560_v32  ;;  %v4310_v36 = vld [vmem:[%s4497_s24 + $0x3c0] ss:$36 sps:$4 sm:$0xff]   ;;  %v4314_v37 = vld [vmem:[%s4497_s24 + $0x338] ss:$36 sps:$4 sm:$0xff]  }
 0x125   : > { %v3475_v40 = vpop.f32.mrf.mxu0  ;;  %v3563_v41 = vpop.f32.mrf.mxu1 }
 0x126   : > { %v4881_v46 = vadd.f32 %v3562_v39, %v1731_v12  ;;  %v4317_v39 = vld [vmem:[%s4497_s24 + $0x40c] ss:$36 sps:$4 sm:$0xff]  }
 0x127   : > { %v3476_v52 = vpop.f32.mrf.mxu0  ;;  %v3564_v53 = vpop.f32.mrf.mxu1 }
 0x128   : > { %v4887_v56 = vadd.f32 %v3476_v52, %v3475_v40  ;;  %v3565_v18 = vadd.f32 %v3564_v53, %v3563_v41  ;;  %v4318_v40 = vld [vmem:[%s4497_s24 + $0x380] ss:$36 sps:$4 sm:$0xff]  }
 0x129   : > { %v3478_v57 = vpop.f32.mrf.mxu0  ;;  %v3566_v58 = vpop.f32.mrf.mxu1  ;;  %2284 = vmatmul.mubr.bf16.gmra.mxu1 %v4300_v42  ;;  %3921 = vmatmul.mubr.bf16.gmra.mxu0 %v4304_v43  ;;  %v1750_v43 = vadd.f32 %v4855_v6, %v4841_v48  ;;  %v1755_v6 = vadd.f32 %v4861_v14, %v4841_v48 }
 0x12a   : > { %v4889_v59 = vadd.f32 %v3565_v18, %v1734_v55  ;;  %2291 = vmatprep.mubr.bf16.mxu1 %v4307_v47  ;;  %3924 = vmatprep.mubr.bf16.mxu0 %v4308_v49 }
 0x12b   : > { %v3479_v63 = vpop.f32.mrf.mxu0  ;;  %v3567_v0 = vpop.f32.mrf.mxu1 }
 0x12c   : > { %v4893_v1 = vadd.f32 %v3479_v63, %v3478_v57  ;;  %v3568_v4 = vadd.f32 %v3567_v0, %v3566_v58 }
 0x12d   : > { %v3481_v5 = vpop.f32.mrf.mxu0  ;;  %v3569_v50 = vpop.f32.mrf.mxu1 }
 0x12e   : > { %v4897_v10 = vadd.f32 %v3568_v4, %v1739_v28  ;;  %v4315_v28 = vld [vmem:[%s4497_s24 + $0x408] ss:$36 sps:$4 sm:$0xff]  }
 0x12f   : > { %v3482_v15 = vpop.f32.mrf.mxu0  ;;  %v3570_v16 = vpop.f32.mrf.mxu1  ;;  %v4319_v4 = vld [vmem:[%s4497_s24 + $0x3c8] ss:$36 sps:$4 sm:$0xff]  }
 0x130   : > { %v4903_v20 = vadd.f32 %v3482_v15, %v3481_v5  ;;  %v3571_v34 = vadd.f32 %v3570_v16, %v3569_v50  ;;  %v4322_v50 = vld [vmem:[%s4497_s24 + $0x454] ss:$36 sps:$4 sm:$0xff]  }
 0x131   : > { %v3484_v21 = vpop.f32.mrf.mxu0  ;;  %v3572_v23 = vpop.f32.mrf.mxu1  ;;  %2292 = vmatmul.mubr.bf16.gmra.mxu1 %v4305_v7  ;;  %3925 = vmatmul.mubr.bf16.gmra.mxu0 %v4309_v8  ;;  %v4323_v7 = vld [vmem:[%s4497_s24 + $0x410] ss:$36 sps:$4 sm:$0xff]  }
 0x132   : > { %v4905_v24 = vadd.f32 %v3571_v34, %v1742_v17  ;;  %2299 = vmatprep.mubr.bf16.mxu1 %v4312_v11  ;;  %3928 = vmatprep.mubr.bf16.mxu0 %v4313_v60  ;;  %v1758_v60 = vadd.f32 %v4871_v30, %v4841_v48 }
 0x133   : > { %v3485_v25 = vpop.f32.mrf.mxu0  ;;  %v3573_v26 = vpop.f32.mrf.mxu1 }
 0x134   : > { %v4909_v27 = vadd.f32 %v3485_v25, %v3484_v21  ;;  %v3574_v2 = vadd.f32 %v3573_v26, %v3572_v23  ;;  %v1763_v25 = vadd.f32 %v4877_v38, %v4841_v48 }
 0x135   : > { %v3487_v31 = vpop.f32.mrf.mxu0  ;;  %v3575_v32 = vpop.f32.mrf.mxu1 }
 0x136   : > { %v4913_v12 = vadd.f32 %v3574_v2, %v1747_v44 }
 0x137   : > { %v3488_v41 = vpop.f32.mrf.mxu0  ;;  %v3576_v42 = vpop.f32.mrf.mxu1 }
 0x138   : > { %v4919_v47 = vadd.f32 %v3488_v41, %v3487_v31  ;;  %v3577_v54 = vadd.f32 %v3576_v42, %v3575_v32  ;;  %v4320_v31 = vld [vmem:[%s4497_s24 + $0x450] ss:$36 sps:$4 sm:$0xff]   ;;  %v4324_v32 = vld [vmem:[%s4497_s24 + $0x458] ss:$36 sps:$4 sm:$0xff]   ;;  %s175_s24 = sand.u32 1, %s4371_s12  }
 0x139   : > { %v3490_v49 = vpop.f32.mrf.mxu0  ;;  %v3578_v52 = vpop.f32.mrf.mxu1  ;;  %2300 = vmatmul.mubr.bf16.gmra.mxu1 %v4310_v36  ;;  %3929 = vmatmul.mubr.bf16.gmra.mxu0 %v4314_v37  ;;  %s3021_s14 = sshll.u32 %s175_s24, 7 }
 0x13a   : > { %v4921_v53 = vadd.f32 %v3577_v54, %v1750_v43  ;;  %2307 = vmatprep.mubr.bf16.mxu1 %v4317_v39  ;;  %3932 = vmatprep.mubr.bf16.mxu0 %v4318_v40  ;;  %v1766_v40 = vadd.f32 %v4887_v56, %v4841_v48  ;;  %s5220_s12 = scalar_lea.vmem [#allocation2], %s3021_s14  }
 0x13b   : > { %v3491_v55 = vpop.f32.mrf.mxu0  ;;  %v3579_v18 = vpop.f32.mrf.mxu1 }
 0x13c   : > { %v4925_v57 = vadd.f32 %v3491_v55, %v3490_v49  ;;  %v3580_v58 = vadd.f32 %v3579_v18, %v3578_v52  ;;  %v1771_v55 = vadd.f32 %v4893_v1, %v4841_v48 }
 0x13d   : > { %v3493_v63 = vpop.f32.mrf.mxu0  ;;  %v3581_v0 = vpop.f32.mrf.mxu1 }
 0x13e   : > { %v4929_v5 = vadd.f32 %v3580_v58, %v1755_v6 }
 0x13f   : > { %v3494_v8 = vpop.f32.mrf.mxu0  ;;  %v3582_v11 = vpop.f32.mrf.mxu1 }
 0x140   : > { %v4935_v15 = vadd.f32 %v3494_v8, %v3493_v63  ;;  %v3583_v14 = vadd.f32 %v3582_v11, %v3581_v0 }
 0x141   : > { %v3496_v16 = vpop.f32.mrf.mxu0  ;;  %v3584_v17 = vpop.f32.mrf.mxu1  ;;  %2308 = vmatmul.mubr.bf16.gmra.mxu1 %v4315_v28  ;;  %3933 = vmatmul.mubr.bf16.gmra.mxu0 %v4319_v4  ;;  %v1774_v4 = vadd.f32 %v4903_v20, %v4841_v48 }
 0x142   : > { %v4937_v34 = vadd.f32 %v3583_v14, %v1758_v60  ;;  %2315 = vmatprep.mubr.bf16.mxu1 %v4322_v50  ;;  %3936 = vmatprep.mubr.bf16.mxu0 %v4323_v7 }
 0x143   : > { %v3497_v21 = vpop.f32.mrf.mxu0  ;;  %v3585_v23 = vpop.f32.mrf.mxu1 }
 0x144   : > { %v4941_v26 = vadd.f32 %v3497_v21, %v3496_v16  ;;  %v3586_v30 = vadd.f32 %v3585_v23, %v3584_v17  ;;  %v1779_v16 = vadd.f32 %v4909_v27, %v4841_v48 }
 0x145   : > { %v3499_v44 = vpop.f32.mrf.mxu0  ;;  %v3587_v2 = vpop.f32.mrf.mxu1 }
 0x146   : > { %v4945_v36 = vadd.f32 %v3586_v30, %v1763_v25 }
 0x147   : > { %v3500_v37 = vpop.f32.mrf.mxu0  ;;  %v3588_v39 = vpop.f32.mrf.mxu1 }
 0x148   : > { %v4949_v41 = vadd.f32 %v3500_v37, %v3499_v44  ;;  %v3589_v42 = vadd.f32 %v3588_v39, %v3587_v2 }
 0x149   : > { %v3502_v43 = vpop.f32.mrf.mxu0  ;;  %v3590_v54 = vpop.f32.mrf.mxu1  ;;  %2316 = vmatmul.mubr.bf16.gmra.mxu1 %v4320_v31  ;;  %3937 = vmatmul.mubr.bf16.gmra.mxu0 %v4324_v32  ;;  %v1782_v31 = vadd.f32 %v4919_v47, %v4841_v48 }
 0x14a   : > { %v4951_v38 = vadd.f32 %v3589_v42, %v1766_v40 }
 0x14b   : > { %v3503_v49 = vpop.f32.mrf.mxu0  ;;  %v3591_v52 = vpop.f32.mrf.mxu1 }
 0x14c   : > { %v4955_v18 = vadd.f32 %v3503_v49, %v3502_v43  ;;  %v3592_v6 = vadd.f32 %v3591_v52, %v3590_v54 }
 0x14d   : > { %v3505_v58 = vpop.f32.mrf.mxu0  ;;  %v3593_v63 = vpop.f32.mrf.mxu1 }
 0x14e   : > { %v4957_v56 = vadd.f32 %v3592_v6, %v1771_v55 }
 0x14f   : > { %v3506_v0 = vpop.f32.mrf.mxu0  ;;  %v3594_v28 = vpop.f32.mrf.mxu1 }
 0x150   : > { %v4961_v50 = vadd.f32 %v3506_v0, %v3505_v58  ;;  %v3595_v7 = vadd.f32 %v3594_v28, %v3593_v63 }
 0x151   : > { %v3596_v8 = vpop.f32.mrf.mxu1  ;;  %v3660_v11 = vpop.f32.mrf.mxu0 }
 0x152   : > { %v4963_v60 = vadd.f32 %v3595_v7, %v1774_v4 }
 0x153   : > { %v3597_v1 = vpop.f32.mrf.mxu1  ;;  %v3661_v14 = vpop.f32.mrf.mxu0 }
 0x154   : > { %v3598_v17 = vadd.f32 %v3597_v1, %v3596_v8  ;;  %v3662_v21 = vadd.f32 %v3661_v14, %v3660_v11 }
 0x155   : > { %v3599_v23 = vpop.f32.mrf.mxu1  ;;  %v3663_v25 = vpop.f32.mrf.mxu0 }
 0x156   : > { %v4967_v30 = vadd.f32 %v3598_v17, %v1779_v16  ;;  %v4970_v20 = vadd.f32 %v3662_v21, %v4849_v62  ;;  %v1787_v62 = vadd.f32 %v4925_v57, %v4841_v48 }
 0x157   : > { %v3600_v44 = vpop.f32.mrf.mxu1  ;;  %v3664_v2 = vpop.f32.mrf.mxu0 }
 0x158   : > { %v3601_v32 = vadd.f32 %v3600_v44, %v3599_v23  ;;  %v3665_v37 = vadd.f32 %v3664_v2, %v3663_v25 }
 0x159   : > { %v3602_v39 = vpop.f32.mrf.mxu1  ;;  %v3666_v40 = vpop.f32.mrf.mxu0 }
 0x15a   : > { %v4974_v42 = vadd.f32 %v3601_v32, %v1782_v31  ;;  %v4977_v27 = vadd.f32 %v3665_v37, %v4857_v9  ;;  %v1790_v9 = vadd.f32 %v4935_v15, %v4841_v48 }
 0x15b   : > { %v3603_v43 = vpop.f32.mrf.mxu1  ;;  %v3667_v54 = vpop.f32.mrf.mxu0 }
 0x15c   : > { %v3604_v49 = vadd.f32 %v3603_v43, %v3602_v39  ;;  %v3668_v52 = vadd.f32 %v3667_v54, %v3666_v40 }
 0x15d   : > { %v3605_v55 = vpop.f32.mrf.mxu1  ;;  %v3669_v6 = vpop.f32.mrf.mxu0 }
 0x15e   : > { %v4981_v58 = vadd.f32 %v3604_v49, %v1787_v62  ;;  %v4984_v47 = vadd.f32 %v3668_v52, %v4865_v22  ;;  %v1795_v22 = vadd.f32 %v4941_v26, %v4841_v48 }
 0x15f   : > { %v3606_v63 = vpop.f32.mrf.mxu1  ;;  %v3670_v0 = vpop.f32.mrf.mxu0 }
 0x160   : > { %v3607_v28 = vadd.f32 %v3606_v63, %v3605_v55  ;;  %v3671_v4 = vadd.f32 %v3670_v0, %v3669_v6 }
 0x161   : > { %v3608_v7 = vpop.f32.mrf.mxu1  ;;  %v3672_v8 = vpop.f32.mrf.mxu0 }
 0x162   : > { %v4988_v11 = vadd.f32 %v3607_v28, %v1790_v9  ;;  %v4991_v57 = vadd.f32 %v3671_v4, %v4873_v33  ;;  %v1798_v33 = vadd.f32 %v4949_v41, %v4841_v48 }
 0x163   : > { %v3609_v1 = vpop.f32.mrf.mxu1  ;;  %v3673_v14 = vpop.f32.mrf.mxu0 }
 0x164   : > { %v3610_v16 = vadd.f32 %v3609_v1, %v3608_v7  ;;  %v3674_v17 = vadd.f32 %v3673_v14, %v3672_v8 }
 0x165   : > { %v3611_v21 = vpop.f32.mrf.mxu1  ;;  %v3675_v23 = vpop.f32.mrf.mxu0 }
 0x166   : > { %v4995_v25 = vadd.f32 %v3610_v16, %v1795_v22  ;;  %v4998_v15 = vadd.f32 %v3674_v17, %v4881_v46  ;;  %v1803_v46 = vadd.f32 %v4955_v18, %v4841_v48 }
 0x167   : > { %v3612_v44 = vpop.f32.mrf.mxu1  ;;  %v3676_v2 = vpop.f32.mrf.mxu0 }
 0x168   : > { %v3613_v31 = vadd.f32 %v3612_v44, %v3611_v21  ;;  %v3677_v32 = vadd.f32 %v3676_v2, %v3675_v23 }
 0x169   : > { %v3614_v37 = vpop.f32.mrf.mxu1  ;;  %v3678_v39 = vpop.f32.mrf.mxu0 }
 0x16a   : > { %v5002_v40 = vadd.f32 %v3613_v31, %v1798_v33  ;;  %v5005_v26 = vadd.f32 %v3677_v32, %v4889_v59  ;;  %v1806_v59 = vadd.f32 %v4961_v50, %v4841_v48 }
 0x16b   : > { %v3615_v43 = vpop.f32.mrf.mxu1  ;;  %v3679_v54 = vpop.f32.mrf.mxu0 }
 0x16c   : > { %v3616_v62 = vadd.f32 %v3615_v43, %v3614_v37  ;;  %v3680_v49 = vadd.f32 %v3679_v54, %v3678_v39 }
 0x16d   : > { %v3617_v52 = vpop.f32.mrf.mxu1  ;;  %v3681_v55 = vpop.f32.mrf.mxu0 }
 0x16e   : > { %v5009_v6 = vadd.f32 %v3616_v62, %v1803_v46  ;;  %v5012_v41 = vadd.f32 %v3680_v49, %v4897_v10  ;;  %v1811_v10 = vadd.f32 %v4792_v51, %v4841_v48 }
 0x16f   : > { %v3618_v63 = vpop.f32.mrf.mxu1  ;;  %v3682_v0 = vpop.f32.mrf.mxu0 }
 0x170   : > { %v3619_v9 = vadd.f32 %v3618_v63, %v3617_v52  ;;  %v3683_v28 = vadd.f32 %v3682_v0, %v3681_v55 }
 0x171   : > { %v3620_v4 = vpop.f32.mrf.mxu1  ;;  %v3684_v7 = vpop.f32.mrf.mxu0 }
 0x172   : > { %v5016_v8 = vadd.f32 %v3619_v9, %v1806_v59  ;;  %v5019_v18 = vadd.f32 %v3683_v28, %v4905_v24  ;;  %v1814_v24 = vadd.f32 %v4800_v61, %v4841_v48 }
 0x173   : > { %v3621_v1 = vpop.f32.mrf.mxu1  ;;  %v3685_v14 = vpop.f32.mrf.mxu0 }
 0x174   : > { %v3622_v22 = vadd.f32 %v3621_v1, %v3620_v4  ;;  %v3686_v16 = vadd.f32 %v3685_v14, %v3684_v7 }
 0x175   : > { %v3623_v17 = vpop.f32.mrf.mxu1  ;;  %v3687_v21 = vpop.f32.mrf.mxu0 }
 0x176   : > { %v5023_v23 = vadd.f32 %v3622_v22, %v1811_v10  ;;  %v5026_v50 = vadd.f32 %v3686_v16, %v4913_v12  ;;  %v1819_v12 = vadd.f32 %v4804_v3, %v4841_v48 }
 0x177   : > { %v3624_v44 = vpop.f32.mrf.mxu1  ;;  %v3688_v2 = vpop.f32.mrf.mxu0 }
 0x178   : > { %v3625_v33 = vadd.f32 %v3624_v44, %v3623_v17  ;;  %v3689_v31 = vadd.f32 %v3688_v2, %v3687_v21 }
 0x179   : > { %v3626_v32 = vpop.f32.mrf.mxu1  ;;  %v3690_v37 = vpop.f32.mrf.mxu0 }
 0x17a   : > { %v5030_v39 = vadd.f32 %v3625_v33, %v1814_v24  ;;  %v5033_v51 = vadd.f32 %v3689_v31, %v4921_v53  ;;  %v1822_v53 = vadd.f32 %v4812_v13, %v4841_v48 }
 0x17b   : > { %v3627_v43 = vpop.f32.mrf.mxu1  ;;  %v3691_v54 = vpop.f32.mrf.mxu0 }
 0x17c   : > { %v3628_v46 = vadd.f32 %v3627_v43, %v3626_v32  ;;  %v3692_v62 = vadd.f32 %v3691_v54, %v3690_v37 }
 0x17d   : > { %v3629_v49 = vpop.f32.mrf.mxu1  ;;  %v3693_v52 = vpop.f32.mrf.mxu0 }
 0x17e   : > { %v5037_v55 = vadd.f32 %v3628_v46, %v1819_v12  ;;  %v5040_v61 = vadd.f32 %v3692_v62, %v4929_v5  ;;  %v1827_v5 = vadd.f32 %v4816_v19, %v4841_v48 }
 0x17f   : > { %v3630_v63 = vpop.f32.mrf.mxu1  ;;  %v3694_v0 = vpop.f32.mrf.mxu0 }
 0x180   : > { %v3631_v59 = vadd.f32 %v3630_v63, %v3629_v49  ;;  %v3695_v9 = vadd.f32 %v3694_v0, %v3693_v52 }
 0x181   : > { %v3632_v28 = vpop.f32.mrf.mxu1  ;;  %v3696_v4 = vpop.f32.mrf.mxu0 }
 0x182   : > { %v5044_v7 = vadd.f32 %v3631_v59, %v1822_v53  ;;  %v5047_v3 = vadd.f32 %v3695_v9, %v4937_v34  ;;  %v1830_v34 = vadd.f32 %v4824_v29, %v4841_v48 }
 0x183   : > { %v3633_v1 = vpop.f32.mrf.mxu1  ;;  %v3697_v14 = vpop.f32.mrf.mxu0 }
 0x184   : > { %v3634_v10 = vadd.f32 %v3633_v1, %v3632_v28  ;;  %v3698_v22 = vadd.f32 %v3697_v14, %v3696_v4 }
 0x185   : > { %v3635_v16 = vpop.f32.mrf.mxu1  ;;  %v3699_v17 = vpop.f32.mrf.mxu0 }
 0x186   : > { %v5051_v21 = vadd.f32 %v3634_v10, %v1827_v5  ;;  %v5054_v13 = vadd.f32 %v3698_v22, %v4945_v36  ;;  %v1835_v36 = vadd.f32 %v4828_v35, %v4841_v48 }
 0x187   : > { %v3636_v44 = vpop.f32.mrf.mxu1  ;;  %v3700_v2 = vpop.f32.mrf.mxu0 }
 0x188   : > { %v3637_v24 = vadd.f32 %v3636_v44, %v3635_v16  ;;  %v3701_v33 = vadd.f32 %v3700_v2, %v3699_v17 }
 0x189   : > { %v3638_v31 = vpop.f32.mrf.mxu1  ;;  %v3702_v32 = vpop.f32.mrf.mxu0 }
 0x18a   : > { %v5058_v37 = vadd.f32 %v3637_v24, %v1830_v34  ;;  %v5061_v19 = vadd.f32 %v3701_v33, %v4951_v38  ;;  %v1838_v38 = vadd.f32 %v4836_v45, %v4841_v48 }
 0x18b   : > { %v3639_v43 = vpop.f32.mrf.mxu1  ;;  %v3703_v54 = vpop.f32.mrf.mxu0 }
 0x18c   : > { %v3640_v12 = vadd.f32 %v3639_v43, %v3638_v31  ;;  %v3704_v46 = vadd.f32 %v3703_v54, %v3702_v32 }
 0x18d   : > { %v3641_v62 = vpop.f32.mrf.mxu1  ;;  %v3705_v49 = vpop.f32.mrf.mxu0 }
 0x18e   : > { %v5065_v52 = vadd.f32 %v3640_v12, %v1835_v36  ;;  %v5068_v29 = vadd.f32 %v3704_v46, %v4957_v56 }
 0x18f   : > { %v3642_v63 = vpop.f32.mrf.mxu1  ;;  %v3706_v0 = vpop.f32.mrf.mxu0 }
 0x190   : > { %v3643_v53 = vadd.f32 %v3642_v63, %v3641_v62  ;;  %v3707_v59 = vadd.f32 %v3706_v0, %v3705_v49 }
 0x191   : > { %v3708_v9 = vpop.f32.mrf.mxu0  ;;  %v3772_v28 = vpop.f32.mrf.mxu1 }
 0x192   : > { %v5072_v4 = vadd.f32 %v3643_v53, %v1838_v38  ;;  %v5075_v35 = vadd.f32 %v3707_v59, %v4963_v60 }
 0x193   : > { %v3709_v1 = vpop.f32.mrf.mxu0  ;;  %v3773_v14 = vpop.f32.mrf.mxu1 }
 0x194   : > { %v3710_v5 = vadd.f32 %v3709_v1, %v3708_v9  ;;  %v3774_v10 = vadd.f32 %v3773_v14, %v3772_v28 }
 0x195   : > { %v3711_v56 = vpop.f32.mrf.mxu0  ;;  %v5077_v22 = vpop.f32.mrf.mxu1 }
 0x196   : > { %v5080_v16 = vadd.f32 %v3710_v5, %v4967_v30  ;;  %v5083_v45 = vadd.f32 %v3774_v10, %v4970_v20 }
 0x197   : > { %v3712_v48 = vpop.f32.mrf.mxu0  ;;  %v5085_v17 = vpop.f32.mrf.mxu1 }
 0x198   : > { %v3713_v44 = vadd.f32 %v3712_v48, %v3711_v56 }
 0x199   : > { %v3714_v2 = vpop.f32.mrf.mxu0  ;;  %v5087_v60 = vpop.f32.mrf.mxu1 }
 0x19a   : > { %v5090_v34 = vadd.f32 %v3713_v44, %v4974_v42 }
 0x19b   : > { %v3715_v24 = vpop.f32.mrf.mxu0  ;;  %v5092_v33 = vpop.f32.mrf.mxu1 }
 0x19c   : > { %v3716_v31 = vadd.f32 %v3715_v24, %v3714_v2 }
 0x19d   : > { %v3717_v32 = vpop.f32.mrf.mxu0  ;;  %v5094_v30 = vpop.f32.mrf.mxu1 }
 0x19e   : > { %v5097_v20 = vadd.f32 %v3716_v31, %v4981_v58 }
 0x19f   : > { %v3718_v43 = vpop.f32.mrf.mxu0  ;;  %v5099_v54 = vpop.f32.mrf.mxu1 }
 0x1a0   : > { %v3719_v36 = vadd.f32 %v3718_v43, %v3717_v32 }
 0x1a1   : > { %v3720_v12 = vpop.f32.mrf.mxu0  ;;  %v5101_v46 = vpop.f32.mrf.mxu1 }
 0x1a2   : > { %v5104_v42 = vadd.f32 %v3719_v36, %v4988_v11 }
 0x1a3   : > { %v3721_v62 = vpop.f32.mrf.mxu0  ;;  %v5106_v49 = vpop.f32.mrf.mxu1 }
 0x1a4   : > { %v3722_v63 = vadd.f32 %v3721_v62, %v3720_v12 }
 0x1a5   : > { %v3723_v0 = vpop.f32.mrf.mxu0  ;;  %v5108_v38 = vpop.f32.mrf.mxu1 }
 0x1a6   : > { %v5111_v58 = vadd.f32 %v3722_v63, %v4995_v25 }
 0x1a7   : > { %v3724_v53 = vpop.f32.mrf.mxu0  ;;  %v5113_v59 = vpop.f32.mrf.mxu1 }
 0x1a8   : > { %5439 = vst [vmem:[#allocation3_spill] sm:$0xff] %v5111_v58  ;;  %v3725_v9 = vadd.f32 %v3724_v53, %v3723_v0 }
 0x1a9   : > { %v3726_v28 = vpop.f32.mrf.mxu0  ;;  %v5115_v1 = vpop.f32.mrf.mxu1 }
 0x1aa   : > { %v5118_v11 = vadd.f32 %v3725_v9, %v5002_v40 }
 0x1ab   : > { %v3727_v14 = vpop.f32.mrf.mxu0  ;;  %v5120_v5 = vpop.f32.mrf.mxu1 }
 0x1ac   : > { %5440 = vst [vmem:[#allocation4_spill] sm:$0xff] %v5118_v11  ;;  %v3728_v10 = vadd.f32 %v3727_v14, %v3726_v28 }
 0x1ad   : > { %v3729_v56 = vpop.f32.mrf.mxu0  ;;  %v5122_v48 = vpop.f32.mrf.mxu1 }
 0x1ae   : > { %v5125_v25 = vadd.f32 %v3728_v10, %v5009_v6 }
 0x1af   : > { %v3730_v44 = vpop.f32.mrf.mxu0  ;;  %v5127_v2 = vpop.f32.mrf.mxu1 }
 0x1b0   : > { %v3731_v24 = vadd.f32 %v3730_v44, %v3729_v56 }
 0x1b1   : > { %v3732_v31 = vpop.f32.mrf.mxu0  ;;  %v5129_v32 = vpop.f32.mrf.mxu1 }
 0x1b2   : > { %v5132_v40 = vadd.f32 %v3731_v24, %v5016_v8 }
 0x1b3   : > { %v3733_v43 = vpop.f32.mrf.mxu0  ;;  %v5134_v36 = vpop.f32.mrf.mxu1 }
 0x1b4   : > { %5441 = vst [vmem:[#allocation5_spill] sm:$0xff] %v5132_v40  ;;  %v3734_v12 = vadd.f32 %v3733_v43, %v3732_v31 }
 0x1b5   : > { %v3735_v62 = vpop.f32.mrf.mxu0  ;;  %v5136_v63 = vpop.f32.mrf.mxu1 }
 0x1b6   : > { %v5139_v6 = vadd.f32 %v3734_v12, %v5023_v23 }
 0x1b7   : > { %v3736_v0 = vpop.f32.mrf.mxu0  ;;  %v5141_v53 = vpop.f32.mrf.mxu1 }
 0x1b8   : > { %5442 = vst [vmem:[#allocation6_spill] sm:$0xff] %v5139_v6  ;;  %v3737_v9 = vadd.f32 %v3736_v0, %v3735_v62 }
 0x1b9   : > { %v3738_v28 = vpop.f32.mrf.mxu0  ;;  %v5143_v14 = vpop.f32.mrf.mxu1 }
 0x1ba   : > { %v5146_v8 = vadd.f32 %v3737_v9, %v5030_v39 }
 0x1bb   : > { %v3739_v10 = vpop.f32.mrf.mxu0  ;;  %v5148_v56 = vpop.f32.mrf.mxu1 }
 0x1bc   : > { %5443 = vst [vmem:[#allocation7_spill] sm:$0xff] %v5146_v8  ;;  %v3740_v44 = vadd.f32 %v3739_v10, %v3738_v28 }
 0x1bd   : > { %v3741_v24 = vpop.f32.mrf.mxu0  ;;  %v5150_v31 = vpop.f32.mrf.mxu1 }
 0x1be   : > { %v5153_v23 = vadd.f32 %v3740_v44, %v5037_v55 }
 0x1bf   : > { %v3742_v43 = vpop.f32.mrf.mxu0  ;;  %v5155_v12 = vpop.f32.mrf.mxu1 }
 0x1c0   : > { %5444 = vst [vmem:[#allocation8_spill] sm:$0xff] %v5153_v23  ;;  %v3743_v62 = vadd.f32 %v3742_v43, %v3741_v24 }
 0x1c1   : > { %v3744_v0 = vpop.f32.mrf.mxu0  ;;  %v5157_v6 = vpop.f32.mrf.mxu1 }
 0x1c2   : > { %v5160_v39 = vadd.f32 %v3743_v62, %v5044_v7 }
 0x1c3   : > { %v3745_v9 = vpop.f32.mrf.mxu0  ;;  %v5162_v8 = vpop.f32.mrf.mxu1 }
 0x1c4   : > { %5445 = vst [vmem:[#allocation9_spill] sm:$0xff] %v5160_v39  ;;  %v3746_v28 = vadd.f32 %v3745_v9, %v3744_v0 }
 0x1c5   : > { %v3747_v10 = vpop.f32.mrf.mxu0  ;;  %v5164_v11 = vpop.f32.mrf.mxu1 }
 0x1c6   : > { %v5167_v55 = vadd.f32 %v3746_v28, %v5051_v21  ;;  %v3780_v21 = vadd.f32 %v5092_v33, %v5087_v60 }
 0x1c7   : > { %v3748_v44 = vpop.f32.mrf.mxu0  ;;  %v5169_v23 = vpop.f32.mrf.mxu1 }
 0x1c8   : > { %5446 = vst [vmem:[#allocation10_spill] sm:$0xff] %v5167_v55  ;;  %v3749_v24 = vadd.f32 %v3748_v44, %v3747_v10  ;;  %v2206_v60 = vadd.f32 %v3780_v21, %v4984_v47  ;;  %v3786_v47 = vadd.f32 %v5106_v49, %v5101_v46 }
 0x1c9   : > { %v3750_v43 = vpop.f32.mrf.mxu0  ;;  %v5171_v40 = vpop.f32.mrf.mxu1 }
 0x1ca   : > { %v5174_v7 = vadd.f32 %v3749_v24, %v5058_v37  ;;  %v3783_v37 = vadd.f32 %v5099_v54, %v5094_v30 }
 0x1cb   : > { %v3751_v62 = vpop.f32.mrf.mxu0  ;;  %v5176_v39 = vpop.f32.mrf.mxu1 }
 0x1cc   : > { %5447 = vst [vmem:[#allocation11_spill] sm:$0xff] %v5174_v7  ;;  %v3752_v0 = vadd.f32 %v3751_v62, %v3750_v43  ;;  %v3777_v62 = vadd.f32 %v5085_v17, %v5077_v22 }
 0x1cd   : > { %v3753_v9 = vpop.f32.mrf.mxu0  ;;  %v5178_v58 = vpop.f32.mrf.mxu1 }
 0x1ce   : > { %v5183_v28 = vadd.f32 %v3752_v0, %v5065_v52  ;;  %v2201_v17 = vadd.f32 %v3777_v62, %v4977_v27 }
 0x1cf   : > { %v3754_v10 = vpop.f32.mrf.mxu0  ;;  %v5185_v44 = vpop.f32.mrf.mxu1 }
 0x1d0   : > { %5448 = vst [vmem:[#allocation12_spill] sm:$0xff] %v5183_v28  ;;  %v3755_v24 = vadd.f32 %v3754_v10, %v3753_v9  ;;  %v2209_v28 = vadd.f32 %v3783_v37, %v4991_v57  ;;  %v3792_v9 = vadd.f32 %v5120_v5, %v5115_v1  ;;  %v3795_v57 = vadd.f32 %v5127_v2, %v5122_v48 }
 0x1d1   : > { %v5189_v7 = vpop.f32.mrf.mxu1  ;;  %v3910_v43 = vpop.f32.mrf.mxu0  ;;  %v3789_v1 = vadd.f32 %v5113_v59, %v5108_v38  ;;  %v2214_v38 = vadd.f32 %v3786_v47, %v4998_v15  ;;  %v3807_v15 = vadd.f32 %v5155_v12, %v5150_v31 }
 0x1d2   : > { %v5194_v55 = vadd.f32 %v3755_v24, %v5072_v4  ;;  %v2367_v0 = vadd.f32 %v3910_v43, %v2206_v60  ;;  %v2222_v46 = vadd.f32 %v3792_v9, %v5012_v41  ;;  %v2225_v59 = vadd.f32 %v3795_v57, %v5019_v18 }
 0x1d3   : > { %v5197_v52 = vpop.f32.mrf.mxu1  ;;  %v2358_v33 = vpop.f32.mrf.mxu0  ;;  %v3804_v41 = vadd.f32 %v5148_v56, %v5143_v14  ;;  %v3801_v14 = vadd.f32 %v5141_v53, %v5136_v63 }
 0x1d4   : > { %v2359_v22 = vadd.f32 %v2358_v33, %v5083_v45  ;;  %v2487_v37 = vmax.f32 %v2367_v0, 0.0 }
 0x1d5   : > { %v5201_v30 = vpop.f32.mrf.mxu1  ;;  %v3911_v54 = vpop.f32.mrf.mxu0 }
 0x1d6   : > { %v2370_v4 = vadd.f32 %v3911_v54, %v2209_v28  ;;  %v2485_v28 = vmax.f32 %v2359_v22, 0.0  ;;  %v2217_v22 = vadd.f32 %v3789_v1, %v5005_v26 }
 0x1d7   : > { %v5209_v21 = vpop.f32.mrf.mxu1  ;;  %v2361_v10 = vpop.f32.mrf.mxu0 }
 0x1d8   : > { %v2488_v24 = vmax.f32 %v2370_v4, 0.0  ;;  %v2362_v43 = vadd.f32 %v2361_v10, %v2201_v17  ;;  %v3798_v4 = vadd.f32 %v5134_v36, %v5129_v32  ;;  %v2238_v32 = vadd.f32 %v3804_v41, %v5040_v61 }
 0x1d9   : > { %v5215_v45 = vpop.f32.mrf.mxu1  ;;  %v3914_v5 = vpop.f32.mrf.mxu0  ;;  %v2233_v61 = vadd.f32 %v3801_v14, %v5033_v51 }
 0x1da   : > { %v3333_v27 = vpack.c.bf16 %v2488_v24, %v2487_v37  ;;  %v2486_v62 = vmax.f32 %v2362_v43, 0.0  ;;  %v2383_v2 = vadd.f32 %v3914_v5, %v2222_v46  ;;  %v2230_v5 = vadd.f32 %v3798_v4, %v5026_v50 }
 0x1db   : > { %v5218_v49 = vpop.f32.mrf.mxu1  ;;  %v2374_v60 = vpop.f32.mrf.mxu0  ;;  %v3819_v50 = vadd.f32 %v5185_v44, %v5178_v58 }
 0x1dc   : > { %3405 = vst [vmem:[%s5220_s12 + $0x8] sm:$0xff] %v3333_v27   ;;  %v3328_v48 = vpack.c.bf16 %v2486_v62, %v2485_v28  ;;  %v2375_v54 = vadd.f32 %v2374_v60, %v2214_v38  ;;  %v2491_v18 = vmax.f32 %v2383_v2, 0.0  ;;  %v2241_v28 = vadd.f32 %v3807_v15, %v5047_v3 }
 0x1dd   : > { %v5225_v33 = vpop.f32.mrf.mxu1  ;;  %v3915_v0 = vpop.f32.mrf.mxu0  ;;  %v3816_v27 = vadd.f32 %v5176_v39, %v5171_v40  ;;  %v3810_v60 = vadd.f32 %v5162_v8, %v5157_v6  ;;  %v3813_v40 = vadd.f32 %v5169_v23, %v5164_v11  ;;  %v2257_v44 = vadd.f32 %v3819_v50, %v5075_v35 }
 0x1de   : > { %3329 = vst [vmem:[%s5220_s12] sm:$0xff] %v3328_v48   ;;  %v2386_v9 = vadd.f32 %v3915_v0, %v2225_v59  ;;  %v2489_v26 = vmax.f32 %v2375_v54, 0.0  ;;  %v3828_v11 = vadd.f32 %v5218_v49, %v5215_v45 }
 0x1df   : > { %v3830_v17 = vpop.f32.mrf.mxu1  ;;  %v2377_v10 = vpop.f32.mrf.mxu0  ;;  %v2254_v6 = vadd.f32 %v3816_v27, %v5068_v29  ;;  %v2246_v58 = vadd.f32 %v3810_v60, %v5054_v13  ;;  %v3822_v29 = vadd.f32 %v5197_v52, %v5189_v7 }
 0x1e0   : > { %v2492_v47 = vmax.f32 %v2386_v9, 0.0  ;;  %v2378_v57 = vadd.f32 %v2377_v10, %v2217_v22  ;;  %v3831_v13 = vadd.f32 %v3830_v17, %v5225_v33 }
 0x1e1   : > { %v5237_v56 = vpop.f32.mrf.mxu1  ;;  %v3918_v37 = vpop.f32.mrf.mxu0  ;;  %v2262_v33 = vadd.f32 %v3822_v29, %v5080_v16 }
 0x1e2   : > { %v3343_v24 = vpack.c.bf16 %v2492_v47, %v2491_v18  ;;  %v2490_v43 = vmax.f32 %v2378_v57, 0.0  ;;  %v2399_v12 = vadd.f32 %v3918_v37, %v2238_v32  ;;  %v2249_v47 = vadd.f32 %v3813_v40, %v5061_v19 }
 0x1e3   : > { %v5240_v36 = vpop.f32.mrf.mxu1  ;;  %v2390_v1 = vpop.f32.mrf.mxu0  ;;  %v2273_v17 = vadd.f32 %v3831_v13, %v5104_v42 }
 0x1e4   : > { %3407 = vst [vmem:[%s5220_s12 + $0x18] sm:$0xff] %v3343_v24   ;;  %v3338_v31 = vpack.c.bf16 %v2490_v43, %v2489_v26  ;;  %v2391_v62 = vadd.f32 %v2390_v1, %v2230_v5  ;;  %v2495_v3 = vmax.f32 %v2399_v12, 0.0  ;;  %v3825_v24 = vadd.f32 %v5209_v21, %v5201_v30 }
 0x1e5   : > { %v5245_v63 = vpop.f32.mrf.mxu1  ;;  %v3919_v53 = vpop.f32.mrf.mxu0  ;;  %v2270_v1 = vadd.f32 %v3828_v11, %v5097_v20  ;;  %v3834_v20 = vadd.f32 %v5240_v36, %v5237_v56 }
 0x1e6   : > { %3406 = vst [vmem:[%s5220_s12 + $0x10] sm:$0xff] %v3338_v31   ;;  %v2402_v46 = vadd.f32 %v3919_v53, %v2241_v28  ;;  %v2493_v41 = vmax.f32 %v2391_v62, 0.0  ;;  %v2265_v27 = vadd.f32 %v3825_v24, %v5090_v34 }
 0x1e7   : > { %v3836_v48 = vpop.f32.mrf.mxu1  ;;  %v2393_v2 = vpop.f32.mrf.mxu0 }
 0x1e8   : > { %v2496_v38 = vmax.f32 %v2402_v46, 0.0  ;;  %v2394_v59 = vadd.f32 %v2393_v2, %v2233_v61  ;;  %v3837_v42 = vadd.f32 %v3836_v48, %v5245_v63 }
 0x1e9   : > { %v3838_v39 = vpop.f32.mrf.mxu1  ;;  %v3922_v0 = vpop.f32.mrf.mxu0 }
 0x1ea   : > { %v3353_v51 = vpack.c.bf16 %v2496_v38, %v2495_v3  ;;  %v2494_v54 = vmax.f32 %v2394_v59, 0.0  ;;  %v2415_v4 = vadd.f32 %v3922_v0, %v2254_v6 }
 0x1eb   : > { %v3839_v8 = vpop.f32.mrf.mxu1  ;;  %v2406_v9 = vpop.f32.mrf.mxu0 }
 0x1ec   : > { %3409 = vst [vmem:[%s5220_s12 + $0x28] sm:$0xff] %v3353_v51   ;;  %v3348_v22 = vpack.c.bf16 %v2494_v54, %v2493_v41  ;;  %v2407_v23 = vadd.f32 %v2406_v9, %v2246_v58  ;;  %v2499_v37 = vmax.f32 %v2415_v4, 0.0  ;;  %v3840_v30 = vadd.f32 %v3839_v8, %v3838_v39  ;;  %v5449_v41 = vld [vmem:[#allocation3_spill] sm:$0xff]  ;;  %v5450_v54 = vld [vmem:[#allocation5_spill] sm:$0xff]  ;;  %v5451_v4 = vld [vmem:[#allocation4_spill] sm:$0xff] }
 0x1ed   : > { %v3841_v10 = vpop.f32.mrf.mxu1  ;;  %v3923_v15 = vpop.f32.mrf.mxu0  ;;  %v2278_v51 = vadd.f32 %v3834_v20, %v5449_v41  ;;  %v2281_v58 = vadd.f32 %v3837_v42, %v5451_v4  ;;  %v5458_v41 = vld [vmem:[#allocation11_spill] sm:$0xff] }
 0x1ee   : > { %3408 = vst [vmem:[%s5220_s12 + $0x20] sm:$0xff] %v3348_v22   ;;  %v2418_v18 = vadd.f32 %v3923_v15, %v2257_v44  ;;  %v2497_v43 = vmax.f32 %v2407_v23, 0.0  ;;  %v2286_v34 = vadd.f32 %v3840_v30, %v5125_v25 }
 0x1ef   : > { %v3842_v57 = vpop.f32.mrf.mxu1  ;;  %v2409_v14 = vpop.f32.mrf.mxu0 }
 0x1f0   : > { %v2500_v35 = vmax.f32 %v2418_v18, 0.0  ;;  %v2410_v26 = vadd.f32 %v2409_v14, %v2249_v47  ;;  %v3843_v61 = vadd.f32 %v3842_v57, %v3841_v10 }
 0x1f1   : > { %v3844_v45 = vpop.f32.mrf.mxu1  ;;  %v3926_v49 = vpop.f32.mrf.mxu0 }
 0x1f2   : > { %v3363_v32 = vpack.c.bf16 %v2500_v35, %v2499_v37  ;;  %v2498_v19 = vmax.f32 %v2410_v26, 0.0  ;;  %v2431_v12 = vadd.f32 %v3926_v49, %v2270_v1  ;;  %v2289_v6 = vadd.f32 %v3843_v61, %v5450_v54  ;;  %v5452_v35 = vld [vmem:[#allocation8_spill] sm:$0xff]  ;;  %v5454_v1 = vld [vmem:[#allocation9_spill] sm:$0xff] }
 0x1f3   : > { %v3845_v7 = vpop.f32.mrf.mxu1  ;;  %v2422_v52 = vpop.f32.mrf.mxu0 }
 0x1f4   : > { %3411 = vst [vmem:[%s5220_s12 + $0x38] sm:$0xff] %v3363_v32   ;;  %v3358_v31 = vpack.c.bf16 %v2498_v19, %v2497_v43  ;;  %v2423_v21 = vadd.f32 %v2422_v52, %v2262_v33  ;;  %v2503_v60 = vmax.f32 %v2431_v12, 0.0  ;;  %v3846_v44 = vadd.f32 %v3845_v7, %v3844_v45  ;;  %v5453_v32 = vld [vmem:[#allocation6_spill] sm:$0xff] }
 0x1f5   : > { %v3847_v5 = vpop.f32.mrf.mxu1  ;;  %v3927_v28 = vpop.f32.mrf.mxu0 }
 0x1f6   : > { %3410 = vst [vmem:[%s5220_s12 + $0x30] sm:$0xff] %v3358_v31   ;;  %v2434_v53 = vadd.f32 %v3927_v28, %v2273_v17  ;;  %v2501_v38 = vmax.f32 %v2423_v21, 0.0  ;;  %v2294_v19 = vadd.f32 %v3846_v44, %v5453_v32  ;;  %v5455_v17 = vld [vmem:[#allocation7_spill] sm:$0xff] }
 0x1f7   : > { %v3848_v62 = vpop.f32.mrf.mxu1  ;;  %v2425_v46 = vpop.f32.mrf.mxu0 }
 0x1f8   : > { %v2504_v2 = vmax.f32 %v2434_v53, 0.0  ;;  %v2426_v16 = vadd.f32 %v2425_v46, %v2265_v27  ;;  %v3849_v47 = vadd.f32 %v3848_v62, %v3847_v5 }
 0x1f9   : > { %v3850_v50 = vpop.f32.mrf.mxu1  ;;  %v3930_v3 = vpop.f32.mrf.mxu0 }
 0x1fa   : > { %v3373_v59 = vpack.c.bf16 %v2504_v2, %v2503_v60  ;;  %v2502_v40 = vmax.f32 %v2426_v16, 0.0  ;;  %v2447_v36 = vadd.f32 %v3930_v3, %v2286_v34  ;;  %v2297_v5 = vadd.f32 %v3849_v47, %v5455_v17 }
 0x1fb   : > { %v3851_v39 = vpop.f32.mrf.mxu1  ;;  %v2438_v0 = vpop.f32.mrf.mxu0 }
 0x1fc   : > { %3413 = vst [vmem:[%s5220_s12 + $0x48] sm:$0xff] %v3373_v59   ;;  %v3368_v56 = vpack.c.bf16 %v2502_v40, %v2501_v38  ;;  %v3852_v63 = vadd.f32 %v3851_v39, %v3850_v50  ;;  %v2439_v48 = vadd.f32 %v2438_v0, %v2278_v51  ;;  %v2507_v15 = vmax.f32 %v2447_v36, 0.0  ;;  %v5456_v59 = vld [vmem:[#allocation10_spill] sm:$0xff]  ;;  %v5457_v0 = vld [vmem:[#allocation12_spill] sm:$0xff] }
 0x1fd   : > { %v3853_v8 = vpop.f32.mrf.mxu1  ;;  %v3931_v9 = vpop.f32.mrf.mxu0 }
 0x1fe   : > { %3412 = vst [vmem:[%s5220_s12 + $0x40] sm:$0xff] %v3368_v56   ;;  %v2450_v22 = vadd.f32 %v3931_v9, %v2289_v6  ;;  %v2505_v14 = vmax.f32 %v2439_v48, 0.0  ;;  %v2302_v26 = vadd.f32 %v3852_v63, %v5452_v35 }
 0x1ff   : > { %v3854_v25 = vpop.f32.mrf.mxu1  ;;  %v2441_v10 = vpop.f32.mrf.mxu0 }
 0x200   : > { %v2508_v11 = vmax.f32 %v2450_v22, 0.0  ;;  %v3855_v23 = vadd.f32 %v3854_v25, %v3853_v8  ;;  %v2442_v18 = vadd.f32 %v2441_v10, %v2281_v58 }
 0x201   : > { %v3856_v29 = vpop.f32.mrf.mxu1  ;;  %v3934_v57 = vpop.f32.mrf.mxu0 }
 0x202   : > { %v3383_v13 = vpack.c.bf16 %v2508_v11, %v2507_v15  ;;  %v2506_v37 = vmax.f32 %v2442_v18, 0.0  ;;  %v2463_v43 = vadd.f32 %v3934_v57, %v2302_v26  ;;  %v2305_v7 = vadd.f32 %v3855_v23, %v5454_v1 }
 0x203   : > { %v3857_v24 = vpop.f32.mrf.mxu1  ;;  %v2454_v49 = vpop.f32.mrf.mxu0 }
 0x204   : > { %3415 = vst [vmem:[%s5220_s12 + $0x58] sm:$0xff] %v3383_v13   ;;  %v3378_v45 = vpack.c.bf16 %v2506_v37, %v2505_v14  ;;  %v2455_v12 = vadd.f32 %v2454_v49, %v2294_v19  ;;  %v2511_v21 = vmax.f32 %v2463_v43, 0.0  ;;  %v3858_v53 = vadd.f32 %v3857_v24, %v3856_v29 }
 0x205   : > { %v3859_v52 = vpop.f32.mrf.mxu1  ;;  %v3935_v31 = vpop.f32.mrf.mxu0 }
 0x206   : > { %3414 = vst [vmem:[%s5220_s12 + $0x50] sm:$0xff] %v3378_v45   ;;  %v2466_v33 = vadd.f32 %v3935_v31, %v2305_v7  ;;  %v2509_v61 = vmax.f32 %v2455_v12, 0.0  ;;  %v2310_v40 = vadd.f32 %v3858_v53, %v5456_v59 }
 0x207   : > { %v3860_v28 = vpop.f32.mrf.mxu1  ;;  %v2457_v30 = vpop.f32.mrf.mxu0 }
 0x208   : > { %v2512_v27 = vmax.f32 %v2466_v33, 0.0  ;;  %v2458_v20 = vadd.f32 %v2457_v30, %v2297_v5  ;;  %v3861_v2 = vadd.f32 %v3860_v28, %v3859_v52 }
 0x209   : > { %v3862_v62 = vpop.f32.mrf.mxu1  ;;  %v3938_v46 = vpop.f32.mrf.mxu0 }
 0x20a   : > { %v3393_v60 = vpack.c.bf16 %v2512_v27, %v2511_v21  ;;  %v2510_v16 = vmax.f32 %v2458_v20, 0.0  ;;  %v2313_v51 = vadd.f32 %v3861_v2, %v5458_v41 }
 0x20b   : > { %v3863_v42 = vpop.f32.mrf.mxu1  ;;  %v2470_v50 = vpop.f32.mrf.mxu0 }
 0x20c   : > { %3417 = vst [vmem:[%s5220_s12 + $0x68] sm:$0xff] %v3393_v60   ;;  %v3388_v3 = vpack.c.bf16 %v2510_v16, %v2509_v61  ;;  %v3864_v38 = vadd.f32 %v3863_v42, %v3862_v62  ;;  %v2471_v36 = vadd.f32 %v2470_v50, %v2310_v40 }
 0x20d   : > { %v3865_v34 = vpop.f32.mrf.mxu1  ;;  %v3939_v39 = vpop.f32.mrf.mxu0 }
 0x20e   : > { %3416 = vst [vmem:[%s5220_s12 + $0x60] sm:$0xff] %v3388_v3   ;;  %v2318_v56 = vadd.f32 %v3864_v38, %v5457_v0  ;;  %v2513_v48 = vmax.f32 %v2471_v36, 0.0 }
 0x20f   : > { %v3866_v54 = vpop.f32.mrf.mxu1  ;;  %v2473_v6 = vpop.f32.mrf.mxu0 }
 0x210   : > { %v3867_v8 = vadd.f32 %v3866_v54, %v3865_v34  ;;  %v2474_v9 = vadd.f32 %v2473_v6, %v2313_v51  ;;  %v2479_v63 = vadd.f32 %v3938_v46, %v2318_v56 }
 0x212   : > { %v2321_v22 = vadd.f32 %v3867_v8, %v5194_v55  ;;  %v2514_v4 = vmax.f32 %v2474_v9, 0.0  ;;  %v2515_v25 = vmax.f32 %v2479_v63, 0.0 }
 0x214   : > { %v2482_v58 = vadd.f32 %v3939_v39, %v2321_v22  ;;  %v3398_v44 = vpack.c.bf16 %v2514_v4, %v2513_v48 }
 0x216   : > { %v2516_v10 = vmax.f32 %v2482_v58, 0.0  ;;  %3418 = vst [vmem:[%s5220_s12 + $0x70] sm:$0xff] %v3398_v44   ;;  %2683 = sbr.rel (!%p4458_p4) target bundleno = 599 (0x257), region = 36 }
 0x218   : > { %v3403_v15 = vpack.c.bf16 %v2516_v10, %v2515_v25 }
 0x21a   : > { %3419 = vst [vmem:[%s5220_s12 + $0x78] sm:$0xff] %v3403_v15  }
 0x21b   : > { %s5466_s17 = smov (!%p2686_p8, %s2685_s17), 32 }
 0x21c   : > { %s3275_s26 = sshll.u32 %s5466_s17, 6 }
 0x21d   : > { %p3278_p9 = scmp.eq.s32.totalorder %s3275_s26, 0 }
 0x21e   : > { %s5312_s27 = sshrl.u32 (!%p3278_p9), %s5466_s17, 5 }
 0x21f   : > { %2694 = sbr.rel (%p3278_p9) target bundleno = 599 (0x257), region = 40  ;;  %p3279_p10 = scmp.le.s32.totalorder (!%p3278_p9), %s5312_s27, 0 }
 0x224   : > { %2973 = sbr.rel (%p3279_p10) target bundleno = 582 (0x246), region = 112  ;;  %s5459_s15 = smov (!%p3279_p10), %s5306_s25 }
 0x225   : > { %s5460_s20 = smov (!%p3279_p10), %s5220_s12  ;;  %s5321_s23 = smov (!%p3279_p10), 0  }
 0x226   : > { %s5323_s28 = smov (!%p3279_p10), 0  }
 0x229 LB: >> { %v2711_v55 = vld [vmem:[%s4387_s20] sm:$0xf]  ;;  %v2713_v11 = vld [vmem:[%s4387_s20 + $0x4] sm:$0xf]  ;;  %v2715_v23 = vld [vmem:[%s4387_s20 + $0x8] sm:$0xf]  ;;  %s4395_s28 = sphi %s5323_s28, %s2705_s28   ;;  %s4391_s23 = sphi %s5321_s23, %s5461_s23   ;;  %s4387_s20 = sphi %s5460_s20, %s2780_s20   ;;  %s4383_s15 = sphi %s5459_s15, %s2781_s15  }
 0x22a   : >> { %2712 = vst [vmem:[%s4383_s15] sm:$0xf] %v2711_v55  ;;  %2714 = vst [vmem:[%s4383_s15 + $0x4] sm:$0xf] %v2713_v11  ;;  %v2717_v18 = vld [vmem:[%s4387_s20 + $0xc] sm:$0xf]  ;;  %s2775_s29 = sadd.s32 1, %s4391_s23 }
 0x22b   : >> { %2716 = vst [vmem:[%s4383_s15 + $0x8] sm:$0xf] %v2715_v23  ;;  %v2719_v47 = vld [vmem:[%s4387_s20 + $0x10] sm:$0xf]  ;;  %v2721_v29 = vld [vmem:[%s4387_s20 + $0x14] sm:$0xf]  ;;  %p2776_p11 = scmp.ge.s32.totalorder %s2775_s29, %s5312_s27 }
 0x22c   : >> { %2718 = vst [vmem:[%s4383_s15 + $0xc] sm:$0xf] %v2717_v18  ;;  %2720 = vst [vmem:[%s4383_s15 + $0x10] sm:$0xf] %v2719_v47  ;;  %v2723_v57 = vld [vmem:[%s4387_s20 + $0x18] sm:$0xf] }
 0x22d   : >> { %2722 = vst [vmem:[%s4383_s15 + $0x14] sm:$0xf] %v2721_v29  ;;  %v2725_v14 = vld [vmem:[%s4387_s20 + $0x1c] sm:$0xf]  ;;  %v2727_v13 = vld [vmem:[%s4387_s20 + $0x20] sm:$0xf] }
 0x22e   : >> { %2724 = vst [vmem:[%s4383_s15 + $0x18] sm:$0xf] %v2723_v57  ;;  %2726 = vst [vmem:[%s4383_s15 + $0x1c] sm:$0xf] %v2725_v14  ;;  %v2729_v37 = vld [vmem:[%s4387_s20 + $0x24] sm:$0xf] }
 0x22f   : >> { %2728 = vst [vmem:[%s4383_s15 + $0x20] sm:$0xf] %v2727_v13  ;;  %v2731_v35 = vld [vmem:[%s4387_s20 + $0x28] sm:$0xf]  ;;  %v2733_v26 = vld [vmem:[%s4387_s20 + $0x2c] sm:$0xf] }
 0x230   : >> { %2730 = vst [vmem:[%s4383_s15 + $0x24] sm:$0xf] %v2729_v37  ;;  %2732 = vst [vmem:[%s4383_s15 + $0x28] sm:$0xf] %v2731_v35  ;;  %v2735_v24 = vld [vmem:[%s4387_s20 + $0x30] sm:$0xf] }
 0x231   : >> { %2734 = vst [vmem:[%s4383_s15 + $0x2c] sm:$0xf] %v2733_v26  ;;  %v2737_v49 = vld [vmem:[%s4387_s20 + $0x34] sm:$0xf]  ;;  %v2739_v45 = vld [vmem:[%s4387_s20 + $0x38] sm:$0xf] }
 0x232   : >> { %2736 = vst [vmem:[%s4383_s15 + $0x30] sm:$0xf] %v2735_v24  ;;  %2738 = vst [vmem:[%s4383_s15 + $0x34] sm:$0xf] %v2737_v49  ;;  %v2741_v43 = vld [vmem:[%s4387_s20 + $0x3c] sm:$0xf] }
 0x233   : >> { %2740 = vst [vmem:[%s4383_s15 + $0x38] sm:$0xf] %v2739_v45  ;;  %v2743_v32 = vld [vmem:[%s4387_s20 + $0x40] sm:$0xf]  ;;  %v2745_v19 = vld [vmem:[%s4387_s20 + $0x44] sm:$0xf] }
 0x234   : >> { %2742 = vst [vmem:[%s4383_s15 + $0x3c] sm:$0xf] %v2741_v43  ;;  %2744 = vst [vmem:[%s4383_s15 + $0x40] sm:$0xf] %v2743_v32  ;;  %v2747_v1 = vld [vmem:[%s4387_s20 + $0x48] sm:$0xf] }
 0x235   : >> { %2746 = vst [vmem:[%s4383_s15 + $0x44] sm:$0xf] %v2745_v19  ;;  %v2749_v7 = vld [vmem:[%s4387_s20 + $0x4c] sm:$0xf]  ;;  %v2751_v52 = vld [vmem:[%s4387_s20 + $0x50] sm:$0xf] }
 0x236   : >> { %2748 = vst [vmem:[%s4383_s15 + $0x48] sm:$0xf] %v2747_v1  ;;  %2750 = vst [vmem:[%s4383_s15 + $0x4c] sm:$0xf] %v2749_v7  ;;  %v2753_v31 = vld [vmem:[%s4387_s20 + $0x54] sm:$0xf] }
 0x237   : >> { %2752 = vst [vmem:[%s4383_s15 + $0x50] sm:$0xf] %v2751_v52  ;;  %v2755_v12 = vld [vmem:[%s4387_s20 + $0x58] sm:$0xf]  ;;  %v2757_v33 = vld [vmem:[%s4387_s20 + $0x5c] sm:$0xf] }
 0x238   : >> { %2754 = vst [vmem:[%s4383_s15 + $0x54] sm:$0xf] %v2753_v31  ;;  %2756 = vst [vmem:[%s4383_s15 + $0x58] sm:$0xf] %v2755_v12  ;;  %v2759_v17 = vld [vmem:[%s4387_s20 + $0x60] sm:$0xf] }
 0x239   : >> { %2758 = vst [vmem:[%s4383_s15 + $0x5c] sm:$0xf] %v2757_v33  ;;  %v2761_v5 = vld [vmem:[%s4387_s20 + $0x64] sm:$0xf]  ;;  %v2763_v28 = vld [vmem:[%s4387_s20 + $0x68] sm:$0xf] }
 0x23a   : >> { %2760 = vst [vmem:[%s4383_s15 + $0x60] sm:$0xf] %v2759_v17  ;;  %2762 = vst [vmem:[%s4383_s15 + $0x64] sm:$0xf] %v2761_v5  ;;  %v2765_v30 = vld [vmem:[%s4387_s20 + $0x6c] sm:$0xf] }
 0x23b   : >> { %2764 = vst [vmem:[%s4383_s15 + $0x68] sm:$0xf] %v2763_v28  ;;  %v2767_v21 = vld [vmem:[%s4387_s20 + $0x70] sm:$0xf]  ;;  %v2769_v53 = vld [vmem:[%s4387_s20 + $0x74] sm:$0xf] }
 0x23c   : >> { %2766 = vst [vmem:[%s4383_s15 + $0x6c] sm:$0xf] %v2765_v30  ;;  %2768 = vst [vmem:[%s4383_s15 + $0x70] sm:$0xf] %v2767_v21  ;;  %v2771_v27 = vld [vmem:[%s4387_s20 + $0x78] sm:$0xf] }
 0x23d   : >> { %2770 = vst [vmem:[%s4383_s15 + $0x74] sm:$0xf] %v2769_v53  ;;  %v2773_v20 = vld [vmem:[%s4387_s20 + $0x7c] sm:$0xf]  ;;  %2772 = vst [vmem:[%s4383_s15 + $0x78] sm:$0xf] %v2771_v27 }
 0x23e   : >> { %2774 = vst [vmem:[%s4383_s15 + $0x7c] sm:$0xf] %v2773_v20  ;;  %s5468_s29 = smov (%p2776_p11, %s2775_s29), 0  ;;  %s2705_s28 = sadd.s32 1, %s4395_s28  }
 0x23f   : >> { %s3280_s30 = sshll.u32 %s5468_s29, 7  ;;  %p2704_p12 = scmp.ge.s32.totalorder %s2705_s28, %s5312_s27 }
 0x240   : >> { %s2780_s20 = scalar_lea.vmem %s5220_s12, %s3280_s30 [#allocation2]   ;;  %s2781_s15 = scalar_lea.vmem %s5306_s25, %s3280_s30  }
 0x241   : >> { %s5461_s23 = smov %s5468_s29  ;;  %2707 = sbr.rel (!%p2704_p12) target bundleno = 553 (0x229), region = 118 }
 0x246 PF: > { %s5416_s4 = sand.u32 31, %s5466_s17   ;;  %s3323_s5 = sshll.u32 %s5312_s27, 7 }
 0x247   : > { %s2786_s6 = scalar_lea.vmem %s5220_s12, %s3323_s5 [#allocation2]   ;;  %s2788_s7 = scalar_lea.vmem %s5306_s25, %s3323_s5  }
 0x248   : > { %p3285_p13 = scmp.le.s32.totalorder %s5416_s4, 0 }
 0x249   : > { %s4397_s8 = smov (!%p3285_p13), %s2788_s7   ;;  %s4401_s9 = smov (!%p3285_p13), %s2786_s6  }
 0x24a   : > { %2987 = sbr.rel (%p3285_p13) target bundleno = 599 (0x257), region = 123  ;;  %s4405_s10 = smov (!%p3285_p13), 0  }
 0x24b   : > { %s4409_s11 = smov (!%p3285_p13), 0  }
 0x24f LB: >> { %v2798_v62 = vld [vmem:[%s4403_s9] sm:$0xf]  ;;  %s2800_s24 = sadd.s32 1, %s4407_s10  ;;  %s2792_s11 = sadd.s32 1, %s4411_s11   ;;  %s4411_s11 = sphi %s4409_s11, %s2792_s11   ;;  %s4407_s10 = sphi %s4405_s10, %s4406_s10   ;;  %s4403_s9 = sphi %s4401_s9, %s2805_s9   ;;  %s4399_s8 = sphi %s4397_s8, %s2806_s8  }
 0x250   : >> { %2799 = vst [vmem:[%s4399_s8] sm:$0xf] %v2798_v62  ;;  %p2801_p0 = scmp.ge.s32.totalorder %s2800_s24, %s5416_s4  ;;  %p2791_p1 = scmp.ge.s32.totalorder %s2792_s11, %s5416_s4 }
 0x252   : >> { %s5470_s24 = smov (%p2801_p0, %s2800_s24), 0  ;;  %2794 = sbr.rel (!%p2791_p1) target bundleno = 591 (0x24f), region = 129 }
 0x253   : >> { %s3286_s14 = sshll.u32 %s5470_s24, 2  ;;  %s4406_s10 = smov %s5470_s24  }
 0x254   : >> { %s2805_s9 = scalar_lea.vmem %s2786_s6, %s3286_s14 [#allocation2]   ;;  %s2806_s8 = scalar_lea.vmem %s2788_s7, %s3286_s14  }
 0x257 PF: > { %p10_p2 = scmp.ge.s32.totalorder %s4448_s16, 5   ;;  %s5462_s12 = smov %s4375_s13 }
 0x258   : > { %s5463_s13 = smov %s4456_s19  ;;  %s5464_s14 = smov %s4448_s16 }
 0x259   :  { %12 = sbr.rel (!%p10_p2) target bundleno = 2 (0x2), region = 140 }

// kernel: puzzle_sim_forward.21
= control target key start
LH: loop header
LB: loop body
LE: loop exit
PB: predicated region body
PF: predicated region fallthrough
CT: control target
= control target key end

     0   :  { %s1056_s12 = smov 0   ;;  %s1058_s13 = smov 0   ;;  %s1199_s0 = inlined_call_operand.vmem [shape: bf16[147,128], index: 0, kind: input, shape index: {}]   ;;  %s1200_s1 = inlined_call_operand.vmem [shape: bf16[128,128], index: 1, kind: input, shape index: {}]   ;;  %s1201_s2 = inlined_call_operand.vmem [shape: f32[1,128], index: 2, kind: input, shape index: {}]   ;;  %s1202_s3 = inlined_call_operand.vmem [shape: bf16[147,128], index: 3, kind: output, shape index: {}]  }
   0x1   :  { %s1060_s14 = smov 0  }
   0x2 LB: > { %s1069_s15 = sadd.s32 4294967295, %s1000_s14   ;;  %s1071_s16 = sadd.s32 1, %s1000_s14   ;;  %s1000_s14 = sphi %s1060_s14, %s1209_s14   ;;  %s996_s13 = sphi %s1058_s13, %s1208_s13   ;;  %s992_s12 = sphi %s1056_s12, %s1207_s12  }
   0x3   : > { %s85_s17 = ssub.s32 %s1000_s14, %s1071_s16  ;;  %s88_s18 = sadd.s32 1, %s996_s13 }
   0x4   : > { %p86_p0 = scmp.eq.s32.totalorder %s85_s17, 0  ;;  %p98_p1 = scmp.ne.s32.totalorder %s996_s13, %s992_s12 }
   0x5   : > { %p99_p2 = scmp.eq.s32.totalorder %s1069_s15, 1  ;;  %p694_p3 = scmp.ge.s32.totalorder %s1000_s14, 1 }
   0x6   : > { %s1079_s19 = scalar_select %p86_p0, %s996_s13, %s88_s18  }
   0x7   : > { %p1081_p4 = por %p99_p2, %p98_p1  ;;  %p146_p5 = scmp.lt.s32.totalorder %s1000_s14, 3 }
   0x9   : > { %p147_p6 = pnand %p694_p3, %p146_p5 }
   0xa   : > { %s1092_s25 = smul.u32 (!%p147_p6), 10, %s1069_s15  ;;  %s170_s24 = sand.u32 (!%p147_p6), 1, %s992_s12  }
   0xb   : > { %150 = sbr.rel (%p147_p6) target bundleno = 329 (0x149), region = 32 }
   0xc   : > { %p178_p7 = scmp.lt.s32.totalorder (!%p147_p6), %s1092_s25, 18  ;;  %s837_s26 = smul.u32 (!%p147_p6), 40, %s170_s24 }
   0xe   : > { %s1133_s12 = scalar_lea.vmem (!%p147_p6), [#allocation2], %s837_s26  }
  0x10   : > { %v929_v0 = vld [vmem:[%s1200_s1 + $0x38] sm:$0xff]   ;;  %v1034_v1 = vmov 0.0   ;;  %v930_v2 = vld [vmem:[%s1200_s1 + $0x30] sm:$0xff]   ;;  %vm1035_vm0 = vmmov 0   ;;  %v931_v3 = vld [vmem:[%s1200_s1 + $0x28] sm:$0xff]   ;;  %s179_s28 = scalar_select %p178_p7, %s1092_s25, 18 }
  0x11   : > { %785 = vmatprep.subr.bf16.mxu0 %v1034_v1  ;;  %821 = vmatprep.subr.bf16.mxu1 %v1034_v1  ;;  %v932_v4 = vld [vmem:[%s1200_s1 + $0x20] sm:$0xff]   ;;  %v933_v5 = vld [vmem:[%s1200_s1 + $0x18] sm:$0xff]   ;;  %v934_v6 = vld [vmem:[%s1200_s1 + $0x10] sm:$0xff]   ;;  %s445_s27 = ssub.s32 (%p1081_p4), 19, %s1092_s25 }
  0x12   : > { %786 = vmatpush3.bf16.msra.mxu0 %v929_v0  ;;  %829 = vmatpush3.bf16.msra.mxu1 %v929_v0  ;;  %s695_s29 = sshll.u32 %s179_s28, 2  ;;  %v935_v7 = vld [vmem:[%s1200_s1 + $0x8] sm:$0xff]   ;;  %v936_v8 = vld [vmem:[%s1200_s1] sm:$0xff]   ;;  %s742_s28 = smul.u32 (%p1081_p4), 40, %s1069_s15 }
  0x13   : > { %787 = vmatprep.subr.bf16.mxu0 %v1034_v1  ;;  %822 = vmatprep.subr.bf16.mxu1 %v1034_v1  ;;  %s1104_s5 = scalar_lea.vmem %s1199_s0, %s695_s29  ;;  %v696_v14 = vld [vmem:[%s1201_s2] ss:$0 sm:$0xff]  ;;  %p446_p8 = scmp.lt.s32.totalorder (%p1081_p4), %s445_s27, 10 }
  0x14   : > { %801 = vmatprep.mubr.msk.bf16.mxu0 %vm1035_vm0, %v1034_v1  ;;  %813 = vmatprep.mubr.msk.bf16.mxu1 %vm1035_vm0, %v1034_v1  ;;  %v937_v9 = vld [vmem:[%s1104_s5] sm:$0xff]   ;;  %v938_v10 = vld [vmem:[%s1104_s5 + $0x18] sm:$0xff]   ;;  %v939_v11 = vld [vmem:[%s1104_s5 + $0x8] sm:$0xff]   ;;  %s1147_s4 = scalar_lea.vmem (%p1081_p4), %s1202_s3, %s742_s28  }
  0x15   : > { %v940_v12 = vld [vmem:[%s1104_s5 + $0x20] sm:$0xff]   ;;  %v941_v13 = vld [vmem:[%s1104_s5 + $0x10] sm:$0xff]  }
  0x16   : > { %788 = vmatpush3.bf16.msra.mxu0 %v930_v2  ;;  %830 = vmatpush3.bf16.msra.mxu1 %v930_v2 }
  0x17   : > { %789 = vmatprep.subr.bf16.mxu0 %v1034_v1  ;;  %823 = vmatprep.subr.bf16.mxu1 %v1034_v1 }
  0x1a   : > { %790 = vmatpush3.bf16.msra.mxu0 %v931_v3  ;;  %831 = vmatpush3.bf16.msra.mxu1 %v931_v3 }
  0x1b   : > { %791 = vmatprep.subr.bf16.mxu0 %v1034_v1  ;;  %824 = vmatprep.subr.bf16.mxu1 %v1034_v1 }
  0x1e   : > { %792 = vmatpush3.bf16.msra.mxu0 %v932_v4  ;;  %832 = vmatpush3.bf16.msra.mxu1 %v932_v4 }
  0x1f   : > { %793 = vmatprep.subr.bf16.mxu0 %v1034_v1  ;;  %825 = vmatprep.subr.bf16.mxu1 %v1034_v1 }
  0x22   : > { %794 = vmatpush3.bf16.msra.mxu0 %v933_v5  ;;  %833 = vmatpush3.bf16.msra.mxu1 %v933_v5 }
  0x23   : > { %795 = vmatprep.subr.bf16.mxu0 %v1034_v1  ;;  %826 = vmatprep.subr.bf16.mxu1 %v1034_v1 }
  0x26   : > { %796 = vmatpush3.bf16.msra.mxu0 %v934_v6  ;;  %834 = vmatpush3.bf16.msra.mxu1 %v934_v6 }
  0x27   : > { %797 = vmatprep.subr.bf16.mxu0 %v1034_v1  ;;  %827 = vmatprep.subr.bf16.mxu1 %v1034_v1 }
  0x2a   : > { %798 = vmatpush3.bf16.msra.mxu0 %v935_v7  ;;  %835 = vmatpush3.bf16.msra.mxu1 %v935_v7 }
  0x2b   : > { %799 = vmatprep.subr.bf16.mxu0 %v1034_v1  ;;  %828 = vmatprep.subr.bf16.mxu1 %v1034_v1 }
  0x2e   : > { %800 = vmatpush3.bf16.msra.mxu0 %v936_v8  ;;  %836 = vmatpush3.bf16.msra.mxu1 %v936_v8 }
  0x31   : > { %802 = vmatmul.mubr.bf16.vlgmr.msra.gmra.mxu0 %v937_v9  ;;  %814 = vmatmul.mubr.bf16.vlgmr.msra.gmra.mxu1 %v938_v10 }
  0x32   : > { %805 = vmatprep.mubr.msk.bf16.mxu0 %vm1035_vm0, %v1034_v1  ;;  %817 = vmatprep.mubr.msk.bf16.mxu1 %vm1035_vm0, %v1034_v1 }
  0x39   : > { %806 = vmatmul.mubr.bf16.gmra.mxu0 %v939_v11  ;;  %818 = vmatmul.mubr.bf16.gmra.mxu1 %v940_v12 }
  0x3a   : > { %809 = vmatprep.mubr.msk.bf16.mxu0 %vm1035_vm0, %v1034_v1 }
  0x41   : > { %810 = vmatmul.mubr.bf16.gmra.mxu0 %v941_v13 }
  0xf1   : > { %v338_v15 = vpop.f32.mrf.mxu0  ;;  %v362_v16 = vpop.f32.mrf.mxu1 }
  0xf2   : > { %v363_v17 = vadd.f32 %v696_v14, %v362_v16  ;;  %v339_v20 = vadd.f32 %v696_v14, %v338_v15 }
  0xf3   : > { %v803_v18 = vpop.f32.mrf.mxu0  ;;  %v815_v19 = vpop.f32.mrf.mxu1 }
  0xf4   : > { %v383_v23 = vmax.f32 %v363_v17, 0.0  ;;  %v377_v28 = vmax.f32 %v339_v20, 0.0 }
  0xf5   : > { %v341_v21 = vpop.f32.mrf.mxu0  ;;  %v365_v22 = vpop.f32.mrf.mxu1 }
  0xf6   : > { %v342_v24 = vadd.f32 %v696_v14, %v341_v21  ;;  %v366_v25 = vadd.f32 %v696_v14, %v365_v22 }
  0xf7   : > { %v804_v26 = vpop.f32.mrf.mxu0  ;;  %v816_v27 = vpop.f32.mrf.mxu1 }
  0xf8   : > { %v378_v29 = vmax.f32 %v342_v24, 0.0  ;;  %v384_v30 = vmax.f32 %v366_v25, 0.0 }
  0xf9   : > { %v346_v31 = vpop.f32.mrf.mxu0  ;;  %v370_v32 = vpop.f32.mrf.mxu1 }
  0xfa   : > { %v746_v33 = vpack.c.bf16 %v378_v29, %v377_v28  ;;  %v761_v34 = vpack.c.bf16 %v384_v30, %v383_v23  ;;  %v371_v35 = vadd.f32 %v696_v14, %v370_v32  ;;  %v347_v38 = vadd.f32 %v696_v14, %v346_v31 }
  0xfb   : > { %v807_v36 = vpop.f32.mrf.mxu0  ;;  %v819_v37 = vpop.f32.mrf.mxu1 }
  0xfc   : > { %747 = vst [vmem:[%s1133_s12] sm:$0xff] %v746_v33   ;;  %770 = vst [vmem:[%s1133_s12 + $0x18] sm:$0xff] %v761_v34   ;;  %v385_v41 = vmax.f32 %v371_v35, 0.0  ;;  %v379_v46 = vmax.f32 %v347_v38, 0.0 }
  0xfd   : > { %v349_v39 = vpop.f32.mrf.mxu0  ;;  %v373_v40 = vpop.f32.mrf.mxu1 }
  0xfe   : > { %v350_v42 = vadd.f32 %v696_v14, %v349_v39  ;;  %v374_v43 = vadd.f32 %v696_v14, %v373_v40 }
  0xff   : > { %v808_v44 = vpop.f32.mrf.mxu0  ;;  %v820_v45 = vpop.f32.mrf.mxu1 }
 0x100   : > { %v380_v47 = vmax.f32 %v350_v42, 0.0  ;;  %v386_v48 = vmax.f32 %v374_v43, 0.0 }
 0x101   : > { %v354_v49 = vpop.f32.mrf.mxu0 }
 0x102   : > { %v751_v50 = vpack.c.bf16 %v380_v47, %v379_v46  ;;  %v766_v51 = vpack.c.bf16 %v386_v48, %v385_v41  ;;  %v355_v53 = vadd.f32 %v696_v14, %v354_v49 }
 0x103   : > { %v811_v52 = vpop.f32.mrf.mxu0 }
 0x104   : > { %768 = vst [vmem:[%s1133_s12 + $0x8] sm:$0xff] %v751_v50   ;;  %771 = vst [vmem:[%s1133_s12 + $0x20] sm:$0xff] %v766_v51   ;;  %v381_v57 = vmax.f32 %v355_v53, 0.0 }
 0x105   : > { %v357_v54 = vpop.f32.mrf.mxu0 }
 0x106   : > { %v358_v55 = vadd.f32 %v696_v14, %v357_v54 }
 0x107   : > { %v812_v56 = vpop.f32.mrf.mxu0 }
 0x108   : > { %v382_v58 = vmax.f32 %v358_v55, 0.0  ;;  %443 = sbr.rel (!%p1081_p4) target bundleno = 329 (0x149), region = 36 }
 0x10a   : > { %v756_v59 = vpack.c.bf16 %v382_v58, %v381_v57 }
 0x10c   : > { %769 = vst [vmem:[%s1133_s12 + $0x10] sm:$0xff] %v756_v59  }
 0x10d   : > { %s1211_s27 = smov (!%p446_p8, %s445_s27), 10 }
 0x10e   : > { %s720_s5 = sshll.u32 %s1211_s27, 6 }
 0x10f   : > { %p723_p9 = scmp.eq.s32.totalorder %s720_s5, 0 }
 0x110   : > { %942 = sdivrem.u32 (!%p723_p9), %s1211_s27, 10 }
 0x111   : > { %454 = sbr.rel (%p723_p9) target bundleno = 329 (0x149), region = 40 }
 0x119   : > { %s1153_s20 = spop.drf %942 }
 0x11a   : > { %p724_p10 = scmp.le.s32.totalorder %s1153_s20, 0 }
 0x11b   : > { %s1204_s15 = smov (!%p724_p10), %s1147_s4  ;;  %s1205_s25 = smov (!%p724_p10), %s1133_s12 }
 0x11c   : > { %647 = sbr.rel (%p724_p10) target bundleno = 304 (0x130), region = 112  ;;  %s1162_s6 = smov (!%p724_p10), 0  }
 0x11d   : > { %s1164_s7 = smov (!%p724_p10), 0  }
 0x121 LB: >> { %v472_v60 = vld [vmem:[%s1008_s25] sm:$0xf]  ;;  %v474_v61 = vld [vmem:[%s1008_s25 + $0x4] sm:$0xf]  ;;  %v476_v62 = vld [vmem:[%s1008_s25 + $0x8] sm:$0xf]  ;;  %s1016_s7 = sphi %s1164_s7, %s466_s7   ;;  %s1012_s6 = sphi %s1162_s6, %s1206_s6   ;;  %s1008_s25 = sphi %s1205_s25, %s497_s25   ;;  %s1004_s15 = sphi %s1204_s15, %s498_s15  }
 0x122   : >> { %473 = vst [vmem:[%s1004_s15] sm:$0xf] %v472_v60  ;;  %475 = vst [vmem:[%s1004_s15 + $0x4] sm:$0xf] %v474_v61  ;;  %v478_v63 = vld [vmem:[%s1008_s25 + $0xc] sm:$0xf]  ;;  %s492_s8 = sadd.s32 1, %s1012_s6 }
 0x123   : >> { %477 = vst [vmem:[%s1004_s15 + $0x8] sm:$0xf] %v476_v62  ;;  %v480_v0 = vld [vmem:[%s1008_s25 + $0x10] sm:$0xf]  ;;  %v482_v1 = vld [vmem:[%s1008_s25 + $0x14] sm:$0xf]  ;;  %p493_p11 = scmp.ge.s32.totalorder %s492_s8, %s1153_s20 }
 0x124   : >> { %479 = vst [vmem:[%s1004_s15 + $0xc] sm:$0xf] %v478_v63  ;;  %481 = vst [vmem:[%s1004_s15 + $0x10] sm:$0xf] %v480_v0  ;;  %v484_v2 = vld [vmem:[%s1008_s25 + $0x18] sm:$0xf] }
 0x125   : >> { %483 = vst [vmem:[%s1004_s15 + $0x14] sm:$0xf] %v482_v1  ;;  %v486_v3 = vld [vmem:[%s1008_s25 + $0x1c] sm:$0xf]  ;;  %v488_v4 = vld [vmem:[%s1008_s25 + $0x20] sm:$0xf] }
 0x126   : >> { %485 = vst [vmem:[%s1004_s15 + $0x18] sm:$0xf] %v484_v2  ;;  %487 = vst [vmem:[%s1004_s15 + $0x1c] sm:$0xf] %v486_v3  ;;  %v490_v5 = vld [vmem:[%s1008_s25 + $0x24] sm:$0xf] }
 0x127   : >> { %489 = vst [vmem:[%s1004_s15 + $0x20] sm:$0xf] %v488_v4  ;;  %491 = vst [vmem:[%s1004_s15 + $0x24] sm:$0xf] %v490_v5  ;;  %s1213_s8 = smov (%p493_p11, %s492_s8), 0  ;;  %s466_s7 = sadd.s32 1, %s1016_s7  }
 0x128   : >> { %s495_s9 = smul.u32 40, %s1213_s8  ;;  %p465_p12 = scmp.ge.s32.totalorder %s466_s7, %s1153_s20 }
 0x129   : >> { %s1206_s6 = smov %s1213_s8 }
 0x12a   : >> { %s497_s25 = scalar_lea.vmem %s1133_s12, %s495_s9 [#allocation2]   ;;  %s498_s15 = scalar_lea.vmem %s1147_s4, %s495_s9  }
 0x12b   : > { %468 = sbr.rel (!%p465_p12) target bundleno = 289 (0x121), region = 118 }
 0x130 PF: > { %944 = sdivrem.u32 %s1211_s27, 10 }
 0x131   : > { %s725_s10 = smul.u32 40, %s1153_s20 }
 0x133   : > { %s503_s11 = scalar_lea.vmem %s1133_s12, %s725_s10 [#allocation2]   ;;  %s505_s14 = scalar_lea.vmem %s1147_s4, %s725_s10  }
 0x139   : > { %s945_s17 = spop.drf %944 }
 0x13a   : > { %p727_p13 = scmp.le.s32.totalorder %s945_s17, 0 }
 0x13b   : > { %s1018_s18 = smov (!%p727_p13), %s505_s14   ;;  %s1022_s21 = smov (!%p727_p13), %s503_s11  }
 0x13c   : > { %661 = sbr.rel (%p727_p13) target bundleno = 329 (0x149), region = 123  ;;  %s1026_s22 = smov (!%p727_p13), 0  }
 0x13d   : > { %s1030_s23 = smov (!%p727_p13), 0  }
 0x141 LB: >> { %v515_v6 = vld [vmem:[%s1024_s21] sm:$0xf]  ;;  %s517_s24 = sadd.s32 1, %s1028_s22  ;;  %s509_s23 = sadd.s32 1, %s1032_s23   ;;  %s1032_s23 = sphi %s1030_s23, %s509_s23   ;;  %s1028_s22 = sphi %s1026_s22, %s1027_s22   ;;  %s1024_s21 = sphi %s1022_s21, %s522_s21   ;;  %s1020_s18 = sphi %s1018_s18, %s523_s18  }
 0x142   : >> { %516 = vst [vmem:[%s1020_s18] sm:$0xf] %v515_v6  ;;  %p518_p0 = scmp.ge.s32.totalorder %s517_s24, %s945_s17  ;;  %p508_p1 = scmp.ge.s32.totalorder %s509_s23, %s945_s17 }
 0x144   : >> { %s1215_s24 = smov (%p518_p0, %s517_s24), 0  ;;  %511 = sbr.rel (!%p508_p1) target bundleno = 321 (0x141), region = 129 }
 0x145   : >> { %s728_s26 = sshll.u32 %s1215_s24, 2  ;;  %s1027_s22 = smov %s1215_s24  }
 0x146   : >> { %s522_s21 = scalar_lea.vmem %s503_s11, %s728_s26 [#allocation2]   ;;  %s523_s18 = scalar_lea.vmem %s505_s14, %s728_s26  }
 0x149 PF: > { %p10_p2 = scmp.ge.s32.totalorder %s1071_s16, 4   ;;  %s1207_s12 = smov %s996_s13 }
 0x14a   : > { %s1208_s13 = smov %s1079_s19  ;;  %s1209_s14 = smov %s1071_s16 }
 0x14b   :  { %12 = sbr.rel (!%p10_p2) target bundleno = 2 (0x2), region = 140 }

// kernel: puzzle_sim_forward.23
= control target key start
LH: loop header
LB: loop body
LE: loop exit
PB: predicated region body
PF: predicated region fallthrough
CT: control target
= control target key end

     0   :  { %s1174_s12 = smov 0   ;;  %s1176_s13 = smov 0   ;;  %s1341_s0 = inlined_call_operand.vmem [shape: bf16[147,256], index: 0, kind: input, shape index: {}]   ;;  %s1342_s1 = inlined_call_operand.vmem [shape: bf16[256,128], index: 1, kind: input, shape index: {}]   ;;  %s1343_s2 = inlined_call_operand.vmem [shape: f32[1,128], index: 2, kind: input, shape index: {}]   ;;  %s1344_s3 = inlined_call_operand.vmem [shape: bf16[147,128], index: 3, kind: output, shape index: {}]  }
   0x1   :  { %s1178_s14 = smov 0  }
   0x2 LB: > { %s1187_s15 = sadd.s32 4294967295, %s1120_s14   ;;  %s1189_s16 = sadd.s32 1, %s1120_s14   ;;  %s1120_s14 = sphi %s1178_s14, %s1351_s14   ;;  %s1116_s13 = sphi %s1176_s13, %s1350_s13   ;;  %s1112_s12 = sphi %s1174_s12, %s1349_s12  }
   0x3   : > { %s85_s17 = ssub.s32 %s1120_s14, %s1189_s16  ;;  %s88_s18 = sadd.s32 1, %s1116_s13 }
   0x4   : > { %p86_p0 = scmp.eq.s32.totalorder %s85_s17, 0  ;;  %p98_p1 = scmp.ne.s32.totalorder %s1116_s13, %s1112_s12 }
   0x5   : > { %p99_p2 = scmp.eq.s32.totalorder %s1187_s15, 1  ;;  %p786_p3 = scmp.ge.s32.totalorder %s1120_s14, 1 }
   0x6   : > { %s1197_s19 = scalar_select %p86_p0, %s1116_s13, %s88_s18  }
   0x7   : > { %p1199_p4 = por %p99_p2, %p98_p1  ;;  %p149_p5 = scmp.lt.s32.totalorder %s1120_s14, 3 }
   0x9   : > { %p150_p6 = pnand %p786_p3, %p149_p5 }
   0xa   : > { %s1207_s23 = smul.u32 (!%p150_p6), 10, %s1187_s15  ;;  %s175_s18 = sand.u32 (!%p150_p6), 1, %s1112_s12  }
   0xb   : > { %153 = sbr.rel (%p150_p6) target bundleno = 333 (0x14d), region = 32 }
   0xc   : > { %p184_p7 = scmp.lt.s32.totalorder (!%p150_p6), %s1207_s23, 18  ;;  %s941_s21 = smul.u32 (!%p150_p6), 40, %s175_s18 }
   0xe   : > { %s1275_s12 = scalar_lea.vmem (!%p150_p6), [#allocation2], %s941_s21  }
  0x10   : > { %v1031_v0 = vld [vmem:[%s1342_s1 + $0x78] sm:$0xff]   ;;  %v1033_v2 = vld [vmem:[%s1342_s1 + $0x70] sm:$0xff]   ;;  %v1035_v4 = vld [vmem:[%s1342_s1 + $0x68] sm:$0xff]   ;;  %s185_s7 = scalar_select %p184_p7, %s1207_s23, 18 }
  0x11   : > { %v1032_v1 = vld [vmem:[%s1342_s1 + $0x38] sm:$0xff]   ;;  %879 = vmatprep.subr.bf16.mxu0 %v1031_v0  ;;  %925 = vmatprep.subr.bf16.mxu1 %v1031_v0  ;;  %v1034_v3 = vld [vmem:[%s1342_s1 + $0x30] sm:$0xff]   ;;  %v1036_v5 = vld [vmem:[%s1342_s1 + $0x28] sm:$0xff]   ;;  %s537_s22 = ssub.s32 (%p1199_p4), 19, %s1207_s23 }
  0x12   : > { %880 = vmatpush3.bf16.msra.mxu0 %v1032_v1  ;;  %933 = vmatpush3.bf16.msra.mxu1 %v1032_v1  ;;  %v1037_v6 = vld [vmem:[%s1342_s1 + $0x60] sm:$0xff]   ;;  %s838_s14 = sshll.u32 %s185_s7, 3  ;;  %v1039_v8 = vld [vmem:[%s1342_s1 + $0x58] sm:$0xff]   ;;  %v1041_v10 = vld [vmem:[%s1342_s1 + $0x50] sm:$0xff]   ;;  %p538_p8 = scmp.lt.s32.totalorder (%p1199_p4), %s537_s22, 10 }
  0x13   : > { %881 = vmatprep.subr.bf16.mxu0 %v1033_v2  ;;  %926 = vmatprep.subr.bf16.mxu1 %v1033_v2  ;;  %v1038_v7 = vld [vmem:[%s1342_s1 + $0x20] sm:$0xff]   ;;  %s1238_s24 = scalar_lea.vmem %s1341_s0, %s838_s14  ;;  %v1040_v9 = vld [vmem:[%s1342_s1 + $0x18] sm:$0xff]   ;;  %v1042_v13 = vld [vmem:[%s1342_s1 + $0x10] sm:$0xff]  }
  0x14   : > { %v1049_v11 = vld [vmem:[%s1238_s24 + $0x4] ss:$8 sps:$4 sm:$0xff]   ;;  %v1052_v12 = vld [vmem:[%s1238_s24 + $0x34] ss:$8 sps:$4 sm:$0xff]   ;;  %v1047_v18 = vld [vmem:[%s1238_s24] ss:$8 sps:$4 sm:$0xff]  }
  0x15   : > { %v1043_v14 = vld [vmem:[%s1342_s1 + $0x48] sm:$0xff]   ;;  %428 = vmatprep.mubr.bf16.mxu0 %v1049_v11  ;;  %452 = vmatprep.mubr.bf16.mxu1 %v1052_v12  ;;  %v1045_v16 = vld [vmem:[%s1342_s1 + $0x40] sm:$0xff]   ;;  %v1050_v19 = vld [vmem:[%s1238_s24 + $0x30] ss:$8 sps:$4 sm:$0xff]  }
  0x16   : > { %882 = vmatpush3.bf16.msra.mxu0 %v1034_v3  ;;  %934 = vmatpush3.bf16.msra.mxu1 %v1034_v3  ;;  %v1044_v15 = vld [vmem:[%s1342_s1 + $0x8] sm:$0xff]   ;;  %v1046_v17 = vld [vmem:[%s1342_s1] sm:$0xff]   ;;  %v1053_v20 = vld [vmem:[%s1238_s24 + $0x14] ss:$8 sps:$4 sm:$0xff]  }
  0x17   : > { %883 = vmatprep.subr.bf16.mxu0 %v1035_v4  ;;  %927 = vmatprep.subr.bf16.mxu1 %v1035_v4  ;;  %v1056_v21 = vld [vmem:[%s1238_s24 + $0x44] ss:$8 sps:$4 sm:$0xff]   ;;  %v1055_v22 = vld [vmem:[%s1238_s24 + $0x10] ss:$8 sps:$4 sm:$0xff]   ;;  %v1058_v23 = vld [vmem:[%s1238_s24 + $0x40] ss:$8 sps:$4 sm:$0xff]  }
  0x18   : > { %v1059_v24 = vld [vmem:[%s1238_s24 + $0x24] ss:$8 sps:$4 sm:$0xff]   ;;  %v1061_v25 = vld [vmem:[%s1238_s24 + $0x20] ss:$8 sps:$4 sm:$0xff]   ;;  %s849_s24 = smul.u32 (%p1199_p4), 40, %s1187_s15 }
  0x19   : > { %v789_v30 = vld [vmem:[%s1343_s2] ss:$0 sm:$0xff] }
  0x1a   : > { %884 = vmatpush3.bf16.msra.mxu0 %v1036_v5  ;;  %935 = vmatpush3.bf16.msra.mxu1 %v1036_v5  ;;  %s1289_s27 = scalar_lea.vmem (%p1199_p4), %s1344_s3, %s849_s24  }
  0x1b   : > { %885 = vmatprep.subr.bf16.mxu0 %v1037_v6  ;;  %928 = vmatprep.subr.bf16.mxu1 %v1037_v6 }
  0x1e   : > { %886 = vmatpush3.bf16.msra.mxu0 %v1038_v7  ;;  %936 = vmatpush3.bf16.msra.mxu1 %v1038_v7 }
  0x1f   : > { %887 = vmatprep.subr.bf16.mxu0 %v1039_v8  ;;  %929 = vmatprep.subr.bf16.mxu1 %v1039_v8 }
  0x22   : > { %888 = vmatpush3.bf16.msra.mxu0 %v1040_v9  ;;  %937 = vmatpush3.bf16.msra.mxu1 %v1040_v9 }
  0x23   : > { %889 = vmatprep.subr.bf16.mxu0 %v1041_v10  ;;  %930 = vmatprep.subr.bf16.mxu1 %v1041_v10 }
  0x26   : > { %890 = vmatpush3.bf16.msra.mxu0 %v1042_v13  ;;  %938 = vmatpush3.bf16.msra.mxu1 %v1042_v13 }
  0x27   : > { %891 = vmatprep.subr.bf16.mxu0 %v1043_v14  ;;  %931 = vmatprep.subr.bf16.mxu1 %v1043_v14 }
  0x2a   : > { %892 = vmatpush3.bf16.msra.mxu0 %v1044_v15  ;;  %939 = vmatpush3.bf16.msra.mxu1 %v1044_v15 }
  0x2b   : > { %893 = vmatprep.subr.bf16.mxu0 %v1045_v16  ;;  %932 = vmatprep.subr.bf16.mxu1 %v1045_v16 }
  0x2e   : > { %894 = vmatpush3.bf16.msra.mxu0 %v1046_v17  ;;  %940 = vmatpush3.bf16.msra.mxu1 %v1046_v17 }
  0x31   : > { %429 = vmatmul.mubr.bf16.vlgmr.msra.gmra.mxu0 %v1047_v18  ;;  %453 = vmatmul.mubr.bf16.vlgmr.msra.gmra.mxu1 %v1050_v19 }
  0x32   : > { %436 = vmatprep.mubr.bf16.mxu0 %v1053_v20  ;;  %460 = vmatprep.mubr.bf16.mxu1 %v1056_v21 }
  0x39   : > { %437 = vmatmul.mubr.bf16.gmra.mxu0 %v1055_v22  ;;  %461 = vmatmul.mubr.bf16.gmra.mxu1 %v1058_v23 }
  0x3a   : > { %444 = vmatprep.mubr.bf16.mxu0 %v1059_v24 }
  0x41   : > { %445 = vmatmul.mubr.bf16.gmra.mxu0 %v1061_v25 }
  0xf1   : > { %v895_v26 = vpop.f32.mrf.mxu0  ;;  %v913_v27 = vpop.f32.mrf.mxu1 }
  0xf3   : > { %v896_v28 = vpop.f32.mrf.mxu0  ;;  %v914_v29 = vpop.f32.mrf.mxu1 }
  0xf4   : > { %v897_v31 = vadd.f32 %v896_v28, %v895_v26  ;;  %v915_v32 = vadd.f32 %v914_v29, %v913_v27 }
  0xf5   : > { %v898_v33 = vpop.f32.mrf.mxu0  ;;  %v916_v34 = vpop.f32.mrf.mxu1 }
  0xf6   : > { %v455_v35 = vadd.f32 %v915_v32, %v789_v30  ;;  %v431_v36 = vadd.f32 %v897_v31, %v789_v30 }
  0xf7   : > { %v899_v37 = vpop.f32.mrf.mxu0  ;;  %v917_v38 = vpop.f32.mrf.mxu1 }
  0xf8   : > { %v900_v39 = vadd.f32 %v899_v37, %v898_v33  ;;  %v918_v40 = vadd.f32 %v917_v38, %v916_v34  ;;  %v475_v43 = vmax.f32 %v455_v35, 0.0  ;;  %v469_v46 = vmax.f32 %v431_v36, 0.0 }
  0xf9   : > { %v901_v41 = vpop.f32.mrf.mxu0  ;;  %v919_v42 = vpop.f32.mrf.mxu1 }
  0xfa   : > { %v434_v44 = vadd.f32 %v900_v39, %v789_v30  ;;  %v458_v45 = vadd.f32 %v918_v40, %v789_v30 }
  0xfb   : > { %v902_v47 = vpop.f32.mrf.mxu0  ;;  %v920_v48 = vpop.f32.mrf.mxu1 }
  0xfc   : > { %v470_v49 = vmax.f32 %v434_v44, 0.0  ;;  %v476_v50 = vmax.f32 %v458_v45, 0.0  ;;  %v903_v51 = vadd.f32 %v902_v47, %v901_v41  ;;  %v921_v52 = vadd.f32 %v920_v48, %v919_v42 }
  0xfd   : > { %v904_v53 = vpop.f32.mrf.mxu0  ;;  %v922_v54 = vpop.f32.mrf.mxu1 }
  0xfe   : > { %v853_v55 = vpack.c.bf16 %v470_v49, %v469_v46  ;;  %v868_v56 = vpack.c.bf16 %v476_v50, %v475_v43  ;;  %v463_v57 = vadd.f32 %v921_v52, %v789_v30  ;;  %v439_v60 = vadd.f32 %v903_v51, %v789_v30 }
  0xff   : > { %v905_v58 = vpop.f32.mrf.mxu0  ;;  %v923_v59 = vpop.f32.mrf.mxu1 }
 0x100   : > { %854 = vst [vmem:[%s1275_s12] sm:$0xff] %v853_v55   ;;  %877 = vst [vmem:[%s1275_s12 + $0x18] sm:$0xff] %v868_v56   ;;  %v906_v61 = vadd.f32 %v905_v58, %v904_v53  ;;  %v924_v62 = vadd.f32 %v923_v59, %v922_v54  ;;  %v477_v0 = vmax.f32 %v463_v57, 0.0  ;;  %v471_v4 = vmax.f32 %v439_v60, 0.0 }
 0x101   : > { %v907_v63 = vpop.f32.mrf.mxu0 }
 0x102   : > { %v442_v1 = vadd.f32 %v906_v61, %v789_v30  ;;  %v466_v2 = vadd.f32 %v924_v62, %v789_v30 }
 0x103   : > { %v908_v3 = vpop.f32.mrf.mxu0 }
 0x104   : > { %v472_v5 = vmax.f32 %v442_v1, 0.0  ;;  %v478_v6 = vmax.f32 %v466_v2, 0.0  ;;  %v909_v7 = vadd.f32 %v908_v3, %v907_v63 }
 0x105   : > { %v910_v8 = vpop.f32.mrf.mxu0 }
 0x106   : > { %v858_v9 = vpack.c.bf16 %v472_v5, %v471_v4  ;;  %v873_v10 = vpack.c.bf16 %v478_v6, %v477_v0  ;;  %v447_v12 = vadd.f32 %v909_v7, %v789_v30 }
 0x107   : > { %v911_v11 = vpop.f32.mrf.mxu0 }
 0x108   : > { %875 = vst [vmem:[%s1275_s12 + $0x8] sm:$0xff] %v858_v9   ;;  %878 = vst [vmem:[%s1275_s12 + $0x20] sm:$0xff] %v873_v10   ;;  %v912_v13 = vadd.f32 %v911_v11, %v910_v8  ;;  %v473_v15 = vmax.f32 %v447_v12, 0.0 }
 0x10a   : > { %v450_v14 = vadd.f32 %v912_v13, %v789_v30 }
 0x10c   : > { %v474_v16 = vmax.f32 %v450_v14, 0.0  ;;  %535 = sbr.rel (!%p1199_p4) target bundleno = 333 (0x14d), region = 36 }
 0x10e   : > { %v863_v17 = vpack.c.bf16 %v474_v16, %v473_v15 }
 0x110   : > { %876 = vst [vmem:[%s1275_s12 + $0x10] sm:$0xff] %v863_v17  }
 0x111   : > { %s1353_s22 = smov (!%p538_p8, %s537_s22), 10 }
 0x112   : > { %s826_s28 = sshll.u32 %s1353_s22, 6 }
 0x113   : > { %p829_p9 = scmp.eq.s32.totalorder %s826_s28, 0 }
 0x114   : > { %1062 = sdivrem.u32 (!%p829_p9), %s1353_s22, 10 }
 0x115   : > { %546 = sbr.rel (%p829_p9) target bundleno = 333 (0x14d), region = 40 }
 0x11d   : > { %s1295_s20 = spop.drf %1062 }
 0x11e   : > { %p830_p10 = scmp.le.s32.totalorder %s1295_s20, 0 }
 0x11f   : > { %s1346_s15 = smov (!%p830_p10), %s1289_s27  ;;  %s1347_s23 = smov (!%p830_p10), %s1275_s12 }
 0x120   : > { %739 = sbr.rel (%p830_p10) target bundleno = 308 (0x134), region = 112  ;;  %s1304_s29 = smov (!%p830_p10), 0  }
 0x121   : > { %s1306_s30 = smov (!%p830_p10), 0  }
 0x125 LB: >> { %v564_v18 = vld [vmem:[%s1128_s23] sm:$0xf]  ;;  %v566_v19 = vld [vmem:[%s1128_s23 + $0x4] sm:$0xf]  ;;  %v568_v20 = vld [vmem:[%s1128_s23 + $0x8] sm:$0xf]  ;;  %s1136_s30 = sphi %s1306_s30, %s558_s30   ;;  %s1132_s29 = sphi %s1304_s29, %s1348_s29   ;;  %s1128_s23 = sphi %s1347_s23, %s589_s23   ;;  %s1124_s15 = sphi %s1346_s15, %s590_s15  }
 0x126   : >> { %565 = vst [vmem:[%s1124_s15] sm:$0xf] %v564_v18  ;;  %567 = vst [vmem:[%s1124_s15 + $0x4] sm:$0xf] %v566_v19  ;;  %v570_v21 = vld [vmem:[%s1128_s23 + $0xc] sm:$0xf]  ;;  %s584_s4 = sadd.s32 1, %s1132_s29 }
 0x127   : >> { %569 = vst [vmem:[%s1124_s15 + $0x8] sm:$0xf] %v568_v20  ;;  %v572_v22 = vld [vmem:[%s1128_s23 + $0x10] sm:$0xf]  ;;  %v574_v23 = vld [vmem:[%s1128_s23 + $0x14] sm:$0xf]  ;;  %p585_p11 = scmp.ge.s32.totalorder %s584_s4, %s1295_s20 }
 0x128   : >> { %571 = vst [vmem:[%s1124_s15 + $0xc] sm:$0xf] %v570_v21  ;;  %573 = vst [vmem:[%s1124_s15 + $0x10] sm:$0xf] %v572_v22  ;;  %v576_v24 = vld [vmem:[%s1128_s23 + $0x18] sm:$0xf] }
 0x129   : >> { %575 = vst [vmem:[%s1124_s15 + $0x14] sm:$0xf] %v574_v23  ;;  %v578_v25 = vld [vmem:[%s1128_s23 + $0x1c] sm:$0xf]  ;;  %v580_v26 = vld [vmem:[%s1128_s23 + $0x20] sm:$0xf] }
 0x12a   : >> { %577 = vst [vmem:[%s1124_s15 + $0x18] sm:$0xf] %v576_v24  ;;  %579 = vst [vmem:[%s1124_s15 + $0x1c] sm:$0xf] %v578_v25  ;;  %v582_v27 = vld [vmem:[%s1128_s23 + $0x24] sm:$0xf] }
 0x12b   : >> { %581 = vst [vmem:[%s1124_s15 + $0x20] sm:$0xf] %v580_v26  ;;  %583 = vst [vmem:[%s1124_s15 + $0x24] sm:$0xf] %v582_v27  ;;  %s1355_s4 = smov (%p585_p11, %s584_s4), 0  ;;  %s558_s30 = sadd.s32 1, %s1136_s30  }
 0x12c   : >> { %s587_s5 = smul.u32 40, %s1355_s4  ;;  %p557_p12 = scmp.ge.s32.totalorder %s558_s30, %s1295_s20 }
 0x12d   : >> { %s1348_s29 = smov %s1355_s4 }
 0x12e   : >> { %s589_s23 = scalar_lea.vmem %s1275_s12, %s587_s5 [#allocation2]   ;;  %s590_s15 = scalar_lea.vmem %s1289_s27, %s587_s5  }
 0x12f   : > { %560 = sbr.rel (!%p557_p12) target bundleno = 293 (0x125), region = 118 }
 0x134 PF: > { %1064 = sdivrem.u32 %s1353_s22, 10 }
 0x135   : > { %s831_s6 = smul.u32 40, %s1295_s20 }
 0x137   : > { %s595_s7 = scalar_lea.vmem %s1275_s12, %s831_s6 [#allocation2]   ;;  %s597_s8 = scalar_lea.vmem %s1289_s27, %s831_s6  }
 0x13d   : > { %s1065_s9 = spop.drf %1064 }
 0x13e   : > { %p833_p13 = scmp.le.s32.totalorder %s1065_s9, 0 }
 0x13f   : > { %s1138_s10 = smov (!%p833_p13), %s597_s8   ;;  %s1142_s11 = smov (!%p833_p13), %s595_s7  }
 0x140   : > { %753 = sbr.rel (%p833_p13) target bundleno = 333 (0x14d), region = 123  ;;  %s1146_s14 = smov (!%p833_p13), 0  }
 0x141   : > { %s1150_s17 = smov (!%p833_p13), 0  }
 0x145 LB: >> { %v607_v28 = vld [vmem:[%s1144_s11] sm:$0xf]  ;;  %s609_s18 = sadd.s32 1, %s1148_s14  ;;  %s601_s17 = sadd.s32 1, %s1152_s17   ;;  %s1152_s17 = sphi %s1150_s17, %s601_s17   ;;  %s1148_s14 = sphi %s1146_s14, %s1147_s14   ;;  %s1144_s11 = sphi %s1142_s11, %s614_s11   ;;  %s1140_s10 = sphi %s1138_s10, %s615_s10  }
 0x146   : >> { %608 = vst [vmem:[%s1140_s10] sm:$0xf] %v607_v28  ;;  %p610_p0 = scmp.ge.s32.totalorder %s609_s18, %s1065_s9  ;;  %p600_p1 = scmp.ge.s32.totalorder %s601_s17, %s1065_s9 }
 0x148   : >> { %s1357_s18 = smov (%p610_p0, %s609_s18), 0  ;;  %603 = sbr.rel (!%p600_p1) target bundleno = 325 (0x145), region = 129 }
 0x149   : >> { %s834_s21 = sshll.u32 %s1357_s18, 2  ;;  %s1147_s14 = smov %s1357_s18  }
 0x14a   : >> { %s614_s11 = scalar_lea.vmem %s595_s7, %s834_s21 [#allocation2]   ;;  %s615_s10 = scalar_lea.vmem %s597_s8, %s834_s21  }
 0x14d PF: > { %p10_p2 = scmp.ge.s32.totalorder %s1189_s16, 4   ;;  %s1349_s12 = smov %s1116_s13 }
 0x14e   : > { %s1350_s13 = smov %s1197_s19  ;;  %s1351_s14 = smov %s1189_s16 }
 0x14f   :  { %12 = sbr.rel (!%p10_p2) target bundleno = 2 (0x2), region = 140 }

// kernel: puzzle_sim_forward.22
= control target key start
LH: loop header
LB: loop body
LE: loop exit
PB: predicated region body
PF: predicated region fallthrough
CT: control target
= control target key end

     0   :  { %s2853_s12 = smov 0   ;;  %s2855_s13 = smov 0   ;;  %s3585_s0 = inlined_call_operand.vmem [shape: bf16[147,1152], index: 0, kind: input, shape index: {}]   ;;  %s3586_s1 = inlined_call_operand.vmem [shape: bf16[1152,256], index: 1, kind: input, shape index: {}]   ;;  %s3587_s2 = inlined_call_operand.vmem [shape: f32[1,256], index: 2, kind: input, shape index: {}]   ;;  %s3588_s3 = inlined_call_operand.vmem [shape: bf16[147,256], index: 3, kind: output, shape index: {}]  }
   0x1   :  { %s2857_s14 = smov 0  }
   0x2 LB: > { %s2866_s15 = sadd.s32 4294967295, %s2798_s14   ;;  %s2868_s16 = sadd.s32 1, %s2798_s14   ;;  %s2798_s14 = sphi %s2857_s14, %s3621_s14   ;;  %s2794_s13 = sphi %s2855_s13, %s3620_s13   ;;  %s2790_s12 = sphi %s2853_s12, %s3619_s12  }
   0x3   : > { %s85_s17 = ssub.s32 %s2798_s14, %s2868_s16  ;;  %s88_s18 = sadd.s32 1, %s2794_s13 }
   0x4   : > { %p86_p0 = scmp.eq.s32.totalorder %s85_s17, 0  ;;  %p98_p1 = scmp.ne.s32.totalorder %s2794_s13, %s2790_s12 }
   0x5   : > { %p99_p2 = scmp.eq.s32.totalorder %s2866_s15, 1  ;;  %p2122_p3 = scmp.ge.s32.totalorder %s2798_s14, 1 }
   0x6   : > { %s2876_s19 = scalar_select %p86_p0, %s2794_s13, %s88_s18  }
   0x7   : > { %p2878_p4 = por %p99_p2, %p98_p1  ;;  %p149_p5 = scmp.lt.s32.totalorder %s2798_s14, 3 }
   0x9   : > { %p150_p6 = pnand %p2122_p3, %p149_p5 }
   0xb   : > { %153 = sbr.rel (%p150_p6) target bundleno = 460 (0x1cc), region = 32 }
  0x10   : > { %v2459_v0 = vld [vmem:[%s3586_s1 + $0x74] ss:$8 sps:$4 sm:$0xff]   ;;  %v2463_v2 = vld [vmem:[%s3586_s1 + $0x70] ss:$8 sps:$4 sm:$0xff]   ;;  %v2465_v4 = vld [vmem:[%s3586_s1 + $0x64] ss:$8 sps:$4 sm:$0xff]  }
  0x11   : > { %v2461_v1 = vld [vmem:[%s3586_s1 + $0x174] ss:$8 sps:$4 sm:$0xff]   ;;  %1358 = vmatprep.subr.bf16.mxu0 %v2459_v0  ;;  %v2464_v3 = vld [vmem:[%s3586_s1 + $0x170] ss:$8 sps:$4 sm:$0xff]   ;;  %v2467_v5 = vld [vmem:[%s3586_s1 + $0x164] ss:$8 sps:$4 sm:$0xff]  }
  0x12   : > { %1441 = vmatprep.subr.bf16.mxu1 %v2461_v1  ;;  %1359 = vmatpush1.bf16.msra.mxu0 %v2463_v2  ;;  %v2469_v6 = vld [vmem:[%s3586_s1 + $0x60] ss:$8 sps:$4 sm:$0xff]   ;;  %v2471_v8 = vld [vmem:[%s3586_s1 + $0x54] ss:$8 sps:$4 sm:$0xff]   ;;  %v2475_v10 = vld [vmem:[%s3586_s1 + $0x50] ss:$8 sps:$4 sm:$0xff]  }
  0x13   : > { %1442 = vmatpush1.bf16.msra.mxu1 %v2464_v3  ;;  %1360 = vmatprep.subr.bf16.mxu0 %v2465_v4  ;;  %v2470_v7 = vld [vmem:[%s3586_s1 + $0x160] ss:$8 sps:$4 sm:$0xff]   ;;  %v2473_v9 = vld [vmem:[%s3586_s1 + $0x154] ss:$8 sps:$4 sm:$0xff]   ;;  %v2476_v11 = vld [vmem:[%s3586_s1 + $0x150] ss:$8 sps:$4 sm:$0xff]  }
  0x14   : > { %1443 = vmatprep.subr.bf16.mxu1 %v2467_v5  ;;  %v2477_v12 = vld [vmem:[%s3586_s1 + $0x44] ss:$8 sps:$4 sm:$0xff]   ;;  %v2481_v14 = vld [vmem:[%s3586_s1 + $0x40] ss:$8 sps:$4 sm:$0xff]   ;;  %v2483_v16 = vld [vmem:[%s3586_s1 + $0x34] ss:$8 sps:$4 sm:$0xff]  }
  0x15   : > { %v2479_v13 = vld [vmem:[%s3586_s1 + $0x144] ss:$8 sps:$4 sm:$0xff]   ;;  %v2482_v15 = vld [vmem:[%s3586_s1 + $0x140] ss:$8 sps:$4 sm:$0xff]   ;;  %v2485_v17 = vld [vmem:[%s3586_s1 + $0x134] ss:$8 sps:$4 sm:$0xff]  }
  0x16   : > { %1361 = vmatpush1.bf16.msra.mxu0 %v2469_v6  ;;  %v2487_v18 = vld [vmem:[%s3586_s1 + $0x30] ss:$8 sps:$4 sm:$0xff]   ;;  %v2489_v20 = vld [vmem:[%s3586_s1 + $0x24] ss:$8 sps:$4 sm:$0xff]   ;;  %v2493_v22 = vld [vmem:[%s3586_s1 + $0x20] ss:$8 sps:$4 sm:$0xff]  }
  0x17   : > { %1444 = vmatpush1.bf16.msra.mxu1 %v2470_v7  ;;  %1362 = vmatprep.subr.bf16.mxu0 %v2471_v8  ;;  %v2488_v19 = vld [vmem:[%s3586_s1 + $0x130] ss:$8 sps:$4 sm:$0xff]   ;;  %v2491_v21 = vld [vmem:[%s3586_s1 + $0x124] ss:$8 sps:$4 sm:$0xff]   ;;  %v2494_v23 = vld [vmem:[%s3586_s1 + $0x120] ss:$8 sps:$4 sm:$0xff]  }
  0x18   : > { %1445 = vmatprep.subr.bf16.mxu1 %v2473_v9  ;;  %v2495_v24 = vld [vmem:[%s3586_s1 + $0x14] ss:$8 sps:$4 sm:$0xff]   ;;  %v2499_v26 = vld [vmem:[%s3586_s1 + $0x10] ss:$8 sps:$4 sm:$0xff]   ;;  %v2501_v28 = vld [vmem:[%s3586_s1 + $0x4] ss:$8 sps:$4 sm:$0xff]  }
  0x19   : > { %v2497_v25 = vld [vmem:[%s3586_s1 + $0x114] ss:$8 sps:$4 sm:$0xff]   ;;  %v2500_v27 = vld [vmem:[%s3586_s1 + $0x110] ss:$8 sps:$4 sm:$0xff]   ;;  %s2970_s10 = smul.u32 10, %s2866_s15 }
  0x1a   : > { %1363 = vmatpush1.bf16.msra.mxu0 %v2475_v10  ;;  %v2503_v29 = vld [vmem:[%s3586_s1 + $0x104] ss:$8 sps:$4 sm:$0xff]   ;;  %v2505_v30 = vld [vmem:[%s3586_s1] ss:$8 sps:$4 sm:$0xff]   ;;  %v2507_v32 = vld [vmem:[%s3586_s1 + $0xf4] ss:$8 sps:$4 sm:$0xff]  }
  0x1b   : > { %1446 = vmatpush1.bf16.msra.mxu1 %v2476_v11  ;;  %1364 = vmatprep.subr.bf16.mxu0 %v2477_v12  ;;  %v2506_v31 = vld [vmem:[%s3586_s1 + $0x100] ss:$8 sps:$4 sm:$0xff]   ;;  %p184_p7 = scmp.lt.s32.totalorder %s2970_s10, 18  ;;  %v2509_v33 = vld [vmem:[%s3586_s1 + $0x1f4] ss:$8 sps:$4 sm:$0xff]   ;;  %s1871_s25 = ssub.s32 (%p2878_p4), 19, %s2970_s10 }
  0x1c   : > { %1447 = vmatprep.subr.bf16.mxu1 %v2479_v13  ;;  %v2511_v34 = vld [vmem:[%s3586_s1 + $0xf0] ss:$8 sps:$4 sm:$0xff]   ;;  %v2513_v36 = vld [vmem:[%s3586_s1 + $0xe4] ss:$8 sps:$4 sm:$0xff]   ;;  %v2517_v38 = vld [vmem:[%s3586_s1 + $0xe0] ss:$8 sps:$4 sm:$0xff]  }
  0x1d   : > { %v2512_v35 = vld [vmem:[%s3586_s1 + $0x1f0] ss:$8 sps:$4 sm:$0xff]   ;;  %s185_s6 = scalar_select %p184_p7, %s2970_s10, 18  ;;  %v2515_v37 = vld [vmem:[%s3586_s1 + $0x1e4] ss:$8 sps:$4 sm:$0xff]  }
  0x1e   : > { %1365 = vmatpush1.bf16.msra.mxu0 %v2481_v14  ;;  %v2518_v39 = vld [vmem:[%s3586_s1 + $0x1e0] ss:$8 sps:$4 sm:$0xff]   ;;  %v2519_v40 = vld [vmem:[%s3586_s1 + $0xd4] ss:$8 sps:$4 sm:$0xff]   ;;  %v2523_v42 = vld [vmem:[%s3586_s1 + $0xd0] ss:$8 sps:$4 sm:$0xff]  }
  0x1f   : > { %1448 = vmatpush1.bf16.msra.mxu1 %v2482_v15  ;;  %1366 = vmatprep.subr.bf16.mxu0 %v2483_v16  ;;  %s2368_s22 = smul.u32 36, %s185_s6  ;;  %v2521_v41 = vld [vmem:[%s3586_s1 + $0x1d4] ss:$8 sps:$4 sm:$0xff]   ;;  %v2524_v43 = vld [vmem:[%s3586_s1 + $0x1d0] ss:$8 sps:$4 sm:$0xff]   ;;  %p1872_p8 = scmp.lt.s32.totalorder (%p2878_p4), %s1871_s25, 10 }
  0x20   : > { %1449 = vmatprep.subr.bf16.mxu1 %v2485_v17  ;;  %v2525_v44 = vld [vmem:[%s3586_s1 + $0xc4] ss:$8 sps:$4 sm:$0xff]   ;;  %v2529_v46 = vld [vmem:[%s3586_s1 + $0xc0] ss:$8 sps:$4 sm:$0xff]   ;;  %v2531_v48 = vld [vmem:[%s3586_s1 + $0xb4] ss:$8 sps:$4 sm:$0xff]  }
  0x21   : > { %s3025_s6 = scalar_lea.vmem %s3585_s0, %s2368_s22  ;;  %v2527_v45 = vld [vmem:[%s3586_s1 + $0x1c4] ss:$8 sps:$4 sm:$0xff]   ;;  %v2530_v47 = vld [vmem:[%s3586_s1 + $0x1c0] ss:$8 sps:$4 sm:$0xff]   ;;  %v2533_v50 = vld [vmem:[%s3586_s1 + $0x1b4] ss:$8 sps:$4 sm:$0xff]  }
  0x22   : > { %1367 = vmatpush1.bf16.msra.mxu0 %v2487_v18  ;;  %v2557_v49 = vld [vmem:[%s3025_s6 + $0x4] ss:$36 sps:$4 sm:$0xff]   ;;  %v2560_v51 = vld [vmem:[%s3025_s6 + $0xc] ss:$36 sps:$4 sm:$0xff]   ;;  %v2543_v58 = vld [vmem:[%s3586_s1 + $0x94] ss:$8 sps:$4 sm:$0xff]  }
  0x23   : > { %1450 = vmatpush1.bf16.msra.mxu1 %v2488_v19  ;;  %1368 = vmatprep.subr.bf16.mxu0 %v2489_v20  ;;  %v2535_v52 = vld [vmem:[%s3586_s1 + $0xb0] ss:$8 sps:$4 sm:$0xff]   ;;  %v2537_v54 = vld [vmem:[%s3586_s1 + $0xa4] ss:$8 sps:$4 sm:$0xff]   ;;  %v2541_v56 = vld [vmem:[%s3586_s1 + $0xa0] ss:$8 sps:$4 sm:$0xff]  }
  0x24   : > { %1451 = vmatprep.subr.bf16.mxu1 %v2491_v21  ;;  %1390 = vmatprep.mubr.bf16.mxu0 %v2557_v49  ;;  %v2536_v53 = vld [vmem:[%s3586_s1 + $0x1b0] ss:$8 sps:$4 sm:$0xff]   ;;  %v2539_v55 = vld [vmem:[%s3586_s1 + $0x1a4] ss:$8 sps:$4 sm:$0xff]   ;;  %v2542_v57 = vld [vmem:[%s3586_s1 + $0x1a0] ss:$8 sps:$4 sm:$0xff]  }
  0x25   : > { %1473 = vmatprep.mubr.bf16.mxu1 %v2560_v51  ;;  %v2545_v59 = vld [vmem:[%s3586_s1 + $0x194] ss:$8 sps:$4 sm:$0xff]   ;;  %v2547_v60 = vld [vmem:[%s3586_s1 + $0x90] ss:$8 sps:$4 sm:$0xff]   ;;  %v2549_v62 = vld [vmem:[%s3586_s1 + $0x84] ss:$8 sps:$4 sm:$0xff]  }
  0x26   : > { %1369 = vmatpush1.bf16.msra.mxu0 %v2493_v22  ;;  %v2548_v61 = vld [vmem:[%s3586_s1 + $0x190] ss:$8 sps:$4 sm:$0xff]   ;;  %v2551_v63 = vld [vmem:[%s3586_s1 + $0x184] ss:$8 sps:$4 sm:$0xff]   ;;  %v2553_v0 = vld [vmem:[%s3586_s1 + $0x80] ss:$8 sps:$4 sm:$0xff]  }
  0x27   : > { %1452 = vmatpush1.bf16.msra.mxu1 %v2494_v23  ;;  %1370 = vmatprep.subr.bf16.mxu0 %v2495_v24  ;;  %v2554_v1 = vld [vmem:[%s3586_s1 + $0x180] ss:$8 sps:$4 sm:$0xff]   ;;  %v2563_v2 = vld [vmem:[%s3586_s1 + $0x274] ss:$8 sps:$4 sm:$0xff]   ;;  %v2561_v6 = vld [vmem:[%s3586_s1 + $0x270] ss:$8 sps:$4 sm:$0xff]  }
  0x28   : > { %1453 = vmatprep.subr.bf16.mxu1 %v2497_v25  ;;  %v2555_v3 = vld [vmem:[%s3025_s6] ss:$36 sps:$4 sm:$0xff]   ;;  %v2566_v4 = vld [vmem:[%s3586_s1 + $0x374] ss:$8 sps:$4 sm:$0xff]   ;;  %v2558_v5 = vld [vmem:[%s3025_s6 + $0x8] ss:$36 sps:$4 sm:$0xff]  }
  0x29   : > { %v2564_v7 = vld [vmem:[%s3586_s1 + $0x370] ss:$8 sps:$4 sm:$0xff]   ;;  %v2569_v8 = vld [vmem:[%s3586_s1 + $0x264] ss:$8 sps:$4 sm:$0xff]   ;;  %v2567_v12 = vld [vmem:[%s3586_s1 + $0x260] ss:$8 sps:$4 sm:$0xff]  }
  0x2a   : > { %1371 = vmatpush1.bf16.msra.mxu0 %v2499_v26  ;;  %v2572_v9 = vld [vmem:[%s3586_s1 + $0x364] ss:$8 sps:$4 sm:$0xff]   ;;  %v2606_v11 = vld [vmem:[%s3025_s6 + $0x54] ss:$36 sps:$4 sm:$0xff]   ;;  %v2570_v13 = vld [vmem:[%s3586_s1 + $0x360] ss:$8 sps:$4 sm:$0xff]  }
  0x2b   : > { %1454 = vmatpush1.bf16.msra.mxu1 %v2500_v27  ;;  %1372 = vmatprep.subr.bf16.mxu0 %v2501_v28  ;;  %v2603_v10 = vld [vmem:[%s3025_s6 + $0x4c] ss:$36 sps:$4 sm:$0xff]   ;;  %v2575_v14 = vld [vmem:[%s3586_s1 + $0x254] ss:$8 sps:$4 sm:$0xff]   ;;  %v2579_v24 = vld [vmem:[%s3586_s1 + $0x240] ss:$8 sps:$4 sm:$0xff]  }
  0x2c   : > { %1455 = vmatprep.subr.bf16.mxu1 %v2503_v29  ;;  %v2578_v15 = vld [vmem:[%s3586_s1 + $0x354] ss:$8 sps:$4 sm:$0xff]   ;;  %v2573_v16 = vld [vmem:[%s3586_s1 + $0x250] ss:$8 sps:$4 sm:$0xff]   ;;  %v2581_v18 = vld [vmem:[%s3586_s1 + $0x244] ss:$8 sps:$4 sm:$0xff]  }
  0x2d   : > { %v2576_v17 = vld [vmem:[%s3586_s1 + $0x350] ss:$8 sps:$4 sm:$0xff]   ;;  %v2605_v19 = vld [vmem:[%s3025_s6 + $0x48] ss:$36 sps:$4 sm:$0xff]   ;;  %v2624_v23 = vld [vmem:[%s3025_s6 + $0x9c] ss:$36 sps:$4 sm:$0xff]  }
  0x2e   : > { %1373 = vmatpush1.bf16.msra.mxu0 %v2505_v30  ;;  %v2614_v20 = vld [vmem:[%s3025_s6 + $0x50] ss:$36 sps:$4 sm:$0xff]   ;;  %v2584_v21 = vld [vmem:[%s3586_s1 + $0x344] ss:$8 sps:$4 sm:$0xff]   ;;  %v2582_v25 = vld [vmem:[%s3586_s1 + $0x340] ss:$8 sps:$4 sm:$0xff]  }
  0x2f   : > { %1456 = vmatpush1.bf16.msra.mxu1 %v2506_v31  ;;  %1374 = vmatprep.subr.bf16.mxu0 %v2507_v32  ;;  %v2621_v22 = vld [vmem:[%s3025_s6 + $0x94] ss:$36 sps:$4 sm:$0xff]   ;;  %v2593_v30 = vld [vmem:[%s3586_s1 + $0x224] ss:$8 sps:$4 sm:$0xff]   ;;  %v2611_v49 = vld [vmem:[%s3586_s1 + $0x300] ss:$8 sps:$4 sm:$0xff]  }
  0x30   : > { %1457 = vmatprep.subr.bf16.mxu1 %v2509_v33  ;;  %v2587_v26 = vld [vmem:[%s3586_s1 + $0x234] ss:$8 sps:$4 sm:$0xff]   ;;  %v2585_v28 = vld [vmem:[%s3586_s1 + $0x230] ss:$8 sps:$4 sm:$0xff]   ;;  %v2596_v33 = vld [vmem:[%s3586_s1 + $0x324] ss:$8 sps:$4 sm:$0xff]  }
  0x31   : > { %v2590_v27 = vld [vmem:[%s3586_s1 + $0x334] ss:$8 sps:$4 sm:$0xff]   ;;  %v2588_v29 = vld [vmem:[%s3586_s1 + $0x330] ss:$8 sps:$4 sm:$0xff]   ;;  %s2350_s26 = smul.u32 (%p2878_p4), 80, %s2866_s15 }
  0x32   : > { %1375 = vmatpush2.bf16.msra.mxu0 %v2511_v34  ;;  %v2623_v31 = vld [vmem:[%s3025_s6 + $0x90] ss:$36 sps:$4 sm:$0xff]   ;;  %v2632_v32 = vld [vmem:[%s3025_s6 + $0x98] ss:$36 sps:$4 sm:$0xff]  }
  0x33   : > { %1458 = vmatpush2.bf16.msra.mxu1 %v2512_v35  ;;  %1376 = vmatprep.subr.bf16.mxu0 %v2513_v36  ;;  %v2639_v34 = vld [vmem:[%s3025_s6 + $0xdc] ss:$36 sps:$4 sm:$0xff]   ;;  %v2642_v35 = vld [vmem:[%s3025_s6 + $0xe4] ss:$36 sps:$4 sm:$0xff]   ;;  %s3533_s29 = scalar_lea.vmem (%p2878_p4), %s3588_s3, %s2350_s26  }
  0x34   : > { %1459 = vmatprep.subr.bf16.mxu1 %v2515_v37  ;;  %v2591_v36 = vld [vmem:[%s3586_s1 + $0x220] ss:$8 sps:$4 sm:$0xff]   ;;  %v2620_v51 = vld [vmem:[%s3586_s1 + $0x3f4] ss:$8 sps:$4 sm:$0xff]  }
  0x35   : > { %v2594_v37 = vld [vmem:[%s3586_s1 + $0x320] ss:$8 sps:$4 sm:$0xff]  }
  0x36   : > { %1377 = vmatpush2.bf16.msra.mxu0 %v2517_v38  ;;  %v2599_v38 = vld [vmem:[%s3586_s1 + $0x214] ss:$8 sps:$4 sm:$0xff]  }
  0x37   : > { %1460 = vmatpush2.bf16.msra.mxu1 %v2518_v39  ;;  %1378 = vmatprep.subr.bf16.mxu0 %v2519_v40  ;;  %v2602_v39 = vld [vmem:[%s3586_s1 + $0x314] ss:$8 sps:$4 sm:$0xff]   ;;  %v2597_v40 = vld [vmem:[%s3586_s1 + $0x210] ss:$8 sps:$4 sm:$0xff]  }
  0x38   : > { %1461 = vmatprep.subr.bf16.mxu1 %v2521_v41  ;;  %v2600_v41 = vld [vmem:[%s3586_s1 + $0x310] ss:$8 sps:$4 sm:$0xff]  }
  0x3a   : > { %1379 = vmatpush2.bf16.msra.mxu0 %v2523_v42  ;;  %v2610_v42 = vld [vmem:[%s3586_s1 + $0x204] ss:$8 sps:$4 sm:$0xff]  }
  0x3b   : > { %1462 = vmatpush2.bf16.msra.mxu1 %v2524_v43  ;;  %1380 = vmatprep.subr.bf16.mxu0 %v2525_v44  ;;  %v2641_v43 = vld [vmem:[%s3025_s6 + $0xd8] ss:$36 sps:$4 sm:$0xff]   ;;  %v2650_v44 = vld [vmem:[%s3025_s6 + $0xe0] ss:$36 sps:$4 sm:$0xff]  }
  0x3c   : > { %1463 = vmatprep.subr.bf16.mxu1 %v2527_v45  ;;  %v2613_v45 = vld [vmem:[%s3586_s1 + $0x304] ss:$8 sps:$4 sm:$0xff]  }
  0x3e   : > { %1381 = vmatpush2.bf16.msra.mxu0 %v2529_v46  ;;  %v2657_v46 = vld [vmem:[%s3025_s6 + $0x124] ss:$36 sps:$4 sm:$0xff]  }
  0x3f   : > { %1464 = vmatpush2.bf16.msra.mxu1 %v2530_v47  ;;  %1382 = vmatprep.subr.bf16.mxu0 %v2531_v48  ;;  %v2660_v47 = vld [vmem:[%s3025_s6 + $0x12c] ss:$36 sps:$4 sm:$0xff]   ;;  %v2608_v48 = vld [vmem:[%s3586_s1 + $0x200] ss:$8 sps:$4 sm:$0xff]  }
  0x40   : > { %1465 = vmatprep.subr.bf16.mxu1 %v2533_v50  ;;  %v2617_v50 = vld [vmem:[%s3586_s1 + $0x2f4] ss:$8 sps:$4 sm:$0xff]  }
  0x42   : > { %1383 = vmatpush2.bf16.msra.mxu0 %v2535_v52  ;;  %v2615_v52 = vld [vmem:[%s3586_s1 + $0x2f0] ss:$8 sps:$4 sm:$0xff]  }
  0x43   : > { %1466 = vmatpush2.bf16.msra.mxu1 %v2536_v53  ;;  %1384 = vmatprep.subr.bf16.mxu0 %v2537_v54  ;;  %v2618_v53 = vld [vmem:[%s3586_s1 + $0x3f0] ss:$8 sps:$4 sm:$0xff]   ;;  %v2659_v54 = vld [vmem:[%s3025_s6 + $0x120] ss:$36 sps:$4 sm:$0xff]  }
  0x44   : > { %1467 = vmatprep.subr.bf16.mxu1 %v2539_v55  ;;  %v2668_v55 = vld [vmem:[%s3025_s6 + $0x128] ss:$36 sps:$4 sm:$0xff]  }
  0x46   : > { %1385 = vmatpush2.bf16.msra.mxu0 %v2541_v56  ;;  %v2628_v56 = vld [vmem:[%s3586_s1 + $0x2e4] ss:$8 sps:$4 sm:$0xff]  }
  0x47   : > { %1468 = vmatpush2.bf16.msra.mxu1 %v2542_v57  ;;  %1386 = vmatprep.subr.bf16.mxu0 %v2543_v58  ;;  %v2631_v57 = vld [vmem:[%s3586_s1 + $0x3e4] ss:$8 sps:$4 sm:$0xff]   ;;  %v2626_v58 = vld [vmem:[%s3586_s1 + $0x2e0] ss:$8 sps:$4 sm:$0xff]  }
  0x48   : > { %1469 = vmatprep.subr.bf16.mxu1 %v2545_v59  ;;  %v2629_v59 = vld [vmem:[%s3586_s1 + $0x3e0] ss:$8 sps:$4 sm:$0xff]  }
  0x4a   : > { %1387 = vmatpush2.bf16.msra.mxu0 %v2547_v60  ;;  %v2635_v60 = vld [vmem:[%s3586_s1 + $0x2d4] ss:$8 sps:$4 sm:$0xff]  }
  0x4b   : > { %1470 = vmatpush2.bf16.msra.mxu1 %v2548_v61  ;;  %1388 = vmatprep.subr.bf16.mxu0 %v2549_v62  ;;  %v2683_v61 = vld [vmem:[%s3025_s6 + $0x14] ss:$36 sps:$4 sm:$0xff]  }
  0x4c   : > { %1471 = vmatprep.subr.bf16.mxu1 %v2551_v63  ;;  %v2638_v62 = vld [vmem:[%s3586_s1 + $0x3d4] ss:$8 sps:$4 sm:$0xff]  }
  0x4d   : > { %v2686_v63 = vld [vmem:[%s3025_s6 + $0x1c] ss:$36 sps:$4 sm:$0xff]  }
  0x4e   : > { %1389 = vmatpush2.bf16.msra.mxu0 %v2553_v0  ;;  %v2633_v0 = vld [vmem:[%s3586_s1 + $0x2d0] ss:$8 sps:$4 sm:$0xff]  }
  0x4f   : > { %1472 = vmatpush2.bf16.msra.mxu1 %v2554_v1  ;;  %1524 = vmatprep.subr.bf16.mxu0 %v2563_v2  ;;  %v2636_v1 = vld [vmem:[%s3586_s1 + $0x3d0] ss:$8 sps:$4 sm:$0xff]   ;;  %v2646_v2 = vld [vmem:[%s3586_s1 + $0x2c4] ss:$8 sps:$4 sm:$0xff]  }
  0x50   : > { %1607 = vmatprep.subr.bf16.mxu1 %v2566_v4  ;;  %v2644_v4 = vld [vmem:[%s3586_s1 + $0x2c0] ss:$8 sps:$4 sm:$0xff]  }
  0x51   : > { %1391 = vmatmul.mubr.bf16.vlgmr.msra.gmra.mxu0 %v2555_v3  ;;  %v2649_v3 = vld [vmem:[%s3586_s1 + $0x3c4] ss:$8 sps:$4 sm:$0xff]  }
  0x52   : > { %1474 = vmatmul.mubr.bf16.vlgmr.msra.gmra.mxu1 %v2558_v5  ;;  %1525 = vmatpush1.bf16.msra.mxu0 %v2561_v6  ;;  %v2647_v5 = vld [vmem:[%s3586_s1 + $0x3c0] ss:$8 sps:$4 sm:$0xff]   ;;  %v2653_v6 = vld [vmem:[%s3586_s1 + $0x2b4] ss:$8 sps:$4 sm:$0xff]  }
  0x53   : > { %1608 = vmatpush1.bf16.msra.mxu1 %v2564_v7  ;;  %1526 = vmatprep.subr.bf16.mxu0 %v2569_v8  ;;  %v2656_v7 = vld [vmem:[%s3586_s1 + $0x3b4] ss:$8 sps:$4 sm:$0xff]   ;;  %v2651_v8 = vld [vmem:[%s3586_s1 + $0x2b0] ss:$8 sps:$4 sm:$0xff]  }
  0x54   : > { %1609 = vmatprep.subr.bf16.mxu1 %v2572_v9  ;;  %1400 = vmatprep.mubr.bf16.mxu0 %v2603_v10  ;;  %v2654_v9 = vld [vmem:[%s3586_s1 + $0x3b0] ss:$8 sps:$4 sm:$0xff]   ;;  %v2664_v10 = vld [vmem:[%s3586_s1 + $0x2a4] ss:$8 sps:$4 sm:$0xff]  }
  0x55   : > { %1483 = vmatprep.mubr.bf16.mxu1 %v2606_v11  ;;  %v2667_v11 = vld [vmem:[%s3586_s1 + $0x3a4] ss:$8 sps:$4 sm:$0xff]  }
  0x56   : > { %1527 = vmatpush1.bf16.msra.mxu0 %v2567_v12  ;;  %v2662_v12 = vld [vmem:[%s3586_s1 + $0x2a0] ss:$8 sps:$4 sm:$0xff]  }
  0x57   : > { %1610 = vmatpush1.bf16.msra.mxu1 %v2570_v13  ;;  %1528 = vmatprep.subr.bf16.mxu0 %v2575_v14  ;;  %v2665_v13 = vld [vmem:[%s3586_s1 + $0x3a0] ss:$8 sps:$4 sm:$0xff]   ;;  %v2671_v14 = vld [vmem:[%s3586_s1 + $0x294] ss:$8 sps:$4 sm:$0xff]  }
  0x58   : > { %1611 = vmatprep.subr.bf16.mxu1 %v2578_v15  ;;  %v2674_v15 = vld [vmem:[%s3586_s1 + $0x394] ss:$8 sps:$4 sm:$0xff]  }
  0x59   : > { %1401 = vmatmul.mubr.bf16.gmra.mxu0 %v2605_v19  ;;  %v2680_v19 = vld [vmem:[%s3586_s1 + $0x384] ss:$8 sps:$4 sm:$0xff]  }
  0x5a   : > { %1484 = vmatmul.mubr.bf16.gmra.mxu1 %v2614_v20  ;;  %1529 = vmatpush1.bf16.msra.mxu0 %v2573_v16  ;;  %v2669_v16 = vld [vmem:[%s3586_s1 + $0x290] ss:$8 sps:$4 sm:$0xff]   ;;  %v2675_v20 = vld [vmem:[%s3586_s1 + $0x280] ss:$8 sps:$4 sm:$0xff]  }
  0x5b   : > { %1612 = vmatpush1.bf16.msra.mxu1 %v2576_v17  ;;  %1530 = vmatprep.subr.bf16.mxu0 %v2581_v18  ;;  %v2672_v17 = vld [vmem:[%s3586_s1 + $0x390] ss:$8 sps:$4 sm:$0xff]   ;;  %v2677_v18 = vld [vmem:[%s3586_s1 + $0x284] ss:$8 sps:$4 sm:$0xff]  }
  0x5c   : > { %1613 = vmatprep.subr.bf16.mxu1 %v2584_v21  ;;  %1410 = vmatprep.mubr.bf16.mxu0 %v2621_v22  ;;  %v2678_v21 = vld [vmem:[%s3586_s1 + $0x380] ss:$8 sps:$4 sm:$0xff]   ;;  %v2689_v22 = vld [vmem:[%s3586_s1 + $0x474] ss:$8 sps:$4 sm:$0xff]  }
  0x5d   : > { %1493 = vmatprep.mubr.bf16.mxu1 %v2624_v23  ;;  %v2681_v23 = vld [vmem:[%s3025_s6 + $0x10] ss:$36 sps:$4 sm:$0xff]  }
  0x5e   : > { %1531 = vmatpush1.bf16.msra.mxu0 %v2579_v24  ;;  %v2684_v24 = vld [vmem:[%s3025_s6 + $0x18] ss:$36 sps:$4 sm:$0xff]  }
  0x5f   : > { %1614 = vmatpush1.bf16.msra.mxu1 %v2582_v25  ;;  %1532 = vmatprep.subr.bf16.mxu0 %v2587_v26  ;;  %v2687_v25 = vld [vmem:[%s3586_s1 + $0x470] ss:$8 sps:$4 sm:$0xff]   ;;  %v2693_v26 = vld [vmem:[%s3025_s6 + $0x5c] ss:$36 sps:$4 sm:$0xff]  }
  0x60   : > { %1615 = vmatprep.subr.bf16.mxu1 %v2590_v27  ;;  %v2692_v27 = vld [vmem:[%s3586_s1 + $0x464] ss:$8 sps:$4 sm:$0xff]  }
  0x61   : > { %1411 = vmatmul.mubr.bf16.gmra.mxu0 %v2623_v31  ;;  %v2697_v31 = vld [vmem:[%s3025_s6 + $0x58] ss:$36 sps:$4 sm:$0xff]  }
  0x62   : > { %1494 = vmatmul.mubr.bf16.gmra.mxu1 %v2632_v32  ;;  %1533 = vmatpush1.bf16.msra.mxu0 %v2585_v28  ;;  %v2695_v28 = vld [vmem:[%s3025_s6 + $0x64] ss:$36 sps:$4 sm:$0xff]  }
  0x63   : > { %1616 = vmatpush1.bf16.msra.mxu1 %v2588_v29  ;;  %1534 = vmatprep.subr.bf16.mxu0 %v2593_v30  ;;  %v2690_v29 = vld [vmem:[%s3586_s1 + $0x460] ss:$8 sps:$4 sm:$0xff]   ;;  %v2701_v30 = vld [vmem:[%s3586_s1 + $0x454] ss:$8 sps:$4 sm:$0xff]  }
  0x64   : > { %1617 = vmatprep.subr.bf16.mxu1 %v2596_v33  ;;  %1420 = vmatprep.mubr.bf16.mxu0 %v2639_v34  ;;  %v2698_v32 = vld [vmem:[%s3025_s6 + $0x60] ss:$36 sps:$4 sm:$0xff]   ;;  %v2699_v33 = vld [vmem:[%s3586_s1 + $0x450] ss:$8 sps:$4 sm:$0xff]  }
  0x65   : > { %1503 = vmatprep.mubr.bf16.mxu1 %v2642_v35  ;;  %v2702_v34 = vld [vmem:[%s3025_s6 + $0xa4] ss:$36 sps:$4 sm:$0xff]   ;;  %v2704_v35 = vld [vmem:[%s3025_s6 + $0xac] ss:$36 sps:$4 sm:$0xff]  }
  0x66   : > { %1535 = vmatpush1.bf16.msra.mxu0 %v2591_v36  ;;  %v2708_v36 = vld [vmem:[%s3586_s1 + $0x444] ss:$8 sps:$4 sm:$0xff]  }
  0x67   : > { %1618 = vmatpush1.bf16.msra.mxu1 %v2594_v37  ;;  %1536 = vmatprep.subr.bf16.mxu0 %v2599_v38  ;;  %v2706_v37 = vld [vmem:[%s3586_s1 + $0x440] ss:$8 sps:$4 sm:$0xff]   ;;  %v2713_v38 = vld [vmem:[%s3586_s1 + $0x434] ss:$8 sps:$4 sm:$0xff]  }
  0x68   : > { %1619 = vmatprep.subr.bf16.mxu1 %v2602_v39  ;;  %v2709_v39 = vld [vmem:[%s3025_s6 + $0xa0] ss:$36 sps:$4 sm:$0xff]  }
  0x69   : > { %1421 = vmatmul.mubr.bf16.gmra.mxu0 %v2641_v43  ;;  %v2716_v43 = vld [vmem:[%s3025_s6 + $0xf4] ss:$36 sps:$4 sm:$0xff]  }
  0x6a   : > { %1504 = vmatmul.mubr.bf16.gmra.mxu1 %v2650_v44  ;;  %1537 = vmatpush1.bf16.msra.mxu0 %v2597_v40  ;;  %v2710_v40 = vld [vmem:[%s3025_s6 + $0xa8] ss:$36 sps:$4 sm:$0xff]  }
  0x6b   : > { %1620 = vmatpush1.bf16.msra.mxu1 %v2600_v41  ;;  %1538 = vmatprep.subr.bf16.mxu0 %v2610_v42  ;;  %v2711_v41 = vld [vmem:[%s3586_s1 + $0x430] ss:$8 sps:$4 sm:$0xff]   ;;  %v2722_v44 = vld [vmem:[%s3586_s1 + $0x424] ss:$8 sps:$4 sm:$0xff]  }
  0x6c   : > { %1621 = vmatprep.subr.bf16.mxu1 %v2613_v45  ;;  %1430 = vmatprep.mubr.bf16.mxu0 %v2657_v46  ;;  %v2714_v42 = vld [vmem:[%s3025_s6 + $0xec] ss:$36 sps:$4 sm:$0xff]   ;;  %v2720_v45 = vld [vmem:[%s3586_s1 + $0x420] ss:$8 sps:$4 sm:$0xff]   ;;  %v2725_v46 = vld [vmem:[%s3586_s1 + $0x414] ss:$8 sps:$4 sm:$0xff]  }
  0x6d   : > { %1513 = vmatprep.mubr.bf16.mxu1 %v2660_v47  ;;  %v2718_v47 = vld [vmem:[%s3025_s6 + $0xe8] ss:$36 sps:$4 sm:$0xff]  }
  0x6e   : > { %1539 = vmatpush1.bf16.msra.mxu0 %v2608_v48  ;;  %v2719_v48 = vld [vmem:[%s3025_s6 + $0xf0] ss:$36 sps:$4 sm:$0xff]  }
  0x6f   : > { %1622 = vmatpush1.bf16.msra.mxu1 %v2611_v49  ;;  %1540 = vmatprep.subr.bf16.mxu0 %v2617_v50  ;;  %v2726_v49 = vld [vmem:[%s3025_s6 + $0x134] ss:$36 sps:$4 sm:$0xff]  }
  0x70   : > { %1623 = vmatprep.subr.bf16.mxu1 %v2620_v51  ;;  %v2723_v50 = vld [vmem:[%s3586_s1 + $0x410] ss:$8 sps:$4 sm:$0xff]   ;;  %v2728_v51 = vld [vmem:[%s3025_s6 + $0x13c] ss:$36 sps:$4 sm:$0xff]  }
  0x71   : > { %1431 = vmatmul.mubr.bf16.gmra.mxu0 %v2659_v54  ;;  %v2730_v54 = vld [vmem:[%s3025_s6 + $0x130] ss:$36 sps:$4 sm:$0xff]  }
  0x72   : > { %1514 = vmatmul.mubr.bf16.gmra.mxu1 %v2668_v55  ;;  %1541 = vmatpush2.bf16.msra.mxu0 %v2615_v52  ;;  %v2734_v52 = vld [vmem:[%s3586_s1 + $0x404] ss:$8 sps:$4 sm:$0xff]   ;;  %v2731_v55 = vld [vmem:[%s3025_s6 + $0x138] ss:$36 sps:$4 sm:$0xff]  }
  0x73   : > { %1624 = vmatpush2.bf16.msra.mxu1 %v2618_v53  ;;  %1542 = vmatprep.subr.bf16.mxu0 %v2628_v56  ;;  %v2732_v53 = vld [vmem:[%s3586_s1 + $0x400] ss:$8 sps:$4 sm:$0xff]   ;;  %v2832_v56 = vmov 0  }
  0x74   : > { %1625 = vmatprep.subr.bf16.mxu1 %v2631_v57  ;;  %1556 = vmatprep.mubr.bf16.mxu0 %v2683_v61  ;;  %v2735_v57 = vld [vmem:[%s3025_s6 + $0x20] ss:$36 sps:$4 sm:$0xff]   ;;  %v2739_v61 = vld [vmem:[%s3025_s6 + $0xb0] ss:$36 sps:$4 sm:$0xff]  }
  0x75   : > { %1639 = vmatprep.mubr.bf16.mxu1 %v2686_v63 }
  0x76   : > { %1543 = vmatpush2.bf16.msra.mxu0 %v2626_v58  ;;  %v2736_v58 = vld [vmem:[%s3025_s6 + $0xf8] ss:$36 sps:$4 sm:$0xff]  }
  0x77   : > { %1626 = vmatpush2.bf16.msra.mxu1 %v2629_v59  ;;  %1544 = vmatprep.subr.bf16.mxu0 %v2635_v60  ;;  %v2737_v59 = vld [vmem:[%s3025_s6 + $0x68] ss:$36 sps:$4 sm:$0xff]   ;;  %v2738_v60 = vld [vmem:[%s3025_s6 + $0x140] ss:$36 sps:$4 sm:$0xff]   ;;  %s175_s6 = sand.u32 1, %s2790_s12  }
  0x78   : > { %1627 = vmatprep.subr.bf16.mxu1 %v2638_v62  ;;  %v398_v62 = vlaneseq  ;;  %s3485_s12 = smul.u32 80, %s175_s6 }
  0x7a   : > { %1545 = vmatpush2.bf16.msra.mxu0 %v2633_v0  ;;  %v399_v63 = vshrl.u32 %v398_v62, 7  ;;  %s3498_s24 = scalar_lea.vmem [#allocation2], %s3485_s12  }
  0x7b   : > { %1628 = vmatpush2.bf16.msra.mxu1 %v2636_v1  ;;  %1546 = vmatprep.subr.bf16.mxu0 %v2646_v2  ;;  %v396_v1 = vld [vmem:[%s3587_s2] sm:$0x3] }
  0x7c   : > { %1629 = vmatprep.subr.bf16.mxu1 %v2649_v3  ;;  %v400_v0 = vsub.s32 0, %v399_v63  ;;  %v404_v2 = vsub.s32 1, %v399_v63 }
  0x7e   : > { %1547 = vmatpush2.bf16.msra.mxu0 %v2644_v4  ;;  %v3372_v3 = vrot.slane %v396_v1, %v400_v0  ;;  %v3374_v4 = vrot.slane %v396_v1, %v404_v2 }
  0x7f   : > { %1630 = vmatpush2.bf16.msra.mxu1 %v2647_v5  ;;  %1548 = vmatprep.subr.bf16.mxu0 %v2653_v6 }
  0x80   : > { %1631 = vmatprep.subr.bf16.mxu1 %v2656_v7 }
  0x82   : > { %1549 = vmatpush2.bf16.msra.mxu0 %v2651_v8 }
  0x83   : > { %1632 = vmatpush2.bf16.msra.mxu1 %v2654_v9  ;;  %1550 = vmatprep.subr.bf16.mxu0 %v2664_v10 }
  0x84   : > { %1633 = vmatprep.subr.bf16.mxu1 %v2667_v11 }
  0x86   : > { %1551 = vmatpush2.bf16.msra.mxu0 %v2662_v12 }
  0x87   : > { %1634 = vmatpush2.bf16.msra.mxu1 %v2665_v13  ;;  %1552 = vmatprep.subr.bf16.mxu0 %v2671_v14 }
  0x88   : > { %1635 = vmatprep.subr.bf16.mxu1 %v2674_v15 }
  0x8a   : > { %1553 = vmatpush2.bf16.msra.mxu0 %v2669_v16 }
  0x8b   : > { %1636 = vmatpush2.bf16.msra.mxu1 %v2672_v17  ;;  %1554 = vmatprep.subr.bf16.mxu0 %v2677_v18 }
  0x8c   : > { %1637 = vmatprep.subr.bf16.mxu1 %v2680_v19 }
  0x8e   : > { %1555 = vmatpush2.bf16.msra.mxu0 %v2675_v20 }
  0x8f   : > { %1638 = vmatpush2.bf16.msra.mxu1 %v2678_v21  ;;  %1690 = vmatprep.subr.bf16.mxu0 %v2689_v22 }
  0x90   : > { %2351 = vmatprep.subr.bf16.mxu1 %v2689_v22 }
  0x91   : > { %1557 = vmatmul.mubr.bf16.vlgmr.msra.gmra.mxu0 %v2681_v23 }
  0x92   : > { %1640 = vmatmul.mubr.bf16.vlgmr.msra.gmra.mxu1 %v2684_v24  ;;  %1691 = vmatpush1.bf16.msra.mxu0 %v2687_v25 }
  0x93   : > { %1566 = vmatprep.mubr.bf16.mxu0 %v2693_v26  ;;  %1692 = vmatprep.subr.bf16.mxu0 %v2692_v27 }
  0x94   : > { %1649 = vmatprep.mubr.bf16.mxu1 %v2695_v28  ;;  %2359 = vmatpush1.bf16.msra.mxu1 %v2687_v25 }
  0x95   : > { %2352 = vmatprep.subr.bf16.mxu1 %v2692_v27 }
  0x96   : > { %1693 = vmatpush1.bf16.msra.mxu0 %v2690_v29 }
  0x97   : > { %1694 = vmatprep.subr.bf16.mxu0 %v2701_v30 }
  0x98   : > { %2360 = vmatpush1.bf16.msra.mxu1 %v2690_v29 }
  0x99   : > { %1567 = vmatmul.mubr.bf16.gmra.mxu0 %v2697_v31  ;;  %2353 = vmatprep.subr.bf16.mxu1 %v2701_v30 }
  0x9a   : > { %1650 = vmatmul.mubr.bf16.gmra.mxu1 %v2698_v32  ;;  %1695 = vmatpush1.bf16.msra.mxu0 %v2699_v33 }
  0x9b   : > { %1576 = vmatprep.mubr.bf16.mxu0 %v2702_v34  ;;  %1659 = vmatprep.mubr.bf16.mxu1 %v2704_v35 }
  0x9c   : > { %1696 = vmatprep.subr.bf16.mxu0 %v2708_v36  ;;  %2361 = vmatpush1.bf16.msra.mxu1 %v2699_v33 }
  0x9d   : > { %2354 = vmatprep.subr.bf16.mxu1 %v2708_v36 }
  0x9e   : > { %1697 = vmatpush1.bf16.msra.mxu0 %v2706_v37 }
  0x9f   : > { %1698 = vmatprep.subr.bf16.mxu0 %v2713_v38 }
  0xa0   : > { %2362 = vmatpush1.bf16.msra.mxu1 %v2706_v37 }
  0xa1   : > { %1577 = vmatmul.mubr.bf16.gmra.mxu0 %v2709_v39  ;;  %2355 = vmatprep.subr.bf16.mxu1 %v2713_v38 }
  0xa2   : > { %1660 = vmatmul.mubr.bf16.gmra.mxu1 %v2710_v40  ;;  %1699 = vmatpush1.bf16.msra.mxu0 %v2711_v41 }
  0xa3   : > { %1586 = vmatprep.mubr.bf16.mxu0 %v2714_v42  ;;  %1669 = vmatprep.mubr.bf16.mxu1 %v2716_v43 }
  0xa4   : > { %1700 = vmatprep.subr.bf16.mxu0 %v2722_v44  ;;  %2363 = vmatpush1.bf16.msra.mxu1 %v2711_v41 }
  0xa5   : > { %2356 = vmatprep.subr.bf16.mxu1 %v2722_v44 }
  0xa6   : > { %1701 = vmatpush1.bf16.msra.mxu0 %v2720_v45 }
  0xa7   : > { %1702 = vmatprep.subr.bf16.mxu0 %v2725_v46 }
  0xa8   : > { %2364 = vmatpush1.bf16.msra.mxu1 %v2720_v45 }
  0xa9   : > { %1587 = vmatmul.mubr.bf16.gmra.mxu0 %v2718_v47  ;;  %2357 = vmatprep.subr.bf16.mxu1 %v2725_v46 }
  0xaa   : > { %1670 = vmatmul.mubr.bf16.gmra.mxu1 %v2719_v48  ;;  %1596 = vmatprep.mubr.bf16.mxu0 %v2726_v49 }
  0xab   : > { %1679 = vmatprep.mubr.bf16.mxu1 %v2728_v51  ;;  %1703 = vmatpush1.bf16.msra.mxu0 %v2723_v50 }
  0xac   : > { %1704 = vmatprep.subr.bf16.mxu0 %v2734_v52  ;;  %2365 = vmatpush1.bf16.msra.mxu1 %v2723_v50 }
  0xad   : > { %2358 = vmatprep.subr.bf16.mxu1 %v2734_v52 }
  0xaf   : > { %1705 = vmatpush1.bf16.msra.mxu0 %v2732_v53 }
  0xb0   : > { %2366 = vmatpush1.bf16.msra.mxu1 %v2732_v53 }
  0xb1   : > { %1597 = vmatmul.mubr.bf16.gmra.mxu0 %v2730_v54 }
  0xb2   : > { %1680 = vmatmul.mubr.bf16.gmra.mxu1 %v2731_v55  ;;  %1722 = vmatprep.mubr.bf16.mxu0 %v2832_v56 }
  0xb3   : > { %1752 = vmatprep.mubr.bf16.mxu1 %v2832_v56 }
  0xb9   : > { %1723 = vmatmul.mubr.bf16.vlgmr.msra.gmra.mxu0 %v2735_v57 }
  0xba   : > { %1753 = vmatmul.mubr.bf16.vlgmr.msra.gmra.mxu1 %v2736_v58  ;;  %1732 = vmatprep.mubr.bf16.mxu0 %v2832_v56 }
  0xbb   : > { %1762 = vmatprep.mubr.bf16.mxu1 %v2832_v56 }
  0xc1   : > { %1733 = vmatmul.mubr.bf16.gmra.mxu0 %v2737_v59 }
  0xc2   : > { %1763 = vmatmul.mubr.bf16.gmra.mxu1 %v2738_v60  ;;  %1742 = vmatprep.mubr.bf16.mxu0 %v2832_v56 }
  0xc9   : > { %1743 = vmatmul.mubr.bf16.gmra.mxu0 %v2739_v61 }
 0x111   : > { %v1392_v5 = vpop.f32.mrf.mxu0 }
 0x112   : > { %v1475_v6 = vpop.f32.mrf.mxu1  ;;  %v1393_v7 = vadd.f32 %v1392_v5, %v3372_v3 }
 0x113   : > { %v1394_v8 = vpop.f32.mrf.mxu0 }
 0x114   : > { %v1477_v9 = vpop.f32.mrf.mxu1  ;;  %v1395_v10 = vadd.f32 %v1394_v8, %v3374_v4  ;;  %v3378_v11 = vadd.f32 %v1475_v6, %v1393_v7 }
 0x115   : > { %v1396_v12 = vpop.f32.mrf.mxu0 }
 0x116   : > { %v1479_v13 = vpop.f32.mrf.mxu1  ;;  %v1397_v14 = vadd.f32 %v1396_v12, %v3372_v3  ;;  %v3381_v15 = vadd.f32 %v1477_v9, %v1395_v10 }
 0x117   : > { %v1398_v16 = vpop.f32.mrf.mxu0 }
 0x118   : > { %v1481_v17 = vpop.f32.mrf.mxu1  ;;  %v1399_v18 = vadd.f32 %v1398_v16, %v3374_v4  ;;  %v3384_v19 = vadd.f32 %v1479_v13, %v1397_v14 }
 0x119   : > { %v1402_v20 = vpop.f32.mrf.mxu0 }
 0x11a   : > { %v1485_v21 = vpop.f32.mrf.mxu1  ;;  %v3386_v22 = vadd.f32 %v1481_v17, %v1399_v18  ;;  %v1403_v23 = vadd.f32 %v1402_v20, %v3372_v3 }
 0x11b   : > { %v1404_v24 = vpop.f32.mrf.mxu0 }
 0x11c   : > { %v1487_v25 = vpop.f32.mrf.mxu1  ;;  %v1405_v26 = vadd.f32 %v1404_v24, %v3374_v4  ;;  %v3390_v27 = vadd.f32 %v1485_v21, %v1403_v23 }
 0x11d   : > { %v1406_v28 = vpop.f32.mrf.mxu0 }
 0x11e   : > { %v1489_v29 = vpop.f32.mrf.mxu1  ;;  %v1407_v30 = vadd.f32 %v1406_v28, %v3372_v3  ;;  %v3393_v31 = vadd.f32 %v1487_v25, %v1405_v26 }
 0x11f   : > { %v1408_v32 = vpop.f32.mrf.mxu0 }
 0x120   : > { %v1491_v33 = vpop.f32.mrf.mxu1  ;;  %v1409_v34 = vadd.f32 %v1408_v32, %v3374_v4  ;;  %v3396_v35 = vadd.f32 %v1489_v29, %v1407_v30 }
 0x121   : > { %v1412_v36 = vpop.f32.mrf.mxu0 }
 0x122   : > { %v1495_v37 = vpop.f32.mrf.mxu1  ;;  %v1413_v38 = vadd.f32 %v1412_v36, %v3372_v3  ;;  %v3399_v39 = vadd.f32 %v1491_v33, %v1409_v34 }
 0x123   : > { %v1414_v40 = vpop.f32.mrf.mxu0 }
 0x124   : > { %v1497_v41 = vpop.f32.mrf.mxu1  ;;  %v1415_v42 = vadd.f32 %v1414_v40, %v3374_v4  ;;  %v3402_v43 = vadd.f32 %v1495_v37, %v1413_v38 }
 0x125   : > { %v1416_v44 = vpop.f32.mrf.mxu0 }
 0x126   : > { %3590 = vst [vmem:[#allocation3_spill] sm:$0xff] %v3402_v43  ;;  %v1499_v45 = vpop.f32.mrf.mxu1  ;;  %v1417_v46 = vadd.f32 %v1416_v44, %v3372_v3  ;;  %v3405_v47 = vadd.f32 %v1497_v41, %v1415_v42 }
 0x127   : > { %v1418_v48 = vpop.f32.mrf.mxu0 }
 0x128   : > { %3591 = vst [vmem:[#allocation4_spill] sm:$0xff] %v3405_v47  ;;  %v1501_v49 = vpop.f32.mrf.mxu1  ;;  %v1419_v50 = vadd.f32 %v1418_v48, %v3374_v4  ;;  %v3408_v51 = vadd.f32 %v1499_v45, %v1417_v46 }
 0x129   : > { %v1422_v53 = vpop.f32.mrf.mxu0 }
 0x12a   : > { %3592 = vst [vmem:[#allocation5_spill] sm:$0xff] %v3408_v51  ;;  %v3410_v52 = vadd.f32 %v1501_v49, %v1419_v50  ;;  %v1505_v54 = vpop.f32.mrf.mxu1  ;;  %v1423_v46 = vadd.f32 %v1422_v53, %v3372_v3 }
 0x12b   : > { %v1424_v55 = vpop.f32.mrf.mxu0 }
 0x12c   : > { %3593 = vst [vmem:[#allocation6_spill] sm:$0xff] %v3410_v52  ;;  %v1507_v56 = vpop.f32.mrf.mxu1  ;;  %v1425_v50 = vadd.f32 %v1424_v55, %v3374_v4 }
 0x12d   : > { %v1426_v57 = vpop.f32.mrf.mxu0 }
 0x12e   : > { %v1509_v58 = vpop.f32.mrf.mxu1 }
 0x12f   : > { %v1428_v59 = vpop.f32.mrf.mxu0 }
 0x130   : > { %v1511_v60 = vpop.f32.mrf.mxu1 }
 0x131   : > { %v1432_v61 = vpop.f32.mrf.mxu0 }
 0x132   : > { %v3412_v62 = vpop.f32.mrf.mxu1 }
 0x133   : > { %v1434_v63 = vpop.f32.mrf.mxu0 }
 0x134   : > { %v3414_v0 = vpop.f32.mrf.mxu1  ;;  %v1435_v55 = vadd.f32 %v1434_v63, %v3374_v4 }
 0x135   : > { %v1436_v1 = vpop.f32.mrf.mxu0 }
 0x136   : > { %v3416_v2 = vpop.f32.mrf.mxu1  ;;  %v1437_v43 = vadd.f32 %v1436_v1, %v3372_v3 }
 0x137   : > { %v1438_v5 = vpop.f32.mrf.mxu0 }
 0x138   : > { %v3418_v6 = vpop.f32.mrf.mxu1 }
 0x151   : > { %v1558_v7 = vpop.f32.mrf.mxu0 }
 0x152   : > { %v1641_v8 = vpop.f32.mrf.mxu1  ;;  %v1559_v53 = vadd.f32 %v1558_v7, %v3378_v11 }
 0x153   : > { %v1560_v9 = vpop.f32.mrf.mxu0 }
 0x154   : > { %v3420_v10 = vpop.f32.mrf.mxu1  ;;  %v1642_v7 = vadd.f32 %v1641_v8, %v1559_v53 }
 0x155   : > { %v1562_v12 = vpop.f32.mrf.mxu0 }
 0x156   : > { %v3422_v13 = vpop.f32.mrf.mxu1  ;;  %v1563_v63 = vadd.f32 %v1562_v12, %v3384_v19 }
 0x157   : > { %v1564_v14 = vpop.f32.mrf.mxu0 }
 0x158   : > { %v3424_v16 = vpop.f32.mrf.mxu1  ;;  %v1646_v12 = vadd.f32 %v3422_v13, %v1563_v63  ;;  %v3603_v63 = vld [vmem:[#allocation3_spill] sm:$0xff] }
 0x159   : > { %v1568_v17 = vpop.f32.mrf.mxu0 }
 0x15a   : > { %v3426_v18 = vpop.f32.mrf.mxu1 }
 0x15b   : > { %v3428_v20 = vpop.f32.mrf.mxu0 }
 0x15c   : > { %v3430_v21 = vpop.f32.mrf.mxu1  ;;  %v1571_v8 = vadd.f32 %v3428_v20, %v3393_v31 }
 0x15d   : > { %v3432_v23 = vpop.f32.mrf.mxu0 }
 0x15e   : > { %v3434_v24 = vpop.f32.mrf.mxu1 }
 0x15f   : > { %v3436_v25 = vpop.f32.mrf.mxu0 }
 0x160   : > { %v3438_v26 = vpop.f32.mrf.mxu1  ;;  %v1575_v53 = vadd.f32 %v3436_v25, %v3399_v39 }
 0x161   : > { %3594 = vst [vmem:[#allocation7_spill] sm:$0xff] %v3438_v26  ;;  %v3440_v28 = vpop.f32.mrf.mxu0  ;;  %v1433_v26 = vadd.f32 %v1432_v61, %v3372_v3 }
 0x162   : > { %3595 = vst [vmem:[#allocation8_spill] sm:$0xff] %v3440_v28  ;;  %v3442_v29 = vpop.f32.mrf.mxu1 }
 0x163   : > { %3596 = vst [vmem:[#allocation9_spill] sm:$0xff] %v3442_v29  ;;  %v3444_v30 = vpop.f32.mrf.mxu0  ;;  %v1508_v29 = vadd.f32 %v1507_v56, %v1425_v50  ;;  %v1439_v56 = vadd.f32 %v1438_v5, %v3374_v4  ;;  %v1516_v11 = vadd.f32 %v3412_v62, %v1433_v26  ;;  %v1520_v62 = vadd.f32 %v3416_v2, %v1437_v43 }
 0x164   : > { %3597 = vst [vmem:[#allocation10_spill] sm:$0xff] %v3444_v30  ;;  %v3446_v32 = vpop.f32.mrf.mxu1 }
 0x165   : > { %3598 = vst [vmem:[#allocation11_spill] sm:$0xff] %v3446_v32  ;;  %v3448_v33 = vpop.f32.mrf.mxu0  ;;  %v1522_v19 = vadd.f32 %v3418_v6, %v1439_v56 }
 0x166   : > { %3599 = vst [vmem:[#allocation12_spill] sm:$0xff] %v3448_v33  ;;  %v3450_v34 = vpop.f32.mrf.mxu1 }
 0x167   : > { %3600 = vst [vmem:[#allocation13_spill] sm:$0xff] %v3450_v34  ;;  %v3452_v36 = vpop.f32.mrf.mxu0  ;;  %v1506_v34 = vadd.f32 %v1505_v54, %v1423_v46  ;;  %v1561_v54 = vadd.f32 %v1560_v9, %v3381_v15  ;;  %v1565_v15 = vadd.f32 %v1564_v14, %v3386_v22 }
 0x168   : > { %3601 = vst [vmem:[#allocation14_spill] sm:$0xff] %v3452_v36  ;;  %v3454_v37 = vpop.f32.mrf.mxu1  ;;  %v1427_v36 = vadd.f32 %v1426_v57, %v3372_v3 }
 0x169   : > { %3602 = vst [vmem:[#allocation15_spill] sm:$0xff] %v3454_v37  ;;  %v1588_v38 = vpop.f32.mrf.mxu0  ;;  %v1429_v37 = vadd.f32 %v1428_v59, %v3374_v4  ;;  %v1644_v4 = vadd.f32 %v3420_v10, %v1561_v54  ;;  %v1648_v26 = vadd.f32 %v3424_v16, %v1565_v15  ;;  %v1573_v16 = vadd.f32 %v3432_v23, %v3396_v35  ;;  %v3605_v15 = vld [vmem:[#allocation4_spill] sm:$0xff] }
 0x16a   : > { %v1671_v40 = vpop.f32.mrf.mxu1  ;;  %v1589_v30 = vadd.f32 %v1588_v38, %v1506_v34  ;;  %v1510_v46 = vadd.f32 %v1509_v58, %v1427_v36  ;;  %v1518_v38 = vadd.f32 %v3414_v0, %v1435_v55  ;;  %v1569_v58 = vadd.f32 %v1568_v17, %v3390_v27 }
 0x16b   : > { %v1590_v41 = vpop.f32.mrf.mxu0  ;;  %v1512_v59 = vadd.f32 %v1511_v60, %v1429_v37 }
 0x16c   : > { %v1673_v42 = vpop.f32.mrf.mxu1  ;;  %v1591_v57 = vadd.f32 %v1590_v41, %v1508_v29  ;;  %v1672_v34 = vadd.f32 %v1671_v40, %v1589_v30  ;;  %v1652_v30 = vadd.f32 %v3426_v18, %v1569_v58  ;;  %v1654_v41 = vadd.f32 %v3430_v21, %v1571_v8  ;;  %v3606_v58 = vld [vmem:[#allocation10_spill] sm:$0xff]  ;;  %v3607_v8 = vld [vmem:[#allocation7_spill] sm:$0xff] }
 0x16d   : > { %v1592_v44 = vpop.f32.mrf.mxu0 }
 0x16e   : > { %v1675_v45 = vpop.f32.mrf.mxu1  ;;  %v1593_v60 = vadd.f32 %v1592_v44, %v1510_v46  ;;  %v1674_v5 = vadd.f32 %v1673_v42, %v1591_v57 }
 0x16f   : > { %v1594_v48 = vpop.f32.mrf.mxu0 }
 0x170   : > { %v1677_v49 = vpop.f32.mrf.mxu1  ;;  %v1595_v0 = vadd.f32 %v1594_v48, %v1512_v59  ;;  %v1676_v43 = vadd.f32 %v1675_v45, %v1593_v60  ;;  %v1581_v60 = vadd.f32 %v3606_v58, %v3605_v15 }
 0x171   : > { %v1598_v52 = vpop.f32.mrf.mxu0 }
 0x172   : > { %v3458_v32 = vpop.f32.mrf.mxu1  ;;  %v1599_v14 = vadd.f32 %v1598_v52, %v1516_v11  ;;  %v1678_v42 = vadd.f32 %v1677_v49, %v1595_v0  ;;  %v1658_v0 = vadd.f32 %v3607_v8, %v1575_v53 }
 0x173   : > { %v1600_v33 = vpop.f32.mrf.mxu0 }
 0x174   : > { %v3462_v51 = vpop.f32.mrf.mxu1  ;;  %v1601_v2 = vadd.f32 %v1600_v33, %v1518_v38  ;;  %v1682_v18 = vadd.f32 %v3458_v32, %v1599_v14 }
 0x175   : > { %v1602_v47 = vpop.f32.mrf.mxu0 }
 0x176   : > { %v3467_v28 = vpop.f32.mrf.mxu1  ;;  %v1603_v55 = vadd.f32 %v1602_v47, %v1520_v62  ;;  %v1684_v46 = vadd.f32 %v3462_v51, %v1601_v2 }
 0x177   : > { %v1604_v50 = vpop.f32.mrf.mxu0 }
 0x178   : > { %v3472_v61 = vpop.f32.mrf.mxu1  ;;  %v1605_v59 = vadd.f32 %v1604_v50, %v1522_v19 }
 0x179   : > { %v1724_v3 = vpop.f32.mrf.mxu0 }
 0x17a   : > { %v1754_v1 = vpop.f32.mrf.mxu1  ;;  %v1725_v9 = vadd.f32 %v1724_v3, %v1642_v7  ;;  %v1656_v7 = vadd.f32 %v3434_v24, %v1573_v16  ;;  %v1686_v3 = vadd.f32 %v3467_v28, %v1603_v55 }
 0x17b   : > { %v1755_v29 = vadd.f32 %v1754_v1, %v1672_v34  ;;  %v1726_v22 = vpop.f32.mrf.mxu0  ;;  %v3604_v34 = vld [vmem:[#allocation8_spill] sm:$0xff] }
 0x17c   : > { %v1756_v27 = vpop.f32.mrf.mxu1  ;;  %v1727_v17 = vadd.f32 %v1726_v22, %v1644_v4  ;;  %v1773_v37 = vmax.f32 %v1725_v9, 0.0  ;;  %v1579_v51 = vadd.f32 %v3604_v34, %v3603_v63  ;;  %v1688_v22 = vadd.f32 %v3472_v61, %v1605_v59 }
 0x17d   : > { %v1757_v10 = vadd.f32 %v1756_v27, %v1674_v5  ;;  %v1728_v6 = vpop.f32.mrf.mxu0  ;;  %v1785_v31 = vmax.f32 %v1755_v29, 0.0 }
 0x17e   : > { %v1758_v36 = vpop.f32.mrf.mxu1  ;;  %v1774_v20 = vmax.f32 %v1727_v17, 0.0  ;;  %v1729_v44 = vadd.f32 %v1728_v6, %v1646_v12  ;;  %v3608_v17 = vld [vmem:[#allocation9_spill] sm:$0xff] }
 0x17f   : > { %v1786_v40 = vmax.f32 %v1757_v10, 0.0  ;;  %v1759_v52 = vadd.f32 %v1758_v36, %v1676_v43  ;;  %v1730_v13 = vpop.f32.mrf.mxu0  ;;  %v1662_v10 = vadd.f32 %v3608_v17, %v1579_v51 }
 0x180   : > { %v1760_v48 = vpop.f32.mrf.mxu1  ;;  %v2337_v33 = vpack.c.bf16 %v1774_v20, %v1773_v37  ;;  %v1731_v54 = vadd.f32 %v1730_v13, %v1648_v26  ;;  %v1775_v32 = vmax.f32 %v1729_v44, 0.0  ;;  %v3609_v26 = vld [vmem:[#allocation5_spill] sm:$0xff]  ;;  %v3611_v20 = vld [vmem:[#allocation11_spill] sm:$0xff] }
 0x181   : > { %v2343_v45 = vpack.c.bf16 %v1786_v40, %v1785_v31  ;;  %v1761_v57 = vadd.f32 %v1760_v48, %v1678_v42  ;;  %v1734_v21 = vpop.f32.mrf.mxu0  ;;  %v1787_v56 = vmax.f32 %v1759_v52, 0.0  ;;  %v1664_v61 = vadd.f32 %v3611_v20, %v1581_v60  ;;  %v3612_v40 = vld [vmem:[#allocation6_spill] sm:$0xff] }
 0x182   : > { %v1764_v49 = vpop.f32.mrf.mxu1  ;;  %1853 = vst [vmem:[%s3498_s24] sm:$0xff] %v2337_v33  ;;  %v1735_v35 = vadd.f32 %v1734_v21, %v1652_v30  ;;  %v1776_v11 = vmax.f32 %v1731_v54, 0.0  ;;  %v3610_v30 = vld [vmem:[#allocation12_spill] sm:$0xff]  ;;  %v3614_v33 = vld [vmem:[#allocation13_spill] sm:$0xff]  ;;  %v3615_v21 = vld [vmem:[#allocation15_spill] sm:$0xff] }
 0x183   : > { %1859 = vst [vmem:[%s3498_s24 + $0x30] sm:$0xff] %v2343_v45  ;;  %v1765_v23 = vadd.f32 %v1764_v49, %v1682_v18  ;;  %v1788_v39 = vmax.f32 %v1761_v57, 0.0  ;;  %v1736_v47 = vpop.f32.mrf.mxu0  ;;  %v1583_v43 = vadd.f32 %v3610_v30, %v3609_v26 }
 0x184   : > { %v1766_v25 = vpop.f32.mrf.mxu1  ;;  %v1737_v50 = vadd.f32 %v1736_v47, %v1654_v41  ;;  %v2338_v1 = vpack.c.bf16 %v1776_v11, %v1775_v32  ;;  %v1777_v29 = vmax.f32 %v1735_v35, 0.0  ;;  %v3613_v41 = vld [vmem:[#allocation14_spill] sm:$0xff] }
 0x185   : > { %v1767_v38 = vadd.f32 %v1766_v25, %v1684_v46  ;;  %v2344_v4 = vpack.c.bf16 %v1788_v39, %v1787_v56  ;;  %v1738_v5 = vpop.f32.mrf.mxu0  ;;  %v1789_v62 = vmax.f32 %v1765_v23, 0.0  ;;  %v1585_v42 = vadd.f32 %v3613_v41, %v3612_v40 }
 0x186   : > { %v1768_v9 = vpop.f32.mrf.mxu1  ;;  %v1778_v19 = vmax.f32 %v1737_v50, 0.0  ;;  %1854 = vst [vmem:[%s3498_s24 + $0x8] sm:$0xff] %v2338_v1  ;;  %v1739_v27 = vadd.f32 %v1738_v5, %v1656_v7  ;;  %v1666_v45 = vadd.f32 %v3614_v33, %v1583_v43 }
 0x187   : > { %v1790_v24 = vmax.f32 %v1767_v38, 0.0  ;;  %1860 = vst [vmem:[%s3498_s24 + $0x38] sm:$0xff] %v2344_v4  ;;  %v1769_v12 = vadd.f32 %v1768_v9, %v1686_v3  ;;  %v1740_v14 = vpop.f32.mrf.mxu0  ;;  %v1668_v49 = vadd.f32 %v3615_v21, %v1585_v42 }
 0x188   : > { %v1770_v28 = vpop.f32.mrf.mxu1  ;;  %v2339_v2 = vpack.c.bf16 %v1778_v19, %v1777_v29  ;;  %v1741_v36 = vadd.f32 %v1740_v14, %v1658_v0  ;;  %v1779_v52 = vmax.f32 %v1739_v27, 0.0 }
 0x189   : > { %v2345_v6 = vpack.c.bf16 %v1790_v24, %v1789_v62  ;;  %v1771_v37 = vadd.f32 %v1770_v28, %v1688_v22  ;;  %v1744_v31 = vpop.f32.mrf.mxu0  ;;  %v1791_v13 = vmax.f32 %v1769_v12, 0.0 }
 0x18a   : > { %1855 = vst [vmem:[%s3498_s24 + $0x10] sm:$0xff] %v2339_v2  ;;  %v1745_v44 = vadd.f32 %v1744_v31, %v1662_v10  ;;  %v1780_v48 = vmax.f32 %v1741_v36, 0.0 }
 0x18b   : > { %1861 = vst [vmem:[%s3498_s24 + $0x40] sm:$0xff] %v2345_v6  ;;  %v1792_v16 = vmax.f32 %v1771_v37, 0.0  ;;  %v1746_v18 = vpop.f32.mrf.mxu0 }
 0x18c   : > { %v1747_v53 = vadd.f32 %v1746_v18, %v1664_v61  ;;  %v2340_v55 = vpack.c.bf16 %v1780_v48, %v1779_v52  ;;  %v1781_v46 = vmax.f32 %v1745_v44, 0.0 }
 0x18d   : > { %v2346_v54 = vpack.c.bf16 %v1792_v16, %v1791_v13  ;;  %v1748_v57 = vpop.f32.mrf.mxu0 }
 0x18e   : > { %v1782_v59 = vmax.f32 %v1747_v53, 0.0  ;;  %v1749_v35 = vadd.f32 %v1748_v57, %v1666_v45  ;;  %1856 = vst [vmem:[%s3498_s24 + $0x18] sm:$0xff] %v2340_v55 }
 0x18f   : > { %1862 = vst [vmem:[%s3498_s24 + $0x48] sm:$0xff] %v2346_v54  ;;  %v1750_v23 = vpop.f32.mrf.mxu0 }
 0x190   : > { %v2341_v32 = vpack.c.bf16 %v1782_v59, %v1781_v46  ;;  %v1751_v56 = vadd.f32 %v1750_v23, %v1668_v49  ;;  %v1783_v11 = vmax.f32 %v1749_v35, 0.0 }
 0x192   : > { %1857 = vst [vmem:[%s3498_s24 + $0x20] sm:$0xff] %v2341_v32  ;;  %v1784_v39 = vmax.f32 %v1751_v56, 0.0  ;;  %1869 = sbr.rel (!%p2878_p4) target bundleno = 460 (0x1cc), region = 36 }
 0x194   : > { %v2342_v47 = vpack.c.bf16 %v1784_v39, %v1783_v11 }
 0x196   : > { %1858 = vst [vmem:[%s3498_s24 + $0x28] sm:$0xff] %v2342_v47 }
 0x197   : > { %s3623_s25 = smov (!%p1872_p8, %s1871_s25), 10 }
 0x198   : > { %s2347_s30 = sshll.u32 %s3623_s25, 7 }
 0x199   : > { %p2328_p9 = scmp.eq.s32.totalorder %s2347_s30, 0 }
 0x19a   : > { %2740 = sdivrem.u32 (!%p2328_p9), %s3623_s25, 10 }
 0x19b   : > { %1882 = sbr.rel (%p2328_p9) target bundleno = 460 (0x1cc), region = 40 }
 0x1a3   : > { %s3539_s20 = spop.drf %2740 }
 0x1a4   : > { %p2329_p10 = scmp.le.s32.totalorder %s3539_s20, 0 }
 0x1a5   : > { %s3616_s15 = smov (!%p2329_p10), %s3533_s29  ;;  %s3617_s10 = smov (!%p2329_p10), %s3498_s24 }
 0x1a6   : > { %2075 = sbr.rel (%p2329_p10) target bundleno = 435 (0x1b3), region = 116  ;;  %s3548_s4 = smov (!%p2329_p10), 0  }
 0x1a7   : > { %s3550_s5 = smov (!%p2329_p10), 0  }
 0x1ab LB: >> { %v1965_v25 = vld [vmem:[%s2806_s10] sm:$0xff]  ;;  %v1967_v7 = vld [vmem:[%s2806_s10 + $0x8] sm:$0xff]  ;;  %v1969_v63 = vld [vmem:[%s2806_s10 + $0x10] sm:$0xff]  ;;  %s1985_s7 = sadd.s32 1, %s2810_s4  ;;  %s1959_s5 = sadd.s32 1, %s2814_s5   ;;  %s2814_s5 = sphi %s3550_s5, %s1959_s5   ;;  %s2810_s4 = sphi %s3548_s4, %s3618_s4   ;;  %s2806_s10 = sphi %s3617_s10, %s1990_s10   ;;  %s2802_s15 = sphi %s3616_s15, %s1991_s15  }
 0x1ac   : >> { %1966 = vst [vmem:[%s2802_s15] sm:$0xff] %v1965_v25  ;;  %1968 = vst [vmem:[%s2802_s15 + $0x8] sm:$0xff] %v1967_v7  ;;  %v1971_v34 = vld [vmem:[%s2806_s10 + $0x18] sm:$0xff]  ;;  %v1973_v51 = vld [vmem:[%s2806_s10 + $0x20] sm:$0xff]  ;;  %p1986_p11 = scmp.ge.s32.totalorder %s1985_s7, %s3539_s20  ;;  %p1958_p12 = scmp.ge.s32.totalorder %s1959_s5, %s3539_s20 }
 0x1ad   : >> { %1970 = vst [vmem:[%s2802_s15 + $0x10] sm:$0xff] %v1969_v63  ;;  %v1975_v50 = vld [vmem:[%s2806_s10 + $0x28] sm:$0xff]  ;;  %1972 = vst [vmem:[%s2802_s15 + $0x18] sm:$0xff] %v1971_v34  ;;  %v1977_v38 = vld [vmem:[%s2806_s10 + $0x30] sm:$0xff] }
 0x1ae   : >> { %1974 = vst [vmem:[%s2802_s15 + $0x20] sm:$0xff] %v1973_v51  ;;  %1976 = vst [vmem:[%s2802_s15 + $0x28] sm:$0xff] %v1975_v50  ;;  %v1979_v15 = vld [vmem:[%s2806_s10 + $0x38] sm:$0xff]  ;;  %v1981_v58 = vld [vmem:[%s2806_s10 + $0x40] sm:$0xff]  ;;  %s3625_s7 = smov (%p1986_p11, %s1985_s7), 0  ;;  %1961 = sbr.rel (!%p1958_p12) target bundleno = 427 (0x1ab), region = 122 }
 0x1af   : >> { %1978 = vst [vmem:[%s2802_s15 + $0x30] sm:$0xff] %v1977_v38  ;;  %1980 = vst [vmem:[%s2802_s15 + $0x38] sm:$0xff] %v1979_v15  ;;  %v1983_v60 = vld [vmem:[%s2806_s10 + $0x48] sm:$0xff]  ;;  %s1988_s8 = smul.u32 80, %s3625_s7  ;;  %s3618_s4 = smov %s3625_s7 }
 0x1b0   : >> { %1982 = vst [vmem:[%s2802_s15 + $0x40] sm:$0xff] %v1981_v58  ;;  %1984 = vst [vmem:[%s2802_s15 + $0x48] sm:$0xff] %v1983_v60 }
 0x1b1   : >> { %s1990_s10 = scalar_lea.vmem %s3498_s24, %s1988_s8 [#allocation2]   ;;  %s1991_s15 = scalar_lea.vmem %s3533_s29, %s1988_s8  }
 0x1b3 PF: > { %2742 = sdivrem.u32 %s3623_s25, 10 }
 0x1b4   : > { %s2330_s9 = smul.u32 80, %s3539_s20 }
 0x1b6   : > { %s1996_s11 = scalar_lea.vmem %s3498_s24, %s2330_s9 [#allocation2]   ;;  %s1998_s14 = scalar_lea.vmem %s3533_s29, %s2330_s9  }
 0x1bc   : > { %s2743_s17 = spop.drf %2742 }
 0x1bd   : > { %p2332_p13 = scmp.le.s32.totalorder %s2743_s17, 0 }
 0x1be   : > { %s2816_s18 = smov (!%p2332_p13), %s1998_s14   ;;  %s2820_s21 = smov (!%p2332_p13), %s1996_s11  }
 0x1bf   : > { %2089 = sbr.rel (%p2332_p13) target bundleno = 460 (0x1cc), region = 127  ;;  %s2824_s22 = smov (!%p2332_p13), 0  }
 0x1c0   : > { %s2828_s23 = smov (!%p2332_p13), 0  }
 0x1c4 LB: >> { %v2008_v3 = vld [vmem:[%s2822_s21] sm:$0xff]  ;;  %s2010_s6 = sadd.s32 1, %s2826_s22  ;;  %s2002_s23 = sadd.s32 1, %s2830_s23   ;;  %s2830_s23 = sphi %s2828_s23, %s2002_s23   ;;  %s2826_s22 = sphi %s2824_s22, %s2825_s22   ;;  %s2822_s21 = sphi %s2820_s21, %s2015_s21   ;;  %s2818_s18 = sphi %s2816_s18, %s2016_s18  }
 0x1c5   : >> { %2009 = vst [vmem:[%s2818_s18] sm:$0xff] %v2008_v3  ;;  %p2011_p0 = scmp.ge.s32.totalorder %s2010_s6, %s2743_s17  ;;  %p2001_p1 = scmp.ge.s32.totalorder %s2002_s23, %s2743_s17 }
 0x1c7   : >> { %s3627_s6 = smov (%p2011_p0, %s2010_s6), 0  ;;  %2004 = sbr.rel (!%p2001_p1) target bundleno = 452 (0x1c4), region = 133 }
 0x1c8   : >> { %s2333_s12 = sshll.u32 %s3627_s6, 3  ;;  %s2825_s22 = smov %s3627_s6  }
 0x1c9   : >> { %s2015_s21 = scalar_lea.vmem %s1996_s11, %s2333_s12 [#allocation2]   ;;  %s2016_s18 = scalar_lea.vmem %s1998_s14, %s2333_s12  }
 0x1cc PF: > { %p10_p2 = scmp.ge.s32.totalorder %s2868_s16, 4   ;;  %s3619_s12 = smov %s2794_s13 }
 0x1cd   : > { %s3620_s13 = smov %s2876_s19  ;;  %s3621_s14 = smov %s2868_s16 }
 0x1ce   :  { %12 = sbr.rel (!%p10_p2) target bundleno = 2 (0x2), region = 144 }

// kernel: puzzle_sim_forward.24
= control target key start
LH: loop header
LB: loop body
LE: loop exit
PB: predicated region body
PF: predicated region fallthrough
CT: control target
= control target key end

     0   :  { %s3480_s15 = smov 0   ;;  %s3482_s16 = smov 0   ;;  %s4391_s0 = inlined_call_operand.vmem [shape: bf16[147,1152], index: 0, kind: input, shape index: {}]   ;;  %s4392_s1 = inlined_call_operand.vmem [shape: bf16[1152,256], index: 1, kind: input, shape index: {}]   ;;  %s4393_s2 = inlined_call_operand.vmem [shape: f32[1,256], index: 2, kind: input, shape index: {}]   ;;  %s4394_s3 = inlined_call_operand.vmem [shape: bf16[147,256], index: 3, kind: output, shape index: {0}]   ;;  %s4395_s4 = inlined_call_operand.vmem [shape: bf16[147,256], index: 4, kind: output, shape index: {1}]  }
   0x1   :  { %s3484_s17 = smov 0  }
   0x2 LB: > { %s3493_s18 = sadd.s32 4294967295, %s3388_s17   ;;  %s3495_s19 = sadd.s32 1, %s3388_s17   ;;  %s3388_s17 = sphi %s3484_s17, %s4427_s17   ;;  %s3384_s16 = sphi %s3482_s16, %s4426_s16   ;;  %s3380_s15 = sphi %s3480_s15, %s4425_s15  }
   0x3   : > { %s87_s20 = ssub.s32 %s3388_s17, %s3495_s19  ;;  %s90_s21 = sadd.s32 1, %s3384_s16 }
   0x4   : > { %p88_p0 = scmp.eq.s32.totalorder %s87_s20, 0  ;;  %p100_p1 = scmp.ne.s32.totalorder %s3384_s16, %s3380_s15 }
   0x5   : > { %p101_p2 = scmp.eq.s32.totalorder %s3493_s18, 1  ;;  %p2555_p3 = scmp.ge.s32.totalorder %s3388_s17, 1 }
   0x6   : > { %s3503_s22 = scalar_select %p88_p0, %s3384_s16, %s90_s21  }
   0x7   : > { %p3505_p4 = por %p101_p2, %p100_p1  ;;  %p177_p5 = scmp.lt.s32.totalorder %s3388_s17, 3 }
   0x9   : > { %p178_p6 = pnand %p2555_p3, %p177_p5 }
   0xb   : > { %181 = sbr.rel (%p178_p6) target bundleno = 682 (0x2aa), region = 32 }
  0x10   : > { %v2993_v0 = vld [vmem:[%s4392_s1 + $0x74] ss:$8 sps:$4 sm:$0xff]   ;;  %v2997_v2 = vld [vmem:[%s4392_s1 + $0x70] ss:$8 sps:$4 sm:$0xff]   ;;  %v2999_v4 = vld [vmem:[%s4392_s1 + $0x64] ss:$8 sps:$4 sm:$0xff]  }
  0x11   : > { %v2995_v1 = vld [vmem:[%s4392_s1 + $0x174] ss:$8 sps:$4 sm:$0xff]   ;;  %1398 = vmatprep.subr.bf16.mxu0 %v2993_v0  ;;  %v2998_v3 = vld [vmem:[%s4392_s1 + $0x170] ss:$8 sps:$4 sm:$0xff]   ;;  %v3001_v5 = vld [vmem:[%s4392_s1 + $0x164] ss:$8 sps:$4 sm:$0xff]  }
  0x12   : > { %1481 = vmatprep.subr.bf16.mxu1 %v2995_v1  ;;  %1399 = vmatpush1.bf16.msra.mxu0 %v2997_v2  ;;  %v3003_v6 = vld [vmem:[%s4392_s1 + $0x60] ss:$8 sps:$4 sm:$0xff]   ;;  %v3005_v8 = vld [vmem:[%s4392_s1 + $0x54] ss:$8 sps:$4 sm:$0xff]   ;;  %v3009_v10 = vld [vmem:[%s4392_s1 + $0x50] ss:$8 sps:$4 sm:$0xff]  }
  0x13   : > { %1482 = vmatpush1.bf16.msra.mxu1 %v2998_v3  ;;  %1400 = vmatprep.subr.bf16.mxu0 %v2999_v4  ;;  %v3004_v7 = vld [vmem:[%s4392_s1 + $0x160] ss:$8 sps:$4 sm:$0xff]   ;;  %v3007_v9 = vld [vmem:[%s4392_s1 + $0x154] ss:$8 sps:$4 sm:$0xff]   ;;  %v3010_v11 = vld [vmem:[%s4392_s1 + $0x150] ss:$8 sps:$4 sm:$0xff]  }
  0x14   : > { %1483 = vmatprep.subr.bf16.mxu1 %v3001_v5  ;;  %v3011_v12 = vld [vmem:[%s4392_s1 + $0x44] ss:$8 sps:$4 sm:$0xff]   ;;  %v3015_v14 = vld [vmem:[%s4392_s1 + $0x40] ss:$8 sps:$4 sm:$0xff]   ;;  %v3017_v16 = vld [vmem:[%s4392_s1 + $0x34] ss:$8 sps:$4 sm:$0xff]  }
  0x15   : > { %v3013_v13 = vld [vmem:[%s4392_s1 + $0x144] ss:$8 sps:$4 sm:$0xff]   ;;  %v3016_v15 = vld [vmem:[%s4392_s1 + $0x140] ss:$8 sps:$4 sm:$0xff]   ;;  %v3019_v17 = vld [vmem:[%s4392_s1 + $0x134] ss:$8 sps:$4 sm:$0xff]  }
  0x16   : > { %1401 = vmatpush1.bf16.msra.mxu0 %v3003_v6  ;;  %v3021_v18 = vld [vmem:[%s4392_s1 + $0x30] ss:$8 sps:$4 sm:$0xff]   ;;  %v3023_v20 = vld [vmem:[%s4392_s1 + $0x24] ss:$8 sps:$4 sm:$0xff]   ;;  %v3027_v22 = vld [vmem:[%s4392_s1 + $0x20] ss:$8 sps:$4 sm:$0xff]  }
  0x17   : > { %1484 = vmatpush1.bf16.msra.mxu1 %v3004_v7  ;;  %1402 = vmatprep.subr.bf16.mxu0 %v3005_v8  ;;  %v3022_v19 = vld [vmem:[%s4392_s1 + $0x130] ss:$8 sps:$4 sm:$0xff]   ;;  %v3025_v21 = vld [vmem:[%s4392_s1 + $0x124] ss:$8 sps:$4 sm:$0xff]   ;;  %v3028_v23 = vld [vmem:[%s4392_s1 + $0x120] ss:$8 sps:$4 sm:$0xff]  }
  0x18   : > { %1485 = vmatprep.subr.bf16.mxu1 %v3007_v9  ;;  %v3029_v24 = vld [vmem:[%s4392_s1 + $0x14] ss:$8 sps:$4 sm:$0xff]   ;;  %v3033_v26 = vld [vmem:[%s4392_s1 + $0x10] ss:$8 sps:$4 sm:$0xff]   ;;  %v3035_v28 = vld [vmem:[%s4392_s1 + $0x4] ss:$8 sps:$4 sm:$0xff]  }
  0x19   : > { %v3031_v25 = vld [vmem:[%s4392_s1 + $0x114] ss:$8 sps:$4 sm:$0xff]   ;;  %v3034_v27 = vld [vmem:[%s4392_s1 + $0x110] ss:$8 sps:$4 sm:$0xff]   ;;  %s3597_s20 = smul.u32 10, %s3493_s18 }
  0x1a   : > { %1403 = vmatpush1.bf16.msra.mxu0 %v3009_v10  ;;  %v3037_v29 = vld [vmem:[%s4392_s1 + $0x104] ss:$8 sps:$4 sm:$0xff]   ;;  %v3039_v30 = vld [vmem:[%s4392_s1] ss:$8 sps:$4 sm:$0xff]   ;;  %v3041_v32 = vld [vmem:[%s4392_s1 + $0xf4] ss:$8 sps:$4 sm:$0xff]  }
  0x1b   : > { %1486 = vmatpush1.bf16.msra.mxu1 %v3010_v11  ;;  %1404 = vmatprep.subr.bf16.mxu0 %v3011_v12  ;;  %v3040_v31 = vld [vmem:[%s4392_s1 + $0x100] ss:$8 sps:$4 sm:$0xff]   ;;  %p218_p7 = scmp.lt.s32.totalorder %s3597_s20, 18  ;;  %v3043_v33 = vld [vmem:[%s4392_s1 + $0x1f4] ss:$8 sps:$4 sm:$0xff]   ;;  %s2075_s26 = ssub.s32 (%p3505_p4), 19, %s3597_s20 }
  0x1c   : > { %1487 = vmatprep.subr.bf16.mxu1 %v3013_v13  ;;  %v3045_v34 = vld [vmem:[%s4392_s1 + $0xf0] ss:$8 sps:$4 sm:$0xff]   ;;  %v3047_v36 = vld [vmem:[%s4392_s1 + $0xe4] ss:$8 sps:$4 sm:$0xff]   ;;  %v3051_v38 = vld [vmem:[%s4392_s1 + $0xe0] ss:$8 sps:$4 sm:$0xff]  }
  0x1d   : > { %v3046_v35 = vld [vmem:[%s4392_s1 + $0x1f0] ss:$8 sps:$4 sm:$0xff]   ;;  %s219_s13 = scalar_select %p218_p7, %s3597_s20, 18  ;;  %v3049_v37 = vld [vmem:[%s4392_s1 + $0x1e4] ss:$8 sps:$4 sm:$0xff]  }
  0x1e   : > { %1405 = vmatpush1.bf16.msra.mxu0 %v3015_v14  ;;  %v3052_v39 = vld [vmem:[%s4392_s1 + $0x1e0] ss:$8 sps:$4 sm:$0xff]   ;;  %v3053_v40 = vld [vmem:[%s4392_s1 + $0xd4] ss:$8 sps:$4 sm:$0xff]   ;;  %v3057_v42 = vld [vmem:[%s4392_s1 + $0xd0] ss:$8 sps:$4 sm:$0xff]  }
  0x1f   : > { %1488 = vmatpush1.bf16.msra.mxu1 %v3016_v15  ;;  %1406 = vmatprep.subr.bf16.mxu0 %v3017_v16  ;;  %s2837_s29 = smul.u32 36, %s219_s13  ;;  %v3055_v41 = vld [vmem:[%s4392_s1 + $0x1d4] ss:$8 sps:$4 sm:$0xff]   ;;  %v3058_v43 = vld [vmem:[%s4392_s1 + $0x1d0] ss:$8 sps:$4 sm:$0xff]   ;;  %p2076_p8 = scmp.lt.s32.totalorder (%p3505_p4), %s2075_s26, 10 }
  0x20   : > { %1489 = vmatprep.subr.bf16.mxu1 %v3019_v17  ;;  %v3059_v44 = vld [vmem:[%s4392_s1 + $0xc4] ss:$8 sps:$4 sm:$0xff]   ;;  %v3063_v46 = vld [vmem:[%s4392_s1 + $0xc0] ss:$8 sps:$4 sm:$0xff]   ;;  %v3065_v48 = vld [vmem:[%s4392_s1 + $0xb4] ss:$8 sps:$4 sm:$0xff]  }
  0x21   : > { %s3652_s14 = scalar_lea.vmem %s4391_s0, %s2837_s29  ;;  %v3061_v45 = vld [vmem:[%s4392_s1 + $0x1c4] ss:$8 sps:$4 sm:$0xff]   ;;  %v3064_v47 = vld [vmem:[%s4392_s1 + $0x1c0] ss:$8 sps:$4 sm:$0xff]   ;;  %v3067_v50 = vld [vmem:[%s4392_s1 + $0x1b4] ss:$8 sps:$4 sm:$0xff]  }
  0x22   : > { %1407 = vmatpush1.bf16.msra.mxu0 %v3021_v18  ;;  %v3091_v49 = vld [vmem:[%s3652_s14 + $0x4] ss:$36 sps:$4 sm:$0xff]   ;;  %v3094_v51 = vld [vmem:[%s3652_s14 + $0xc] ss:$36 sps:$4 sm:$0xff]   ;;  %v3077_v58 = vld [vmem:[%s4392_s1 + $0x94] ss:$8 sps:$4 sm:$0xff]  }
  0x23   : > { %1490 = vmatpush1.bf16.msra.mxu1 %v3022_v19  ;;  %1408 = vmatprep.subr.bf16.mxu0 %v3023_v20  ;;  %v3069_v52 = vld [vmem:[%s4392_s1 + $0xb0] ss:$8 sps:$4 sm:$0xff]   ;;  %v3071_v54 = vld [vmem:[%s4392_s1 + $0xa4] ss:$8 sps:$4 sm:$0xff]   ;;  %v3075_v56 = vld [vmem:[%s4392_s1 + $0xa0] ss:$8 sps:$4 sm:$0xff]  }
  0x24   : > { %1491 = vmatprep.subr.bf16.mxu1 %v3025_v21  ;;  %1430 = vmatprep.mubr.bf16.mxu0 %v3091_v49  ;;  %v3070_v53 = vld [vmem:[%s4392_s1 + $0x1b0] ss:$8 sps:$4 sm:$0xff]   ;;  %v3073_v55 = vld [vmem:[%s4392_s1 + $0x1a4] ss:$8 sps:$4 sm:$0xff]   ;;  %v3076_v57 = vld [vmem:[%s4392_s1 + $0x1a0] ss:$8 sps:$4 sm:$0xff]  }
  0x25   : > { %1513 = vmatprep.mubr.bf16.mxu1 %v3094_v51  ;;  %v3079_v59 = vld [vmem:[%s4392_s1 + $0x194] ss:$8 sps:$4 sm:$0xff]   ;;  %v3081_v60 = vld [vmem:[%s4392_s1 + $0x90] ss:$8 sps:$4 sm:$0xff]   ;;  %v3083_v62 = vld [vmem:[%s4392_s1 + $0x84] ss:$8 sps:$4 sm:$0xff]  }
  0x26   : > { %1409 = vmatpush1.bf16.msra.mxu0 %v3027_v22  ;;  %v3082_v61 = vld [vmem:[%s4392_s1 + $0x190] ss:$8 sps:$4 sm:$0xff]   ;;  %v3085_v63 = vld [vmem:[%s4392_s1 + $0x184] ss:$8 sps:$4 sm:$0xff]   ;;  %v3087_v0 = vld [vmem:[%s4392_s1 + $0x80] ss:$8 sps:$4 sm:$0xff]  }
  0x27   : > { %1492 = vmatpush1.bf16.msra.mxu1 %v3028_v23  ;;  %1410 = vmatprep.subr.bf16.mxu0 %v3029_v24  ;;  %v3088_v1 = vld [vmem:[%s4392_s1 + $0x180] ss:$8 sps:$4 sm:$0xff]   ;;  %v3097_v2 = vld [vmem:[%s4392_s1 + $0x274] ss:$8 sps:$4 sm:$0xff]   ;;  %v3095_v6 = vld [vmem:[%s4392_s1 + $0x270] ss:$8 sps:$4 sm:$0xff]  }
  0x28   : > { %1493 = vmatprep.subr.bf16.mxu1 %v3031_v25  ;;  %v3089_v3 = vld [vmem:[%s3652_s14] ss:$36 sps:$4 sm:$0xff]   ;;  %v3100_v4 = vld [vmem:[%s4392_s1 + $0x374] ss:$8 sps:$4 sm:$0xff]   ;;  %v3092_v5 = vld [vmem:[%s3652_s14 + $0x8] ss:$36 sps:$4 sm:$0xff]  }
  0x29   : > { %v3098_v7 = vld [vmem:[%s4392_s1 + $0x370] ss:$8 sps:$4 sm:$0xff]   ;;  %v3103_v8 = vld [vmem:[%s4392_s1 + $0x264] ss:$8 sps:$4 sm:$0xff]   ;;  %v3101_v12 = vld [vmem:[%s4392_s1 + $0x260] ss:$8 sps:$4 sm:$0xff]  }
  0x2a   : > { %1411 = vmatpush1.bf16.msra.mxu0 %v3033_v26  ;;  %v3106_v9 = vld [vmem:[%s4392_s1 + $0x364] ss:$8 sps:$4 sm:$0xff]   ;;  %v3140_v11 = vld [vmem:[%s3652_s14 + $0x54] ss:$36 sps:$4 sm:$0xff]   ;;  %v3104_v13 = vld [vmem:[%s4392_s1 + $0x360] ss:$8 sps:$4 sm:$0xff]  }
  0x2b   : > { %1494 = vmatpush1.bf16.msra.mxu1 %v3034_v27  ;;  %1412 = vmatprep.subr.bf16.mxu0 %v3035_v28  ;;  %v3137_v10 = vld [vmem:[%s3652_s14 + $0x4c] ss:$36 sps:$4 sm:$0xff]   ;;  %v3109_v14 = vld [vmem:[%s4392_s1 + $0x254] ss:$8 sps:$4 sm:$0xff]   ;;  %v3113_v24 = vld [vmem:[%s4392_s1 + $0x240] ss:$8 sps:$4 sm:$0xff]  }
  0x2c   : > { %1495 = vmatprep.subr.bf16.mxu1 %v3037_v29  ;;  %v3112_v15 = vld [vmem:[%s4392_s1 + $0x354] ss:$8 sps:$4 sm:$0xff]   ;;  %v3107_v16 = vld [vmem:[%s4392_s1 + $0x250] ss:$8 sps:$4 sm:$0xff]   ;;  %v3115_v18 = vld [vmem:[%s4392_s1 + $0x244] ss:$8 sps:$4 sm:$0xff]  }
  0x2d   : > { %v3110_v17 = vld [vmem:[%s4392_s1 + $0x350] ss:$8 sps:$4 sm:$0xff]   ;;  %v3139_v19 = vld [vmem:[%s3652_s14 + $0x48] ss:$36 sps:$4 sm:$0xff]   ;;  %v3158_v23 = vld [vmem:[%s3652_s14 + $0x9c] ss:$36 sps:$4 sm:$0xff]  }
  0x2e   : > { %1413 = vmatpush1.bf16.msra.mxu0 %v3039_v30  ;;  %v3148_v20 = vld [vmem:[%s3652_s14 + $0x50] ss:$36 sps:$4 sm:$0xff]   ;;  %v3118_v21 = vld [vmem:[%s4392_s1 + $0x344] ss:$8 sps:$4 sm:$0xff]   ;;  %v3116_v25 = vld [vmem:[%s4392_s1 + $0x340] ss:$8 sps:$4 sm:$0xff]  }
  0x2f   : > { %1496 = vmatpush1.bf16.msra.mxu1 %v3040_v31  ;;  %1414 = vmatprep.subr.bf16.mxu0 %v3041_v32  ;;  %v3155_v22 = vld [vmem:[%s3652_s14 + $0x94] ss:$36 sps:$4 sm:$0xff]   ;;  %v3127_v30 = vld [vmem:[%s4392_s1 + $0x224] ss:$8 sps:$4 sm:$0xff]   ;;  %v3145_v49 = vld [vmem:[%s4392_s1 + $0x300] ss:$8 sps:$4 sm:$0xff]  }
  0x30   : > { %1497 = vmatprep.subr.bf16.mxu1 %v3043_v33  ;;  %v3121_v26 = vld [vmem:[%s4392_s1 + $0x234] ss:$8 sps:$4 sm:$0xff]   ;;  %v3119_v28 = vld [vmem:[%s4392_s1 + $0x230] ss:$8 sps:$4 sm:$0xff]   ;;  %v3130_v33 = vld [vmem:[%s4392_s1 + $0x324] ss:$8 sps:$4 sm:$0xff]  }
  0x31   : > { %v3124_v27 = vld [vmem:[%s4392_s1 + $0x334] ss:$8 sps:$4 sm:$0xff]   ;;  %v3122_v29 = vld [vmem:[%s4392_s1 + $0x330] ss:$8 sps:$4 sm:$0xff]   ;;  %s2818_s27 = smul.u32 (%p3505_p4), 80, %s3493_s18 }
  0x32   : > { %1415 = vmatpush2.bf16.msra.mxu0 %v3045_v34  ;;  %v3157_v31 = vld [vmem:[%s3652_s14 + $0x90] ss:$36 sps:$4 sm:$0xff]   ;;  %v3166_v32 = vld [vmem:[%s3652_s14 + $0x98] ss:$36 sps:$4 sm:$0xff]  }
  0x33   : > { %1498 = vmatpush2.bf16.msra.mxu1 %v3046_v35  ;;  %1416 = vmatprep.subr.bf16.mxu0 %v3047_v36  ;;  %v3173_v34 = vld [vmem:[%s3652_s14 + $0xdc] ss:$36 sps:$4 sm:$0xff]   ;;  %v3176_v35 = vld [vmem:[%s3652_s14 + $0xe4] ss:$36 sps:$4 sm:$0xff]   ;;  %s4290_s29 = scalar_lea.vmem (%p3505_p4), %s4394_s3, %s2818_s27  }
  0x34   : > { %1499 = vmatprep.subr.bf16.mxu1 %v3049_v37  ;;  %v3125_v36 = vld [vmem:[%s4392_s1 + $0x220] ss:$8 sps:$4 sm:$0xff]   ;;  %v3154_v51 = vld [vmem:[%s4392_s1 + $0x3f4] ss:$8 sps:$4 sm:$0xff]  }
  0x35   : > { %v3128_v37 = vld [vmem:[%s4392_s1 + $0x320] ss:$8 sps:$4 sm:$0xff]  }
  0x36   : > { %1417 = vmatpush2.bf16.msra.mxu0 %v3051_v38  ;;  %v3133_v38 = vld [vmem:[%s4392_s1 + $0x214] ss:$8 sps:$4 sm:$0xff]  }
  0x37   : > { %1500 = vmatpush2.bf16.msra.mxu1 %v3052_v39  ;;  %1418 = vmatprep.subr.bf16.mxu0 %v3053_v40  ;;  %v3136_v39 = vld [vmem:[%s4392_s1 + $0x314] ss:$8 sps:$4 sm:$0xff]   ;;  %v3131_v40 = vld [vmem:[%s4392_s1 + $0x210] ss:$8 sps:$4 sm:$0xff]  }
  0x38   : > { %1501 = vmatprep.subr.bf16.mxu1 %v3055_v41  ;;  %v3134_v41 = vld [vmem:[%s4392_s1 + $0x310] ss:$8 sps:$4 sm:$0xff]  }
  0x3a   : > { %1419 = vmatpush2.bf16.msra.mxu0 %v3057_v42  ;;  %v3144_v42 = vld [vmem:[%s4392_s1 + $0x204] ss:$8 sps:$4 sm:$0xff]  }
  0x3b   : > { %1502 = vmatpush2.bf16.msra.mxu1 %v3058_v43  ;;  %1420 = vmatprep.subr.bf16.mxu0 %v3059_v44  ;;  %v3175_v43 = vld [vmem:[%s3652_s14 + $0xd8] ss:$36 sps:$4 sm:$0xff]   ;;  %v3184_v44 = vld [vmem:[%s3652_s14 + $0xe0] ss:$36 sps:$4 sm:$0xff]  }
  0x3c   : > { %1503 = vmatprep.subr.bf16.mxu1 %v3061_v45  ;;  %v3147_v45 = vld [vmem:[%s4392_s1 + $0x304] ss:$8 sps:$4 sm:$0xff]  }
  0x3e   : > { %1421 = vmatpush2.bf16.msra.mxu0 %v3063_v46  ;;  %v3191_v46 = vld [vmem:[%s3652_s14 + $0x124] ss:$36 sps:$4 sm:$0xff]  }
  0x3f   : > { %1504 = vmatpush2.bf16.msra.mxu1 %v3064_v47  ;;  %1422 = vmatprep.subr.bf16.mxu0 %v3065_v48  ;;  %v3194_v47 = vld [vmem:[%s3652_s14 + $0x12c] ss:$36 sps:$4 sm:$0xff]   ;;  %v3142_v48 = vld [vmem:[%s4392_s1 + $0x200] ss:$8 sps:$4 sm:$0xff]  }
  0x40   : > { %1505 = vmatprep.subr.bf16.mxu1 %v3067_v50  ;;  %v3151_v50 = vld [vmem:[%s4392_s1 + $0x2f4] ss:$8 sps:$4 sm:$0xff]  }
  0x42   : > { %1423 = vmatpush2.bf16.msra.mxu0 %v3069_v52  ;;  %v3149_v52 = vld [vmem:[%s4392_s1 + $0x2f0] ss:$8 sps:$4 sm:$0xff]  }
  0x43   : > { %1506 = vmatpush2.bf16.msra.mxu1 %v3070_v53  ;;  %1424 = vmatprep.subr.bf16.mxu0 %v3071_v54  ;;  %v3152_v53 = vld [vmem:[%s4392_s1 + $0x3f0] ss:$8 sps:$4 sm:$0xff]   ;;  %v3193_v54 = vld [vmem:[%s3652_s14 + $0x120] ss:$36 sps:$4 sm:$0xff]  }
  0x44   : > { %1507 = vmatprep.subr.bf16.mxu1 %v3073_v55  ;;  %v3202_v55 = vld [vmem:[%s3652_s14 + $0x128] ss:$36 sps:$4 sm:$0xff]  }
  0x46   : > { %1425 = vmatpush2.bf16.msra.mxu0 %v3075_v56  ;;  %v3162_v56 = vld [vmem:[%s4392_s1 + $0x2e4] ss:$8 sps:$4 sm:$0xff]  }
  0x47   : > { %1508 = vmatpush2.bf16.msra.mxu1 %v3076_v57  ;;  %1426 = vmatprep.subr.bf16.mxu0 %v3077_v58  ;;  %v3165_v57 = vld [vmem:[%s4392_s1 + $0x3e4] ss:$8 sps:$4 sm:$0xff]   ;;  %v3160_v58 = vld [vmem:[%s4392_s1 + $0x2e0] ss:$8 sps:$4 sm:$0xff]  }
  0x48   : > { %1509 = vmatprep.subr.bf16.mxu1 %v3079_v59  ;;  %v3163_v59 = vld [vmem:[%s4392_s1 + $0x3e0] ss:$8 sps:$4 sm:$0xff]  }
  0x4a   : > { %1427 = vmatpush2.bf16.msra.mxu0 %v3081_v60  ;;  %v3169_v60 = vld [vmem:[%s4392_s1 + $0x2d4] ss:$8 sps:$4 sm:$0xff]  }
  0x4b   : > { %1510 = vmatpush2.bf16.msra.mxu1 %v3082_v61  ;;  %1428 = vmatprep.subr.bf16.mxu0 %v3083_v62  ;;  %v3217_v61 = vld [vmem:[%s3652_s14 + $0x14] ss:$36 sps:$4 sm:$0xff]  }
  0x4c   : > { %1511 = vmatprep.subr.bf16.mxu1 %v3085_v63  ;;  %v3172_v62 = vld [vmem:[%s4392_s1 + $0x3d4] ss:$8 sps:$4 sm:$0xff]  }
  0x4d   : > { %v3220_v63 = vld [vmem:[%s3652_s14 + $0x1c] ss:$36 sps:$4 sm:$0xff]  }
  0x4e   : > { %1429 = vmatpush2.bf16.msra.mxu0 %v3087_v0  ;;  %v3167_v0 = vld [vmem:[%s4392_s1 + $0x2d0] ss:$8 sps:$4 sm:$0xff]  }
  0x4f   : > { %1512 = vmatpush2.bf16.msra.mxu1 %v3088_v1  ;;  %1564 = vmatprep.subr.bf16.mxu0 %v3097_v2  ;;  %v3170_v1 = vld [vmem:[%s4392_s1 + $0x3d0] ss:$8 sps:$4 sm:$0xff]   ;;  %v3180_v2 = vld [vmem:[%s4392_s1 + $0x2c4] ss:$8 sps:$4 sm:$0xff]  }
  0x50   : > { %1647 = vmatprep.subr.bf16.mxu1 %v3100_v4  ;;  %v3178_v4 = vld [vmem:[%s4392_s1 + $0x2c0] ss:$8 sps:$4 sm:$0xff]  }
  0x51   : > { %1431 = vmatmul.mubr.bf16.vlgmr.msra.gmra.mxu0 %v3089_v3  ;;  %v3183_v3 = vld [vmem:[%s4392_s1 + $0x3c4] ss:$8 sps:$4 sm:$0xff]  }
  0x52   : > { %1514 = vmatmul.mubr.bf16.vlgmr.msra.gmra.mxu1 %v3092_v5  ;;  %1565 = vmatpush1.bf16.msra.mxu0 %v3095_v6  ;;  %v3181_v5 = vld [vmem:[%s4392_s1 + $0x3c0] ss:$8 sps:$4 sm:$0xff]   ;;  %v3187_v6 = vld [vmem:[%s4392_s1 + $0x2b4] ss:$8 sps:$4 sm:$0xff]  }
  0x53   : > { %1648 = vmatpush1.bf16.msra.mxu1 %v3098_v7  ;;  %1566 = vmatprep.subr.bf16.mxu0 %v3103_v8  ;;  %v3190_v7 = vld [vmem:[%s4392_s1 + $0x3b4] ss:$8 sps:$4 sm:$0xff]   ;;  %v3185_v8 = vld [vmem:[%s4392_s1 + $0x2b0] ss:$8 sps:$4 sm:$0xff]  }
  0x54   : > { %1649 = vmatprep.subr.bf16.mxu1 %v3106_v9  ;;  %1440 = vmatprep.mubr.bf16.mxu0 %v3137_v10  ;;  %v3188_v9 = vld [vmem:[%s4392_s1 + $0x3b0] ss:$8 sps:$4 sm:$0xff]   ;;  %v3198_v10 = vld [vmem:[%s4392_s1 + $0x2a4] ss:$8 sps:$4 sm:$0xff]  }
  0x55   : > { %1523 = vmatprep.mubr.bf16.mxu1 %v3140_v11  ;;  %v3201_v11 = vld [vmem:[%s4392_s1 + $0x3a4] ss:$8 sps:$4 sm:$0xff]  }
  0x56   : > { %1567 = vmatpush1.bf16.msra.mxu0 %v3101_v12  ;;  %v3196_v12 = vld [vmem:[%s4392_s1 + $0x2a0] ss:$8 sps:$4 sm:$0xff]  }
  0x57   : > { %1650 = vmatpush1.bf16.msra.mxu1 %v3104_v13  ;;  %1568 = vmatprep.subr.bf16.mxu0 %v3109_v14  ;;  %v3199_v13 = vld [vmem:[%s4392_s1 + $0x3a0] ss:$8 sps:$4 sm:$0xff]   ;;  %v3205_v14 = vld [vmem:[%s4392_s1 + $0x294] ss:$8 sps:$4 sm:$0xff]  }
  0x58   : > { %1651 = vmatprep.subr.bf16.mxu1 %v3112_v15  ;;  %v3208_v15 = vld [vmem:[%s4392_s1 + $0x394] ss:$8 sps:$4 sm:$0xff]  }
  0x59   : > { %1441 = vmatmul.mubr.bf16.gmra.mxu0 %v3139_v19  ;;  %v3214_v19 = vld [vmem:[%s4392_s1 + $0x384] ss:$8 sps:$4 sm:$0xff]  }
  0x5a   : > { %1524 = vmatmul.mubr.bf16.gmra.mxu1 %v3148_v20  ;;  %1569 = vmatpush1.bf16.msra.mxu0 %v3107_v16  ;;  %v3203_v16 = vld [vmem:[%s4392_s1 + $0x290] ss:$8 sps:$4 sm:$0xff]   ;;  %v3209_v20 = vld [vmem:[%s4392_s1 + $0x280] ss:$8 sps:$4 sm:$0xff]  }
  0x5b   : > { %1652 = vmatpush1.bf16.msra.mxu1 %v3110_v17  ;;  %1570 = vmatprep.subr.bf16.mxu0 %v3115_v18  ;;  %v3206_v17 = vld [vmem:[%s4392_s1 + $0x390] ss:$8 sps:$4 sm:$0xff]   ;;  %v3211_v18 = vld [vmem:[%s4392_s1 + $0x284] ss:$8 sps:$4 sm:$0xff]  }
  0x5c   : > { %1653 = vmatprep.subr.bf16.mxu1 %v3118_v21  ;;  %1450 = vmatprep.mubr.bf16.mxu0 %v3155_v22  ;;  %v3212_v21 = vld [vmem:[%s4392_s1 + $0x380] ss:$8 sps:$4 sm:$0xff]   ;;  %v3223_v22 = vld [vmem:[%s4392_s1 + $0x474] ss:$8 sps:$4 sm:$0xff]  }
  0x5d   : > { %1533 = vmatprep.mubr.bf16.mxu1 %v3158_v23  ;;  %v3215_v23 = vld [vmem:[%s3652_s14 + $0x10] ss:$36 sps:$4 sm:$0xff]  }
  0x5e   : > { %1571 = vmatpush1.bf16.msra.mxu0 %v3113_v24  ;;  %v3218_v24 = vld [vmem:[%s3652_s14 + $0x18] ss:$36 sps:$4 sm:$0xff]  }
  0x5f   : > { %1654 = vmatpush1.bf16.msra.mxu1 %v3116_v25  ;;  %1572 = vmatprep.subr.bf16.mxu0 %v3121_v26  ;;  %v3221_v25 = vld [vmem:[%s4392_s1 + $0x470] ss:$8 sps:$4 sm:$0xff]   ;;  %v3226_v26 = vld [vmem:[%s4392_s1 + $0x464] ss:$8 sps:$4 sm:$0xff]  }
  0x60   : > { %1655 = vmatprep.subr.bf16.mxu1 %v3124_v27  ;;  %v3227_v27 = vld [vmem:[%s3652_s14 + $0x5c] ss:$36 sps:$4 sm:$0xff]  }
  0x61   : > { %1451 = vmatmul.mubr.bf16.gmra.mxu0 %v3157_v31  ;;  %v3231_v31 = vld [vmem:[%s3652_s14 + $0x58] ss:$36 sps:$4 sm:$0xff]  }
  0x62   : > { %1534 = vmatmul.mubr.bf16.gmra.mxu1 %v3166_v32  ;;  %1573 = vmatpush1.bf16.msra.mxu0 %v3119_v28  ;;  %v3229_v28 = vld [vmem:[%s3652_s14 + $0x64] ss:$36 sps:$4 sm:$0xff]  }
  0x63   : > { %1656 = vmatpush1.bf16.msra.mxu1 %v3122_v29  ;;  %1574 = vmatprep.subr.bf16.mxu0 %v3127_v30  ;;  %v3224_v29 = vld [vmem:[%s4392_s1 + $0x460] ss:$8 sps:$4 sm:$0xff]   ;;  %v3235_v30 = vld [vmem:[%s4392_s1 + $0x454] ss:$8 sps:$4 sm:$0xff]  }
  0x64   : > { %1657 = vmatprep.subr.bf16.mxu1 %v3130_v33  ;;  %1460 = vmatprep.mubr.bf16.mxu0 %v3173_v34  ;;  %v3232_v32 = vld [vmem:[%s3652_s14 + $0x60] ss:$36 sps:$4 sm:$0xff]   ;;  %v3233_v33 = vld [vmem:[%s4392_s1 + $0x450] ss:$8 sps:$4 sm:$0xff]  }
  0x65   : > { %1543 = vmatprep.mubr.bf16.mxu1 %v3176_v35  ;;  %v3236_v34 = vld [vmem:[%s3652_s14 + $0xa4] ss:$36 sps:$4 sm:$0xff]   ;;  %v3238_v35 = vld [vmem:[%s3652_s14 + $0xac] ss:$36 sps:$4 sm:$0xff]  }
  0x66   : > { %1575 = vmatpush1.bf16.msra.mxu0 %v3125_v36  ;;  %v3242_v36 = vld [vmem:[%s4392_s1 + $0x444] ss:$8 sps:$4 sm:$0xff]  }
  0x67   : > { %1658 = vmatpush1.bf16.msra.mxu1 %v3128_v37  ;;  %1576 = vmatprep.subr.bf16.mxu0 %v3133_v38  ;;  %v3240_v37 = vld [vmem:[%s4392_s1 + $0x440] ss:$8 sps:$4 sm:$0xff]   ;;  %v3247_v38 = vld [vmem:[%s4392_s1 + $0x434] ss:$8 sps:$4 sm:$0xff]  }
  0x68   : > { %1659 = vmatprep.subr.bf16.mxu1 %v3136_v39  ;;  %v3243_v39 = vld [vmem:[%s3652_s14 + $0xa0] ss:$36 sps:$4 sm:$0xff]  }
  0x69   : > { %1461 = vmatmul.mubr.bf16.gmra.mxu0 %v3175_v43  ;;  %v3250_v43 = vld [vmem:[%s3652_s14 + $0xf4] ss:$36 sps:$4 sm:$0xff]  }
  0x6a   : > { %1544 = vmatmul.mubr.bf16.gmra.mxu1 %v3184_v44  ;;  %1577 = vmatpush1.bf16.msra.mxu0 %v3131_v40  ;;  %v3244_v40 = vld [vmem:[%s3652_s14 + $0xa8] ss:$36 sps:$4 sm:$0xff]  }
  0x6b   : > { %1660 = vmatpush1.bf16.msra.mxu1 %v3134_v41  ;;  %1578 = vmatprep.subr.bf16.mxu0 %v3144_v42  ;;  %v3245_v41 = vld [vmem:[%s4392_s1 + $0x430] ss:$8 sps:$4 sm:$0xff]   ;;  %v3256_v44 = vld [vmem:[%s4392_s1 + $0x424] ss:$8 sps:$4 sm:$0xff]  }
  0x6c   : > { %1661 = vmatprep.subr.bf16.mxu1 %v3147_v45  ;;  %1470 = vmatprep.mubr.bf16.mxu0 %v3191_v46  ;;  %v3248_v42 = vld [vmem:[%s3652_s14 + $0xec] ss:$36 sps:$4 sm:$0xff]   ;;  %v3254_v45 = vld [vmem:[%s4392_s1 + $0x420] ss:$8 sps:$4 sm:$0xff]   ;;  %v3259_v46 = vld [vmem:[%s4392_s1 + $0x414] ss:$8 sps:$4 sm:$0xff]  }
  0x6d   : > { %1553 = vmatprep.mubr.bf16.mxu1 %v3194_v47  ;;  %v3252_v47 = vld [vmem:[%s3652_s14 + $0xe8] ss:$36 sps:$4 sm:$0xff]  }
  0x6e   : > { %1579 = vmatpush1.bf16.msra.mxu0 %v3142_v48  ;;  %v3253_v48 = vld [vmem:[%s3652_s14 + $0xf0] ss:$36 sps:$4 sm:$0xff]  }
  0x6f   : > { %1662 = vmatpush1.bf16.msra.mxu1 %v3145_v49  ;;  %1580 = vmatprep.subr.bf16.mxu0 %v3151_v50  ;;  %v3260_v49 = vld [vmem:[%s3652_s14 + $0x134] ss:$36 sps:$4 sm:$0xff]   ;;  %v3262_v50 = vld [vmem:[%s3652_s14 + $0x13c] ss:$36 sps:$4 sm:$0xff]  }
  0x70   : > { %1663 = vmatprep.subr.bf16.mxu1 %v3154_v51  ;;  %v3257_v51 = vld [vmem:[%s4392_s1 + $0x410] ss:$8 sps:$4 sm:$0xff]  }
  0x71   : > { %1471 = vmatmul.mubr.bf16.gmra.mxu0 %v3193_v54  ;;  %v3264_v54 = vld [vmem:[%s3652_s14 + $0x130] ss:$36 sps:$4 sm:$0xff]  }
  0x72   : > { %1554 = vmatmul.mubr.bf16.gmra.mxu1 %v3202_v55  ;;  %1581 = vmatpush2.bf16.msra.mxu0 %v3149_v52  ;;  %v3268_v52 = vld [vmem:[%s4392_s1 + $0x404] ss:$8 sps:$4 sm:$0xff]   ;;  %v3265_v55 = vld [vmem:[%s3652_s14 + $0x138] ss:$36 sps:$4 sm:$0xff]  }
  0x73   : > { %1664 = vmatpush2.bf16.msra.mxu1 %v3152_v53  ;;  %1582 = vmatprep.subr.bf16.mxu0 %v3162_v56  ;;  %v3266_v53 = vld [vmem:[%s4392_s1 + $0x400] ss:$8 sps:$4 sm:$0xff]   ;;  %v3454_v56 = vmov 0  }
  0x74   : > { %1665 = vmatprep.subr.bf16.mxu1 %v3165_v57  ;;  %1596 = vmatprep.mubr.bf16.mxu0 %v3217_v61  ;;  %v3269_v57 = vld [vmem:[%s3652_s14 + $0x20] ss:$36 sps:$4 sm:$0xff]   ;;  %v3273_v61 = vld [vmem:[%s3652_s14 + $0xb0] ss:$36 sps:$4 sm:$0xff]  }
  0x75   : > { %1679 = vmatprep.mubr.bf16.mxu1 %v3220_v63 }
  0x76   : > { %1583 = vmatpush2.bf16.msra.mxu0 %v3160_v58  ;;  %v3270_v58 = vld [vmem:[%s3652_s14 + $0xf8] ss:$36 sps:$4 sm:$0xff]  }
  0x77   : > { %1666 = vmatpush2.bf16.msra.mxu1 %v3163_v59  ;;  %1584 = vmatprep.subr.bf16.mxu0 %v3169_v60  ;;  %v3271_v59 = vld [vmem:[%s3652_s14 + $0x68] ss:$36 sps:$4 sm:$0xff]   ;;  %v3272_v60 = vld [vmem:[%s3652_s14 + $0x140] ss:$36 sps:$4 sm:$0xff]   ;;  %s203_s14 = sand.u32 1, %s3380_s15  }
  0x78   : > { %1667 = vmatprep.subr.bf16.mxu1 %v3172_v62  ;;  %v438_v62 = vlaneseq  ;;  %s4115_s15 = smul.u32 80, %s203_s14 }
  0x7a   : > { %1585 = vmatpush2.bf16.msra.mxu0 %v3167_v0  ;;  %v439_v63 = vshrl.u32 %v438_v62, 7  ;;  %s4146_s24 = scalar_lea.vmem [#allocation2], %s4115_s15   ;;  %s4253_s25 = scalar_lea.vmem [#allocation3], %s4115_s15  }
  0x7b   : > { %1668 = vmatpush2.bf16.msra.mxu1 %v3170_v1  ;;  %1586 = vmatprep.subr.bf16.mxu0 %v3180_v2  ;;  %v436_v1 = vld [vmem:[%s4393_s2] sm:$0x3] }
  0x7c   : > { %1669 = vmatprep.subr.bf16.mxu1 %v3183_v3  ;;  %v440_v0 = vsub.s32 0, %v439_v63  ;;  %v444_v2 = vsub.s32 1, %v439_v63 }
  0x7e   : > { %1587 = vmatpush2.bf16.msra.mxu0 %v3178_v4  ;;  %v3999_v3 = vrot.slane %v436_v1, %v440_v0  ;;  %v4001_v4 = vrot.slane %v436_v1, %v444_v2 }
  0x7f   : > { %1670 = vmatpush2.bf16.msra.mxu1 %v3181_v5  ;;  %1588 = vmatprep.subr.bf16.mxu0 %v3187_v6 }
  0x80   : > { %1671 = vmatprep.subr.bf16.mxu1 %v3190_v7 }
  0x82   : > { %1589 = vmatpush2.bf16.msra.mxu0 %v3185_v8 }
  0x83   : > { %1672 = vmatpush2.bf16.msra.mxu1 %v3188_v9  ;;  %1590 = vmatprep.subr.bf16.mxu0 %v3198_v10 }
  0x84   : > { %1673 = vmatprep.subr.bf16.mxu1 %v3201_v11 }
  0x86   : > { %1591 = vmatpush2.bf16.msra.mxu0 %v3196_v12 }
  0x87   : > { %1674 = vmatpush2.bf16.msra.mxu1 %v3199_v13  ;;  %1592 = vmatprep.subr.bf16.mxu0 %v3205_v14 }
  0x88   : > { %1675 = vmatprep.subr.bf16.mxu1 %v3208_v15 }
  0x8a   : > { %1593 = vmatpush2.bf16.msra.mxu0 %v3203_v16 }
  0x8b   : > { %1676 = vmatpush2.bf16.msra.mxu1 %v3206_v17  ;;  %1594 = vmatprep.subr.bf16.mxu0 %v3211_v18 }
  0x8c   : > { %1677 = vmatprep.subr.bf16.mxu1 %v3214_v19 }
  0x8e   : > { %1595 = vmatpush2.bf16.msra.mxu0 %v3209_v20 }
  0x8f   : > { %1678 = vmatpush2.bf16.msra.mxu1 %v3212_v21  ;;  %1730 = vmatprep.subr.bf16.mxu0 %v3223_v22 }
  0x90   : > { %2820 = vmatprep.subr.bf16.mxu1 %v3223_v22 }
  0x91   : > { %1597 = vmatmul.mubr.bf16.vlgmr.msra.gmra.mxu0 %v3215_v23 }
  0x92   : > { %1680 = vmatmul.mubr.bf16.vlgmr.msra.gmra.mxu1 %v3218_v24  ;;  %1731 = vmatpush1.bf16.msra.mxu0 %v3221_v25 }
  0x93   : > { %2828 = vmatpush1.bf16.msra.mxu1 %v3221_v25  ;;  %1732 = vmatprep.subr.bf16.mxu0 %v3226_v26 }
  0x94   : > { %1606 = vmatprep.mubr.bf16.mxu0 %v3227_v27  ;;  %1689 = vmatprep.mubr.bf16.mxu1 %v3229_v28 }
  0x95   : > { %2821 = vmatprep.subr.bf16.mxu1 %v3226_v26 }
  0x96   : > { %1733 = vmatpush1.bf16.msra.mxu0 %v3224_v29 }
  0x97   : > { %2829 = vmatpush1.bf16.msra.mxu1 %v3224_v29  ;;  %1734 = vmatprep.subr.bf16.mxu0 %v3235_v30 }
  0x98   : > { %2822 = vmatprep.subr.bf16.mxu1 %v3235_v30 }
  0x99   : > { %1607 = vmatmul.mubr.bf16.gmra.mxu0 %v3231_v31 }
  0x9a   : > { %1690 = vmatmul.mubr.bf16.gmra.mxu1 %v3232_v32  ;;  %1735 = vmatpush1.bf16.msra.mxu0 %v3233_v33 }
  0x9b   : > { %1616 = vmatprep.mubr.bf16.mxu0 %v3236_v34  ;;  %1699 = vmatprep.mubr.bf16.mxu1 %v3238_v35 }
  0x9c   : > { %2830 = vmatpush1.bf16.msra.mxu1 %v3233_v33  ;;  %1736 = vmatprep.subr.bf16.mxu0 %v3242_v36 }
  0x9d   : > { %2823 = vmatprep.subr.bf16.mxu1 %v3242_v36 }
  0x9e   : > { %1737 = vmatpush1.bf16.msra.mxu0 %v3240_v37 }
  0x9f   : > { %1738 = vmatprep.subr.bf16.mxu0 %v3247_v38 }
  0xa0   : > { %2831 = vmatpush1.bf16.msra.mxu1 %v3240_v37 }
  0xa1   : > { %2824 = vmatprep.subr.bf16.mxu1 %v3247_v38  ;;  %1617 = vmatmul.mubr.bf16.gmra.mxu0 %v3243_v39 }
  0xa2   : > { %1700 = vmatmul.mubr.bf16.gmra.mxu1 %v3244_v40  ;;  %1739 = vmatpush1.bf16.msra.mxu0 %v3245_v41 }
  0xa3   : > { %1626 = vmatprep.mubr.bf16.mxu0 %v3248_v42  ;;  %1709 = vmatprep.mubr.bf16.mxu1 %v3250_v43 }
  0xa4   : > { %2832 = vmatpush1.bf16.msra.mxu1 %v3245_v41  ;;  %1740 = vmatprep.subr.bf16.mxu0 %v3256_v44 }
  0xa5   : > { %2825 = vmatprep.subr.bf16.mxu1 %v3256_v44 }
  0xa6   : > { %1741 = vmatpush1.bf16.msra.mxu0 %v3254_v45 }
  0xa7   : > { %1742 = vmatprep.subr.bf16.mxu0 %v3259_v46 }
  0xa8   : > { %2833 = vmatpush1.bf16.msra.mxu1 %v3254_v45 }
  0xa9   : > { %2826 = vmatprep.subr.bf16.mxu1 %v3259_v46  ;;  %1627 = vmatmul.mubr.bf16.gmra.mxu0 %v3252_v47 }
  0xaa   : > { %1710 = vmatmul.mubr.bf16.gmra.mxu1 %v3253_v48  ;;  %1636 = vmatprep.mubr.bf16.mxu0 %v3260_v49 }
  0xab   : > { %1719 = vmatprep.mubr.bf16.mxu1 %v3262_v50  ;;  %1743 = vmatpush1.bf16.msra.mxu0 %v3257_v51 }
  0xac   : > { %2834 = vmatpush1.bf16.msra.mxu1 %v3257_v51  ;;  %1744 = vmatprep.subr.bf16.mxu0 %v3268_v52 }
  0xad   : > { %2827 = vmatprep.subr.bf16.mxu1 %v3268_v52 }
  0xaf   : > { %1745 = vmatpush1.bf16.msra.mxu0 %v3266_v53 }
  0xb0   : > { %2835 = vmatpush1.bf16.msra.mxu1 %v3266_v53 }
  0xb1   : > { %1637 = vmatmul.mubr.bf16.gmra.mxu0 %v3264_v54 }
  0xb2   : > { %1720 = vmatmul.mubr.bf16.gmra.mxu1 %v3265_v55  ;;  %1762 = vmatprep.mubr.bf16.mxu0 %v3454_v56 }
  0xb3   : > { %1792 = vmatprep.mubr.bf16.mxu1 %v3454_v56 }
  0xb9   : > { %1763 = vmatmul.mubr.bf16.vlgmr.msra.gmra.mxu0 %v3269_v57 }
  0xba   : > { %1793 = vmatmul.mubr.bf16.vlgmr.msra.gmra.mxu1 %v3270_v58  ;;  %1772 = vmatprep.mubr.bf16.mxu0 %v3454_v56 }
  0xbb   : > { %1802 = vmatprep.mubr.bf16.mxu1 %v3454_v56 }
  0xc1   : > { %1773 = vmatmul.mubr.bf16.gmra.mxu0 %v3271_v59 }
  0xc2   : > { %1803 = vmatmul.mubr.bf16.gmra.mxu1 %v3272_v60  ;;  %1782 = vmatprep.mubr.bf16.mxu0 %v3454_v56 }
  0xc9   : > { %1783 = vmatmul.mubr.bf16.gmra.mxu0 %v3273_v61 }
 0x111   : > { %v1432_v5 = vpop.f32.mrf.mxu0 }
 0x112   : > { %v1515_v6 = vpop.f32.mrf.mxu1  ;;  %v1433_v7 = vadd.f32 %v1432_v5, %v3999_v3 }
 0x113   : > { %v1434_v8 = vpop.f32.mrf.mxu0 }
 0x114   : > { %v1517_v9 = vpop.f32.mrf.mxu1  ;;  %v4004_v10 = vadd.f32 %v1515_v6, %v1433_v7  ;;  %v1435_v11 = vadd.f32 %v1434_v8, %v4001_v4 }
 0x115   : > { %v1436_v12 = vpop.f32.mrf.mxu0 }
 0x116   : > { %v1519_v13 = vpop.f32.mrf.mxu1  ;;  %v4007_v14 = vadd.f32 %v1517_v9, %v1435_v11  ;;  %v1437_v15 = vadd.f32 %v1436_v12, %v3999_v3 }
 0x117   : > { %v1438_v16 = vpop.f32.mrf.mxu0 }
 0x118   : > { %v1521_v17 = vpop.f32.mrf.mxu1  ;;  %v4010_v18 = vadd.f32 %v1519_v13, %v1437_v15  ;;  %v1439_v19 = vadd.f32 %v1438_v16, %v4001_v4 }
 0x119   : > { %v1442_v20 = vpop.f32.mrf.mxu0 }
 0x11a   : > { %v1525_v21 = vpop.f32.mrf.mxu1  ;;  %v4013_v22 = vadd.f32 %v1521_v17, %v1439_v19  ;;  %v1443_v23 = vadd.f32 %v1442_v20, %v3999_v3 }
 0x11b   : > { %v1444_v24 = vpop.f32.mrf.mxu0 }
 0x11c   : > { %v1527_v25 = vpop.f32.mrf.mxu1  ;;  %v1445_v26 = vadd.f32 %v1444_v24, %v4001_v4  ;;  %v4017_v27 = vadd.f32 %v1525_v21, %v1443_v23 }
 0x11d   : > { %v1446_v28 = vpop.f32.mrf.mxu0 }
 0x11e   : > { %v1529_v29 = vpop.f32.mrf.mxu1  ;;  %v1447_v30 = vadd.f32 %v1446_v28, %v3999_v3  ;;  %v4020_v31 = vadd.f32 %v1527_v25, %v1445_v26 }
 0x11f   : > { %v1448_v32 = vpop.f32.mrf.mxu0 }
 0x120   : > { %v1531_v33 = vpop.f32.mrf.mxu1  ;;  %v1449_v34 = vadd.f32 %v1448_v32, %v4001_v4  ;;  %v4023_v35 = vadd.f32 %v1529_v29, %v1447_v30 }
 0x121   : > { %v1452_v36 = vpop.f32.mrf.mxu0 }
 0x122   : > { %v1535_v37 = vpop.f32.mrf.mxu1  ;;  %v1453_v38 = vadd.f32 %v1452_v36, %v3999_v3  ;;  %v4026_v39 = vadd.f32 %v1531_v33, %v1449_v34 }
 0x123   : > { %v1454_v40 = vpop.f32.mrf.mxu0 }
 0x124   : > { %v1537_v41 = vpop.f32.mrf.mxu1  ;;  %v1455_v42 = vadd.f32 %v1454_v40, %v4001_v4  ;;  %v4029_v43 = vadd.f32 %v1535_v37, %v1453_v38 }
 0x125   : > { %v1456_v44 = vpop.f32.mrf.mxu0 }
 0x126   : > { %v1539_v45 = vpop.f32.mrf.mxu1  ;;  %v1457_v46 = vadd.f32 %v1456_v44, %v3999_v3  ;;  %v4032_v47 = vadd.f32 %v1537_v41, %v1455_v42 }
 0x127   : > { %v1458_v48 = vpop.f32.mrf.mxu0 }
 0x128   : > { %4397 = vst [vmem:[#allocation4_spill] sm:$0xff] %v4032_v47  ;;  %v1541_v49 = vpop.f32.mrf.mxu1  ;;  %v1459_v50 = vadd.f32 %v1458_v48, %v4001_v4  ;;  %v4035_v51 = vadd.f32 %v1539_v45, %v1457_v46 }
 0x129   : > { %v1462_v53 = vpop.f32.mrf.mxu0 }
 0x12a   : > { %4398 = vst [vmem:[#allocation5_spill] sm:$0xff] %v4035_v51  ;;  %v4037_v52 = vadd.f32 %v1541_v49, %v1459_v50  ;;  %v1545_v54 = vpop.f32.mrf.mxu1  ;;  %v1463_v44 = vadd.f32 %v1462_v53, %v3999_v3 }
 0x12b   : > { %v1464_v55 = vpop.f32.mrf.mxu0 }
 0x12c   : > { %4399 = vst [vmem:[#allocation6_spill] sm:$0xff] %v4037_v52  ;;  %v1547_v56 = vpop.f32.mrf.mxu1  ;;  %v1465_v48 = vadd.f32 %v1464_v55, %v4001_v4 }
 0x12d   : > { %v1466_v57 = vpop.f32.mrf.mxu0 }
 0x12e   : > { %v1549_v58 = vpop.f32.mrf.mxu1  ;;  %v1467_v49 = vadd.f32 %v1466_v57, %v3999_v3 }
 0x12f   : > { %v1468_v59 = vpop.f32.mrf.mxu0 }
 0x130   : > { %v1551_v60 = vpop.f32.mrf.mxu1  ;;  %v1550_v51 = vadd.f32 %v1549_v58, %v1467_v49 }
 0x131   : > { %v1472_v61 = vpop.f32.mrf.mxu0 }
 0x132   : > { %v4039_v62 = vpop.f32.mrf.mxu1 }
 0x133   : > { %v1474_v63 = vpop.f32.mrf.mxu0 }
 0x134   : > { %v4041_v0 = vpop.f32.mrf.mxu1  ;;  %v1475_v53 = vadd.f32 %v1474_v63, %v4001_v4 }
 0x135   : > { %v1476_v1 = vpop.f32.mrf.mxu0 }
 0x136   : > { %v4043_v2 = vpop.f32.mrf.mxu1  ;;  %v1477_v47 = vadd.f32 %v1476_v1, %v3999_v3 }
 0x137   : > { %v1478_v5 = vpop.f32.mrf.mxu0 }
 0x138   : > { %v4045_v6 = vpop.f32.mrf.mxu1  ;;  %v1479_v55 = vadd.f32 %v1478_v5, %v4001_v4 }
 0x151   : > { %v1598_v7 = vpop.f32.mrf.mxu0 }
 0x152   : > { %v4047_v8 = vpop.f32.mrf.mxu1  ;;  %v1599_v57 = vadd.f32 %v1598_v7, %v4004_v10 }
 0x153   : > { %v1600_v9 = vpop.f32.mrf.mxu0 }
 0x154   : > { %v4049_v11 = vpop.f32.mrf.mxu1 }
 0x155   : > { %v1602_v12 = vpop.f32.mrf.mxu0 }
 0x156   : > { %v4051_v13 = vpop.f32.mrf.mxu1 }
 0x157   : > { %v1604_v15 = vpop.f32.mrf.mxu0 }
 0x158   : > { %v4053_v16 = vpop.f32.mrf.mxu1 }
 0x159   : > { %v1608_v17 = vpop.f32.mrf.mxu0 }
 0x15a   : > { %v4055_v19 = vpop.f32.mrf.mxu1 }
 0x15b   : > { %v1610_v20 = vpop.f32.mrf.mxu0 }
 0x15c   : > { %v4057_v21 = vpop.f32.mrf.mxu1  ;;  %v1611_v63 = vadd.f32 %v1610_v20, %v4020_v31  ;;  %v1682_v31 = vadd.f32 %v4047_v8, %v1599_v57 }
 0x15d   : > { %v1612_v23 = vpop.f32.mrf.mxu0 }
 0x15e   : > { %v4059_v24 = vpop.f32.mrf.mxu1 }
 0x15f   : > { %v1614_v25 = vpop.f32.mrf.mxu0 }
 0x160   : > { %v1697_v26 = vpop.f32.mrf.mxu1 }
 0x161   : > { %v1618_v28 = vpop.f32.mrf.mxu0 }
 0x162   : > { %v4061_v29 = vpop.f32.mrf.mxu1 }
 0x163   : > { %4400 = vst [vmem:[#allocation7_spill] sm:$0xff] %v4061_v29  ;;  %v4063_v30 = vpop.f32.mrf.mxu0 }
 0x164   : > { %4401 = vst [vmem:[#allocation8_spill] sm:$0xff] %v4063_v30  ;;  %v4065_v32 = vpop.f32.mrf.mxu1  ;;  %v1473_v30 = vadd.f32 %v1472_v61, %v3999_v3  ;;  %v1609_v61 = vadd.f32 %v1608_v17, %v4017_v27  ;;  %v1613_v3 = vadd.f32 %v1612_v23, %v4023_v35  ;;  %v1562_v27 = vadd.f32 %v4045_v6, %v1479_v55 }
 0x165   : > { %4402 = vst [vmem:[#allocation9_spill] sm:$0xff] %v4065_v32  ;;  %v4067_v33 = vpop.f32.mrf.mxu0 }
 0x166   : > { %4403 = vst [vmem:[#allocation10_spill] sm:$0xff] %v4067_v33  ;;  %v4069_v34 = vpop.f32.mrf.mxu1  ;;  %v1548_v33 = vadd.f32 %v1547_v56, %v1465_v48  ;;  %v1605_v56 = vadd.f32 %v1604_v15, %v4013_v22  ;;  %v1560_v22 = vadd.f32 %v4043_v2, %v1477_v47  ;;  %v4108_v47 = vadd.f32 %v4059_v24, %v1613_v3 }
 0x167   : > { %4404 = vst [vmem:[#allocation11_spill] sm:$0xff] %v4069_v34  ;;  %v4071_v36 = vpop.f32.mrf.mxu0  ;;  %v1469_v34 = vadd.f32 %v1468_v59, %v4001_v4  ;;  %v1615_v4 = vadd.f32 %v1614_v25, %v4026_v39 }
 0x168   : > { %4405 = vst [vmem:[#allocation12_spill] sm:$0xff] %v4071_v36  ;;  %v4073_v37 = vpop.f32.mrf.mxu1  ;;  %v1546_v36 = vadd.f32 %v1545_v54, %v1463_v44  ;;  %v1603_v44 = vadd.f32 %v1602_v12, %v4010_v18  ;;  %v1619_v18 = vadd.f32 %v1618_v28, %v4029_v43  ;;  %v1688_v12 = vadd.f32 %v4053_v16, %v1605_v56 }
 0x169   : > { %4406 = vst [vmem:[#allocation13_spill] sm:$0xff] %v4073_v37  ;;  %v1628_v38 = vpop.f32.mrf.mxu0  ;;  %v1552_v54 = vadd.f32 %v1551_v60, %v1469_v34  ;;  %v1558_v60 = vadd.f32 %v4041_v0, %v1475_v53  ;;  %v1692_v43 = vadd.f32 %v4055_v19, %v1609_v61  ;;  %v1694_v0 = vadd.f32 %v4057_v21, %v1611_v63 }
 0x16a   : > { %v1711_v40 = vpop.f32.mrf.mxu1  ;;  %v1629_v58 = vadd.f32 %v1628_v38, %v1546_v36  ;;  %v4110_v2 = vadd.f32 %v1697_v26, %v1615_v4  ;;  %v4408_v8 = vld [vmem:[#allocation7_spill] sm:$0xff]  ;;  %v4411_v38 = vld [vmem:[#allocation5_spill] sm:$0xff] }
 0x16b   : > { %v1630_v41 = vpop.f32.mrf.mxu0  ;;  %v4410_v34 = vld [vmem:[#allocation8_spill] sm:$0xff] }
 0x16c   : > { %v1713_v42 = vpop.f32.mrf.mxu1  ;;  %v1631_v5 = vadd.f32 %v1630_v41, %v1548_v33  ;;  %v4409_v33 = vld [vmem:[#allocation4_spill] sm:$0xff] }
 0x16d   : > { %v1632_v45 = vpop.f32.mrf.mxu0  ;;  %v4119_v36 = vadd.f32 %v4410_v34, %v4409_v33 }
 0x16e   : > { %v1715_v46 = vpop.f32.mrf.mxu1  ;;  %v1633_v15 = vadd.f32 %v1632_v45, %v1550_v51 }
 0x16f   : > { %v1634_v50 = vpop.f32.mrf.mxu0 }
 0x170   : > { %v4078_v52 = vpop.f32.mrf.mxu1  ;;  %v1635_v20 = vadd.f32 %v1634_v50, %v1552_v54  ;;  %v1716_v24 = vadd.f32 %v1715_v46, %v1633_v15 }
 0x171   : > { %4407 = vst [vmem:[#allocation14_spill] sm:$0xff] %v4078_v52  ;;  %v1638_v32 = vpop.f32.mrf.mxu0  ;;  %v1601_v52 = vadd.f32 %v1600_v9, %v4007_v14  ;;  %v1556_v14 = vadd.f32 %v4039_v62, %v1473_v30  ;;  %v1686_v9 = vadd.f32 %v4051_v13, %v1603_v44  ;;  %v1712_v62 = vadd.f32 %v1711_v40, %v1629_v58  ;;  %v4412_v40 = vld [vmem:[#allocation10_spill] sm:$0xff] }
 0x172   : > { %v4081_v37 = vpop.f32.mrf.mxu1  ;;  %v1714_v13 = vadd.f32 %v1713_v42, %v1631_v5  ;;  %v4123_v41 = vadd.f32 %v4412_v40, %v4411_v38 }
 0x173   : > { %v1640_v29 = vpop.f32.mrf.mxu0  ;;  %v1684_v35 = vadd.f32 %v4049_v11, %v1601_v52  ;;  %v4113_v11 = vadd.f32 %v4408_v8, %v1619_v18  ;;  %v1639_v51 = vadd.f32 %v1638_v32, %v1556_v14 }
 0x174   : > { %v1723_v59 = vpop.f32.mrf.mxu1  ;;  %v1641_v23 = vadd.f32 %v1640_v29, %v1558_v60 }
 0x175   : > { %v1642_v1 = vpop.f32.mrf.mxu0  ;;  %v1722_v57 = vadd.f32 %v4081_v37, %v1639_v51 }
 0x176   : > { %v1725_v10 = vpop.f32.mrf.mxu1  ;;  %v1643_v25 = vadd.f32 %v1642_v1, %v1560_v22  ;;  %v1724_v54 = vadd.f32 %v1723_v59, %v1641_v23 }
 0x177   : > { %v1644_v7 = vpop.f32.mrf.mxu0 }
 0x178   : > { %v1727_v39 = vpop.f32.mrf.mxu1  ;;  %v1645_v28 = vadd.f32 %v1644_v7, %v1562_v27  ;;  %v4413_v53 = vld [vmem:[#allocation14_spill] sm:$0xff]  ;;  %v1726_v44 = vadd.f32 %v1725_v10, %v1643_v25 }
 0x179   : > { %v1764_v6 = vpop.f32.mrf.mxu0  ;;  %v1718_v55 = vadd.f32 %v4413_v53, %v1635_v20 }
 0x17a   : > { %v1794_v52 = vpop.f32.mrf.mxu1  ;;  %v1765_v17 = vadd.f32 %v1764_v6, %v1682_v31  ;;  %v1728_v61 = vadd.f32 %v1727_v39, %v1645_v28 }
 0x17b   : > { %v1795_v16 = vadd.f32 %v1794_v52, %v1712_v62  ;;  %v1766_v19 = vpop.f32.mrf.mxu0 }
 0x17c   : > { %v1796_v21 = vpop.f32.mrf.mxu1  ;;  %v1767_v26 = vadd.f32 %v1766_v19, %v1684_v35  ;;  %v4125_v42 = vmax.f32 %v1765_v17, 0.0 }
 0x17d   : > { %v1797_v30 = vadd.f32 %v1796_v21, %v1714_v13  ;;  %v4127_v29 = vmax.f32 %v1795_v16, 0.0  ;;  %v1768_v32 = vpop.f32.mrf.mxu0 }
 0x17e   : > { %v1798_v45 = vpop.f32.mrf.mxu1  ;;  %v4129_v48 = vmax.f32 %v1767_v26, 0.0  ;;  %v1769_v49 = vadd.f32 %v1768_v32, %v1686_v9  ;;  %v1903_v37 = vmul.f32 %v4125_v42, %v4125_v42 }
 0x17f   : > { %v4131_v46 = vmax.f32 %v1797_v30, 0.0  ;;  %v1799_v50 = vadd.f32 %v1798_v45, %v1716_v24  ;;  %v1770_v56 = vpop.f32.mrf.mxu0  ;;  %v1915_v27 = vmul.f32 %v4127_v29, %v4127_v29 }
 0x180   : > { %v1800_v58 = vpop.f32.mrf.mxu1  ;;  %v2792_v63 = vpack.c.bf16 %v4129_v48, %v4125_v42  ;;  %v1771_v1 = vadd.f32 %v1770_v56, %v1688_v12  ;;  %v1904_v59 = vmul.f32 %v4129_v48, %v4129_v48  ;;  %v4150_v10 = vmax.f32 %v1769_v49, 0.0 }
 0x181   : > { %v2798_v3 = vpack.c.bf16 %v4131_v46, %v4127_v29  ;;  %v4139_v4 = vmax.f32 %v1799_v50, 0.0  ;;  %v1801_v14 = vadd.f32 %v1800_v58, %v1718_v55  ;;  %v1774_v60 = vpop.f32.mrf.mxu0  ;;  %v1916_v12 = vmul.f32 %v4131_v46, %v4131_v46  ;;  %v4414_v50 = vld [vmem:[#allocation9_spill] sm:$0xff]  ;;  %v4415_v55 = vld [vmem:[#allocation6_spill] sm:$0xff] }
 0x182   : > { %v1804_v18 = vpop.f32.mrf.mxu1  ;;  %1893 = vst [vmem:[%s4146_s24] sm:$0xff] %v2792_v63  ;;  %v1775_v5 = vadd.f32 %v1774_v60, %v1692_v43  ;;  %v4154_v31 = vmax.f32 %v1771_v1, 0.0  ;;  %v1923_v9 = vadd.f32 %v1904_v59, %v1903_v37  ;;  %v1905_v30 = vmul.f32 %v4150_v10, %v4150_v10 }
 0x183   : > { %1899 = vst [vmem:[%s4146_s24 + $0x30] sm:$0xff] %v2798_v3  ;;  %v1805_v22 = vadd.f32 %v1804_v18, %v1722_v57  ;;  %v4156_v35 = vmax.f32 %v1801_v14, 0.0  ;;  %v1776_v7 = vpop.f32.mrf.mxu0  ;;  %v1917_v6 = vmul.f32 %v4139_v4, %v4139_v4  ;;  %v1941_v26 = vadd.f32 %v1916_v12, %v1915_v27  ;;  %v4416_v57 = vld [vmem:[#allocation12_spill] sm:$0xff] }
 0x184   : > { %v1806_v39 = vpop.f32.mrf.mxu1  ;;  %v4160_v62 = vmax.f32 %v1775_v5, 0.0  ;;  %v1777_v15 = vadd.f32 %v1776_v7, %v1694_v0  ;;  %v2793_v52 = vpack.c.bf16 %v4154_v31, %v4150_v10  ;;  %1924 = vadd.xlane.f32.xlu0 %v1923_v9  ;;  %v1906_v25 = vmul.f32 %v4154_v31, %v4154_v31 }
 0x185   : > { %v1807_v43 = vadd.f32 %v1806_v39, %v1724_v54  ;;  %v2799_v8 = vpack.c.bf16 %v4156_v35, %v4139_v4  ;;  %v4168_v13 = vmax.f32 %v1805_v22, 0.0  ;;  %v1778_v17 = vpop.f32.mrf.mxu0  ;;  %v1918_v20 = vmul.f32 %v4156_v35, %v4156_v35 }
 0x186   : > { %v1808_v16 = vpop.f32.mrf.mxu1  ;;  %v4172_v51 = vmax.f32 %v1777_v15, 0.0  ;;  %v1779_v23 = vadd.f32 %v1778_v17, %v4108_v47  ;;  %1894 = vst [vmem:[%s4146_s24 + $0x8] sm:$0xff] %v2793_v52  ;;  %v1907_v38 = vmul.f32 %v4160_v62, %v4160_v62  ;;  %v1704_v53 = vadd.f32 %v4414_v50, %v4119_v36  ;;  %v4417_v36 = vld [vmem:[#allocation11_spill] sm:$0xff] }
 0x187   : > { %v4174_v0 = vmax.f32 %v1807_v43, 0.0  ;;  %1900 = vst [vmem:[%s4146_s24 + $0x38] sm:$0xff] %v2799_v8  ;;  %v1809_v19 = vadd.f32 %v1808_v16, %v1726_v44  ;;  %v1780_v21 = vpop.f32.mrf.mxu0  ;;  %v1944_v28 = vadd.f32 %v1918_v20, %v1917_v6  ;;  %v1625_v54 = vadd.f32 %v4416_v57, %v4415_v55 }
 0x188   : > { %v1810_v24 = vpop.f32.mrf.mxu1  ;;  %v2794_v33 = vpack.c.bf16 %v4172_v51, %v4160_v62  ;;  %v4187_v34 = vmax.f32 %v1779_v23, 0.0  ;;  %v1781_v40 = vadd.f32 %v1780_v21, %v4110_v2  ;;  %1942 = vadd.xlane.f32.xlu0 %v1941_v26  ;;  %v1908_v49 = vmul.f32 %v4172_v51, %v4172_v51 }
 0x189   : > { %v2800_v47 = vpack.c.bf16 %v4174_v0, %v4168_v13  ;;  %v1811_v32 = vadd.f32 %v1810_v24, %v1728_v61  ;;  %1945 = vadd.xlane.f32.xlu1 %v1944_v28  ;;  %v1784_v45 = vpop.f32.mrf.mxu0  ;;  %v1926_v56 = vadd.f32 %v1906_v25, %v1905_v30  ;;  %v4201_v58 = vmax.f32 %v1809_v19, 0.0 }
 0x18a   : > { %1895 = vst [vmem:[%s4146_s24 + $0x10] sm:$0xff] %v2794_v33  ;;  %v1785_v44 = vadd.f32 %v1784_v45, %v4113_v11  ;;  %v4203_v2 = vmax.f32 %v1781_v40, 0.0  ;;  %v1929_v3 = vadd.f32 %v1908_v49, %v1907_v38  ;;  %v1706_v1 = vadd.f32 %v4417_v36, %v4123_v41  ;;  %v4418_v41 = vld [vmem:[#allocation13_spill] sm:$0xff] }
 0x18b   : > { %1901 = vst [vmem:[%s4146_s24 + $0x40] sm:$0xff] %v2800_v47  ;;  %v4205_v61 = vmax.f32 %v1811_v32, 0.0  ;;  %v1786_v63 = vpop.f32.mrf.mxu0  ;;  %v1909_v11 = vmul.f32 %v4187_v34, %v4187_v34  ;;  %v1708_v22 = vadd.f32 %v4418_v41, %v1625_v54  ;;  %v1920_v16 = vmul.f32 %v4174_v0, %v4174_v0 }
 0x18c   : > { %v4209_v14 = vmax.f32 %v1785_v44, 0.0  ;;  %v1787_v60 = vadd.f32 %v1786_v63, %v1704_v53  ;;  %v2795_v18 = vpack.c.bf16 %v4203_v2, %v4187_v34  ;;  %1927 = vadd.xlane.f32.xlu0 %v1926_v56  ;;  %v1910_v5 = vmul.f32 %v4203_v2, %v4203_v2 }
 0x18d   : > { %v2801_v37 = vpack.c.bf16 %v4205_v61, %v4201_v58  ;;  %1930 = vadd.xlane.f32.xlu1 %v1929_v3  ;;  %v1788_v59 = vpop.f32.mrf.mxu0  ;;  %v1919_v19 = vmul.f32 %v4168_v13, %v4168_v13  ;;  %v1922_v28 = vmul.f32 %v4205_v61, %v4205_v61  ;;  %v1921_v26 = vmul.f32 %v4201_v58, %v4201_v58 }
 0x18e   : > { %v4220_v27 = vmax.f32 %v1787_v60, 0.0  ;;  %v1789_v7 = vadd.f32 %v1788_v59, %v1706_v1  ;;  %1896 = vst [vmem:[%s4146_s24 + $0x18] sm:$0xff] %v2795_v18  ;;  %v1932_v9 = vadd.f32 %v1910_v5, %v1909_v11  ;;  %v1911_v12 = vmul.f32 %v4209_v14, %v4209_v14 }
 0x18f   : > { %1902 = vst [vmem:[%s4146_s24 + $0x48] sm:$0xff] %v2801_v37  ;;  %v1790_v39 = vpop.f32.mrf.mxu0  ;;  %v1947_v24 = vadd.f32 %v1920_v16, %v1919_v19  ;;  %v1950_v30 = vadd.f32 %v1922_v28, %v1921_v26 }
 0x190   : > { %v2796_v15 = vpack.c.bf16 %v4220_v27, %v4209_v14  ;;  %v4228_v43 = vmax.f32 %v1789_v7, 0.0  ;;  %v1791_v6 = vadd.f32 %v1790_v39, %v1708_v22  ;;  %v1912_v52 = vmul.f32 %v4220_v27, %v4220_v27 }
 0x191   : > { %1933 = vadd.xlane.f32.xlu1 %v1932_v9 }
 0x192   : > { %1897 = vst [vmem:[%s4146_s24 + $0x20] sm:$0xff] %v2796_v15  ;;  %v4233_v8 = vmax.f32 %v1791_v6, 0.0  ;;  %v1935_v17 = vadd.f32 %v1912_v52, %v1911_v12  ;;  %v1913_v23 = vmul.f32 %v4228_v43, %v4228_v43 }
 0x194   : > { %v2797_v20 = vpack.c.bf16 %v4233_v8, %v4228_v43  ;;  %1936 = vadd.xlane.f32.xlu0 %v1935_v17  ;;  %v1914_v25 = vmul.f32 %v4233_v8, %v4233_v8 }
 0x196   : > { %1898 = vst [vmem:[%s4146_s24 + $0x28] sm:$0xff] %v2797_v20  ;;  %v1938_v21 = vadd.f32 %v1914_v25, %v1913_v23 }
 0x198   : > { %1939 = vadd.xlane.f32.xlu1 %v1938_v21  ;;  %1948 = vadd.xlane.f32.xlu0 %v1947_v24 }
 0x19c   : > { %1951 = vadd.xlane.f32.xlu1 %v1950_v30 }
 0x20d   : > { %v1925_v33 = vpop.xlane.xlu0 %1924 }
 0x20e   : > { %v1953_v47 = vadd.f32 1e-08, %v1925_v33 }
 0x210   : > { %3274 = vrsqrt.f32 %v1953_v47 }
 0x211   : > { %v1943_v40 = vpop.xlane.xlu0 %1942 }
 0x212   : > { %v1946_v38 = vpop.xlane.xlu1 %1945  ;;  %v1959_v45 = vadd.f32 1e-08, %v1943_v40 }
 0x213   : > { %v1960_v32 = vadd.f32 1e-08, %v1946_v38 }
 0x215   : > { %3276 = vrsqrt.f32 %v1960_v32  ;;  %v1928_v50 = vpop.xlane.xlu0 %1927 }
 0x216   : > { %3278 = vrsqrt.f32 %v1959_v45  ;;  %v1931_v49 = vpop.xlane.xlu1 %1930  ;;  %v1954_v55 = vadd.f32 1e-08, %v1928_v50 }
 0x217   : > { %v1955_v53 = vadd.f32 1e-08, %v1931_v49 }
 0x219   : > { %3280 = vrsqrt.f32 %v1955_v53 }
 0x21a   : > { %3282 = vrsqrt.f32 %v1954_v55  ;;  %v1934_v57 = vpop.xlane.xlu1 %1933 }
 0x21b   : > { %v1956_v54 = vadd.f32 1e-08, %v1934_v57 }
 0x21d   : > { %3284 = vrsqrt.f32 %v1956_v54  ;;  %v1937_v44 = vpop.xlane.xlu0 %1936  ;;  %v3275_v56 = vpop.eup %3274 }
 0x21e   : > { %v1957_v63 = vadd.f32 1e-08, %v1937_v44  ;;  %v1973_v3 = vmul.f32 %v3275_v56, %v4125_v42  ;;  %v1974_v36 = vmul.f32 %v3275_v56, %v4129_v48 }
 0x220   : > { %3286 = vrsqrt.f32 %v1957_v63  ;;  %v2802_v1 = vpack.c.bf16 %v1974_v36, %v1973_v3 }
 0x221   : > { %v1940_v60 = vpop.xlane.xlu1 %1939  ;;  %v1949_v11 = vpop.xlane.xlu0 %1948 }
 0x222   : > { %v3277_v18 = vpop.eup %3276  ;;  %v1958_v37 = vadd.f32 1e-08, %v1940_v60  ;;  %v1961_v59 = vadd.f32 1e-08, %v1949_v11  ;;  %2053 = vst [vmem:[%s4253_s25] sm:$0xff] %v2802_v1 }
 0x223   : > { %v3279_v5 = vpop.eup %3278  ;;  %v1987_v41 = vmul.f32 %v3277_v18, %v4139_v4  ;;  %v1988_v42 = vmul.f32 %v3277_v18, %v4156_v35 }
 0x224   : > { %v1985_v48 = vmul.f32 %v3279_v5, %v4127_v29  ;;  %v1986_v22 = vmul.f32 %v3279_v5, %v4131_v46  ;;  %3288 = vrsqrt.f32 %v1958_v37 }
 0x225   : > { %v2809_v7 = vpack.c.bf16 %v1988_v42, %v1987_v41  ;;  %3290 = vrsqrt.f32 %v1961_v59  ;;  %v1952_v39 = vpop.xlane.xlu1 %1951 }
 0x226   : > { %v3281_v9 = vpop.eup %3280  ;;  %v2808_v12 = vpack.c.bf16 %v1986_v22, %v1985_v48  ;;  %v1962_v15 = vadd.f32 1e-08, %v1952_v39 }
 0x227   : > { %v3283_v6 = vpop.eup %3282  ;;  %2060 = vst [vmem:[%s4253_s25 + $0x38] sm:$0xff] %v2809_v7  ;;  %v1977_v52 = vmul.f32 %v3281_v9, %v4160_v62  ;;  %v1978_v4 = vmul.f32 %v3281_v9, %v4172_v51 }
 0x228   : > { %2059 = vst [vmem:[%s4253_s25 + $0x30] sm:$0xff] %v2808_v12  ;;  %v1975_v29 = vmul.f32 %v3283_v6, %v4150_v10  ;;  %v1976_v46 = vmul.f32 %v3283_v6, %v4154_v31  ;;  %3292 = vrsqrt.f32 %v1962_v15 }
 0x229   : > { %v2804_v35 = vpack.c.bf16 %v1978_v4, %v1977_v52 }
 0x22a   : > { %v3285_v17 = vpop.eup %3284  ;;  %v2803_v16 = vpack.c.bf16 %v1976_v46, %v1975_v29 }
 0x22b   : > { %2055 = vst [vmem:[%s4253_s25 + $0x10] sm:$0xff] %v2804_v35  ;;  %v1979_v20 = vmul.f32 %v3285_v17, %v4187_v34  ;;  %v1980_v23 = vmul.f32 %v3285_v17, %v4203_v2 }
 0x22c   : > { %2054 = vst [vmem:[%s4253_s25 + $0x8] sm:$0xff] %v2803_v16 }
 0x22d   : > { %v3287_v62 = vpop.eup %3286  ;;  %v2805_v51 = vpack.c.bf16 %v1980_v23, %v1979_v20 }
 0x22e   : > { %v1981_v25 = vmul.f32 %v3287_v62, %v4209_v14  ;;  %v1982_v10 = vmul.f32 %v3287_v62, %v4220_v27 }
 0x22f   : > { %2056 = vst [vmem:[%s4253_s25 + $0x18] sm:$0xff] %v2805_v51 }
 0x230   : > { %v2806_v31 = vpack.c.bf16 %v1982_v10, %v1981_v25 }
 0x231   : > { %v3289_v19 = vpop.eup %3288 }
 0x232   : > { %v3291_v21 = vpop.eup %3290  ;;  %2057 = vst [vmem:[%s4253_s25 + $0x20] sm:$0xff] %v2806_v31  ;;  %v1983_v24 = vmul.f32 %v3289_v19, %v4228_v43  ;;  %v1984_v34 = vmul.f32 %v3289_v19, %v4233_v8 }
 0x233   : > { %v1989_v2 = vmul.f32 %v3291_v21, %v4168_v13  ;;  %v1990_v28 = vmul.f32 %v3291_v21, %v4174_v0 }
 0x234   : > { %v2807_v26 = vpack.c.bf16 %v1984_v34, %v1983_v24 }
 0x235   : > { %v3293_v30 = vpop.eup %3292  ;;  %v2810_v14 = vpack.c.bf16 %v1990_v28, %v1989_v2 }
 0x236   : > { %2058 = vst [vmem:[%s4253_s25 + $0x28] sm:$0xff] %v2807_v26  ;;  %v1991_v27 = vmul.f32 %v3293_v30, %v4201_v58  ;;  %v1992_v33 = vmul.f32 %v3293_v30, %v4205_v61  ;;  %2073 = sbr.rel (!%p3505_p4) target bundleno = 624 (0x270), region = 36 }
 0x237   : > { %2061 = vst [vmem:[%s4253_s25 + $0x40] sm:$0xff] %v2810_v14 }
 0x238   : > { %v2811_v47 = vpack.c.bf16 %v1992_v33, %v1991_v27 }
 0x23a   : > { %2062 = vst [vmem:[%s4253_s25 + $0x48] sm:$0xff] %v2811_v47 }
 0x23b   : > { %s4429_s26 = smov (!%p2076_p8, %s2075_s26), 10 }
 0x23c   : > { %s2812_s5 = sshll.u32 %s4429_s26, 7 }
 0x23d   : > { %p2771_p9 = scmp.eq.s32.totalorder %s2812_s5, 0 }
 0x23e   : > { %3294 = sdivrem.u32 (!%p2771_p9), %s4429_s26, 10 }
 0x23f   : > { %2086 = sbr.rel (%p2771_p9) target bundleno = 624 (0x270), region = 40 }
 0x247   : > { %s4296_s6 = spop.drf %3294 }
 0x248   : > { %p2772_p10 = scmp.le.s32.totalorder %s4296_s6, 0 }
 0x249   : > { %s4419_s7 = smov (!%p2772_p10), %s4290_s29  ;;  %s4420_s8 = smov (!%p2772_p10), %s4146_s24 }
 0x24a   : > { %2471 = sbr.rel (%p2772_p10) target bundleno = 599 (0x257), region = 188  ;;  %s4305_s9 = smov (!%p2772_p10), 0  }
 0x24b   : > { %s4307_s10 = smov (!%p2772_p10), 0  }
 0x24f LB: >> { %v2169_v13 = vld [vmem:[%s3396_s8] sm:$0xff]  ;;  %v2171_v0 = vld [vmem:[%s3396_s8 + $0x8] sm:$0xff]  ;;  %v2173_v58 = vld [vmem:[%s3396_s8 + $0x10] sm:$0xff]  ;;  %s2189_s11 = sadd.s32 1, %s3400_s9  ;;  %s2163_s10 = sadd.s32 1, %s3404_s10   ;;  %s3404_s10 = sphi %s4307_s10, %s2163_s10   ;;  %s3400_s9 = sphi %s4305_s9, %s4421_s9   ;;  %s3396_s8 = sphi %s4420_s8, %s2194_s8   ;;  %s3392_s7 = sphi %s4419_s7, %s2195_s7  }
 0x250   : >> { %2170 = vst [vmem:[%s3392_s7] sm:$0xff] %v2169_v13  ;;  %2172 = vst [vmem:[%s3392_s7 + $0x8] sm:$0xff] %v2171_v0  ;;  %v2175_v61 = vld [vmem:[%s3396_s8 + $0x18] sm:$0xff]  ;;  %v2177_v43 = vld [vmem:[%s3396_s8 + $0x20] sm:$0xff]  ;;  %p2190_p11 = scmp.ge.s32.totalorder %s2189_s11, %s4296_s6  ;;  %p2162_p12 = scmp.ge.s32.totalorder %s2163_s10, %s4296_s6 }
 0x251   : >> { %2174 = vst [vmem:[%s3392_s7 + $0x10] sm:$0xff] %v2173_v58  ;;  %v2179_v8 = vld [vmem:[%s3396_s8 + $0x28] sm:$0xff]  ;;  %2176 = vst [vmem:[%s3392_s7 + $0x18] sm:$0xff] %v2175_v61  ;;  %v2181_v38 = vld [vmem:[%s3396_s8 + $0x30] sm:$0xff] }
 0x252   : >> { %2178 = vst [vmem:[%s3392_s7 + $0x20] sm:$0xff] %v2177_v43  ;;  %2180 = vst [vmem:[%s3392_s7 + $0x28] sm:$0xff] %v2179_v8  ;;  %v2183_v40 = vld [vmem:[%s3396_s8 + $0x38] sm:$0xff]  ;;  %v2185_v32 = vld [vmem:[%s3396_s8 + $0x40] sm:$0xff]  ;;  %s4431_s11 = smov (%p2190_p11, %s2189_s11), 0  ;;  %2165 = sbr.rel (!%p2162_p12) target bundleno = 591 (0x24f), region = 194 }
 0x253   : >> { %2182 = vst [vmem:[%s3392_s7 + $0x30] sm:$0xff] %v2181_v38  ;;  %2184 = vst [vmem:[%s3392_s7 + $0x38] sm:$0xff] %v2183_v40  ;;  %v2187_v45 = vld [vmem:[%s3396_s8 + $0x48] sm:$0xff]  ;;  %s2192_s12 = smul.u32 80, %s4431_s11  ;;  %s4421_s9 = smov %s4431_s11 }
 0x254   : >> { %2186 = vst [vmem:[%s3392_s7 + $0x40] sm:$0xff] %v2185_v32  ;;  %2188 = vst [vmem:[%s3392_s7 + $0x48] sm:$0xff] %v2187_v45 }
 0x255   : >> { %s2194_s8 = scalar_lea.vmem %s4146_s24, %s2192_s12 [#allocation2]   ;;  %s2195_s7 = scalar_lea.vmem %s4290_s29, %s2192_s12  }
 0x257 PF: > { %3296 = sdivrem.u32 %s4429_s26, 10 }
 0x258   : > { %s2773_s13 = smul.u32 80, %s4296_s6 }
 0x25a   : > { %s2200_s17 = scalar_lea.vmem %s4146_s24, %s2773_s13 [#allocation2]   ;;  %s2202_s21 = scalar_lea.vmem %s4290_s29, %s2773_s13  }
 0x260   : > { %s3297_s14 = spop.drf %3296 }
 0x261   : > { %p2775_p13 = scmp.le.s32.totalorder %s3297_s14, 0 }
 0x262   : > { %s3406_s15 = smov (!%p2775_p13), %s2202_s21   ;;  %s3410_s27 = smov (!%p2775_p13), %s2200_s17  }
 0x263   : > { %2485 = sbr.rel (%p2775_p13) target bundleno = 624 (0x270), region = 199  ;;  %s3414_s28 = smov (!%p2775_p13), 0  }
 0x264   : > { %s3418_s30 = smov (!%p2775_p13), 0  }
 0x268 LB: >> { %v2212_v49 = vld [vmem:[%s3412_s27] sm:$0xff]  ;;  %s2214_s5 = sadd.s32 1, %s3416_s28  ;;  %s2206_s30 = sadd.s32 1, %s3420_s30   ;;  %s3420_s30 = sphi %s3418_s30, %s2206_s30   ;;  %s3416_s28 = sphi %s3414_s28, %s3415_s28   ;;  %s3412_s27 = sphi %s3410_s27, %s2219_s27   ;;  %s3408_s15 = sphi %s3406_s15, %s2220_s15  }
 0x269   : >> { %2213 = vst [vmem:[%s3408_s15] sm:$0xff] %v2212_v49  ;;  %p2215_p0 = scmp.ge.s32.totalorder %s2214_s5, %s3297_s14  ;;  %p2205_p1 = scmp.ge.s32.totalorder %s2206_s30, %s3297_s14 }
 0x26b   : >> { %s4433_s5 = smov (%p2215_p0, %s2214_s5), 0  ;;  %2208 = sbr.rel (!%p2205_p1) target bundleno = 616 (0x268), region = 205 }
 0x26c   : >> { %s2776_s24 = sshll.u32 %s4433_s5, 3  ;;  %s3415_s28 = smov %s4433_s5  }
 0x26d   : >> { %s2219_s27 = scalar_lea.vmem %s2200_s17, %s2776_s24 [#allocation2]   ;;  %s2220_s15 = scalar_lea.vmem %s2202_s21, %s2776_s24  }
 0x270 PF: > { %2226 = sbr.rel (!%p3505_p4) target bundleno = 682 (0x2aa), region = 88  ;;  %s2228_s26 = ssub.s32 (%p3505_p4), 19, %s3597_s20 }
 0x271   : > { %s2819_s29 = smul.u32 (%p3505_p4), 80, %s3493_s18  ;;  %p2229_p2 = scmp.lt.s32.totalorder (%p3505_p4), %s2228_s26, 10 }
 0x273   : > { %s4339_s8 = scalar_lea.vmem (%p3505_p4), %s4395_s4, %s2819_s29  }
 0x275   : > { %s4435_s26 = smov (!%p2229_p2, %s2228_s26), 10 }
 0x276   : > { %s2815_s9 = sshll.u32 %s4435_s26, 7 }
 0x277   : > { %p2783_p3 = scmp.eq.s32.totalorder %s2815_s9, 0 }
 0x278   : > { %3298 = sdivrem.u32 (!%p2783_p3), %s4435_s26, 10 }
 0x279   : > { %2239 = sbr.rel (%p2783_p3) target bundleno = 682 (0x2aa), region = 92 }
 0x281   : > { %s4345_s23 = spop.drf %3298 }
 0x282   : > { %p2784_p4 = scmp.le.s32.totalorder %s4345_s23, 0 }
 0x283   : > { %s4422_s18 = smov (!%p2784_p4), %s4339_s8  ;;  %s4423_s20 = smov (!%p2784_p4), %s4253_s25 }
 0x284   : > { %2499 = sbr.rel (%p2784_p4) target bundleno = 657 (0x291), region = 210  ;;  %s4354_s10 = smov (!%p2784_p4), 0  }
 0x285   : > { %s4356_s11 = smov (!%p2784_p4), 0  }
 0x289 LB: >> { %v2322_v50 = vld [vmem:[%s3428_s20] sm:$0xff]  ;;  %v2324_v53 = vld [vmem:[%s3428_s20 + $0x8] sm:$0xff]  ;;  %v2326_v55 = vld [vmem:[%s3428_s20 + $0x10] sm:$0xff]  ;;  %s2342_s12 = sadd.s32 1, %s3432_s10  ;;  %s2316_s11 = sadd.s32 1, %s3436_s11   ;;  %s3436_s11 = sphi %s4356_s11, %s2316_s11   ;;  %s3432_s10 = sphi %s4354_s10, %s4424_s10   ;;  %s3428_s20 = sphi %s4423_s20, %s2347_s20   ;;  %s3424_s18 = sphi %s4422_s18, %s2348_s18  }
 0x28a   : >> { %2323 = vst [vmem:[%s3424_s18] sm:$0xff] %v2322_v50  ;;  %2325 = vst [vmem:[%s3424_s18 + $0x8] sm:$0xff] %v2324_v53  ;;  %v2328_v57 = vld [vmem:[%s3428_s20 + $0x18] sm:$0xff]  ;;  %v2330_v54 = vld [vmem:[%s3428_s20 + $0x20] sm:$0xff]  ;;  %p2343_p5 = scmp.ge.s32.totalorder %s2342_s12, %s4345_s23  ;;  %p2315_p6 = scmp.ge.s32.totalorder %s2316_s11, %s4345_s23 }
 0x28b   : >> { %2327 = vst [vmem:[%s3424_s18 + $0x10] sm:$0xff] %v2326_v55  ;;  %v2332_v44 = vld [vmem:[%s3428_s20 + $0x28] sm:$0xff]  ;;  %2329 = vst [vmem:[%s3424_s18 + $0x18] sm:$0xff] %v2328_v57  ;;  %v2334_v56 = vld [vmem:[%s3428_s20 + $0x30] sm:$0xff] }
 0x28c   : >> { %2331 = vst [vmem:[%s3424_s18 + $0x20] sm:$0xff] %v2330_v54  ;;  %2333 = vst [vmem:[%s3424_s18 + $0x28] sm:$0xff] %v2332_v44  ;;  %v2336_v63 = vld [vmem:[%s3428_s20 + $0x38] sm:$0xff]  ;;  %v2338_v3 = vld [vmem:[%s3428_s20 + $0x40] sm:$0xff]  ;;  %s4437_s12 = smov (%p2343_p5, %s2342_s12), 0  ;;  %2318 = sbr.rel (!%p2315_p6) target bundleno = 649 (0x289), region = 216 }
 0x28d   : >> { %2335 = vst [vmem:[%s3424_s18 + $0x30] sm:$0xff] %v2334_v56  ;;  %2337 = vst [vmem:[%s3424_s18 + $0x38] sm:$0xff] %v2336_v63  ;;  %v2340_v36 = vld [vmem:[%s3428_s20 + $0x48] sm:$0xff]  ;;  %s2345_s13 = smul.u32 80, %s4437_s12  ;;  %s4424_s10 = smov %s4437_s12 }
 0x28e   : >> { %2339 = vst [vmem:[%s3424_s18 + $0x40] sm:$0xff] %v2338_v3  ;;  %2341 = vst [vmem:[%s3424_s18 + $0x48] sm:$0xff] %v2340_v36 }
 0x28f   : >> { %s2347_s20 = scalar_lea.vmem %s4253_s25, %s2345_s13 [#allocation3]   ;;  %s2348_s18 = scalar_lea.vmem %s4339_s8, %s2345_s13  }
 0x291 PF: > { %3300 = sdivrem.u32 %s4435_s26, 10 }
 0x292   : > { %s2785_s17 = smul.u32 80, %s4345_s23 }
 0x294   : > { %s2353_s21 = scalar_lea.vmem %s4253_s25, %s2785_s17 [#allocation3]   ;;  %s2355_s14 = scalar_lea.vmem %s4339_s8, %s2785_s17  }
 0x29a   : > { %s3301_s15 = spop.drf %3300 }
 0x29b   : > { %p2787_p7 = scmp.le.s32.totalorder %s3301_s15, 0 }
 0x29c   : > { %s3438_s27 = smov (!%p2787_p7), %s2355_s14   ;;  %s3442_s28 = smov (!%p2787_p7), %s2353_s21  }
 0x29d   : > { %2513 = sbr.rel (%p2787_p7) target bundleno = 682 (0x2aa), region = 221  ;;  %s3446_s30 = smov (!%p2787_p7), 0  }
 0x29e   : > { %s3450_s5 = smov (!%p2787_p7), 0  }
 0x2a2 LB: >> { %v2365_v1 = vld [vmem:[%s3444_s28] sm:$0xff]  ;;  %s2367_s24 = sadd.s32 1, %s3448_s30  ;;  %s2359_s5 = sadd.s32 1, %s3452_s5   ;;  %s3452_s5 = sphi %s3450_s5, %s2359_s5   ;;  %s3448_s30 = sphi %s3446_s30, %s3447_s30   ;;  %s3444_s28 = sphi %s3442_s28, %s2372_s28   ;;  %s3440_s27 = sphi %s3438_s27, %s2373_s27  }
 0x2a3   : >> { %2366 = vst [vmem:[%s3440_s27] sm:$0xff] %v2365_v1  ;;  %p2368_p8 = scmp.ge.s32.totalorder %s2367_s24, %s3301_s15  ;;  %p2358_p9 = scmp.ge.s32.totalorder %s2359_s5, %s3301_s15 }
 0x2a5   : >> { %s4439_s24 = smov (%p2368_p8, %s2367_s24), 0  ;;  %2361 = sbr.rel (!%p2358_p9) target bundleno = 674 (0x2a2), region = 227 }
 0x2a6   : >> { %s2788_s25 = sshll.u32 %s4439_s24, 3  ;;  %s3447_s30 = smov %s4439_s24  }
 0x2a7   : >> { %s2372_s28 = scalar_lea.vmem %s2353_s21, %s2788_s25 [#allocation3]   ;;  %s2373_s27 = scalar_lea.vmem %s2355_s14, %s2788_s25  }
 0x2aa PF: > { %p12_p10 = scmp.ge.s32.totalorder %s3495_s19, 4   ;;  %s4425_s15 = smov %s3384_s16 }
 0x2ab   : > { %s4426_s16 = smov %s3503_s22  ;;  %s4427_s17 = smov %s3495_s19 }
 0x2ac   :  { %14 = sbr.rel (!%p12_p10) target bundleno = 2 (0x2), region = 238 }

// kernel: puzzle_sim_forward.25
= control target key start
LH: loop header
LB: loop body
LE: loop exit
PB: predicated region body
PF: predicated region fallthrough
CT: control target
= control target key end

     0   :  { %s552_s12 = smov 0   ;;  %s624_s0 = inlined_call_operand.vmem [shape: bf16[27,256], index: 0, kind: input, shape index: {}]   ;;  %s625_s1 = inlined_call_operand.vmem [shape: bf16[256,128], index: 1, kind: input, shape index: {}]   ;;  %s626_s2 = inlined_call_operand.vmem [shape: f32[1,128], index: 2, kind: input, shape index: {}]   ;;  %s627_s3 = inlined_call_operand.vmem [shape: bf16[27,128], index: 3, kind: output, shape index: {}]  }
   0x1 LB: > { %s434_s13 = sadd.s32 4294967295, %s530_s12   ;;  %p438_p0 = scmp.ge.s32.totalorder %s530_s12, 1  ;;  %s530_s12 = sphi %s552_s12, %s13_s12  }
   0x2   : > { %p139_p1 = scmp.lt.s32.totalorder %s530_s12, 3 }
   0x4   : > { %p140_p2 = pnand %p438_p0, %p139_p1 }
   0x5   : > { %s439_s16 = sshll.u32 (!%p140_p2), %s434_s13, 1 }
   0x6   : > { %143 = sbr.rel (%p140_p2) target bundleno = 252 (0xfc), region = 32  ;;  %p165_p3 = scmp.lt.s32.totalorder (!%p140_p2), %s439_s16, 3 }
   0xb   : > { %v505_v0 = vld [vmem:[%s625_s1 + $0x78] sm:$0xff]   ;;  %v507_v2 = vld [vmem:[%s625_s1 + $0x70] sm:$0xff]   ;;  %v509_v4 = vld [vmem:[%s625_s1 + $0x68] sm:$0xff]   ;;  %s629_s16 = smov (!%p165_p3, %s439_s16), 3 }
   0xc   : > { %v506_v1 = vld [vmem:[%s625_s1 + $0x38] sm:$0xff]   ;;  %475 = vmatprep.subr.bf16.mxu0 %v505_v0  ;;  %v508_v3 = vld [vmem:[%s625_s1 + $0x30] sm:$0xff]   ;;  %v510_v5 = vld [vmem:[%s625_s1 + $0x28] sm:$0xff]   ;;  %s467_s4 = sshll.u32 %s629_s16, 3  ;;  %s443_s28 = sshll.u32 %s629_s16, 2 }
   0xd   : > { %476 = vmatpush3.bf16.msra.mxu0 %v506_v1  ;;  %v511_v6 = vld [vmem:[%s625_s1 + $0x60] sm:$0xff]   ;;  %v513_v8 = vld [vmem:[%s625_s1 + $0x58] sm:$0xff]   ;;  %s169_s9 = scalar_lea.vmem %s624_s0, %s467_s4  ;;  %v515_v10 = vld [vmem:[%s625_s1 + $0x50] sm:$0xff]   ;;  %s175_s4 = scalar_lea.vmem %s627_s3, %s443_s28 }
   0xe   : > { %477 = vmatprep.subr.bf16.mxu0 %v507_v2  ;;  %v512_v7 = vld [vmem:[%s625_s1 + $0x20] sm:$0xff]   ;;  %v514_v9 = vld [vmem:[%s625_s1 + $0x18] sm:$0xff]   ;;  %v516_v12 = vld [vmem:[%s625_s1 + $0x10] sm:$0xff]  }
   0xf   : > { %v523_v11 = vld [vmem:[%s169_s9 + $0x4] ss:$8 sps:$4 sm:$0xff]   ;;  %v521_v17 = vld [vmem:[%s169_s9] ss:$8 sps:$4 sm:$0xff]  }
  0x10   : > { %357 = vmatprep.mubr.bf16.mxu0 %v523_v11  ;;  %v517_v13 = vld [vmem:[%s625_s1 + $0x48] sm:$0xff]   ;;  %v519_v15 = vld [vmem:[%s625_s1 + $0x40] sm:$0xff]  }
  0x11   : > { %478 = vmatpush3.bf16.msra.mxu0 %v508_v3  ;;  %v518_v14 = vld [vmem:[%s625_s1 + $0x8] sm:$0xff]   ;;  %v520_v16 = vld [vmem:[%s625_s1] sm:$0xff]  }
  0x12   : > { %479 = vmatprep.subr.bf16.mxu0 %v509_v4  ;;  %v444_v21 = vld [vmem:[%s626_s2] ss:$0 sm:$0xff] }
  0x15   : > { %480 = vmatpush3.bf16.msra.mxu0 %v510_v5 }
  0x16   : > { %481 = vmatprep.subr.bf16.mxu0 %v511_v6 }
  0x19   : > { %482 = vmatpush3.bf16.msra.mxu0 %v512_v7 }
  0x1a   : > { %483 = vmatprep.subr.bf16.mxu0 %v513_v8 }
  0x1d   : > { %484 = vmatpush3.bf16.msra.mxu0 %v514_v9 }
  0x1e   : > { %485 = vmatprep.subr.bf16.mxu0 %v515_v10 }
  0x21   : > { %486 = vmatpush3.bf16.msra.mxu0 %v516_v12 }
  0x22   : > { %487 = vmatprep.subr.bf16.mxu0 %v517_v13 }
  0x25   : > { %488 = vmatpush3.bf16.msra.mxu0 %v518_v14 }
  0x26   : > { %489 = vmatprep.subr.bf16.mxu0 %v519_v15 }
  0x29   : > { %490 = vmatpush3.bf16.msra.mxu0 %v520_v16 }
  0x2c   : > { %358 = vmatmul.mubr.bf16.vlgmr.msra.gmra.mxu0 %v521_v17 }
  0xec   : > { %v491_v18 = vpop.f32.mrf.mxu0 }
  0xee   : > { %v492_v19 = vpop.f32.mrf.mxu0 }
  0xef   : > { %v493_v20 = vadd.f32 %v492_v19, %v491_v18 }
  0xf0   : > { %v494_v22 = vpop.f32.mrf.mxu0 }
  0xf1   : > { %v360_v24 = vadd.f32 %v493_v20, %v444_v21 }
  0xf2   : > { %v495_v23 = vpop.f32.mrf.mxu0 }
  0xf3   : > { %v496_v25 = vadd.f32 %v495_v23, %v494_v22  ;;  %v366_v27 = vmax.f32 %v360_v24, 0.0 }
  0xf5   : > { %v363_v26 = vadd.f32 %v496_v25, %v444_v21 }
  0xf7   : > { %v367_v28 = vmax.f32 %v363_v26, 0.0 }
  0xf9   : > { %v473_v29 = vpack.c.bf16 %v367_v28, %v366_v27 }
  0xfb   : > { %474 = vst [vmem:[%s175_s4] sm:$0xff] %v473_v29  }
  0xfc PF: > { %s13_s12 = sadd.s32 1, %s530_s12  }
  0xfd   : > { %p10_p4 = scmp.ge.s32.totalorder %s13_s12, 4  }
  0xff   :  { %12 = sbr.rel (!%p10_p4) target bundleno = 1 (0x1), region = 62 }

// kernel: puzzle_sim_forward.27
= control target key start
LH: loop header
LB: loop body
LE: loop exit
PB: predicated region body
PF: predicated region fallthrough
CT: control target
= control target key end

     0   :  { %s715_s12 = smov 0   ;;  %s811_s0 = inlined_call_operand.vmem [shape: bf16[27,384], index: 0, kind: input, shape index: {}]   ;;  %s812_s1 = inlined_call_operand.vmem [shape: bf16[384,128], index: 1, kind: input, shape index: {}]   ;;  %s813_s2 = inlined_call_operand.vmem [shape: f32[1,128], index: 2, kind: input, shape index: {}]   ;;  %s814_s3 = inlined_call_operand.vmem [shape: bf16[27,128], index: 3, kind: output, shape index: {}]  }
   0x1 LB: > { %s547_s13 = sadd.s32 4294967295, %s691_s12   ;;  %p551_p0 = scmp.ge.s32.totalorder %s691_s12, 1  ;;  %s691_s12 = sphi %s715_s12, %s13_s12  }
   0x2   : > { %p139_p1 = scmp.lt.s32.totalorder %s691_s12, 3 }
   0x4   : > { %p140_p2 = pnand %p551_p0, %p139_p1 }
   0x5   : > { %s552_s30 = sshll.u32 (!%p140_p2), %s547_s13, 1 }
   0x6   : > { %143 = sbr.rel (%p140_p2) target bundleno = 254 (0xfe), region = 32  ;;  %p165_p3 = scmp.lt.s32.totalorder (!%p140_p2), %s552_s30, 3 }
   0xb   : > { %v657_v0 = vld [vmem:[%s812_s1 + $0x78] sm:$0xff]   ;;  %v693_v1 = vmov 0.0   ;;  %v660_v4 = vld [vmem:[%s812_s1 + $0x70] sm:$0xff]   ;;  %vm694_vm0 = vmmov 0   ;;  %v663_v7 = vld [vmem:[%s812_s1 + $0x68] sm:$0xff]   ;;  %s816_s30 = smov (!%p165_p3, %s552_s30), 3 }
   0xc   : > { %626 = vmatprep.subr.bf16.mxu1 %v693_v1  ;;  %v658_v2 = vld [vmem:[%s812_s1 + $0x38] sm:$0xff]   ;;  %595 = vmatprep.subr.bf16.mxu0 %v657_v0  ;;  %v661_v5 = vld [vmem:[%s812_s1 + $0x30] sm:$0xff]   ;;  %v664_v8 = vld [vmem:[%s812_s1 + $0x28] sm:$0xff]   ;;  %s646_s23 = smul.u32 12, %s816_s30  ;;  %s555_s18 = sshll.u32 %s816_s30, 2 }
   0xd   : > { %v659_v3 = vld [vmem:[%s812_s1 + $0xb8] sm:$0xff]   ;;  %596 = vmatpush3.bf16.msra.mxu0 %v658_v2  ;;  %642 = vmatprep.mubr.msk.bf16.mxu1 %vm694_vm0, %v693_v1  ;;  %v662_v6 = vld [vmem:[%s812_s1 + $0xb0] sm:$0xff]   ;;  %v665_v9 = vld [vmem:[%s812_s1 + $0xa8] sm:$0xff]   ;;  %s175_s21 = scalar_lea.vmem %s814_s3, %s555_s18 }
   0xe   : > { %627 = vmatpush3.bf16.msra.mxu1 %v659_v3  ;;  %597 = vmatprep.subr.bf16.mxu0 %v660_v4  ;;  %v666_v10 = vld [vmem:[%s812_s1 + $0x60] sm:$0xff]   ;;  %v669_v13 = vld [vmem:[%s812_s1 + $0x58] sm:$0xff]   ;;  %v672_v16 = vld [vmem:[%s812_s1 + $0x50] sm:$0xff]   ;;  %s169_s6 = scalar_lea.vmem %s811_s0, %s646_s23 }
   0xf   : > { %628 = vmatprep.subr.bf16.mxu1 %v693_v1  ;;  %v667_v11 = vld [vmem:[%s812_s1 + $0x20] sm:$0xff]   ;;  %v670_v14 = vld [vmem:[%s812_s1 + $0x18] sm:$0xff]   ;;  %v673_v17 = vld [vmem:[%s812_s1 + $0x10] sm:$0xff]  }
  0x10   : > { %v668_v12 = vld [vmem:[%s812_s1 + $0xa0] sm:$0xff]   ;;  %v671_v15 = vld [vmem:[%s812_s1 + $0x98] sm:$0xff]   ;;  %v674_v18 = vld [vmem:[%s812_s1 + $0x90] sm:$0xff]  }
  0x11   : > { %598 = vmatpush3.bf16.msra.mxu0 %v661_v5  ;;  %v675_v19 = vld [vmem:[%s812_s1 + $0x48] sm:$0xff]   ;;  %v678_v22 = vld [vmem:[%s812_s1 + $0x40] sm:$0xff]  }
  0x12   : > { %629 = vmatpush3.bf16.msra.mxu1 %v662_v6  ;;  %599 = vmatprep.subr.bf16.mxu0 %v663_v7  ;;  %v676_v20 = vld [vmem:[%s812_s1 + $0x8] sm:$0xff]   ;;  %v683_v23 = vld [vmem:[%s169_s6 + $0x4] ss:$12 sps:$4 sm:$0xff]   ;;  %v556_v30 = vld [vmem:[%s813_s2] ss:$0 sm:$0xff] }
  0x13   : > { %630 = vmatprep.subr.bf16.mxu1 %v693_v1  ;;  %v677_v21 = vld [vmem:[%s812_s1 + $0x88] sm:$0xff]   ;;  %v679_v24 = vld [vmem:[%s812_s1] sm:$0xff]   ;;  %429 = vmatprep.mubr.bf16.mxu0 %v683_v23 }
  0x14   : > { %v680_v25 = vld [vmem:[%s812_s1 + $0x80] sm:$0xff]   ;;  %v684_v27 = vld [vmem:[%s169_s6 + $0x8] ss:$12 sps:$4 sm:$0xff]  }
  0x15   : > { %600 = vmatpush3.bf16.msra.mxu0 %v664_v8  ;;  %v681_v26 = vld [vmem:[%s169_s6] ss:$12 sps:$4 sm:$0xff]  }
  0x16   : > { %631 = vmatpush3.bf16.msra.mxu1 %v665_v9  ;;  %601 = vmatprep.subr.bf16.mxu0 %v666_v10 }
  0x17   : > { %632 = vmatprep.subr.bf16.mxu1 %v693_v1 }
  0x19   : > { %602 = vmatpush3.bf16.msra.mxu0 %v667_v11 }
  0x1a   : > { %633 = vmatpush3.bf16.msra.mxu1 %v668_v12  ;;  %603 = vmatprep.subr.bf16.mxu0 %v669_v13 }
  0x1b   : > { %634 = vmatprep.subr.bf16.mxu1 %v693_v1 }
  0x1d   : > { %604 = vmatpush3.bf16.msra.mxu0 %v670_v14 }
  0x1e   : > { %635 = vmatpush3.bf16.msra.mxu1 %v671_v15  ;;  %605 = vmatprep.subr.bf16.mxu0 %v672_v16 }
  0x1f   : > { %636 = vmatprep.subr.bf16.mxu1 %v693_v1 }
  0x21   : > { %606 = vmatpush3.bf16.msra.mxu0 %v673_v17 }
  0x22   : > { %637 = vmatpush3.bf16.msra.mxu1 %v674_v18  ;;  %607 = vmatprep.subr.bf16.mxu0 %v675_v19 }
  0x23   : > { %638 = vmatprep.subr.bf16.mxu1 %v693_v1 }
  0x25   : > { %608 = vmatpush3.bf16.msra.mxu0 %v676_v20 }
  0x26   : > { %639 = vmatpush3.bf16.msra.mxu1 %v677_v21  ;;  %609 = vmatprep.subr.bf16.mxu0 %v678_v22 }
  0x27   : > { %640 = vmatprep.subr.bf16.mxu1 %v693_v1 }
  0x29   : > { %610 = vmatpush3.bf16.msra.mxu0 %v679_v24 }
  0x2a   : > { %641 = vmatpush3.bf16.msra.mxu1 %v680_v25 }
  0x2c   : > { %430 = vmatmul.mubr.bf16.vlgmr.msra.gmra.mxu0 %v681_v26 }
  0x2d   : > { %643 = vmatmul.mubr.bf16.vlgmr.msra.gmra.mxu1 %v684_v27 }
  0xec   : > { %v611_v28 = vpop.f32.mrf.mxu0 }
  0xed   : > { %v472_v29 = vpop.f32.mrf.mxu1 }
  0xee   : > { %v612_v31 = vpop.f32.mrf.mxu0 }
  0xef   : > { %v613_v32 = vadd.f32 %v612_v31, %v611_v28  ;;  %v644_v33 = vpop.f32.mrf.mxu1 }
  0xf0   : > { %v614_v34 = vpop.f32.mrf.mxu0 }
  0xf1   : > { %v432_v35 = vadd.f32 %v613_v32, %v556_v30  ;;  %v475_v36 = vpop.f32.mrf.mxu1 }
  0xf2   : > { %v615_v37 = vpop.f32.mrf.mxu0 }
  0xf3   : > { %v616_v38 = vadd.f32 %v615_v37, %v614_v34  ;;  %v645_v39 = vpop.f32.mrf.mxu1  ;;  %v473_v40 = vadd.f32 %v472_v29, %v432_v35 }
  0xf5   : > { %v435_v41 = vadd.f32 %v616_v38, %v556_v30  ;;  %v479_v43 = vmax.f32 %v473_v40, 0.0 }
  0xf7   : > { %v476_v42 = vadd.f32 %v475_v36, %v435_v41 }
  0xf9   : > { %v480_v44 = vmax.f32 %v476_v42, 0.0 }
  0xfb   : > { %v593_v45 = vpack.c.bf16 %v480_v44, %v479_v43 }
  0xfd   : > { %594 = vst [vmem:[%s175_s21] sm:$0xff] %v593_v45  }
  0xfe PF: > { %s13_s12 = sadd.s32 1, %s691_s12  }
  0xff   : > { %p10_p4 = scmp.ge.s32.totalorder %s13_s12, 4  }
 0x101   :  { %12 = sbr.rel (!%p10_p4) target bundleno = 1 (0x1), region = 62 }

// kernel: squeeze.3
= control target key start
LH: loop header
LB: loop body
LE: loop exit
PB: predicated region body
PF: predicated region fallthrough
CT: control target
= control target key end

     0   :  { %s76_s8 = smov 121   ;;  %vm20_vm0 = vcmask 56320   ;;  %s77_s9 = smov 100   ;;  %v81_v16 = vmov 0.0   ;;  %s105_s0 = inlined_call_operand.vmem [shape: bf16[49], index: 0, kind: input, shape index: {}]   ;;  %s106_s1 = inlined_call_operand.vmem [shape: bf16[7,7], index: 1, kind: output, shape index: {}]  }
   0x1   :  { %v15_v0 = vld [vmem:[%s105_s0] sm:$0x1]  ;;  %s75_s0 = smov 107   ;;  %s78_s10 = smov 114  }
   0x2   :  { %v16_v1 = vunpack.c.l.bf16 %v15_v0  ;;  %s79_s11 = smov 86   ;;  %s80_s12 = smov 93  }
   0x4   :  { %18 = vst [vmem:[#allocation1] sm:$0x3] %v16_v1 }
   0xb   :  { %v34_v2 = vld [vmem:[#allocation1] sm:$0x1]  }
   0xc   :  { %v22_v3 = vld [vmem:[#allocation1] sm:$0x1]   ;;  %35 = vrot.lane.b32.xlu1 %v34_v2, %s75_s0 }
   0xd   :  { %23 = vrot.lane.b32.xlu0 %v22_v3, %s76_s8  ;;  %v40_v4 = vld [vmem:[#allocation1] sm:$0x1]  }
   0xe   :  { %v28_v5 = vld [vmem:[#allocation1] sm:$0x1]  }
   0xf   :  { %v19_v6 = vld [vmem:[#allocation1] sm:$0x1]  }
  0x10   :  { %21 = vst.msk [vmem:[#allocation0] sm:$0x1] %vm20_vm0, %v19_v6   ;;  %41 = vrot.lane.b32.xlu1 %v40_v4, %s77_s9  ;;  %v52_v7 = vld [vmem:[#allocation1] sm:$0x1]  }
  0x11   :  { %29 = vrot.lane.b32.xlu0 %v28_v5, %s78_s10  ;;  %v46_v8 = vld [vmem:[#allocation1] sm:$0x1]  }
  0x14   :  { %53 = vrot.lane.b32.xlu1 %v52_v7, %s79_s11 }
  0x15   :  { %47 = vrot.lane.b32.xlu0 %v46_v8, %s80_s12 }
  0x7e   :  { %v36_v9 = vpop.permute.xlu1 %35  }
  0x7f   :  { %v24_v10 = vpop.permute.xlu0 %23   ;;  %39 = vst.msk [vmem:[#allocation0 + $0x3] sm:$0x1] %vm20_vm0, %v36_v9  }
  0x80   :  { %27 = vst.msk [vmem:[#allocation0 + $0x1] sm:$0x1] %vm20_vm0, %v24_v10  }
  0x82   :  { %v42_v11 = vpop.permute.xlu1 %41  }
  0x83   :  { %v30_v12 = vpop.permute.xlu0 %29   ;;  %45 = vst.msk [vmem:[#allocation0 + $0x4] sm:$0x1] %vm20_vm0, %v42_v11  }
  0x84   :  { %33 = vst.msk [vmem:[#allocation0 + $0x2] sm:$0x1] %vm20_vm0, %v30_v12  }
  0x86   :  { %v54_v13 = vpop.permute.xlu1 %53  }
  0x87   :  { %v48_v14 = vpop.permute.xlu0 %47   ;;  %57 = vst.msk [vmem:[#allocation0 + $0x6] sm:$0x1] %vm20_vm0, %v54_v13  }
  0x88   :  { %51 = vst.msk [vmem:[#allocation0 + $0x5] sm:$0x1] %vm20_vm0, %v48_v14  }
  0x8f   :  { %v63_v15 = vld [vmem:[#allocation0] sm:$0xff] }
  0x90   :  { %v64_v17 = vpack.c.bf16 %v81_v16, %v63_v15 }
  0x92   :  { %67 = vst [vmem:[%s106_s1] sm:$0xf] %v64_v17 }

// kernel: puzzle_sim_forward.29
= control target key start
LH: loop header
LB: loop body
LE: loop exit
PB: predicated region body
PF: predicated region fallthrough
CT: control target
= control target key end

     0   :  { %v276_v45 = vlaneseq  ;;  %s560_s1 = inlined_call_operand.vmem [shape: bf16[128,256], index: 1, kind: input, shape index: {}]   ;;  %s561_s0 = inlined_call_operand.vmem [shape: bf16[104,256], index: 0, kind: input, shape index: {}]   ;;  %s562_s2 = inlined_call_operand.vmem [shape: f32[1,128], index: 2, kind: output, shape index: {}]  }
   0x1   :  { %v411_v0 = vld [vmem:[%s560_s1 + $0x74] ss:$8 sps:$4 sm:$0xff]   ;;  %v413_v1 = vld [vmem:[%s560_s1 + $0x70] ss:$8 sps:$4 sm:$0xff]   ;;  %v414_v2 = vld [vmem:[%s560_s1 + $0x64] ss:$8 sps:$4 sm:$0xff]  }
   0x2   :  { %188 = vmatprep.subr.bf16.mxu0 %v411_v0  ;;  %395 = vmatprep.subr.bf16.mxu1 %v411_v0  ;;  %v416_v3 = vld [vmem:[%s560_s1 + $0x60] ss:$8 sps:$4 sm:$0xff]   ;;  %v417_v4 = vld [vmem:[%s560_s1 + $0x54] ss:$8 sps:$4 sm:$0xff]   ;;  %v437_v5 = vld [vmem:[%s561_s0 + $0x4] ss:$8 sps:$4 sm:$0xff]  }
   0x3   :  { %189 = vmatpush1.bf16.xpose.msra.mxu0 %v413_v1  ;;  %403 = vmatpush1.bf16.xpose.msra.mxu1 %v413_v1  ;;  %v440_v6 = vld [vmem:[%s561_s0 + $0x44] ss:$8 sps:$4 sm:$0xff]   ;;  %v419_v7 = vld [vmem:[%s560_s1 + $0x50] ss:$8 sps:$4 sm:$0xff]   ;;  %v422_v9 = vld [vmem:[%s560_s1 + $0x40] ss:$8 sps:$4 sm:$0xff]  }
   0x4   :  { %190 = vmatprep.subr.bf16.mxu0 %v414_v2  ;;  %396 = vmatprep.subr.bf16.mxu1 %v414_v2  ;;  %v420_v8 = vld [vmem:[%s560_s1 + $0x44] ss:$8 sps:$4 sm:$0xff]   ;;  %v423_v10 = vld [vmem:[%s560_s1 + $0x34] ss:$8 sps:$4 sm:$0xff]   ;;  %v425_v11 = vld [vmem:[%s560_s1 + $0x30] ss:$8 sps:$4 sm:$0xff]  }
   0x5   :  { %220 = vmatprep.mubr.bf16.mxu0 %v437_v5  ;;  %252 = vmatprep.mubr.bf16.mxu1 %v440_v6  ;;  %v426_v12 = vld [vmem:[%s560_s1 + $0x24] ss:$8 sps:$4 sm:$0xff]   ;;  %v428_v13 = vld [vmem:[%s560_s1 + $0x20] ss:$8 sps:$4 sm:$0xff]   ;;  %v429_v14 = vld [vmem:[%s560_s1 + $0x14] ss:$8 sps:$4 sm:$0xff]  }
   0x6   :  { %v431_v15 = vld [vmem:[%s560_s1 + $0x10] ss:$8 sps:$4 sm:$0xff]   ;;  %v432_v16 = vld [vmem:[%s560_s1 + $0x4] ss:$8 sps:$4 sm:$0xff]   ;;  %v434_v17 = vld [vmem:[%s560_s1] ss:$8 sps:$4 sm:$0xff]  }
   0x7   :  { %v435_v18 = vld [vmem:[%s561_s0] ss:$8 sps:$4 sm:$0xff]   ;;  %v441_v20 = vld [vmem:[%s561_s0 + $0x14] ss:$8 sps:$4 sm:$0xff]   ;;  %v443_v23 = vld [vmem:[%s561_s0 + $0x10] ss:$8 sps:$4 sm:$0xff]  }
   0x8   :  { %v438_v19 = vld [vmem:[%s561_s0 + $0x40] ss:$8 sps:$4 sm:$0xff]   ;;  %v444_v21 = vld [vmem:[%s561_s0 + $0x54] ss:$8 sps:$4 sm:$0xff]   ;;  %v446_v24 = vld [vmem:[%s561_s0 + $0x50] ss:$8 sps:$4 sm:$0xff]  }
   0x9   :  { %v24_v22 = vld [vmem:[%s561_s0 + $0x60] sm:$0xff]  ;;  %v452_v29 = vld [vmem:[%s561_s0 + $0x34] ss:$8 sps:$4 sm:$0xff]   ;;  %v454_v30 = vld [vmem:[%s561_s0 + $0x30] ss:$8 sps:$4 sm:$0xff]   ;;  %v277_v50 = vshrl.u32 %v276_v45, 7 }
   0xa   :  { %v447_v25 = vld [vmem:[%s561_s0 + $0x24] ss:$8 sps:$4 sm:$0xff]   ;;  %v378_v26 = vcombine.high %v24_v22, %v24_v22  ;;  %v449_v27 = vld [vmem:[%s561_s0 + $0x20] ss:$8 sps:$4 sm:$0xff]   ;;  %v377_v28 = vcombine.low %v24_v22, %v24_v22 }
   0xb   :  { %191 = vmatpush1.bf16.xpose.msra.mxu0 %v416_v3  ;;  %404 = vmatpush1.bf16.xpose.msra.mxu1 %v416_v3  ;;  %v289_v55 = vadd.s32 96, %v277_v50 }
   0xc   :  { %192 = vmatprep.subr.bf16.mxu0 %v417_v4  ;;  %397 = vmatprep.subr.bf16.mxu1 %v417_v4 }
   0xd   :  { %vm317_vm0 = vcmp.lt.s32.totalorder %v289_v55, 98 }
  0x13   :  { %193 = vmatpush1.bf16.xpose.msra.mxu0 %v419_v7  ;;  %405 = vmatpush1.bf16.xpose.msra.mxu1 %v419_v7 }
  0x14   :  { %194 = vmatprep.subr.bf16.mxu0 %v420_v8  ;;  %398 = vmatprep.subr.bf16.mxu1 %v420_v8 }
  0x1b   :  { %195 = vmatpush1.bf16.xpose.msra.mxu0 %v422_v9  ;;  %406 = vmatpush1.bf16.xpose.msra.mxu1 %v422_v9 }
  0x1c   :  { %196 = vmatprep.subr.bf16.mxu0 %v423_v10  ;;  %399 = vmatprep.subr.bf16.mxu1 %v423_v10 }
  0x23   :  { %197 = vmatpush1.bf16.xpose.msra.mxu0 %v425_v11  ;;  %407 = vmatpush1.bf16.xpose.msra.mxu1 %v425_v11 }
  0x24   :  { %198 = vmatprep.subr.bf16.mxu0 %v426_v12  ;;  %400 = vmatprep.subr.bf16.mxu1 %v426_v12 }
  0x2b   :  { %199 = vmatpush1.bf16.xpose.msra.mxu0 %v428_v13  ;;  %408 = vmatpush1.bf16.xpose.msra.mxu1 %v428_v13 }
  0x2c   :  { %200 = vmatprep.subr.bf16.mxu0 %v429_v14  ;;  %401 = vmatprep.subr.bf16.mxu1 %v429_v14 }
  0x33   :  { %201 = vmatpush1.bf16.xpose.msra.mxu0 %v431_v15  ;;  %409 = vmatpush1.bf16.xpose.msra.mxu1 %v431_v15 }
  0x34   :  { %202 = vmatprep.subr.bf16.mxu0 %v432_v16  ;;  %402 = vmatprep.subr.bf16.mxu1 %v432_v16 }
  0x3b   :  { %203 = vmatpush1.bf16.xpose.msra.mxu0 %v434_v17  ;;  %410 = vmatpush1.bf16.xpose.msra.mxu1 %v434_v17 }
  0x42   :  { %221 = vmatmul.mubr.bf16.vlgmr.msra.gmra.mxu0 %v435_v18  ;;  %253 = vmatmul.mubr.bf16.vlgmr.msra.gmra.mxu1 %v438_v19 }
  0x43   :  { %228 = vmatprep.mubr.bf16.mxu0 %v441_v20  ;;  %260 = vmatprep.mubr.bf16.mxu1 %v444_v21 }
  0x4a   :  { %229 = vmatmul.mubr.bf16.gmra.mxu0 %v443_v23  ;;  %261 = vmatmul.mubr.bf16.gmra.mxu1 %v446_v24 }
  0x4b   :  { %236 = vmatprep.mubr.bf16.mxu0 %v447_v25  ;;  %268 = vmatprep.mubr.bf16.mxu1 %v378_v26 }
  0x52   :  { %237 = vmatmul.mubr.bf16.gmra.mxu0 %v449_v27  ;;  %269 = vmatmul.mubr.bf16.gmra.mxu1 %v377_v28 }
  0x53   :  { %244 = vmatprep.mubr.bf16.mxu0 %v452_v29 }
  0x5a   :  { %245 = vmatmul.mubr.bf16.gmra.mxu0 %v454_v30 }
 0x102   :  { %v222_v31 = vpop.f32.mrf.mxu0  ;;  %v254_v32 = vpop.f32.mrf.mxu1 }
 0x104   :  { %v224_v33 = vpop.f32.mrf.mxu0  ;;  %v256_v34 = vpop.f32.mrf.mxu1 }
 0x106   :  { %v225_v35 = vpop.f32.mrf.mxu0  ;;  %v257_v36 = vpop.f32.mrf.mxu1 }
 0x108   :  { %v227_v37 = vpop.f32.mrf.mxu0  ;;  %v259_v38 = vpop.f32.mrf.mxu1 }
 0x10a   :  { %v230_v39 = vpop.f32.mrf.mxu0  ;;  %v262_v40 = vpop.f32.mrf.mxu1 }
 0x10c   :  { %v232_v41 = vpop.f32.mrf.mxu0  ;;  %v264_v42 = vpop.f32.mrf.mxu1 }
 0x10e   :  { %v233_v43 = vpop.f32.mrf.mxu0  ;;  %v265_v44 = vpop.f32.mrf.mxu1 }
 0x110   :  { %v235_v46 = vpop.f32.mrf.mxu0  ;;  %v267_v47 = vpop.f32.mrf.mxu1 }
 0x112   :  { %v238_v48 = vpop.f32.mrf.mxu0  ;;  %v270_v49 = vpop.f32.mrf.mxu1 }
 0x113   :  { %v331_v58 = vmax.f32 %v222_v31, %v238_v48  ;;  %v330_v0 = vsel %vm317_vm0, %v270_v49, -inf }
 0x114   :  { %v240_v51 = vpop.f32.mrf.mxu0  ;;  %v272_v52 = vpop.f32.mrf.mxu1 }
 0x115   :  { %v335_v62 = vmax.f32 %v331_v58, %v254_v32 }
 0x116   :  { %v241_v53 = vpop.f32.mrf.mxu0  ;;  %v273_v54 = vpop.f32.mrf.mxu1 }
 0x117   :  { %v332_v60 = vmax.f32 %v225_v35, %v241_v53  ;;  %v339_v5 = vmax.f32 %v335_v62, %v330_v0 }
 0x118   :  { %v243_v56 = vpop.f32.mrf.mxu0  ;;  %v274_v57 = vpop.f32.mrf.mxu1 }
 0x119   :  { %v336_v2 = vmax.f32 %v332_v60, %v257_v36 }
 0x11a   :  { %v246_v59 = vpop.f32.mrf.mxu0 }
 0x11b   :  { %v333_v63 = vmax.f32 %v230_v39, %v246_v59  ;;  %v340_v8 = vmax.f32 %v339_v5, %v336_v2 }
 0x11c   :  { %v248_v61 = vpop.f32.mrf.mxu0 }
 0x11d   :  { %v337_v6 = vmax.f32 %v333_v63, %v262_v40 }
 0x11e   :  { %v249_v1 = vpop.f32.mrf.mxu0 }
 0x11f   :  { %v334_v3 = vmax.f32 %v233_v43, %v249_v1 }
 0x120   :  { %v251_v4 = vpop.f32.mrf.mxu0 }
 0x121   :  { %v338_v7 = vmax.f32 %v334_v3, %v265_v44 }
 0x123   :  { %v341_v9 = vmax.f32 %v337_v6, %v338_v7 }
 0x125   :  { %v342_v10 = vmax.f32 %v340_v8, %v341_v9 }
 0x127   :  { %v343_v11 = vrot.slane %v342_v10, 4 }
 0x129   :  { %v344_v12 = vmax.f32 %v342_v10, %v343_v11 }
 0x12b   :  { %v345_v13 = vrot.slane %v344_v12, 2 }
 0x12d   :  { %v346_v14 = vmax.f32 %v344_v12, %v345_v13 }
 0x12f   :  { %v347_v15 = vrot.slane %v346_v14, 1 }
 0x131   :  { %v348_v16 = vmax.f32 %v346_v14, %v347_v15 }
 0x133   :  { %353 = vst [vmem:[%s562_s2] sm:$0x1] %v348_v16 }

// kernel: puzzle_sim_forward.26
= control target key start
LH: loop header
LB: loop body
LE: loop exit
PB: predicated region body
PF: predicated region fallthrough
CT: control target
= control target key end

     0   :  { %s3053_s15 = smov 0   ;;  %s3816_s0 = inlined_call_operand.vmem [shape: bf16[27,1152], index: 0, kind: input, shape index: {}]   ;;  %s3817_s1 = inlined_call_operand.vmem [shape: bf16[1152,384], index: 1, kind: input, shape index: {}]   ;;  %s3818_s2 = inlined_call_operand.vmem [shape: f32[1,384], index: 2, kind: input, shape index: {}]   ;;  %s3819_s3 = inlined_call_operand.vmem [shape: bf16[27,384], index: 3, kind: output, shape index: {0}]   ;;  %s3820_s4 = inlined_call_operand.vmem [shape: bf16[27,384], index: 4, kind: output, shape index: {1}]  }
   0x1 LB: > { %s2328_s16 = sadd.s32 4294967295, %s3023_s15   ;;  %p2332_p0 = scmp.ge.s32.totalorder %s3023_s15, 1  ;;  %s3023_s15 = sphi %s3053_s15, %s15_s15  }
   0x2   : > { %p167_p1 = scmp.lt.s32.totalorder %s3023_s15, 3 }
   0x4   : > { %p168_p2 = pnand %p2332_p0, %p167_p1 }
   0x5   : > { %s2333_s29 = sshll.u32 (!%p168_p2), %s2328_s16, 1 }
   0x6   : > { %171 = sbr.rel (%p168_p2) target bundleno = 606 (0x25e), region = 32  ;;  %p202_p3 = scmp.lt.s32.totalorder (!%p168_p2), %s2333_s29, 3 }
   0xb   : > { %v2712_v0 = vld [vmem:[%s3817_s1 + $0xac] ss:$12 sps:$4 sm:$0xff]   ;;  %v2716_v2 = vld [vmem:[%s3817_s1 + $0xa8] ss:$12 sps:$4 sm:$0xff]   ;;  %v2722_v6 = vld [vmem:[%s3817_s1 + $0x90] ss:$12 sps:$4 sm:$0xff]  }
   0xc   : > { %v2714_v1 = vld [vmem:[%s3817_s1 + $0x22c] ss:$12 sps:$4 sm:$0xff]   ;;  %1736 = vmatprep.subr.bf16.mxu0 %v2712_v0  ;;  %v2717_v3 = vld [vmem:[%s3817_s1 + $0x228] ss:$12 sps:$4 sm:$0xff]   ;;  %v2723_v7 = vld [vmem:[%s3817_s1 + $0x210] ss:$12 sps:$4 sm:$0xff]  }
   0xd   : > { %1779 = vmatprep.subr.bf16.mxu1 %v2714_v1  ;;  %v2718_v4 = vld [vmem:[%s3817_s1 + $0x94] ss:$12 sps:$4 sm:$0xff]   ;;  %1737 = vmatpush1.bf16.msra.mxu0 %v2716_v2  ;;  %v2724_v8 = vld [vmem:[%s3817_s1 + $0x7c] ss:$12 sps:$4 sm:$0xff]   ;;  %v2728_v10 = vld [vmem:[%s3817_s1 + $0x78] ss:$12 sps:$4 sm:$0xff]  }
   0xe   : > { %1780 = vmatpush1.bf16.msra.mxu1 %v2717_v3  ;;  %v2720_v5 = vld [vmem:[%s3817_s1 + $0x214] ss:$12 sps:$4 sm:$0xff]   ;;  %1738 = vmatprep.subr.bf16.mxu0 %v2718_v4  ;;  %v2726_v9 = vld [vmem:[%s3817_s1 + $0x1fc] ss:$12 sps:$4 sm:$0xff]   ;;  %v2729_v11 = vld [vmem:[%s3817_s1 + $0x1f8] ss:$12 sps:$4 sm:$0xff]  }
   0xf   : > { %1781 = vmatprep.subr.bf16.mxu1 %v2720_v5  ;;  %v2730_v12 = vld [vmem:[%s3817_s1 + $0x64] ss:$12 sps:$4 sm:$0xff]   ;;  %v2734_v14 = vld [vmem:[%s3817_s1 + $0x60] ss:$12 sps:$4 sm:$0xff]   ;;  %v2740_v18 = vld [vmem:[%s3817_s1 + $0x48] ss:$12 sps:$4 sm:$0xff]  }
  0x10   : > { %v2732_v13 = vld [vmem:[%s3817_s1 + $0x1e4] ss:$12 sps:$4 sm:$0xff]   ;;  %v2735_v15 = vld [vmem:[%s3817_s1 + $0x1e0] ss:$12 sps:$4 sm:$0xff]   ;;  %v2741_v19 = vld [vmem:[%s3817_s1 + $0x1c8] ss:$12 sps:$4 sm:$0xff]  }
  0x11   : > { %1739 = vmatpush1.bf16.msra.mxu0 %v2722_v6  ;;  %v2736_v16 = vld [vmem:[%s3817_s1 + $0x4c] ss:$12 sps:$4 sm:$0xff]   ;;  %v2742_v20 = vld [vmem:[%s3817_s1 + $0x34] ss:$12 sps:$4 sm:$0xff]   ;;  %v2746_v22 = vld [vmem:[%s3817_s1 + $0x30] ss:$12 sps:$4 sm:$0xff]  }
  0x12   : > { %1782 = vmatpush1.bf16.msra.mxu1 %v2723_v7  ;;  %1740 = vmatprep.subr.bf16.mxu0 %v2724_v8  ;;  %v2738_v17 = vld [vmem:[%s3817_s1 + $0x1cc] ss:$12 sps:$4 sm:$0xff]   ;;  %v2744_v21 = vld [vmem:[%s3817_s1 + $0x1b4] ss:$12 sps:$4 sm:$0xff]   ;;  %v2747_v23 = vld [vmem:[%s3817_s1 + $0x1b0] ss:$12 sps:$4 sm:$0xff]  }
  0x13   : > { %1783 = vmatprep.subr.bf16.mxu1 %v2726_v9  ;;  %v2748_v24 = vld [vmem:[%s3817_s1 + $0x1c] ss:$12 sps:$4 sm:$0xff]   ;;  %v2752_v26 = vld [vmem:[%s3817_s1 + $0x18] ss:$12 sps:$4 sm:$0xff]   ;;  %v2758_v30 = vld [vmem:[%s3817_s1] ss:$12 sps:$4 sm:$0xff]  }
  0x14   : > { %v2750_v25 = vld [vmem:[%s3817_s1 + $0x19c] ss:$12 sps:$4 sm:$0xff]   ;;  %v2753_v27 = vld [vmem:[%s3817_s1 + $0x198] ss:$12 sps:$4 sm:$0xff]   ;;  %v2759_v31 = vld [vmem:[%s3817_s1 + $0x180] ss:$12 sps:$4 sm:$0xff]  }
  0x15   : > { %1741 = vmatpush1.bf16.msra.mxu0 %v2728_v10  ;;  %v2754_v28 = vld [vmem:[%s3817_s1 + $0x4] ss:$12 sps:$4 sm:$0xff]   ;;  %v2760_v32 = vld [vmem:[%s3817_s1 + $0x16c] ss:$12 sps:$4 sm:$0xff]   ;;  %v2764_v34 = vld [vmem:[%s3817_s1 + $0x168] ss:$12 sps:$4 sm:$0xff]  }
  0x16   : > { %1784 = vmatpush1.bf16.msra.mxu1 %v2729_v11  ;;  %1742 = vmatprep.subr.bf16.mxu0 %v2730_v12  ;;  %v2756_v29 = vld [vmem:[%s3817_s1 + $0x184] ss:$12 sps:$4 sm:$0xff]   ;;  %v2762_v33 = vld [vmem:[%s3817_s1 + $0x2ec] ss:$12 sps:$4 sm:$0xff]   ;;  %v2765_v35 = vld [vmem:[%s3817_s1 + $0x2e8] ss:$12 sps:$4 sm:$0xff]  }
  0x17   : > { %1785 = vmatprep.subr.bf16.mxu1 %v2732_v13  ;;  %v2766_v36 = vld [vmem:[%s3817_s1 + $0x154] ss:$12 sps:$4 sm:$0xff]   ;;  %s3822_s29 = smov (!%p202_p3, %s2333_s29), 3  ;;  %v2770_v38 = vld [vmem:[%s3817_s1 + $0x150] ss:$12 sps:$4 sm:$0xff]   ;;  %vm3027_vm0 = vmmov 0  }
  0x18   : > { %v2768_v37 = vld [vmem:[%s3817_s1 + $0x2d4] ss:$12 sps:$4 sm:$0xff]   ;;  %v2771_v39 = vld [vmem:[%s3817_s1 + $0x2d0] ss:$12 sps:$4 sm:$0xff]   ;;  %s2699_s27 = smul.u32 36, %s3822_s29 }
  0x19   : > { %1743 = vmatpush1.bf16.msra.mxu0 %v2734_v14  ;;  %v2772_v40 = vld [vmem:[%s3817_s1 + $0x13c] ss:$12 sps:$4 sm:$0xff]   ;;  %v2776_v42 = vld [vmem:[%s3817_s1 + $0x138] ss:$12 sps:$4 sm:$0xff]   ;;  %v2782_v46 = vld [vmem:[%s3817_s1 + $0x120] ss:$12 sps:$4 sm:$0xff]  }
  0x1a   : > { %1786 = vmatpush1.bf16.msra.mxu1 %v2735_v15  ;;  %1744 = vmatprep.subr.bf16.mxu0 %v2736_v16  ;;  %v2774_v41 = vld [vmem:[%s3817_s1 + $0x2bc] ss:$12 sps:$4 sm:$0xff]   ;;  %v2777_v43 = vld [vmem:[%s3817_s1 + $0x2b8] ss:$12 sps:$4 sm:$0xff]   ;;  %s3204_s12 = scalar_lea.vmem %s3816_s0, %s2699_s27  ;;  %v2783_v47 = vld [vmem:[%s3817_s1 + $0x2a0] ss:$12 sps:$4 sm:$0xff]  }
  0x1b   : > { %1787 = vmatprep.subr.bf16.mxu1 %v2738_v17  ;;  %v2778_v44 = vld [vmem:[%s3817_s1 + $0x124] ss:$12 sps:$4 sm:$0xff]   ;;  %v2784_v48 = vld [vmem:[%s3817_s1 + $0x10c] ss:$12 sps:$4 sm:$0xff]   ;;  %v2788_v52 = vld [vmem:[%s3817_s1 + $0x108] ss:$12 sps:$4 sm:$0xff]  }
  0x1c   : > { %v2780_v45 = vld [vmem:[%s3817_s1 + $0x2a4] ss:$12 sps:$4 sm:$0xff]   ;;  %v2786_v50 = vld [vmem:[%s3817_s1 + $0x28c] ss:$12 sps:$4 sm:$0xff]   ;;  %v2789_v53 = vld [vmem:[%s3817_s1 + $0x288] ss:$12 sps:$4 sm:$0xff]  }
  0x1d   : > { %1745 = vmatpush1.bf16.msra.mxu0 %v2740_v18  ;;  %v3219_v49 = vld [vmem:[%s3204_s12 + $0x4] ss:$36 sps:$4 sm:$0xff]   ;;  %v3225_v51 = vld [vmem:[%s3204_s12 + $0xc] ss:$36 sps:$4 sm:$0xff]   ;;  %v2790_v54 = vld [vmem:[%s3817_s1 + $0xf4] ss:$12 sps:$4 sm:$0xff]  }
  0x1e   : > { %1788 = vmatpush1.bf16.msra.mxu1 %v2741_v19  ;;  %1746 = vmatprep.subr.bf16.mxu0 %v2742_v20  ;;  %v2792_v55 = vld [vmem:[%s3817_s1 + $0x274] ss:$12 sps:$4 sm:$0xff]   ;;  %v2794_v56 = vld [vmem:[%s3817_s1 + $0xf0] ss:$12 sps:$4 sm:$0xff]   ;;  %v2800_v60 = vld [vmem:[%s3817_s1 + $0xd8] ss:$12 sps:$4 sm:$0xff]  }
  0x1f   : > { %1789 = vmatprep.subr.bf16.mxu1 %v2744_v21  ;;  %1768 = vmatprep.mubr.bf16.mxu0 %v3219_v49  ;;  %v2795_v57 = vld [vmem:[%s3817_s1 + $0x270] ss:$12 sps:$4 sm:$0xff]   ;;  %v2801_v61 = vld [vmem:[%s3817_s1 + $0x258] ss:$12 sps:$4 sm:$0xff]   ;;  %v2806_v0 = vld [vmem:[%s3817_s1 + $0xc0] ss:$12 sps:$4 sm:$0xff]  }
  0x20   : > { %1811 = vmatprep.mubr.bf16.mxu1 %v3225_v51  ;;  %v2796_v58 = vld [vmem:[%s3817_s1 + $0xdc] ss:$12 sps:$4 sm:$0xff]   ;;  %v2802_v62 = vld [vmem:[%s3817_s1 + $0xc4] ss:$12 sps:$4 sm:$0xff]   ;;  %v2807_v1 = vld [vmem:[%s3817_s1 + $0x240] ss:$12 sps:$4 sm:$0xff]  }
  0x21   : > { %1747 = vmatpush1.bf16.msra.mxu0 %v2746_v22  ;;  %v2798_v59 = vld [vmem:[%s3817_s1 + $0x25c] ss:$12 sps:$4 sm:$0xff]   ;;  %v2804_v63 = vld [vmem:[%s3817_s1 + $0x244] ss:$12 sps:$4 sm:$0xff]   ;;  %v2816_v2 = vld [vmem:[%s3817_s1 + $0x3ac] ss:$12 sps:$4 sm:$0xff]  }
  0x22   : > { %1790 = vmatpush1.bf16.msra.mxu1 %v2747_v23  ;;  %1748 = vmatprep.subr.bf16.mxu0 %v2748_v24  ;;  %v2819_v3 = vld [vmem:[%s3817_s1 + $0x52c] ss:$12 sps:$4 sm:$0xff]   ;;  %v3278_v4 = vld [vmem:[%s3204_s12] ss:$36 sps:$4 sm:$0xff]   ;;  %v2814_v6 = vld [vmem:[%s3817_s1 + $0x3a8] ss:$12 sps:$4 sm:$0xff]  }
  0x23   : > { %1791 = vmatprep.subr.bf16.mxu1 %v2750_v25  ;;  %v3281_v5 = vld [vmem:[%s3204_s12 + $0x8] ss:$36 sps:$4 sm:$0xff]   ;;  %v2822_v8 = vld [vmem:[%s3817_s1 + $0x394] ss:$12 sps:$4 sm:$0xff]   ;;  %v2820_v10 = vld [vmem:[%s3817_s1 + $0x390] ss:$12 sps:$4 sm:$0xff]  }
  0x24   : > { %v2817_v7 = vld [vmem:[%s3817_s1 + $0x528] ss:$12 sps:$4 sm:$0xff]   ;;  %v2823_v11 = vld [vmem:[%s3817_s1 + $0x510] ss:$12 sps:$4 sm:$0xff]   ;;  %v2826_v14 = vld [vmem:[%s3817_s1 + $0x378] ss:$12 sps:$4 sm:$0xff]  }
  0x25   : > { %1749 = vmatpush1.bf16.msra.mxu0 %v2752_v26  ;;  %v2825_v9 = vld [vmem:[%s3817_s1 + $0x514] ss:$12 sps:$4 sm:$0xff]   ;;  %v2828_v12 = vld [vmem:[%s3817_s1 + $0x37c] ss:$12 sps:$4 sm:$0xff]   ;;  %v2829_v15 = vld [vmem:[%s3817_s1 + $0x4f8] ss:$12 sps:$4 sm:$0xff]  }
  0x26   : > { %1792 = vmatpush1.bf16.msra.mxu1 %v2753_v27  ;;  %1750 = vmatprep.subr.bf16.mxu0 %v2754_v28  ;;  %v2831_v13 = vld [vmem:[%s3817_s1 + $0x4fc] ss:$12 sps:$4 sm:$0xff]   ;;  %v2834_v16 = vld [vmem:[%s3817_s1 + $0x364] ss:$12 sps:$4 sm:$0xff]   ;;  %v2832_v18 = vld [vmem:[%s3817_s1 + $0x360] ss:$12 sps:$4 sm:$0xff]  }
  0x27   : > { %1793 = vmatprep.subr.bf16.mxu1 %v2756_v29  ;;  %v2837_v17 = vld [vmem:[%s3817_s1 + $0x4e4] ss:$12 sps:$4 sm:$0xff]   ;;  %v2835_v19 = vld [vmem:[%s3817_s1 + $0x4e0] ss:$12 sps:$4 sm:$0xff]   ;;  %v2838_v22 = vld [vmem:[%s3817_s1 + $0x348] ss:$12 sps:$4 sm:$0xff]  }
  0x28   : > { %v2840_v20 = vld [vmem:[%s3817_s1 + $0x34c] ss:$12 sps:$4 sm:$0xff]   ;;  %v2841_v23 = vld [vmem:[%s3817_s1 + $0x4c8] ss:$12 sps:$4 sm:$0xff]   ;;  %v2844_v26 = vld [vmem:[%s3817_s1 + $0x330] ss:$12 sps:$4 sm:$0xff]  }
  0x29   : > { %1751 = vmatpush1.bf16.msra.mxu0 %v2758_v30  ;;  %v2843_v21 = vld [vmem:[%s3817_s1 + $0x4cc] ss:$12 sps:$4 sm:$0xff]   ;;  %v2846_v24 = vld [vmem:[%s3817_s1 + $0x334] ss:$12 sps:$4 sm:$0xff]   ;;  %v2847_v27 = vld [vmem:[%s3817_s1 + $0x4b0] ss:$12 sps:$4 sm:$0xff]  }
  0x2a   : > { %1794 = vmatpush1.bf16.msra.mxu1 %v2759_v31  ;;  %1752 = vmatprep.subr.bf16.mxu0 %v2760_v32  ;;  %v2849_v25 = vld [vmem:[%s3817_s1 + $0x4b4] ss:$12 sps:$4 sm:$0xff]   ;;  %v2852_v28 = vld [vmem:[%s3817_s1 + $0x31c] ss:$12 sps:$4 sm:$0xff]   ;;  %v2850_v30 = vld [vmem:[%s3817_s1 + $0x318] ss:$12 sps:$4 sm:$0xff]  }
  0x2b   : > { %1795 = vmatprep.subr.bf16.mxu1 %v2762_v33  ;;  %v2855_v29 = vld [vmem:[%s3817_s1 + $0x49c] ss:$12 sps:$4 sm:$0xff]   ;;  %v2853_v31 = vld [vmem:[%s3817_s1 + $0x498] ss:$12 sps:$4 sm:$0xff]   ;;  %s2700_s7 = smul.u32 12, %s3822_s29 }
  0x2c   : > { %v2858_v32 = vld [vmem:[%s3817_s1 + $0x304] ss:$12 sps:$4 sm:$0xff]  }
  0x2d   : > { %1753 = vmatpush2.bf16.msra.mxu0 %v2764_v34  ;;  %v2861_v33 = vld [vmem:[%s3817_s1 + $0x484] ss:$12 sps:$4 sm:$0xff]   ;;  %v3370_v34 = vld [vmem:[%s3204_s12 + $0x14] ss:$36 sps:$4 sm:$0xff]   ;;  %s3781_s10 = scalar_lea.vmem %s3819_s3, %s2700_s7  ;;  %s220_s13 = scalar_lea.vmem %s3820_s4, %s2700_s7 }
  0x2e   : > { %1796 = vmatpush2.bf16.msra.mxu1 %v2765_v35  ;;  %1754 = vmatprep.subr.bf16.mxu0 %v2766_v36  ;;  %v3373_v35 = vld [vmem:[%s3204_s12 + $0x1c] ss:$36 sps:$4 sm:$0xff]  }
  0x2f   : > { %1797 = vmatprep.subr.bf16.mxu1 %v2768_v37  ;;  %v2856_v36 = vld [vmem:[%s3817_s1 + $0x300] ss:$12 sps:$4 sm:$0xff]  }
  0x30   : > { %v2859_v37 = vld [vmem:[%s3817_s1 + $0x480] ss:$12 sps:$4 sm:$0xff]  }
  0x31   : > { %1755 = vmatpush2.bf16.msra.mxu0 %v2770_v38  ;;  %v2864_v38 = vld [vmem:[%s3817_s1 + $0x46c] ss:$12 sps:$4 sm:$0xff]  }
  0x32   : > { %1798 = vmatpush2.bf16.msra.mxu1 %v2771_v39  ;;  %1756 = vmatprep.subr.bf16.mxu0 %v2772_v40  ;;  %v2867_v39 = vld [vmem:[%s3817_s1 + $0x5ec] ss:$12 sps:$4 sm:$0xff]   ;;  %v2862_v40 = vld [vmem:[%s3817_s1 + $0x468] ss:$12 sps:$4 sm:$0xff]  }
  0x33   : > { %1799 = vmatprep.subr.bf16.mxu1 %v2774_v41  ;;  %v2865_v41 = vld [vmem:[%s3817_s1 + $0x5e8] ss:$12 sps:$4 sm:$0xff]  }
  0x35   : > { %1757 = vmatpush2.bf16.msra.mxu0 %v2776_v42  ;;  %v2870_v42 = vld [vmem:[%s3817_s1 + $0x454] ss:$12 sps:$4 sm:$0xff]  }
  0x36   : > { %1800 = vmatpush2.bf16.msra.mxu1 %v2777_v43  ;;  %1758 = vmatprep.subr.bf16.mxu0 %v2778_v44  ;;  %v2873_v43 = vld [vmem:[%s3817_s1 + $0x5d4] ss:$12 sps:$4 sm:$0xff]   ;;  %v2868_v44 = vld [vmem:[%s3817_s1 + $0x450] ss:$12 sps:$4 sm:$0xff]  }
  0x37   : > { %1801 = vmatprep.subr.bf16.mxu1 %v2780_v45  ;;  %v2871_v45 = vld [vmem:[%s3817_s1 + $0x5d0] ss:$12 sps:$4 sm:$0xff]  }
  0x39   : > { %1759 = vmatpush2.bf16.msra.mxu0 %v2782_v46  ;;  %v2876_v46 = vld [vmem:[%s3817_s1 + $0x43c] ss:$12 sps:$4 sm:$0xff]  }
  0x3a   : > { %1802 = vmatpush2.bf16.msra.mxu1 %v2783_v47  ;;  %1760 = vmatprep.subr.bf16.mxu0 %v2784_v48  ;;  %v2879_v47 = vld [vmem:[%s3817_s1 + $0x5bc] ss:$12 sps:$4 sm:$0xff]   ;;  %v2874_v48 = vld [vmem:[%s3817_s1 + $0x438] ss:$12 sps:$4 sm:$0xff]  }
  0x3b   : > { %1803 = vmatprep.subr.bf16.mxu1 %v2786_v50  ;;  %v2877_v50 = vld [vmem:[%s3817_s1 + $0x5b8] ss:$12 sps:$4 sm:$0xff]  }
  0x3d   : > { %1761 = vmatpush2.bf16.msra.mxu0 %v2788_v52  ;;  %v2882_v52 = vld [vmem:[%s3817_s1 + $0x424] ss:$12 sps:$4 sm:$0xff]  }
  0x3e   : > { %1804 = vmatpush2.bf16.msra.mxu1 %v2789_v53  ;;  %1762 = vmatprep.subr.bf16.mxu0 %v2790_v54  ;;  %v2885_v53 = vld [vmem:[%s3817_s1 + $0x5a4] ss:$12 sps:$4 sm:$0xff]   ;;  %v2880_v54 = vld [vmem:[%s3817_s1 + $0x420] ss:$12 sps:$4 sm:$0xff]  }
  0x3f   : > { %1805 = vmatprep.subr.bf16.mxu1 %v2792_v55  ;;  %v2883_v55 = vld [vmem:[%s3817_s1 + $0x5a0] ss:$12 sps:$4 sm:$0xff]  }
  0x41   : > { %1763 = vmatpush2.bf16.msra.mxu0 %v2794_v56  ;;  %v2888_v56 = vld [vmem:[%s3817_s1 + $0x40c] ss:$12 sps:$4 sm:$0xff]  }
  0x42   : > { %1806 = vmatpush2.bf16.msra.mxu1 %v2795_v57  ;;  %1764 = vmatprep.subr.bf16.mxu0 %v2796_v58  ;;  %v2891_v57 = vld [vmem:[%s3817_s1 + $0x58c] ss:$12 sps:$4 sm:$0xff]   ;;  %v2886_v58 = vld [vmem:[%s3817_s1 + $0x408] ss:$12 sps:$4 sm:$0xff]  }
  0x43   : > { %1807 = vmatprep.subr.bf16.mxu1 %v2798_v59  ;;  %v2889_v59 = vld [vmem:[%s3817_s1 + $0x588] ss:$12 sps:$4 sm:$0xff]  }
  0x45   : > { %1765 = vmatpush2.bf16.msra.mxu0 %v2800_v60  ;;  %v2894_v60 = vld [vmem:[%s3817_s1 + $0x3f4] ss:$12 sps:$4 sm:$0xff]  }
  0x46   : > { %1808 = vmatpush2.bf16.msra.mxu1 %v2801_v61  ;;  %1766 = vmatprep.subr.bf16.mxu0 %v2802_v62  ;;  %v2897_v61 = vld [vmem:[%s3817_s1 + $0x574] ss:$12 sps:$4 sm:$0xff]   ;;  %v2892_v62 = vld [vmem:[%s3817_s1 + $0x3f0] ss:$12 sps:$4 sm:$0xff]  }
  0x47   : > { %1809 = vmatprep.subr.bf16.mxu1 %v2804_v63  ;;  %v2895_v63 = vld [vmem:[%s3817_s1 + $0x570] ss:$12 sps:$4 sm:$0xff]  }
  0x49   : > { %1767 = vmatpush2.bf16.msra.mxu0 %v2806_v0  ;;  %v2900_v0 = vld [vmem:[%s3817_s1 + $0x3dc] ss:$12 sps:$4 sm:$0xff]  }
  0x4a   : > { %1810 = vmatpush2.bf16.msra.mxu1 %v2807_v1  ;;  %1822 = vmatprep.subr.bf16.mxu0 %v2816_v2  ;;  %v2903_v1 = vld [vmem:[%s3817_s1 + $0x55c] ss:$12 sps:$4 sm:$0xff]   ;;  %v2898_v2 = vld [vmem:[%s3817_s1 + $0x3d8] ss:$12 sps:$4 sm:$0xff]  }
  0x4b   : > { %1865 = vmatprep.subr.bf16.mxu1 %v2819_v3  ;;  %v2901_v3 = vld [vmem:[%s3817_s1 + $0x558] ss:$12 sps:$4 sm:$0xff]  }
  0x4c   : > { %1769 = vmatmul.mubr.bf16.vlgmr.msra.gmra.mxu0 %v3278_v4 }
  0x4d   : > { %1812 = vmatmul.mubr.bf16.vlgmr.msra.gmra.mxu1 %v3281_v5  ;;  %1823 = vmatpush1.bf16.msra.mxu0 %v2814_v6  ;;  %v2906_v6 = vld [vmem:[%s3817_s1 + $0x3c4] ss:$12 sps:$4 sm:$0xff]  }
  0x4e   : > { %1866 = vmatpush1.bf16.msra.mxu1 %v2817_v7  ;;  %1824 = vmatprep.subr.bf16.mxu0 %v2822_v8  ;;  %v2909_v7 = vld [vmem:[%s3817_s1 + $0x544] ss:$12 sps:$4 sm:$0xff]   ;;  %v2904_v8 = vld [vmem:[%s3817_s1 + $0x3c0] ss:$12 sps:$4 sm:$0xff]  }
  0x4f   : > { %1867 = vmatprep.subr.bf16.mxu1 %v2825_v9  ;;  %1854 = vmatprep.mubr.bf16.mxu0 %v3370_v34  ;;  %v2907_v9 = vld [vmem:[%s3817_s1 + $0x540] ss:$12 sps:$4 sm:$0xff]  }
  0x50   : > { %1897 = vmatprep.mubr.bf16.mxu1 %v3373_v35 }
  0x51   : > { %1825 = vmatpush1.bf16.msra.mxu0 %v2820_v10  ;;  %v2918_v10 = vld [vmem:[%s3817_s1 + $0x6ac] ss:$12 sps:$4 sm:$0xff]  }
  0x52   : > { %1868 = vmatpush1.bf16.msra.mxu1 %v2823_v11  ;;  %1826 = vmatprep.subr.bf16.mxu0 %v2828_v12  ;;  %v3483_v11 = vld [vmem:[%s3204_s12 + $0x10] ss:$36 sps:$4 sm:$0xff]   ;;  %v3486_v12 = vld [vmem:[%s3204_s12 + $0x18] ss:$36 sps:$4 sm:$0xff]  }
  0x53   : > { %1869 = vmatprep.subr.bf16.mxu1 %v2831_v13  ;;  %v2919_v13 = vld [vmem:[%s3817_s1 + $0x170] ss:$12 sps:$4 sm:$0xff]  }
  0x55   : > { %1827 = vmatpush1.bf16.msra.mxu0 %v2826_v14  ;;  %v2916_v14 = vld [vmem:[%s3817_s1 + $0x6a8] ss:$12 sps:$4 sm:$0xff]  }
  0x56   : > { %1870 = vmatpush1.bf16.msra.mxu1 %v2829_v15  ;;  %1828 = vmatprep.subr.bf16.mxu0 %v2834_v16  ;;  %v2920_v15 = vld [vmem:[%s3817_s1 + $0xb0] ss:$12 sps:$4 sm:$0xff]   ;;  %v2923_v16 = vld [vmem:[%s3817_s1 + $0x694] ss:$12 sps:$4 sm:$0xff]  }
  0x57   : > { %1871 = vmatprep.subr.bf16.mxu1 %v2837_v17  ;;  %v2924_v17 = vld [vmem:[%s3817_s1 + $0x158] ss:$12 sps:$4 sm:$0xff]  }
  0x59   : > { %1829 = vmatpush1.bf16.msra.mxu0 %v2832_v18  ;;  %v2921_v18 = vld [vmem:[%s3817_s1 + $0x690] ss:$12 sps:$4 sm:$0xff]  }
  0x5a   : > { %1872 = vmatpush1.bf16.msra.mxu1 %v2835_v19  ;;  %1830 = vmatprep.subr.bf16.mxu0 %v2840_v20  ;;  %v2925_v19 = vld [vmem:[%s3817_s1 + $0x98] ss:$12 sps:$4 sm:$0xff]   ;;  %v2928_v20 = vld [vmem:[%s3817_s1 + $0x67c] ss:$12 sps:$4 sm:$0xff]  }
  0x5b   : > { %1873 = vmatprep.subr.bf16.mxu1 %v2843_v21  ;;  %v2929_v21 = vld [vmem:[%s3817_s1 + $0x140] ss:$12 sps:$4 sm:$0xff]  }
  0x5d   : > { %1831 = vmatpush1.bf16.msra.mxu0 %v2838_v22  ;;  %v2926_v22 = vld [vmem:[%s3817_s1 + $0x678] ss:$12 sps:$4 sm:$0xff]  }
  0x5e   : > { %1874 = vmatpush1.bf16.msra.mxu1 %v2841_v23  ;;  %1832 = vmatprep.subr.bf16.mxu0 %v2846_v24  ;;  %v3025_v23 = vmov 0   ;;  %v2930_v24 = vld [vmem:[%s3817_s1 + $0x80] ss:$12 sps:$4 sm:$0xff]  }
  0x5f   : > { %1875 = vmatprep.subr.bf16.mxu1 %v2849_v25  ;;  %v2933_v25 = vld [vmem:[%s3817_s1 + $0x664] ss:$12 sps:$4 sm:$0xff]  }
  0x61   : > { %1833 = vmatpush1.bf16.msra.mxu0 %v2844_v26  ;;  %v2934_v26 = vld [vmem:[%s3817_s1 + $0x128] ss:$12 sps:$4 sm:$0xff]  }
  0x62   : > { %1876 = vmatpush1.bf16.msra.mxu1 %v2847_v27  ;;  %1834 = vmatprep.subr.bf16.mxu0 %v2852_v28  ;;  %v2935_v27 = vld [vmem:[%s3817_s1 + $0x68] ss:$12 sps:$4 sm:$0xff]   ;;  %v2938_v28 = vld [vmem:[%s3817_s1 + $0x64c] ss:$12 sps:$4 sm:$0xff]  }
  0x63   : > { %1877 = vmatprep.subr.bf16.mxu1 %v2855_v29  ;;  %v2939_v29 = vld [vmem:[%s3817_s1 + $0x110] ss:$12 sps:$4 sm:$0xff]  }
  0x65   : > { %1835 = vmatpush1.bf16.msra.mxu0 %v2850_v30  ;;  %v2936_v30 = vld [vmem:[%s3817_s1 + $0x648] ss:$12 sps:$4 sm:$0xff]  }
  0x66   : > { %1878 = vmatpush1.bf16.msra.mxu1 %v2853_v31  ;;  %1836 = vmatprep.subr.bf16.mxu0 %v2858_v32  ;;  %v2940_v31 = vld [vmem:[%s3817_s1 + $0x50] ss:$12 sps:$4 sm:$0xff]   ;;  %v2943_v32 = vld [vmem:[%s3817_s1 + $0x634] ss:$12 sps:$4 sm:$0xff]  }
  0x67   : > { %1879 = vmatprep.subr.bf16.mxu1 %v2861_v33  ;;  %v2944_v33 = vld [vmem:[%s3817_s1 + $0xf8] ss:$12 sps:$4 sm:$0xff]  }
  0x69   : > { %1837 = vmatpush1.bf16.msra.mxu0 %v2856_v36  ;;  %v2941_v36 = vld [vmem:[%s3817_s1 + $0x630] ss:$12 sps:$4 sm:$0xff]  }
  0x6a   : > { %1880 = vmatpush1.bf16.msra.mxu1 %v2859_v37  ;;  %1838 = vmatprep.subr.bf16.mxu0 %v2864_v38  ;;  %v2945_v37 = vld [vmem:[%s3817_s1 + $0x38] ss:$12 sps:$4 sm:$0xff]   ;;  %v2948_v38 = vld [vmem:[%s3817_s1 + $0x61c] ss:$12 sps:$4 sm:$0xff]  }
  0x6b   : > { %1881 = vmatprep.subr.bf16.mxu1 %v2867_v39  ;;  %v2949_v39 = vld [vmem:[%s3817_s1 + $0xe0] ss:$12 sps:$4 sm:$0xff]  }
  0x6d   : > { %1839 = vmatpush2.bf16.msra.mxu0 %v2862_v40  ;;  %v2946_v40 = vld [vmem:[%s3817_s1 + $0x618] ss:$12 sps:$4 sm:$0xff]  }
  0x6e   : > { %1882 = vmatpush2.bf16.msra.mxu1 %v2865_v41  ;;  %1840 = vmatprep.subr.bf16.mxu0 %v2870_v42  ;;  %v2950_v41 = vld [vmem:[%s3817_s1 + $0x20] ss:$12 sps:$4 sm:$0xff]   ;;  %v2953_v42 = vld [vmem:[%s3817_s1 + $0x604] ss:$12 sps:$4 sm:$0xff]  }
  0x6f   : > { %1883 = vmatprep.subr.bf16.mxu1 %v2873_v43  ;;  %v2954_v43 = vld [vmem:[%s3817_s1 + $0xc8] ss:$12 sps:$4 sm:$0xff]  }
  0x71   : > { %1841 = vmatpush2.bf16.msra.mxu0 %v2868_v44  ;;  %v2951_v44 = vld [vmem:[%s3817_s1 + $0x600] ss:$12 sps:$4 sm:$0xff]  }
  0x72   : > { %1884 = vmatpush2.bf16.msra.mxu1 %v2871_v45  ;;  %1842 = vmatprep.subr.bf16.mxu0 %v2876_v46  ;;  %v2955_v45 = vld [vmem:[%s3817_s1 + $0x8] ss:$12 sps:$4 sm:$0xff]   ;;  %v2957_v46 = vld [vmem:[%s3817_s1 + $0x2f0] ss:$12 sps:$4 sm:$0xff]  }
  0x73   : > { %1885 = vmatprep.subr.bf16.mxu1 %v2879_v47  ;;  %v3588_v47 = vld [vmem:[%s3204_s12 + $0x20] ss:$36 sps:$4 sm:$0xff]  }
  0x75   : > { %1843 = vmatpush2.bf16.msra.mxu0 %v2874_v48  ;;  %v2958_v48 = vld [vmem:[%s3817_s1 + $0x470] ss:$12 sps:$4 sm:$0xff]  }
  0x76   : > { %1886 = vmatpush2.bf16.msra.mxu1 %v2877_v50  ;;  %1844 = vmatprep.subr.bf16.mxu0 %v2882_v52  ;;  %v2959_v50 = vld [vmem:[%s3817_s1 + $0x230] ss:$12 sps:$4 sm:$0xff]  }
  0x77   : > { %1887 = vmatprep.subr.bf16.mxu1 %v2885_v53  ;;  %v2960_v52 = vld [vmem:[%s3817_s1 + $0x3b0] ss:$12 sps:$4 sm:$0xff]   ;;  %v2961_v53 = vld [vmem:[%s3817_s1 + $0x2d8] ss:$12 sps:$4 sm:$0xff]  }
  0x79   : > { %1845 = vmatpush2.bf16.msra.mxu0 %v2880_v54  ;;  %v2962_v54 = vld [vmem:[%s3817_s1 + $0x458] ss:$12 sps:$4 sm:$0xff]  }
  0x7a   : > { %1888 = vmatpush2.bf16.msra.mxu1 %v2883_v55  ;;  %1846 = vmatprep.subr.bf16.mxu0 %v2888_v56  ;;  %v2963_v55 = vld [vmem:[%s3817_s1 + $0x218] ss:$12 sps:$4 sm:$0xff]  }
  0x7b   : > { %1889 = vmatprep.subr.bf16.mxu1 %v2891_v57  ;;  %v2964_v56 = vld [vmem:[%s3817_s1 + $0x398] ss:$12 sps:$4 sm:$0xff]   ;;  %v2965_v57 = vld [vmem:[%s3817_s1 + $0x2c0] ss:$12 sps:$4 sm:$0xff]  }
  0x7d   : > { %1847 = vmatpush2.bf16.msra.mxu0 %v2886_v58  ;;  %v2966_v58 = vld [vmem:[%s3817_s1 + $0x440] ss:$12 sps:$4 sm:$0xff]  }
  0x7e   : > { %1890 = vmatpush2.bf16.msra.mxu1 %v2889_v59  ;;  %1848 = vmatprep.subr.bf16.mxu0 %v2894_v60  ;;  %v2968_v59 = vld [vmem:[%s3817_s1 + $0x380] ss:$12 sps:$4 sm:$0xff]   ;;  %v2969_v60 = vld [vmem:[%s3817_s1 + $0x2a8] ss:$12 sps:$4 sm:$0xff]  }
  0x7f   : > { %1891 = vmatprep.subr.bf16.mxu1 %v2897_v61  ;;  %v2970_v61 = vld [vmem:[%s3817_s1 + $0x428] ss:$12 sps:$4 sm:$0xff]  }
  0x81   : > { %1849 = vmatpush2.bf16.msra.mxu0 %v2892_v62  ;;  %v2973_v62 = vld [vmem:[%s3817_s1 + $0x290] ss:$12 sps:$4 sm:$0xff]  }
  0x82   : > { %1892 = vmatpush2.bf16.msra.mxu1 %v2895_v63  ;;  %1850 = vmatprep.subr.bf16.mxu0 %v2900_v0  ;;  %v2974_v63 = vld [vmem:[%s3817_s1 + $0x410] ss:$12 sps:$4 sm:$0xff]  }
  0x83   : > { %1893 = vmatprep.subr.bf16.mxu1 %v2903_v1  ;;  %v2975_v0 = vld [vmem:[%s3817_s1 + $0x1d0] ss:$12 sps:$4 sm:$0xff]  }
  0x84   : > { %v2976_v1 = vld [vmem:[%s3817_s1 + $0x350] ss:$12 sps:$4 sm:$0xff]  }
  0x85   : > { %1851 = vmatpush2.bf16.msra.mxu0 %v2898_v2  ;;  %v2977_v2 = vld [vmem:[%s3817_s1 + $0x278] ss:$12 sps:$4 sm:$0xff]  }
  0x86   : > { %1894 = vmatpush2.bf16.msra.mxu1 %v2901_v3  ;;  %1852 = vmatprep.subr.bf16.mxu0 %v2906_v6  ;;  %v2978_v3 = vld [vmem:[%s3817_s1 + $0x3f8] ss:$12 sps:$4 sm:$0xff]  }
  0x87   : > { %1895 = vmatprep.subr.bf16.mxu1 %v2909_v7  ;;  %v2979_v6 = vld [vmem:[%s3817_s1 + $0x1b8] ss:$12 sps:$4 sm:$0xff]  }
  0x88   : > { %v2980_v7 = vld [vmem:[%s3817_s1 + $0x338] ss:$12 sps:$4 sm:$0xff]  }
  0x89   : > { %1853 = vmatpush2.bf16.msra.mxu0 %v2904_v8  ;;  %v2981_v8 = vld [vmem:[%s3817_s1 + $0x260] ss:$12 sps:$4 sm:$0xff]  }
  0x8a   : > { %1896 = vmatpush2.bf16.msra.mxu1 %v2907_v9  ;;  %1908 = vmatprep.subr.bf16.mxu0 %v2918_v10  ;;  %v2982_v9 = vld [vmem:[%s3817_s1 + $0x3e0] ss:$12 sps:$4 sm:$0xff]  }
  0x8b   : > { %2582 = vmatprep.subr.bf16.mxu1 %v2919_v13  ;;  %v2983_v10 = vld [vmem:[%s3817_s1 + $0x1a0] ss:$12 sps:$4 sm:$0xff]  }
  0x8c   : > { %1855 = vmatmul.mubr.bf16.vlgmr.msra.gmra.mxu0 %v3483_v11  ;;  %v2984_v13 = vld [vmem:[%s3817_s1 + $0x320] ss:$12 sps:$4 sm:$0xff]  }
  0x8d   : > { %1898 = vmatmul.mubr.bf16.vlgmr.msra.gmra.mxu1 %v3486_v12  ;;  %1909 = vmatpush1.bf16.msra.mxu0 %v2916_v14  ;;  %v2985_v14 = vld [vmem:[%s3817_s1 + $0x248] ss:$12 sps:$4 sm:$0xff]  }
  0x8e   : > { %2583 = vmatpush3.bf16.msra.mxu1 %v2920_v15  ;;  %1910 = vmatprep.subr.bf16.mxu0 %v2923_v16  ;;  %v2986_v15 = vld [vmem:[%s3817_s1 + $0x3c8] ss:$12 sps:$4 sm:$0xff]  }
  0x8f   : > { %2584 = vmatprep.subr.bf16.mxu1 %v2924_v17  ;;  %1940 = vmatprep.mubr.bf16.mxu0 %v3025_v23  ;;  %v2987_v16 = vld [vmem:[%s3817_s1 + $0x188] ss:$12 sps:$4 sm:$0xff]   ;;  %v2993_v23 = vld [vmem:[%s3817_s1 + $0x518] ss:$12 sps:$4 sm:$0xff]  }
  0x90   : > { %1983 = vmatprep.mubr.bf16.mxu1 %v3219_v49  ;;  %v2931_v49 = vld [vmem:[%s3817_s1 + $0x660] ss:$12 sps:$4 sm:$0xff]   ;;  %v2988_v17 = vld [vmem:[%s3817_s1 + $0x308] ss:$12 sps:$4 sm:$0xff]  }
  0x91   : > { %1911 = vmatpush1.bf16.msra.mxu0 %v2921_v18  ;;  %v2989_v18 = vld [vmem:[%s3817_s1 + $0x5f0] ss:$12 sps:$4 sm:$0xff]  }
  0x92   : > { %2585 = vmatpush3.bf16.msra.mxu1 %v2925_v19  ;;  %1912 = vmatprep.subr.bf16.mxu0 %v2928_v20  ;;  %v2990_v19 = vld [vmem:[%s3817_s1 + $0x530] ss:$12 sps:$4 sm:$0xff]  }
  0x93   : > { %2586 = vmatprep.subr.bf16.mxu1 %v2929_v21  ;;  %v2991_v20 = vld [vmem:[%s3817_s1 + $0x6b0] ss:$12 sps:$4 sm:$0xff]   ;;  %v3026_v21 = vmov 0.0  }
  0x95   : > { %1913 = vmatpush1.bf16.msra.mxu0 %v2926_v22  ;;  %v2992_v22 = vld [vmem:[%s3817_s1 + $0x5d8] ss:$12 sps:$4 sm:$0xff]  }
  0x96   : > { %2587 = vmatpush3.bf16.msra.mxu1 %v2930_v24  ;;  %1914 = vmatprep.subr.bf16.mxu0 %v2933_v25  ;;  %v2994_v24 = vld [vmem:[%s3817_s1 + $0x698] ss:$12 sps:$4 sm:$0xff]   ;;  %v2995_v25 = vld [vmem:[%s3817_s1 + $0x5c0] ss:$12 sps:$4 sm:$0xff]  }
  0x97   : > { %2588 = vmatprep.subr.bf16.mxu1 %v2934_v26  ;;  %v2998_v26 = vld [vmem:[%s3817_s1 + $0x5a8] ss:$12 sps:$4 sm:$0xff]  }
  0x99   : > { %1915 = vmatpush1.bf16.msra.mxu0 %v2931_v49  ;;  %v3000_v49 = vld [vmem:[%s3817_s1 + $0x668] ss:$12 sps:$4 sm:$0xff]  }
  0x9a   : > { %2589 = vmatpush3.bf16.msra.mxu1 %v2935_v27  ;;  %1916 = vmatprep.subr.bf16.mxu0 %v2938_v28  ;;  %v3001_v27 = vld [vmem:[%s3817_s1 + $0x590] ss:$12 sps:$4 sm:$0xff]  }
  0x9b   : > { %2590 = vmatprep.subr.bf16.mxu1 %v2939_v29  ;;  %v3002_v28 = vld [vmem:[%s3817_s1 + $0x4d0] ss:$12 sps:$4 sm:$0xff]  }
  0x9c   : > { %v3003_v29 = vld [vmem:[%s3817_s1 + $0x650] ss:$12 sps:$4 sm:$0xff]  }
  0x9d   : > { %1917 = vmatpush1.bf16.msra.mxu0 %v2936_v30  ;;  %v3004_v30 = vld [vmem:[%s3817_s1 + $0x578] ss:$12 sps:$4 sm:$0xff]  }
  0x9e   : > { %2591 = vmatpush3.bf16.msra.mxu1 %v2940_v31  ;;  %1918 = vmatprep.subr.bf16.mxu0 %v2943_v32  ;;  %v3005_v31 = vld [vmem:[%s3817_s1 + $0x4b8] ss:$12 sps:$4 sm:$0xff]  }
  0x9f   : > { %2592 = vmatprep.subr.bf16.mxu1 %v2944_v33  ;;  %v3006_v32 = vld [vmem:[%s3817_s1 + $0x638] ss:$12 sps:$4 sm:$0xff]   ;;  %v3007_v33 = vld [vmem:[%s3817_s1 + $0x560] ss:$12 sps:$4 sm:$0xff]  }
  0xa1   : > { %1919 = vmatpush1.bf16.msra.mxu0 %v2941_v36  ;;  %v3008_v36 = vld [vmem:[%s3817_s1 + $0x4a0] ss:$12 sps:$4 sm:$0xff]  }
  0xa2   : > { %2593 = vmatpush3.bf16.msra.mxu1 %v2945_v37  ;;  %1920 = vmatprep.subr.bf16.mxu0 %v2948_v38  ;;  %v3009_v37 = vld [vmem:[%s3817_s1 + $0x620] ss:$12 sps:$4 sm:$0xff]   ;;  %v3010_v38 = vld [vmem:[%s3817_s1 + $0x548] ss:$12 sps:$4 sm:$0xff]  }
  0xa3   : > { %2594 = vmatprep.subr.bf16.mxu1 %v2949_v39  ;;  %v3011_v39 = vld [vmem:[%s3817_s1 + $0x488] ss:$12 sps:$4 sm:$0xff]  }
  0xa5   : > { %1921 = vmatpush1.bf16.msra.mxu0 %v2946_v40  ;;  %v3012_v40 = vld [vmem:[%s3817_s1 + $0x608] ss:$12 sps:$4 sm:$0xff]  }
  0xa6   : > { %2595 = vmatpush3.bf16.msra.mxu1 %v2950_v41  ;;  %1922 = vmatprep.subr.bf16.mxu0 %v2953_v42  ;;  %v523_v42 = vlaneseq }
  0xa7   : > { %2596 = vmatprep.subr.bf16.mxu1 %v2954_v43 }
  0xa9   : > { %1923 = vmatpush1.bf16.msra.mxu0 %v2951_v44 }
  0xaa   : > { %2597 = vmatpush3.bf16.msra.mxu1 %v2955_v45  ;;  %2604 = vmatprep.subr.bf16.mxu0 %v2957_v46  ;;  %v3764_v45 = vshrl.u32 %v523_v42, 7 }
  0xab   : > { %2626 = vmatprep.subr.bf16.mxu1 %v2958_v48 }
  0xac   : > { %1941 = vmatmul.mubr.bf16.vlgmr.msra.gmra.mxu0 %v3588_v47 }
  0xad   : > { %1984 = vmatmul.mubr.bf16.vlgmr.msra.gmra.mxu1 %v3278_v4  ;;  %2605 = vmatpush3.bf16.msra.mxu0 %v2959_v50  ;;  %v2967_v4 = vld [vmem:[%s3817_s1 + $0x200] ss:$12 sps:$4 sm:$0xff]   ;;  %v525_v50 = vsub.s32 0, %v3764_v45 }
  0xae   : > { %2627 = vmatpush3.bf16.msra.mxu1 %v2960_v52  ;;  %2606 = vmatprep.subr.bf16.mxu0 %v2961_v53  ;;  %v521_v52 = vld [vmem:[%s3818_s2] sm:$0x7]  ;;  %v529_v53 = vsub.s32 1, %v3764_v45 }
  0xaf   : > { %2628 = vmatprep.subr.bf16.mxu1 %v2962_v54  ;;  %2024 = vmatprep.mubr.bf16.mxu0 %v3225_v51  ;;  %v2971_v51 = vld [vmem:[%s3817_s1 + $0x1e8] ss:$12 sps:$4 sm:$0xff]  }
  0xb0   : > { %2065 = vmatprep.mubr.bf16.mxu1 %v3370_v34  ;;  %v2972_v34 = vld [vmem:[%s3817_s1 + $0x368] ss:$12 sps:$4 sm:$0xff]  }
  0xb1   : > { %2607 = vmatpush3.bf16.msra.mxu0 %v2963_v55  ;;  %v526_v55 = vrot.slane %v521_v52, %v525_v50 }
  0xb2   : > { %2629 = vmatpush3.bf16.msra.mxu1 %v2964_v56  ;;  %2608 = vmatprep.subr.bf16.mxu0 %v2965_v57  ;;  %v530_v56 = vrot.slane %v521_v52, %v529_v53 }
  0xb3   : > { %2630 = vmatprep.subr.bf16.mxu1 %v2966_v58 }
  0xb5   : > { %2609 = vmatpush3.bf16.msra.mxu0 %v2967_v4 }
  0xb6   : > { %2631 = vmatpush3.bf16.msra.mxu1 %v2968_v59  ;;  %2610 = vmatprep.subr.bf16.mxu0 %v2969_v60 }
  0xb7   : > { %2632 = vmatprep.subr.bf16.mxu1 %v2970_v61 }
  0xb9   : > { %2611 = vmatpush3.bf16.msra.mxu0 %v2971_v51 }
  0xba   : > { %2633 = vmatpush3.bf16.msra.mxu1 %v2972_v34  ;;  %2612 = vmatprep.subr.bf16.mxu0 %v2973_v62 }
  0xbb   : > { %2634 = vmatprep.subr.bf16.mxu1 %v2974_v63 }
  0xbd   : > { %2613 = vmatpush3.bf16.msra.mxu0 %v2975_v0 }
  0xbe   : > { %2635 = vmatpush3.bf16.msra.mxu1 %v2976_v1  ;;  %2614 = vmatprep.subr.bf16.mxu0 %v2977_v2 }
  0xbf   : > { %2636 = vmatprep.subr.bf16.mxu1 %v2978_v3 }
  0xc1   : > { %2615 = vmatpush3.bf16.msra.mxu0 %v2979_v6 }
  0xc2   : > { %2637 = vmatpush3.bf16.msra.mxu1 %v2980_v7  ;;  %2616 = vmatprep.subr.bf16.mxu0 %v2981_v8 }
  0xc3   : > { %2638 = vmatprep.subr.bf16.mxu1 %v2982_v9 }
  0xc5   : > { %2617 = vmatpush3.bf16.msra.mxu0 %v2983_v10 }
  0xc6   : > { %2639 = vmatpush3.bf16.msra.mxu1 %v2984_v13  ;;  %2618 = vmatprep.subr.bf16.mxu0 %v2985_v14 }
  0xc7   : > { %2640 = vmatprep.subr.bf16.mxu1 %v2986_v15 }
  0xc9   : > { %2619 = vmatpush3.bf16.msra.mxu0 %v2987_v16 }
  0xca   : > { %2641 = vmatpush3.bf16.msra.mxu1 %v2988_v17  ;;  %2648 = vmatprep.subr.bf16.mxu0 %v2989_v18 }
  0xcb   : > { %2679 = vmatprep.subr.bf16.mxu1 %v3026_v21 }
  0xcc   : > { %2025 = vmatmul.mubr.bf16.vlgmr.msra.gmra.mxu0 %v3281_v5  ;;  %v2996_v5 = vld [vmem:[%s3817_s1 + $0x500] ss:$12 sps:$4 sm:$0xff]  }
  0xcd   : > { %2066 = vmatmul.mubr.bf16.vlgmr.msra.gmra.mxu1 %v3483_v11  ;;  %2649 = vmatpush3.bf16.msra.mxu0 %v2990_v19  ;;  %v2997_v11 = vld [vmem:[%s3817_s1 + $0x680] ss:$12 sps:$4 sm:$0xff]  }
  0xce   : > { %2680 = vmatpush3.bf16.msra.mxu1 %v2991_v20  ;;  %2650 = vmatprep.subr.bf16.mxu0 %v2992_v22 }
  0xcf   : > { %2681 = vmatprep.subr.bf16.mxu1 %v3026_v21  ;;  %2106 = vmatprep.mubr.bf16.mxu0 %v3373_v35  ;;  %v2999_v35 = vld [vmem:[%s3817_s1 + $0x4e8] ss:$12 sps:$4 sm:$0xff]  }
  0xd0   : > { %2695 = vmatprep.mubr.msk.bf16.mxu1 %vm3027_vm0, %v3026_v21 }
  0xd1   : > { %2651 = vmatpush3.bf16.msra.mxu0 %v2993_v23 }
  0xd2   : > { %2682 = vmatpush3.bf16.msra.mxu1 %v2994_v24  ;;  %2652 = vmatprep.subr.bf16.mxu0 %v2995_v25 }
  0xd3   : > { %2683 = vmatprep.subr.bf16.mxu1 %v3026_v21 }
  0xd5   : > { %2653 = vmatpush3.bf16.msra.mxu0 %v2996_v5 }
  0xd6   : > { %2684 = vmatpush3.bf16.msra.mxu1 %v2997_v11  ;;  %2654 = vmatprep.subr.bf16.mxu0 %v2998_v26 }
  0xd7   : > { %2685 = vmatprep.subr.bf16.mxu1 %v3026_v21 }
  0xd9   : > { %2655 = vmatpush3.bf16.msra.mxu0 %v2999_v35 }
  0xda   : > { %2686 = vmatpush3.bf16.msra.mxu1 %v3000_v49  ;;  %2656 = vmatprep.subr.bf16.mxu0 %v3001_v27 }
  0xdb   : > { %2687 = vmatprep.subr.bf16.mxu1 %v3026_v21 }
  0xdd   : > { %2657 = vmatpush3.bf16.msra.mxu0 %v3002_v28 }
  0xde   : > { %2688 = vmatpush3.bf16.msra.mxu1 %v3003_v29  ;;  %2658 = vmatprep.subr.bf16.mxu0 %v3004_v30 }
  0xdf   : > { %2689 = vmatprep.subr.bf16.mxu1 %v3026_v21 }
  0xe1   : > { %2659 = vmatpush3.bf16.msra.mxu0 %v3005_v31 }
  0xe2   : > { %2690 = vmatpush3.bf16.msra.mxu1 %v3006_v32  ;;  %2660 = vmatprep.subr.bf16.mxu0 %v3007_v33 }
  0xe3   : > { %2691 = vmatprep.subr.bf16.mxu1 %v3026_v21 }
  0xe5   : > { %2661 = vmatpush3.bf16.msra.mxu0 %v3008_v36 }
  0xe6   : > { %2692 = vmatpush3.bf16.msra.mxu1 %v3009_v37  ;;  %2662 = vmatprep.subr.bf16.mxu0 %v3010_v38  ;;  %v533_v37 = vsub.s32 2, %v3764_v45 }
  0xe7   : > { %2693 = vmatprep.subr.bf16.mxu1 %v3026_v21 }
  0xe9   : > { %2663 = vmatpush3.bf16.msra.mxu0 %v3011_v39 }
  0xea   : > { %2694 = vmatpush3.bf16.msra.mxu1 %v3012_v40  ;;  %v534_v40 = vrot.slane %v521_v52, %v533_v37 }
  0xec   : > { %2107 = vmatmul.mubr.bf16.vlgmr.msra.gmra.mxu0 %v3486_v12 }
  0xed   : > { %2696 = vmatmul.mubr.bf16.vlgmr.msra.gmra.mxu1 %v3588_v47 }
 0x10c   : > { %v1770_v41 = vpop.f32.mrf.mxu0 }
 0x10d   : > { %v1813_v43 = vpop.f32.mrf.mxu1  ;;  %v1771_v58 = vadd.f32 %v1770_v41, %v526_v55 }
 0x10e   : > { %v1772_v44 = vpop.f32.mrf.mxu0 }
 0x10f   : > { %v1815_v46 = vpop.f32.mrf.mxu1  ;;  %v1773_v60 = vadd.f32 %v1772_v44, %v530_v56  ;;  %v1814_v61 = vadd.f32 %v1813_v43, %v1771_v58 }
 0x110   : > { %v1774_v48 = vpop.f32.mrf.mxu0 }
 0x111   : > { %v1817_v54 = vpop.f32.mrf.mxu1  ;;  %v1775_v51 = vadd.f32 %v1774_v48, %v526_v55  ;;  %v1816_v63 = vadd.f32 %v1815_v46, %v1773_v60 }
 0x112   : > { %v1776_v12 = vpop.f32.mrf.mxu0 }
 0x113   : > { %v1819_v57 = vpop.f32.mrf.mxu1  ;;  %v1777_v0 = vadd.f32 %v1776_v12, %v530_v56  ;;  %v1818_v2 = vadd.f32 %v1817_v54, %v1775_v51 }
 0x115   : > { %v1820_v8 = vadd.f32 %v1819_v57, %v1777_v0 }
 0x14c   : > { %v1856_v47 = vpop.f32.mrf.mxu0 }
 0x14d   : > { %v1899_v4 = vpop.f32.mrf.mxu1  ;;  %v1857_v1 = vadd.f32 %v1856_v47, %v1814_v61 }
 0x14e   : > { %v1858_v59 = vpop.f32.mrf.mxu0 }
 0x14f   : > { %v1901_v34 = vpop.f32.mrf.mxu1  ;;  %v1859_v3 = vadd.f32 %v1858_v59, %v1816_v63  ;;  %v1900_v9 = vadd.f32 %v1899_v4, %v1857_v1 }
 0x150   : > { %v1860_v62 = vpop.f32.mrf.mxu0 }
 0x151   : > { %v1903_v6 = vpop.f32.mrf.mxu1  ;;  %v1861_v10 = vadd.f32 %v1860_v62, %v1818_v2  ;;  %v1902_v14 = vadd.f32 %v1901_v34, %v1859_v3 }
 0x152   : > { %v1862_v7 = vpop.f32.mrf.mxu0 }
 0x153   : > { %v1863_v15 = vadd.f32 %v1862_v7, %v1820_v8  ;;  %v1905_v17 = vpop.f32.mrf.mxu1  ;;  %v1904_v19 = vadd.f32 %v1903_v6, %v1861_v10 }
 0x155   : > { %v1906_v22 = vadd.f32 %v1905_v17, %v1863_v15 }
 0x16c   : > { %v1942_v13 = vpop.f32.mrf.mxu0 }
 0x16d   : > { %v1943_v16 = vadd.f32 %v1942_v13, %v1900_v9  ;;  %v2598_v28 = vpop.f32.mrf.mxu1 }
 0x16e   : > { %v1944_v18 = vpop.f32.mrf.mxu0 }
 0x16f   : > { %v1945_v20 = vadd.f32 %v1944_v18, %v1902_v14  ;;  %v3772_v23 = vmax.f32 %v1943_v16, 0.0  ;;  %v2599_v29 = vpop.f32.mrf.mxu1 }
 0x170   : > { %v1946_v21 = vpop.f32.mrf.mxu0  ;;  %v2600_v41 = vadd.f32 %v2599_v29, %v2598_v28 }
 0x171   : > { %v3774_v24 = vmax.f32 %v1945_v20, 0.0  ;;  %v1947_v25 = vadd.f32 %v1946_v21, %v1904_v19  ;;  %v2601_v30 = vpop.f32.mrf.mxu1  ;;  %v2186_v3 = vmul.f32 %v3772_v23, %v3772_v23 }
 0x172   : > { %v1948_v5 = vpop.f32.mrf.mxu0  ;;  %v1986_v46 = vadd.f32 %v2600_v41, %v534_v40 }
 0x173   : > { %v2574_v11 = vpack.c.bf16 %v3774_v24, %v3772_v23  ;;  %v1949_v26 = vadd.f32 %v1948_v5, %v1906_v22  ;;  %v3786_v35 = vmax.f32 %v1947_v25, 0.0  ;;  %v2602_v31 = vpop.f32.mrf.mxu1  ;;  %v2187_v63 = vmul.f32 %v3774_v24, %v3774_v24 }
 0x174   : > { %v2603_v48 = vadd.f32 %v2602_v31, %v2601_v30 }
 0x175   : > { %2182 = vst [vmem:[%s3781_s10] sm:$0xff] %v2574_v11  ;;  %v3788_v49 = vmax.f32 %v1949_v26, 0.0  ;;  %v2192_v8 = vadd.f32 %v2187_v63, %v2186_v3  ;;  %v2189_v17 = vmul.f32 %v3786_v35, %v3786_v35 }
 0x176   : > { %v1989_v56 = vadd.f32 %v2603_v48, %v534_v40 }
 0x177   : > { %v2576_v27 = vpack.c.bf16 %v3788_v49, %v3786_v35  ;;  %v2190_v14 = vmul.f32 %v3788_v49, %v3788_v49 }
 0x179   : > { %2184 = vst [vmem:[%s3781_s10 + $0xc] sm:$0xff] %v2576_v27  ;;  %v2196_v20 = vadd.f32 %v2190_v14, %v2189_v17 }
 0x18c   : > { %v2620_v32 = vpop.f32.mrf.mxu0 }
 0x18d   : > { %v2642_v33 = vpop.f32.mrf.mxu1 }
 0x18e   : > { %v2621_v36 = vpop.f32.mrf.mxu0 }
 0x18f   : > { %v2643_v38 = vpop.f32.mrf.mxu1  ;;  %v2622_v43 = vadd.f32 %v2621_v36, %v2620_v32 }
 0x190   : > { %v2623_v39 = vpop.f32.mrf.mxu0  ;;  %v2644_v54 = vadd.f32 %v2643_v38, %v2642_v33 }
 0x191   : > { %v2645_v42 = vpop.f32.mrf.mxu1  ;;  %v2027_v53 = vadd.f32 %v2622_v43, %v1986_v46 }
 0x192   : > { %v2624_v44 = vpop.f32.mrf.mxu0 }
 0x193   : > { %v2646_v50 = vpop.f32.mrf.mxu1  ;;  %v2625_v12 = vadd.f32 %v2624_v44, %v2623_v39  ;;  %v2068_v4 = vadd.f32 %v2644_v54, %v2027_v53 }
 0x194   : > { %v2647_v59 = vadd.f32 %v2646_v50, %v2645_v42 }
 0x195   : > { %v2030_v45 = vadd.f32 %v2625_v12, %v1989_v56 }
 0x197   : > { %v2071_v0 = vadd.f32 %v2647_v59, %v2030_v45 }
 0x1ac   : > { %v2664_v55 = vpop.f32.mrf.mxu0 }
 0x1ad   : > { %v2149_v47 = vpop.f32.mrf.mxu1 }
 0x1ae   : > { %v2665_v57 = vpop.f32.mrf.mxu0 }
 0x1af   : > { %v2697_v58 = vpop.f32.mrf.mxu1  ;;  %v2666_v60 = vadd.f32 %v2665_v57, %v2664_v55 }
 0x1b0   : > { %v2667_v52 = vpop.f32.mrf.mxu0 }
 0x1b1   : > { %v2152_v61 = vpop.f32.mrf.mxu1  ;;  %v2109_v51 = vadd.f32 %v2666_v60, %v2068_v4 }
 0x1b2   : > { %v2668_v34 = vpop.f32.mrf.mxu0 }
 0x1b3   : > { %v2698_v62 = vpop.f32.mrf.mxu1  ;;  %v2150_v1 = vadd.f32 %v2149_v47, %v2109_v51  ;;  %v2669_v2 = vadd.f32 %v2668_v34, %v2667_v52 }
 0x1b5   : > { %v2158_v6 = vmax.f32 %v2150_v1, 0.0  ;;  %v2112_v7 = vadd.f32 %v2669_v2, %v2071_v0 }
 0x1b7   : > { %v2575_v9 = vpack.c.bf16 %v2158_v6, %v2158_v6  ;;  %v2153_v10 = vadd.f32 %v2152_v61, %v2112_v7  ;;  %v2188_v13 = vmul.f32 %v2158_v6, %v2158_v6 }
 0x1b9   : > { %2183 = vst [vmem:[%s3781_s10 + $0x8] sm:$0xf] %v2575_v9  ;;  %v2161_v15 = vmax.f32 %v2153_v10, 0.0  ;;  %v2193_v16 = vadd.f32 %v2192_v8, %v2188_v13 }
 0x1bb   : > { %v2577_v18 = vpack.c.bf16 %v2161_v15, %v2161_v15  ;;  %2194 = vadd.xlane.f32.xlu0 %v2193_v16  ;;  %v2191_v19 = vmul.f32 %v2161_v15, %v2161_v15 }
 0x1bd   : > { %2185 = vst [vmem:[%s3781_s10 + $0x14] sm:$0xf] %v2577_v18  ;;  %v2197_v21 = vadd.f32 %v2196_v20, %v2191_v19 }
 0x1bf   : > { %2198 = vadd.xlane.f32.xlu0 %v2197_v21 }
 0x244   : > { %v2195_v22 = vpop.xlane.xlu0 %2194 }
 0x245   : > { %v2200_v25 = vadd.f32 1e-08, %v2195_v22 }
 0x247   : > { %3013 = vrsqrt.f32 %v2200_v25 }
 0x248   : > { %v2199_v5 = vpop.xlane.xlu0 %2198 }
 0x249   : > { %v2201_v11 = vadd.f32 1e-08, %v2199_v5 }
 0x24b   : > { %3015 = vrsqrt.f32 %v2201_v11 }
 0x254   : > { %v3014_v26 = vpop.eup %3013 }
 0x255   : > { %v2204_v27 = vmul.f32 %v3014_v26, %v3772_v23  ;;  %v2205_v28 = vmul.f32 %v3014_v26, %v3774_v24  ;;  %v2206_v29 = vmul.f32 %v3014_v26, %v2158_v6 }
 0x257   : > { %v2578_v30 = vpack.c.bf16 %v2205_v28, %v2204_v27  ;;  %v2579_v31 = vpack.c.bf16 %v2206_v29, %v2206_v29 }
 0x258   : > { %v3016_v32 = vpop.eup %3015 }
 0x259   : > { %2230 = vst [vmem:[%s220_s13] sm:$0xff] %v2578_v30  ;;  %2231 = vst [vmem:[%s220_s13 + $0x8] sm:$0xf] %v2579_v31  ;;  %v2207_v33 = vmul.f32 %v3016_v32, %v3786_v35  ;;  %v2208_v36 = vmul.f32 %v3016_v32, %v3788_v49  ;;  %v2209_v37 = vmul.f32 %v3016_v32, %v2161_v15 }
 0x25b   : > { %v2580_v38 = vpack.c.bf16 %v2208_v36, %v2207_v33  ;;  %v2581_v23 = vpack.c.bf16 %v2209_v37, %v2209_v37 }
 0x25d   : > { %2232 = vst [vmem:[%s220_s13 + $0xc] sm:$0xff] %v2580_v38  ;;  %2233 = vst [vmem:[%s220_s13 + $0x14] sm:$0xf] %v2581_v23 }
 0x25e PF: > { %s15_s15 = sadd.s32 1, %s3023_s15  }
 0x25f   : > { %p12_p4 = scmp.ge.s32.totalorder %s15_s15, 4  }
 0x261   :  { %14 = sbr.rel (!%p12_p4) target bundleno = 1 (0x1), region = 74 }

// kernel: squeeze.5
= control target key start
LH: loop header
LB: loop body
LE: loop exit
PB: predicated region body
PF: predicated region fallthrough
CT: control target
= control target key end

     0   :  { %vm20_vm0 = vcmask 23552   ;;  %s48_s8 = smov 122   ;;  %v49_v8 = vmov 0.0   ;;  %s66_s0 = inlined_call_operand.vmem [shape: bf16[9], index: 0, kind: input, shape index: {}]   ;;  %s67_s1 = inlined_call_operand.vmem [shape: bf16[3,3], index: 1, kind: output, shape index: {}]  }
   0x1   :  { %v15_v0 = vld [vmem:[%s66_s0] sm:$0x1]  ;;  %s47_s0 = smov 125  }
   0x2   :  { %v16_v1 = vunpack.c.l.bf16 %v15_v0 }
   0x4   :  { %18 = vst [vmem:[#allocation1] sm:$0x3] %v16_v1 }
   0xb   :  { %v22_v2 = vld [vmem:[#allocation1] sm:$0x1]  }
   0xc   :  { %v19_v3 = vld [vmem:[#allocation1] sm:$0x1]   ;;  %23 = vrot.lane.b32.xlu0 %v22_v2, %s47_s0 }
   0xd   :  { %21 = vst.msk [vmem:[#allocation0] sm:$0x1] %vm20_vm0, %v19_v3   ;;  %v28_v4 = vld [vmem:[#allocation1] sm:$0x1]  }
  0x10   :  { %29 = vrot.lane.b32.xlu0 %v28_v4, %s48_s8 }
  0x7e   :  { %v24_v5 = vpop.permute.xlu0 %23  }
  0x7f   :  { %27 = vst.msk [vmem:[#allocation0 + $0x1] sm:$0x1] %vm20_vm0, %v24_v5  }
  0x82   :  { %v30_v6 = vpop.permute.xlu0 %29  }
  0x83   :  { %33 = vst.msk [vmem:[#allocation0 + $0x2] sm:$0x1] %vm20_vm0, %v30_v6  }
  0x8a   :  { %v39_v7 = vld [vmem:[#allocation0] sm:$0xf] }
  0x8b   :  { %v40_v9 = vpack.c.bf16 %v49_v8, %v39_v7 }
  0x8d   :  { %43 = vst [vmem:[%s67_s1] sm:$0x3] %v40_v9 }

// kernel: puzzle_sim_forward.31
= control target key start
LH: loop header
LB: loop body
LE: loop exit
PB: predicated region body
PF: predicated region fallthrough
CT: control target
= control target key end

     0   :  { %v301_v31 = vlaneseq  ;;  %s544_s1 = inlined_call_operand.vmem [shape: bf16[128,384], index: 1, kind: input, shape index: {}]   ;;  %s545_s0 = inlined_call_operand.vmem [shape: bf16[24,384], index: 0, kind: input, shape index: {}]   ;;  %s546_s2 = inlined_call_operand.vmem [shape: f32[1,128], index: 2, kind: output, shape index: {}]  }
   0x1   :  { %v400_v0 = vld [vmem:[%s544_s1 + $0xac] ss:$12 sps:$4 sm:$0xff]   ;;  %v402_v1 = vld [vmem:[%s544_s1 + $0xb0] ss:$12 sps:$4 sm:$0xff]   ;;  %v403_v2 = vld [vmem:[%s544_s1 + $0xa8] ss:$12 sps:$4 sm:$0xff]  }
   0x2   :  { %205 = vmatprep.subr.bf16.mxu0 %v400_v0  ;;  %380 = vmatprep.subr.bf16.mxu1 %v402_v1  ;;  %v404_v3 = vld [vmem:[%s544_s1 + $0x94] ss:$12 sps:$4 sm:$0xff]   ;;  %v406_v4 = vld [vmem:[%s544_s1 + $0x98] ss:$12 sps:$4 sm:$0xff]   ;;  %v407_v5 = vld [vmem:[%s544_s1 + $0x90] ss:$12 sps:$4 sm:$0xff]  }
   0x3   :  { %206 = vmatpush1.bf16.xpose.msra.mxu0 %v403_v2  ;;  %381 = vmatpush3.bf16.xpose.msra.mxu1 %v402_v1  ;;  %v408_v6 = vld [vmem:[%s544_s1 + $0x7c] ss:$12 sps:$4 sm:$0xff]   ;;  %v410_v7 = vld [vmem:[%s544_s1 + $0x80] ss:$12 sps:$4 sm:$0xff]   ;;  %v411_v8 = vld [vmem:[%s544_s1 + $0x78] ss:$12 sps:$4 sm:$0xff]  }
   0x4   :  { %207 = vmatprep.subr.bf16.mxu0 %v404_v3  ;;  %382 = vmatprep.subr.bf16.mxu1 %v406_v4  ;;  %v412_v9 = vld [vmem:[%s544_s1 + $0x64] ss:$12 sps:$4 sm:$0xff]   ;;  %v414_v10 = vld [vmem:[%s544_s1 + $0x68] ss:$12 sps:$4 sm:$0xff]   ;;  %v415_v13 = vld [vmem:[%s544_s1 + $0x60] ss:$12 sps:$4 sm:$0xff]  }
   0x5   :  { %v434_v11 = vld [vmem:[%s545_s0 + $0x4] ss:$12 sps:$4 sm:$0xff]   ;;  %v435_v12 = vld [vmem:[%s545_s0 + $0x8] ss:$12 sps:$4 sm:$0xff]   ;;  %v416_v14 = vld [vmem:[%s544_s1 + $0x4c] ss:$12 sps:$4 sm:$0xff]  }
   0x6   :  { %237 = vmatprep.mubr.bf16.mxu0 %v434_v11  ;;  %396 = vmatprep.mubr.bf16.mxu1 %v435_v12  ;;  %v418_v15 = vld [vmem:[%s544_s1 + $0x50] ss:$12 sps:$4 sm:$0xff]   ;;  %v419_v16 = vld [vmem:[%s544_s1 + $0x48] ss:$12 sps:$4 sm:$0xff]   ;;  %v422_v18 = vld [vmem:[%s544_s1 + $0x38] ss:$12 sps:$4 sm:$0xff]  }
   0x7   :  { %v420_v17 = vld [vmem:[%s544_s1 + $0x34] ss:$12 sps:$4 sm:$0xff]   ;;  %v423_v19 = vld [vmem:[%s544_s1 + $0x30] ss:$12 sps:$4 sm:$0xff]   ;;  %v427_v22 = vld [vmem:[%s544_s1 + $0x18] ss:$12 sps:$4 sm:$0xff]  }
   0x8   :  { %v424_v20 = vld [vmem:[%s544_s1 + $0x1c] ss:$12 sps:$4 sm:$0xff]   ;;  %v426_v21 = vld [vmem:[%s544_s1 + $0x20] ss:$12 sps:$4 sm:$0xff]   ;;  %v428_v23 = vld [vmem:[%s544_s1 + $0x4] ss:$12 sps:$4 sm:$0xff]  }
   0x9   :  { %v430_v24 = vld [vmem:[%s544_s1 + $0x8] ss:$12 sps:$4 sm:$0xff]   ;;  %v431_v25 = vld [vmem:[%s544_s1] ss:$12 sps:$4 sm:$0xff]   ;;  %v16_v26 = vld [vmem:[%s545_s0 + $0x18] sm:$0xff]  ;;  %v302_v34 = vshrl.u32 %v301_v31, 7 }
   0xa   :  { %v432_v27 = vld [vmem:[%s545_s0] ss:$12 sps:$4 sm:$0xff]   ;;  %v344_v29 = vcombine.high %v16_v26, %v16_v26  ;;  %v343_v30 = vcombine.low %v16_v26, %v16_v26 }
   0xb   :  { %208 = vmatpush1.bf16.xpose.msra.mxu0 %v407_v5  ;;  %383 = vmatpush3.bf16.xpose.msra.mxu1 %v406_v4  ;;  %v436_v28 = vld [vmem:[%s545_s0 + $0x20] ss:$0 sps:$4 sm:$0xff]   ;;  %v304_v39 = vadd.s32 16, %v302_v34 }
   0xc   :  { %209 = vmatprep.subr.bf16.mxu0 %v408_v6  ;;  %384 = vmatprep.subr.bf16.mxu1 %v410_v7 }
   0xd   :  { %vm312_vm0 = vcmp.lt.s32.totalorder %v304_v39, 18 }
  0x13   :  { %210 = vmatpush1.bf16.xpose.msra.mxu0 %v411_v8  ;;  %385 = vmatpush3.bf16.xpose.msra.mxu1 %v410_v7 }
  0x14   :  { %211 = vmatprep.subr.bf16.mxu0 %v412_v9  ;;  %386 = vmatprep.subr.bf16.mxu1 %v414_v10 }
  0x1b   :  { %212 = vmatpush1.bf16.xpose.msra.mxu0 %v415_v13  ;;  %387 = vmatpush3.bf16.xpose.msra.mxu1 %v414_v10 }
  0x1c   :  { %213 = vmatprep.subr.bf16.mxu0 %v416_v14  ;;  %388 = vmatprep.subr.bf16.mxu1 %v418_v15 }
  0x23   :  { %214 = vmatpush1.bf16.xpose.msra.mxu0 %v419_v16  ;;  %389 = vmatpush3.bf16.xpose.msra.mxu1 %v418_v15 }
  0x24   :  { %215 = vmatprep.subr.bf16.mxu0 %v420_v17  ;;  %390 = vmatprep.subr.bf16.mxu1 %v422_v18 }
  0x2b   :  { %216 = vmatpush1.bf16.xpose.msra.mxu0 %v423_v19  ;;  %391 = vmatpush3.bf16.xpose.msra.mxu1 %v422_v18 }
  0x2c   :  { %217 = vmatprep.subr.bf16.mxu0 %v424_v20  ;;  %392 = vmatprep.subr.bf16.mxu1 %v426_v21 }
  0x33   :  { %218 = vmatpush1.bf16.xpose.msra.mxu0 %v427_v22  ;;  %393 = vmatpush3.bf16.xpose.msra.mxu1 %v426_v21 }
  0x34   :  { %219 = vmatprep.subr.bf16.mxu0 %v428_v23  ;;  %394 = vmatprep.subr.bf16.mxu1 %v430_v24 }
  0x3b   :  { %220 = vmatpush1.bf16.xpose.msra.mxu0 %v431_v25  ;;  %395 = vmatpush3.bf16.xpose.msra.mxu1 %v430_v24 }
  0x42   :  { %238 = vmatmul.mubr.bf16.vlgmr.msra.gmra.mxu0 %v432_v27  ;;  %397 = vmatmul.mubr.bf16.vlgmr.msra.gmra.mxu1 %v436_v28 }
  0x43   :  { %245 = vmatprep.mubr.bf16.mxu0 %v344_v29 }
  0x4a   :  { %246 = vmatmul.mubr.bf16.gmra.mxu0 %v343_v30 }
 0x102   :  { %v239_v32 = vpop.f32.mrf.mxu0  ;;  %v398_v33 = vpop.f32.mrf.mxu1 }
 0x104   :  { %v241_v35 = vpop.f32.mrf.mxu0  ;;  %v287_v36 = vpop.f32.mrf.mxu1 }
 0x105   :  { %v288_v42 = vadd.f32 %v287_v36, %v239_v32 }
 0x106   :  { %v242_v37 = vpop.f32.mrf.mxu0  ;;  %v399_v38 = vpop.f32.mrf.mxu1 }
 0x108   :  { %v244_v40 = vpop.f32.mrf.mxu0  ;;  %v290_v41 = vpop.f32.mrf.mxu1 }
 0x109   :  { %v291_v43 = vadd.f32 %v290_v41, %v242_v37 }
 0x10a   :  { %v247_v44 = vpop.f32.mrf.mxu0 }
 0x10b   :  { %v316_v45 = vmax.f32 %v288_v42, %v291_v43  ;;  %v296_v46 = vadd.f32 %v398_v33, %v247_v44 }
 0x10c   :  { %v249_v47 = vpop.f32.mrf.mxu0 }
 0x10d   :  { %v315_v48 = vsel %vm312_vm0, %v296_v46, -inf }
 0x10e   :  { %v317_v49 = vmax.f32 %v316_v45, %v315_v48  ;;  %v250_v50 = vpop.f32.mrf.mxu0 }
 0x110   :  { %v318_v51 = vrot.slane %v317_v49, 4  ;;  %v251_v52 = vpop.f32.mrf.mxu0 }
 0x112   :  { %v319_v53 = vmax.f32 %v317_v49, %v318_v51 }
 0x114   :  { %v320_v54 = vrot.slane %v319_v53, 2 }
 0x116   :  { %v321_v55 = vmax.f32 %v319_v53, %v320_v54 }
 0x118   :  { %v322_v56 = vrot.slane %v321_v55, 1 }
 0x11a   :  { %v323_v57 = vmax.f32 %v321_v55, %v322_v56 }
 0x11c   :  { %328 = vst [vmem:[%s546_s2] sm:$0x1] %v323_v57 }

// kernel: puzzle_sim_forward.28
= control target key start
LH: loop header
LB: loop body
LE: loop exit
PB: predicated region body
PF: predicated region fallthrough
CT: control target
= control target key end

     0   :  { %10 = vsyncpa [#allocation3], 0  ;;  %s4006_s0 = inlined_call_operand.vmem [shape: bf16[27,1152], index: 0, kind: input, shape index: {}]   ;;  %s4007_s1 = inlined_call_operand.vmem [shape: bf16[1152,384], index: 1, kind: input, shape index: {}]   ;;  %s4008_s2 = inlined_call_operand.vmem [shape: f32[1,384], index: 2, kind: input, shape index: {}]   ;;  %s4009_s3 = inlined_call_operand.hbm [shape: bf16[27,384], index: 3, kind: output, shape index: {0}]   ;;  %s4010_s4 = inlined_call_operand.vmem [shape: bf16[27,384], index: 4, kind: output, shape index: {1}]  }
   0x1   :  { %12 = vsyncpa [#allocation3 + $0x1], 0  ;;  %s3160_s15 = smov 0   ;;  %s3162_s16 = smov 0  }
   0x2   :  { %s3164_s17 = smov 0   ;;  %s3166_s18 = smov 0  }
   0x3 LB: > { %s3181_s19 = sadd.s32 4294967295, %s3127_s18   ;;  %s2343_s20 = sadd.s32 4294967294, %s3127_s18   ;;  %s3127_s18 = sphi %s3166_s18, %s4016_s18   ;;  %s3123_s17 = sphi %s3164_s17, %s4015_s17   ;;  %s3119_s16 = sphi %s3162_s16, %s4014_s16   ;;  %s3115_s15 = sphi %s3160_s15, %s4013_s15  }
   0x4   : > { %s3185_s21 = sadd.s32 1, %s3127_s18   ;;  %s93_s22 = sadd.s32 1, %s3123_s17 }
   0x5   : > { %s90_s23 = ssub.s32 %s3127_s18, %s3185_s21  ;;  %p103_p0 = scmp.ne.s32.totalorder %s3123_s17, %s3119_s16 }
   0x6   : > { %p91_p1 = scmp.eq.s32.totalorder %s90_s23, 0  ;;  %p104_p2 = scmp.eq.s32.totalorder %s3181_s19, 1 }
   0x7   : > { %p109_p3 = scmp.ne.s32.totalorder %s3119_s16, %s3115_s15  ;;  %p110_p4 = scmp.eq.s32.totalorder %s2343_s20, 1 }
   0x8   : > { %s3196_s24 = scalar_select %p91_p1, %s3123_s17, %s93_s22  }
   0x9   : > { %p3198_p5 = por %p104_p2, %p103_p0  ;;  %p3202_p6 = por %p110_p4, %p109_p3 }
   0xa   : > { %p2346_p7 = scmp.ge.s32.totalorder %s3127_s18, 1  ;;  %p170_p8 = scmp.lt.s32.totalorder %s3127_s18, 3 }
   0xc   : > { %p171_p9 = pnand %p2346_p7, %p170_p8 }
   0xd   : > { %s2347_s10 = sshll.u32 (!%p171_p9), %s3181_s19, 1  ;;  %s192_s30 = sand.u32 (!%p171_p9), 1, %s3119_s16  }
   0xe   : > { %174 = sbr.rel (%p171_p9) target bundleno = 614 (0x266), region = 32  ;;  %p204_p10 = scmp.lt.s32.totalorder (!%p171_p9), %s2347_s10, 3 }
   0xf   : > { %s2717_s6 = smul.u32 (!%p171_p9), 384, %s3181_s19  ;;  %s3132_s19 = smov (!%p171_p9), [#allocation2]  }
  0x10   : > { %s3071_s14 = sshll.u32 (!%p171_p9), %s3132_s19, 4  ;;  %s3072_s14 = int_to_ptr.vmem [resolvable:$false] %s3071_s14 }
  0x11   : > { %s3952_s11 = scalar_lea.hbm (!%p171_p9), %s4009_s3, %s2717_s6  ;;  %s3073_s20 = scalar_lea.vmem (!%p171_p9), %s3072_s14, 768 }
  0x13   : > { %v2762_v0 = vld [vmem:[%s4007_s1 + $0xac] ss:$12 sps:$4 sm:$0xff]   ;;  %v2766_v2 = vld [vmem:[%s4007_s1 + $0xa8] ss:$12 sps:$4 sm:$0xff]   ;;  %v2772_v6 = vld [vmem:[%s4007_s1 + $0x90] ss:$12 sps:$4 sm:$0xff]  }
  0x14   : > { %v2764_v1 = vld [vmem:[%s4007_s1 + $0x22c] ss:$12 sps:$4 sm:$0xff]   ;;  %1732 = vmatprep.subr.bf16.mxu0 %v2762_v0  ;;  %v2767_v3 = vld [vmem:[%s4007_s1 + $0x228] ss:$12 sps:$4 sm:$0xff]   ;;  %v2773_v7 = vld [vmem:[%s4007_s1 + $0x210] ss:$12 sps:$4 sm:$0xff]  }
  0x15   : > { %1775 = vmatprep.subr.bf16.mxu1 %v2764_v1  ;;  %v2768_v4 = vld [vmem:[%s4007_s1 + $0x94] ss:$12 sps:$4 sm:$0xff]   ;;  %1733 = vmatpush1.bf16.msra.mxu0 %v2766_v2  ;;  %v2774_v8 = vld [vmem:[%s4007_s1 + $0x7c] ss:$12 sps:$4 sm:$0xff]   ;;  %v2778_v10 = vld [vmem:[%s4007_s1 + $0x78] ss:$12 sps:$4 sm:$0xff]  }
  0x16   : > { %1776 = vmatpush1.bf16.msra.mxu1 %v2767_v3  ;;  %v2770_v5 = vld [vmem:[%s4007_s1 + $0x214] ss:$12 sps:$4 sm:$0xff]   ;;  %1734 = vmatprep.subr.bf16.mxu0 %v2768_v4  ;;  %v2776_v9 = vld [vmem:[%s4007_s1 + $0x1fc] ss:$12 sps:$4 sm:$0xff]   ;;  %v2779_v11 = vld [vmem:[%s4007_s1 + $0x1f8] ss:$12 sps:$4 sm:$0xff]  }
  0x17   : > { %1777 = vmatprep.subr.bf16.mxu1 %v2770_v5  ;;  %v2780_v12 = vld [vmem:[%s4007_s1 + $0x64] ss:$12 sps:$4 sm:$0xff]   ;;  %v2784_v14 = vld [vmem:[%s4007_s1 + $0x60] ss:$12 sps:$4 sm:$0xff]   ;;  %v2790_v18 = vld [vmem:[%s4007_s1 + $0x48] ss:$12 sps:$4 sm:$0xff]  }
  0x18   : > { %v2782_v13 = vld [vmem:[%s4007_s1 + $0x1e4] ss:$12 sps:$4 sm:$0xff]   ;;  %v2785_v15 = vld [vmem:[%s4007_s1 + $0x1e0] ss:$12 sps:$4 sm:$0xff]   ;;  %v2791_v19 = vld [vmem:[%s4007_s1 + $0x1c8] ss:$12 sps:$4 sm:$0xff]  }
  0x19   : > { %1735 = vmatpush1.bf16.msra.mxu0 %v2772_v6  ;;  %v2786_v16 = vld [vmem:[%s4007_s1 + $0x4c] ss:$12 sps:$4 sm:$0xff]   ;;  %v2792_v20 = vld [vmem:[%s4007_s1 + $0x34] ss:$12 sps:$4 sm:$0xff]   ;;  %v2796_v22 = vld [vmem:[%s4007_s1 + $0x30] ss:$12 sps:$4 sm:$0xff]  }
  0x1a   : > { %1778 = vmatpush1.bf16.msra.mxu1 %v2773_v7  ;;  %1736 = vmatprep.subr.bf16.mxu0 %v2774_v8  ;;  %v2788_v17 = vld [vmem:[%s4007_s1 + $0x1cc] ss:$12 sps:$4 sm:$0xff]   ;;  %v2794_v21 = vld [vmem:[%s4007_s1 + $0x1b4] ss:$12 sps:$4 sm:$0xff]   ;;  %v2797_v23 = vld [vmem:[%s4007_s1 + $0x1b0] ss:$12 sps:$4 sm:$0xff]  }
  0x1b   : > { %1779 = vmatprep.subr.bf16.mxu1 %v2776_v9  ;;  %v2798_v24 = vld [vmem:[%s4007_s1 + $0x1c] ss:$12 sps:$4 sm:$0xff]   ;;  %v2802_v26 = vld [vmem:[%s4007_s1 + $0x18] ss:$12 sps:$4 sm:$0xff]   ;;  %v2808_v30 = vld [vmem:[%s4007_s1] ss:$12 sps:$4 sm:$0xff]  }
  0x1c   : > { %v2800_v25 = vld [vmem:[%s4007_s1 + $0x19c] ss:$12 sps:$4 sm:$0xff]   ;;  %v2803_v27 = vld [vmem:[%s4007_s1 + $0x198] ss:$12 sps:$4 sm:$0xff]   ;;  %v2809_v31 = vld [vmem:[%s4007_s1 + $0x180] ss:$12 sps:$4 sm:$0xff]  }
  0x1d   : > { %1737 = vmatpush1.bf16.msra.mxu0 %v2778_v10  ;;  %v2804_v28 = vld [vmem:[%s4007_s1 + $0x4] ss:$12 sps:$4 sm:$0xff]   ;;  %v2810_v32 = vld [vmem:[%s4007_s1 + $0x16c] ss:$12 sps:$4 sm:$0xff]   ;;  %v2814_v34 = vld [vmem:[%s4007_s1 + $0x168] ss:$12 sps:$4 sm:$0xff]  }
  0x1e   : > { %1780 = vmatpush1.bf16.msra.mxu1 %v2779_v11  ;;  %1738 = vmatprep.subr.bf16.mxu0 %v2780_v12  ;;  %v2806_v29 = vld [vmem:[%s4007_s1 + $0x184] ss:$12 sps:$4 sm:$0xff]   ;;  %v2812_v33 = vld [vmem:[%s4007_s1 + $0x2ec] ss:$12 sps:$4 sm:$0xff]   ;;  %v2815_v35 = vld [vmem:[%s4007_s1 + $0x2e8] ss:$12 sps:$4 sm:$0xff]  }
  0x1f   : > { %1781 = vmatprep.subr.bf16.mxu1 %v2782_v13  ;;  %v2816_v36 = vld [vmem:[%s4007_s1 + $0x154] ss:$12 sps:$4 sm:$0xff]   ;;  %s4018_s10 = smov (!%p204_p10, %s2347_s10), 3  ;;  %v2820_v38 = vld [vmem:[%s4007_s1 + $0x150] ss:$12 sps:$4 sm:$0xff]   ;;  %vm3131_vm0 = vmmov 0  }
  0x20   : > { %v2818_v37 = vld [vmem:[%s4007_s1 + $0x2d4] ss:$12 sps:$4 sm:$0xff]   ;;  %v2821_v39 = vld [vmem:[%s4007_s1 + $0x2d0] ss:$12 sps:$4 sm:$0xff]   ;;  %s2715_s23 = smul.u32 36, %s4018_s10 }
  0x21   : > { %1739 = vmatpush1.bf16.msra.mxu0 %v2784_v14  ;;  %v2822_v40 = vld [vmem:[%s4007_s1 + $0x13c] ss:$12 sps:$4 sm:$0xff]   ;;  %v2826_v42 = vld [vmem:[%s4007_s1 + $0x138] ss:$12 sps:$4 sm:$0xff]   ;;  %v2832_v46 = vld [vmem:[%s4007_s1 + $0x120] ss:$12 sps:$4 sm:$0xff]  }
  0x22   : > { %1782 = vmatpush1.bf16.msra.mxu1 %v2785_v15  ;;  %1740 = vmatprep.subr.bf16.mxu0 %v2786_v16  ;;  %v2824_v41 = vld [vmem:[%s4007_s1 + $0x2bc] ss:$12 sps:$4 sm:$0xff]   ;;  %v2827_v43 = vld [vmem:[%s4007_s1 + $0x2b8] ss:$12 sps:$4 sm:$0xff]   ;;  %s3350_s12 = scalar_lea.vmem %s4006_s0, %s2715_s23  ;;  %v2833_v47 = vld [vmem:[%s4007_s1 + $0x2a0] ss:$12 sps:$4 sm:$0xff]  }
  0x23   : > { %1783 = vmatprep.subr.bf16.mxu1 %v2788_v17  ;;  %v2828_v44 = vld [vmem:[%s4007_s1 + $0x124] ss:$12 sps:$4 sm:$0xff]   ;;  %v2834_v48 = vld [vmem:[%s4007_s1 + $0x10c] ss:$12 sps:$4 sm:$0xff]   ;;  %v2838_v52 = vld [vmem:[%s4007_s1 + $0x108] ss:$12 sps:$4 sm:$0xff]  }
  0x24   : > { %v2830_v45 = vld [vmem:[%s4007_s1 + $0x2a4] ss:$12 sps:$4 sm:$0xff]   ;;  %v2836_v50 = vld [vmem:[%s4007_s1 + $0x28c] ss:$12 sps:$4 sm:$0xff]   ;;  %v2839_v53 = vld [vmem:[%s4007_s1 + $0x288] ss:$12 sps:$4 sm:$0xff]  }
  0x25   : > { %1741 = vmatpush1.bf16.msra.mxu0 %v2790_v18  ;;  %v3365_v49 = vld [vmem:[%s3350_s12 + $0x4] ss:$36 sps:$4 sm:$0xff]   ;;  %v3371_v51 = vld [vmem:[%s3350_s12 + $0xc] ss:$36 sps:$4 sm:$0xff]   ;;  %v2840_v54 = vld [vmem:[%s4007_s1 + $0xf4] ss:$12 sps:$4 sm:$0xff]  }
  0x26   : > { %1784 = vmatpush1.bf16.msra.mxu1 %v2791_v19  ;;  %1742 = vmatprep.subr.bf16.mxu0 %v2792_v20  ;;  %v2842_v55 = vld [vmem:[%s4007_s1 + $0x274] ss:$12 sps:$4 sm:$0xff]   ;;  %v2844_v56 = vld [vmem:[%s4007_s1 + $0xf0] ss:$12 sps:$4 sm:$0xff]   ;;  %v2850_v60 = vld [vmem:[%s4007_s1 + $0xd8] ss:$12 sps:$4 sm:$0xff]  }
  0x27   : > { %1785 = vmatprep.subr.bf16.mxu1 %v2794_v21  ;;  %1764 = vmatprep.mubr.bf16.mxu0 %v3365_v49  ;;  %v2845_v57 = vld [vmem:[%s4007_s1 + $0x270] ss:$12 sps:$4 sm:$0xff]   ;;  %v2851_v61 = vld [vmem:[%s4007_s1 + $0x258] ss:$12 sps:$4 sm:$0xff]   ;;  %v2856_v0 = vld [vmem:[%s4007_s1 + $0xc0] ss:$12 sps:$4 sm:$0xff]  }
  0x28   : > { %1807 = vmatprep.mubr.bf16.mxu1 %v3371_v51  ;;  %v2846_v58 = vld [vmem:[%s4007_s1 + $0xdc] ss:$12 sps:$4 sm:$0xff]   ;;  %v2852_v62 = vld [vmem:[%s4007_s1 + $0xc4] ss:$12 sps:$4 sm:$0xff]   ;;  %v2857_v1 = vld [vmem:[%s4007_s1 + $0x240] ss:$12 sps:$4 sm:$0xff]  }
  0x29   : > { %1743 = vmatpush1.bf16.msra.mxu0 %v2796_v22  ;;  %v2848_v59 = vld [vmem:[%s4007_s1 + $0x25c] ss:$12 sps:$4 sm:$0xff]   ;;  %v2854_v63 = vld [vmem:[%s4007_s1 + $0x244] ss:$12 sps:$4 sm:$0xff]   ;;  %v2866_v2 = vld [vmem:[%s4007_s1 + $0x3ac] ss:$12 sps:$4 sm:$0xff]  }
  0x2a   : > { %1786 = vmatpush1.bf16.msra.mxu1 %v2797_v23  ;;  %1744 = vmatprep.subr.bf16.mxu0 %v2798_v24  ;;  %v2869_v3 = vld [vmem:[%s4007_s1 + $0x52c] ss:$12 sps:$4 sm:$0xff]   ;;  %v3424_v4 = vld [vmem:[%s3350_s12] ss:$36 sps:$4 sm:$0xff]   ;;  %v2864_v6 = vld [vmem:[%s4007_s1 + $0x3a8] ss:$12 sps:$4 sm:$0xff]  }
  0x2b   : > { %1787 = vmatprep.subr.bf16.mxu1 %v2800_v25  ;;  %v3427_v5 = vld [vmem:[%s3350_s12 + $0x8] ss:$36 sps:$4 sm:$0xff]   ;;  %v2872_v8 = vld [vmem:[%s4007_s1 + $0x394] ss:$12 sps:$4 sm:$0xff]   ;;  %v2870_v10 = vld [vmem:[%s4007_s1 + $0x390] ss:$12 sps:$4 sm:$0xff]  }
  0x2c   : > { %v2867_v7 = vld [vmem:[%s4007_s1 + $0x528] ss:$12 sps:$4 sm:$0xff]   ;;  %v2873_v11 = vld [vmem:[%s4007_s1 + $0x510] ss:$12 sps:$4 sm:$0xff]   ;;  %v2876_v14 = vld [vmem:[%s4007_s1 + $0x378] ss:$12 sps:$4 sm:$0xff]  }
  0x2d   : > { %1745 = vmatpush1.bf16.msra.mxu0 %v2802_v26  ;;  %v2875_v9 = vld [vmem:[%s4007_s1 + $0x514] ss:$12 sps:$4 sm:$0xff]   ;;  %v2878_v12 = vld [vmem:[%s4007_s1 + $0x37c] ss:$12 sps:$4 sm:$0xff]   ;;  %v2879_v15 = vld [vmem:[%s4007_s1 + $0x4f8] ss:$12 sps:$4 sm:$0xff]  }
  0x2e   : > { %1788 = vmatpush1.bf16.msra.mxu1 %v2803_v27  ;;  %1746 = vmatprep.subr.bf16.mxu0 %v2804_v28  ;;  %v2881_v13 = vld [vmem:[%s4007_s1 + $0x4fc] ss:$12 sps:$4 sm:$0xff]   ;;  %v2884_v16 = vld [vmem:[%s4007_s1 + $0x364] ss:$12 sps:$4 sm:$0xff]   ;;  %v2882_v18 = vld [vmem:[%s4007_s1 + $0x360] ss:$12 sps:$4 sm:$0xff]  }
  0x2f   : > { %1789 = vmatprep.subr.bf16.mxu1 %v2806_v29  ;;  %v2887_v17 = vld [vmem:[%s4007_s1 + $0x4e4] ss:$12 sps:$4 sm:$0xff]   ;;  %v2885_v19 = vld [vmem:[%s4007_s1 + $0x4e0] ss:$12 sps:$4 sm:$0xff]   ;;  %v2888_v22 = vld [vmem:[%s4007_s1 + $0x348] ss:$12 sps:$4 sm:$0xff]  }
  0x30   : > { %v2890_v20 = vld [vmem:[%s4007_s1 + $0x34c] ss:$12 sps:$4 sm:$0xff]   ;;  %v2891_v23 = vld [vmem:[%s4007_s1 + $0x4c8] ss:$12 sps:$4 sm:$0xff]   ;;  %v2894_v26 = vld [vmem:[%s4007_s1 + $0x330] ss:$12 sps:$4 sm:$0xff]  }
  0x31   : > { %1747 = vmatpush1.bf16.msra.mxu0 %v2808_v30  ;;  %v2893_v21 = vld [vmem:[%s4007_s1 + $0x4cc] ss:$12 sps:$4 sm:$0xff]   ;;  %v2896_v24 = vld [vmem:[%s4007_s1 + $0x334] ss:$12 sps:$4 sm:$0xff]   ;;  %v2897_v27 = vld [vmem:[%s4007_s1 + $0x4b0] ss:$12 sps:$4 sm:$0xff]  }
  0x32   : > { %1790 = vmatpush1.bf16.msra.mxu1 %v2809_v31  ;;  %1748 = vmatprep.subr.bf16.mxu0 %v2810_v32  ;;  %v2899_v25 = vld [vmem:[%s4007_s1 + $0x4b4] ss:$12 sps:$4 sm:$0xff]   ;;  %v2902_v28 = vld [vmem:[%s4007_s1 + $0x31c] ss:$12 sps:$4 sm:$0xff]   ;;  %v2900_v30 = vld [vmem:[%s4007_s1 + $0x318] ss:$12 sps:$4 sm:$0xff]  }
  0x33   : > { %1791 = vmatprep.subr.bf16.mxu1 %v2812_v33  ;;  %v2905_v29 = vld [vmem:[%s4007_s1 + $0x49c] ss:$12 sps:$4 sm:$0xff]   ;;  %v2903_v31 = vld [vmem:[%s4007_s1 + $0x498] ss:$12 sps:$4 sm:$0xff]   ;;  %s2714_s23 = smul.u32 24, %s192_s30 }
  0x34   : > { %v2908_v32 = vld [vmem:[%s4007_s1 + $0x304] ss:$12 sps:$4 sm:$0xff]  }
  0x35   : > { %1749 = vmatpush2.bf16.msra.mxu0 %v2814_v34  ;;  %v2911_v33 = vld [vmem:[%s4007_s1 + $0x484] ss:$12 sps:$4 sm:$0xff]   ;;  %v3516_v34 = vld [vmem:[%s3350_s12 + $0x14] ss:$36 sps:$4 sm:$0xff]   ;;  %s3926_s5 = scalar_lea.vmem [#allocation2], %s2714_s23 }
  0x36   : > { %1792 = vmatpush2.bf16.msra.mxu1 %v2815_v35  ;;  %1750 = vmatprep.subr.bf16.mxu0 %v2816_v36  ;;  %v3519_v35 = vld [vmem:[%s3350_s12 + $0x1c] ss:$36 sps:$4 sm:$0xff]   ;;  %s2251_s7 = sshll.u32 %s3926_s5, 4  ;;  %s3954_s7 = int_to_ptr.vmem [resolvable:$true] %s2251_s7 }
  0x37   : > { %1793 = vmatprep.subr.bf16.mxu1 %v2818_v37  ;;  %v2906_v36 = vld [vmem:[%s4007_s1 + $0x300] ss:$12 sps:$4 sm:$0xff]   ;;  %s3067_s13 = scalar_lea.vmem %s3954_s7, 384  ;;  %p3074_p0 = scmp.lt.s32.totalorder %s3954_s7, %s3072_s14 }
  0x38   : > { %v2909_v37 = vld [vmem:[%s4007_s1 + $0x480] ss:$12 sps:$4 sm:$0xff]   ;;  %p3068_p11 = scmp.ne.s32.totalorder %s3954_s7, %s3067_s13  ;;  %p3075_p1 = scmp.lt.s32.totalorder %s3073_s20, %s3067_s13 }
  0x39   : > { %1751 = vmatpush2.bf16.msra.mxu0 %v2820_v38  ;;  %v2914_v38 = vld [vmem:[%s4007_s1 + $0x46c] ss:$12 sps:$4 sm:$0xff]  }
  0x3a   : > { %1794 = vmatpush2.bf16.msra.mxu1 %v2821_v39  ;;  %1752 = vmatprep.subr.bf16.mxu0 %v2822_v40  ;;  %v2917_v39 = vld [vmem:[%s4007_s1 + $0x5ec] ss:$12 sps:$4 sm:$0xff]   ;;  %v2912_v40 = vld [vmem:[%s4007_s1 + $0x468] ss:$12 sps:$4 sm:$0xff]   ;;  %p3069_p12 = pnand %p3068_p11, %p3198_p5  ;;  %p3076_p2 = por %p3075_p1, %p3074_p0 }
  0x3b   : > { %1795 = vmatprep.subr.bf16.mxu1 %v2824_v41  ;;  %v2915_v41 = vld [vmem:[%s4007_s1 + $0x5e8] ss:$12 sps:$4 sm:$0xff]  }
  0x3c   : > { %p3070_p13 = pneg %p3069_p12 }
  0x3d   : > { %1753 = vmatpush2.bf16.msra.mxu0 %v2826_v42  ;;  %v2920_v42 = vld [vmem:[%s4007_s1 + $0x454] ss:$12 sps:$4 sm:$0xff]  }
  0x3e   : > { %1796 = vmatpush2.bf16.msra.mxu1 %v2827_v43  ;;  %1754 = vmatprep.subr.bf16.mxu0 %v2828_v44  ;;  %v2923_v43 = vld [vmem:[%s4007_s1 + $0x5d4] ss:$12 sps:$4 sm:$0xff]   ;;  %v2918_v44 = vld [vmem:[%s4007_s1 + $0x450] ss:$12 sps:$4 sm:$0xff]   ;;  %p3077_p3 = pnand %p3076_p2, %p3070_p13 }
  0x3f   : > { %1797 = vmatprep.subr.bf16.mxu1 %v2830_v45  ;;  %v2921_v45 = vld [vmem:[%s4007_s1 + $0x5d0] ss:$12 sps:$4 sm:$0xff]  }
  0x41   : > { %1755 = vmatpush2.bf16.msra.mxu0 %v2832_v46  ;;  %v2926_v46 = vld [vmem:[%s4007_s1 + $0x43c] ss:$12 sps:$4 sm:$0xff]  }
  0x42   : > { %1798 = vmatpush2.bf16.msra.mxu1 %v2833_v47  ;;  %1756 = vmatprep.subr.bf16.mxu0 %v2834_v48  ;;  %v2929_v47 = vld [vmem:[%s4007_s1 + $0x5bc] ss:$12 sps:$4 sm:$0xff]   ;;  %v2924_v48 = vld [vmem:[%s4007_s1 + $0x438] ss:$12 sps:$4 sm:$0xff]  }
  0x43   : > { %1799 = vmatprep.subr.bf16.mxu1 %v2836_v50  ;;  %v2927_v50 = vld [vmem:[%s4007_s1 + $0x5b8] ss:$12 sps:$4 sm:$0xff]  }
  0x45   : > { %1757 = vmatpush2.bf16.msra.mxu0 %v2838_v52  ;;  %v2932_v52 = vld [vmem:[%s4007_s1 + $0x424] ss:$12 sps:$4 sm:$0xff]  }
  0x46   : > { %1800 = vmatpush2.bf16.msra.mxu1 %v2839_v53  ;;  %1758 = vmatprep.subr.bf16.mxu0 %v2840_v54  ;;  %v2935_v53 = vld [vmem:[%s4007_s1 + $0x5a4] ss:$12 sps:$4 sm:$0xff]   ;;  %v2930_v54 = vld [vmem:[%s4007_s1 + $0x420] ss:$12 sps:$4 sm:$0xff]  }
  0x47   : > { %1801 = vmatprep.subr.bf16.mxu1 %v2842_v55  ;;  %v2933_v55 = vld [vmem:[%s4007_s1 + $0x5a0] ss:$12 sps:$4 sm:$0xff]  }
  0x49   : > { %1759 = vmatpush2.bf16.msra.mxu0 %v2844_v56  ;;  %v2938_v56 = vld [vmem:[%s4007_s1 + $0x40c] ss:$12 sps:$4 sm:$0xff]  }
  0x4a   : > { %1802 = vmatpush2.bf16.msra.mxu1 %v2845_v57  ;;  %1760 = vmatprep.subr.bf16.mxu0 %v2846_v58  ;;  %v2941_v57 = vld [vmem:[%s4007_s1 + $0x58c] ss:$12 sps:$4 sm:$0xff]   ;;  %v2936_v58 = vld [vmem:[%s4007_s1 + $0x408] ss:$12 sps:$4 sm:$0xff]  }
  0x4b   : > { %1803 = vmatprep.subr.bf16.mxu1 %v2848_v59  ;;  %v2939_v59 = vld [vmem:[%s4007_s1 + $0x588] ss:$12 sps:$4 sm:$0xff]  }
  0x4d   : > { %1761 = vmatpush2.bf16.msra.mxu0 %v2850_v60  ;;  %v2944_v60 = vld [vmem:[%s4007_s1 + $0x3f4] ss:$12 sps:$4 sm:$0xff]  }
  0x4e   : > { %1804 = vmatpush2.bf16.msra.mxu1 %v2851_v61  ;;  %1762 = vmatprep.subr.bf16.mxu0 %v2852_v62  ;;  %v2947_v61 = vld [vmem:[%s4007_s1 + $0x574] ss:$12 sps:$4 sm:$0xff]   ;;  %v2942_v62 = vld [vmem:[%s4007_s1 + $0x3f0] ss:$12 sps:$4 sm:$0xff]  }
  0x4f   : > { %1805 = vmatprep.subr.bf16.mxu1 %v2854_v63  ;;  %v2945_v63 = vld [vmem:[%s4007_s1 + $0x570] ss:$12 sps:$4 sm:$0xff]  }
  0x51   : > { %1763 = vmatpush2.bf16.msra.mxu0 %v2856_v0  ;;  %v2950_v0 = vld [vmem:[%s4007_s1 + $0x3dc] ss:$12 sps:$4 sm:$0xff]  }
  0x52   : > { %1806 = vmatpush2.bf16.msra.mxu1 %v2857_v1  ;;  %1818 = vmatprep.subr.bf16.mxu0 %v2866_v2  ;;  %v2953_v1 = vld [vmem:[%s4007_s1 + $0x55c] ss:$12 sps:$4 sm:$0xff]   ;;  %v2948_v2 = vld [vmem:[%s4007_s1 + $0x3d8] ss:$12 sps:$4 sm:$0xff]  }
  0x53   : > { %1861 = vmatprep.subr.bf16.mxu1 %v2869_v3  ;;  %v2951_v3 = vld [vmem:[%s4007_s1 + $0x558] ss:$12 sps:$4 sm:$0xff]  }
  0x54   : > { %1765 = vmatmul.mubr.bf16.vlgmr.msra.gmra.mxu0 %v3424_v4 }
  0x55   : > { %1808 = vmatmul.mubr.bf16.vlgmr.msra.gmra.mxu1 %v3427_v5  ;;  %1819 = vmatpush1.bf16.msra.mxu0 %v2864_v6  ;;  %v2956_v6 = vld [vmem:[%s4007_s1 + $0x3c4] ss:$12 sps:$4 sm:$0xff]  }
  0x56   : > { %1862 = vmatpush1.bf16.msra.mxu1 %v2867_v7  ;;  %1820 = vmatprep.subr.bf16.mxu0 %v2872_v8  ;;  %v2959_v7 = vld [vmem:[%s4007_s1 + $0x544] ss:$12 sps:$4 sm:$0xff]   ;;  %v2954_v8 = vld [vmem:[%s4007_s1 + $0x3c0] ss:$12 sps:$4 sm:$0xff]  }
  0x57   : > { %1863 = vmatprep.subr.bf16.mxu1 %v2875_v9  ;;  %1850 = vmatprep.mubr.bf16.mxu0 %v3516_v34  ;;  %v2957_v9 = vld [vmem:[%s4007_s1 + $0x540] ss:$12 sps:$4 sm:$0xff]  }
  0x58   : > { %1893 = vmatprep.mubr.bf16.mxu1 %v3519_v35 }
  0x59   : > { %1821 = vmatpush1.bf16.msra.mxu0 %v2870_v10  ;;  %v2968_v10 = vld [vmem:[%s4007_s1 + $0x6ac] ss:$12 sps:$4 sm:$0xff]  }
  0x5a   : > { %1864 = vmatpush1.bf16.msra.mxu1 %v2873_v11  ;;  %1822 = vmatprep.subr.bf16.mxu0 %v2878_v12  ;;  %v3629_v11 = vld [vmem:[%s3350_s12 + $0x10] ss:$36 sps:$4 sm:$0xff]   ;;  %v3632_v12 = vld [vmem:[%s3350_s12 + $0x18] ss:$36 sps:$4 sm:$0xff]  }
  0x5b   : > { %1865 = vmatprep.subr.bf16.mxu1 %v2881_v13  ;;  %v2969_v13 = vld [vmem:[%s4007_s1 + $0x170] ss:$12 sps:$4 sm:$0xff]  }
  0x5d   : > { %1823 = vmatpush1.bf16.msra.mxu0 %v2876_v14  ;;  %v2966_v14 = vld [vmem:[%s4007_s1 + $0x6a8] ss:$12 sps:$4 sm:$0xff]  }
  0x5e   : > { %1866 = vmatpush1.bf16.msra.mxu1 %v2879_v15  ;;  %1824 = vmatprep.subr.bf16.mxu0 %v2884_v16  ;;  %v2970_v15 = vld [vmem:[%s4007_s1 + $0xb0] ss:$12 sps:$4 sm:$0xff]   ;;  %v2973_v16 = vld [vmem:[%s4007_s1 + $0x694] ss:$12 sps:$4 sm:$0xff]  }
  0x5f   : > { %1867 = vmatprep.subr.bf16.mxu1 %v2887_v17  ;;  %v2974_v17 = vld [vmem:[%s4007_s1 + $0x158] ss:$12 sps:$4 sm:$0xff]  }
  0x61   : > { %1825 = vmatpush1.bf16.msra.mxu0 %v2882_v18  ;;  %v2971_v18 = vld [vmem:[%s4007_s1 + $0x690] ss:$12 sps:$4 sm:$0xff]  }
  0x62   : > { %1868 = vmatpush1.bf16.msra.mxu1 %v2885_v19  ;;  %1826 = vmatprep.subr.bf16.mxu0 %v2890_v20  ;;  %v2975_v19 = vld [vmem:[%s4007_s1 + $0x98] ss:$12 sps:$4 sm:$0xff]   ;;  %v2978_v20 = vld [vmem:[%s4007_s1 + $0x67c] ss:$12 sps:$4 sm:$0xff]  }
  0x63   : > { %1869 = vmatprep.subr.bf16.mxu1 %v2893_v21  ;;  %v2979_v21 = vld [vmem:[%s4007_s1 + $0x140] ss:$12 sps:$4 sm:$0xff]  }
  0x65   : > { %1827 = vmatpush1.bf16.msra.mxu0 %v2888_v22  ;;  %v2976_v22 = vld [vmem:[%s4007_s1 + $0x678] ss:$12 sps:$4 sm:$0xff]  }
  0x66   : > { %1870 = vmatpush1.bf16.msra.mxu1 %v2891_v23  ;;  %1828 = vmatprep.subr.bf16.mxu0 %v2896_v24  ;;  %v3129_v23 = vmov 0   ;;  %v2980_v24 = vld [vmem:[%s4007_s1 + $0x80] ss:$12 sps:$4 sm:$0xff]  }
  0x67   : > { %1871 = vmatprep.subr.bf16.mxu1 %v2899_v25  ;;  %v2983_v25 = vld [vmem:[%s4007_s1 + $0x664] ss:$12 sps:$4 sm:$0xff]  }
  0x69   : > { %1829 = vmatpush1.bf16.msra.mxu0 %v2894_v26  ;;  %v2984_v26 = vld [vmem:[%s4007_s1 + $0x128] ss:$12 sps:$4 sm:$0xff]  }
  0x6a   : > { %1872 = vmatpush1.bf16.msra.mxu1 %v2897_v27  ;;  %1830 = vmatprep.subr.bf16.mxu0 %v2902_v28  ;;  %v2985_v27 = vld [vmem:[%s4007_s1 + $0x68] ss:$12 sps:$4 sm:$0xff]   ;;  %v2988_v28 = vld [vmem:[%s4007_s1 + $0x64c] ss:$12 sps:$4 sm:$0xff]  }
  0x6b   : > { %1873 = vmatprep.subr.bf16.mxu1 %v2905_v29  ;;  %v2989_v29 = vld [vmem:[%s4007_s1 + $0x110] ss:$12 sps:$4 sm:$0xff]  }
  0x6d   : > { %1831 = vmatpush1.bf16.msra.mxu0 %v2900_v30  ;;  %v2986_v30 = vld [vmem:[%s4007_s1 + $0x648] ss:$12 sps:$4 sm:$0xff]  }
  0x6e   : > { %1874 = vmatpush1.bf16.msra.mxu1 %v2903_v31  ;;  %1832 = vmatprep.subr.bf16.mxu0 %v2908_v32  ;;  %v2990_v31 = vld [vmem:[%s4007_s1 + $0x50] ss:$12 sps:$4 sm:$0xff]   ;;  %v2993_v32 = vld [vmem:[%s4007_s1 + $0x634] ss:$12 sps:$4 sm:$0xff]  }
  0x6f   : > { %1875 = vmatprep.subr.bf16.mxu1 %v2911_v33  ;;  %v2994_v33 = vld [vmem:[%s4007_s1 + $0xf8] ss:$12 sps:$4 sm:$0xff]  }
  0x71   : > { %1833 = vmatpush1.bf16.msra.mxu0 %v2906_v36  ;;  %v2991_v36 = vld [vmem:[%s4007_s1 + $0x630] ss:$12 sps:$4 sm:$0xff]  }
  0x72   : > { %1876 = vmatpush1.bf16.msra.mxu1 %v2909_v37  ;;  %1834 = vmatprep.subr.bf16.mxu0 %v2914_v38  ;;  %v2995_v37 = vld [vmem:[%s4007_s1 + $0x38] ss:$12 sps:$4 sm:$0xff]   ;;  %v2998_v38 = vld [vmem:[%s4007_s1 + $0x61c] ss:$12 sps:$4 sm:$0xff]  }
  0x73   : > { %1877 = vmatprep.subr.bf16.mxu1 %v2917_v39  ;;  %v2999_v39 = vld [vmem:[%s4007_s1 + $0xe0] ss:$12 sps:$4 sm:$0xff]  }
  0x75   : > { %1835 = vmatpush2.bf16.msra.mxu0 %v2912_v40  ;;  %v2996_v40 = vld [vmem:[%s4007_s1 + $0x618] ss:$12 sps:$4 sm:$0xff]  }
  0x76   : > { %1878 = vmatpush2.bf16.msra.mxu1 %v2915_v41  ;;  %1836 = vmatprep.subr.bf16.mxu0 %v2920_v42  ;;  %v3000_v41 = vld [vmem:[%s4007_s1 + $0x20] ss:$12 sps:$4 sm:$0xff]   ;;  %v3003_v42 = vld [vmem:[%s4007_s1 + $0x604] ss:$12 sps:$4 sm:$0xff]  }
  0x77   : > { %1879 = vmatprep.subr.bf16.mxu1 %v2923_v43  ;;  %v3004_v43 = vld [vmem:[%s4007_s1 + $0xc8] ss:$12 sps:$4 sm:$0xff]  }
  0x79   : > { %1837 = vmatpush2.bf16.msra.mxu0 %v2918_v44  ;;  %v3001_v44 = vld [vmem:[%s4007_s1 + $0x600] ss:$12 sps:$4 sm:$0xff]  }
  0x7a   : > { %1880 = vmatpush2.bf16.msra.mxu1 %v2921_v45  ;;  %1838 = vmatprep.subr.bf16.mxu0 %v2926_v46  ;;  %v3005_v45 = vld [vmem:[%s4007_s1 + $0x8] ss:$12 sps:$4 sm:$0xff]   ;;  %v3007_v46 = vld [vmem:[%s4007_s1 + $0x2f0] ss:$12 sps:$4 sm:$0xff]  }
  0x7b   : > { %1881 = vmatprep.subr.bf16.mxu1 %v2929_v47  ;;  %v3734_v47 = vld [vmem:[%s3350_s12 + $0x20] ss:$36 sps:$4 sm:$0xff]   ;;  %s3958_s12 = scalar_lea.sflag [#allocation3], %s192_s30 }
  0x7d   : > { %1839 = vmatpush2.bf16.msra.mxu0 %v2924_v48  ;;  %v3008_v48 = vld [vmem:[%s4007_s1 + $0x470] ss:$12 sps:$4 sm:$0xff]  }
  0x7e   : > { %1882 = vmatpush2.bf16.msra.mxu1 %v2927_v50  ;;  %1840 = vmatprep.subr.bf16.mxu0 %v2932_v52  ;;  %v3009_v50 = vld [vmem:[%s4007_s1 + $0x230] ss:$12 sps:$4 sm:$0xff]  }
  0x7f   : > { %1883 = vmatprep.subr.bf16.mxu1 %v2935_v53  ;;  %v3010_v52 = vld [vmem:[%s4007_s1 + $0x3b0] ss:$12 sps:$4 sm:$0xff]   ;;  %v3011_v53 = vld [vmem:[%s4007_s1 + $0x2d8] ss:$12 sps:$4 sm:$0xff]  }
  0x81   : > { %1841 = vmatpush2.bf16.msra.mxu0 %v2930_v54  ;;  %v3012_v54 = vld [vmem:[%s4007_s1 + $0x458] ss:$12 sps:$4 sm:$0xff]  }
  0x82   : > { %1884 = vmatpush2.bf16.msra.mxu1 %v2933_v55  ;;  %1842 = vmatprep.subr.bf16.mxu0 %v2938_v56  ;;  %v3013_v55 = vld [vmem:[%s4007_s1 + $0x218] ss:$12 sps:$4 sm:$0xff]  }
  0x83   : > { %1885 = vmatprep.subr.bf16.mxu1 %v2941_v57  ;;  %v3014_v56 = vld [vmem:[%s4007_s1 + $0x398] ss:$12 sps:$4 sm:$0xff]   ;;  %v3015_v57 = vld [vmem:[%s4007_s1 + $0x2c0] ss:$12 sps:$4 sm:$0xff]  }
  0x85   : > { %1843 = vmatpush2.bf16.msra.mxu0 %v2936_v58  ;;  %v3016_v58 = vld [vmem:[%s4007_s1 + $0x440] ss:$12 sps:$4 sm:$0xff]  }
  0x86   : > { %1886 = vmatpush2.bf16.msra.mxu1 %v2939_v59  ;;  %1844 = vmatprep.subr.bf16.mxu0 %v2944_v60  ;;  %v3018_v59 = vld [vmem:[%s4007_s1 + $0x380] ss:$12 sps:$4 sm:$0xff]   ;;  %v3019_v60 = vld [vmem:[%s4007_s1 + $0x2a8] ss:$12 sps:$4 sm:$0xff]  }
  0x87   : > { %1887 = vmatprep.subr.bf16.mxu1 %v2947_v61  ;;  %v3020_v61 = vld [vmem:[%s4007_s1 + $0x428] ss:$12 sps:$4 sm:$0xff]  }
  0x89   : > { %1845 = vmatpush2.bf16.msra.mxu0 %v2942_v62  ;;  %v3023_v62 = vld [vmem:[%s4007_s1 + $0x290] ss:$12 sps:$4 sm:$0xff]  }
  0x8a   : > { %1888 = vmatpush2.bf16.msra.mxu1 %v2945_v63  ;;  %1846 = vmatprep.subr.bf16.mxu0 %v2950_v0  ;;  %v3024_v63 = vld [vmem:[%s4007_s1 + $0x410] ss:$12 sps:$4 sm:$0xff]  }
  0x8b   : > { %1889 = vmatprep.subr.bf16.mxu1 %v2953_v1  ;;  %v3025_v0 = vld [vmem:[%s4007_s1 + $0x1d0] ss:$12 sps:$4 sm:$0xff]  }
  0x8c   : > { %v3026_v1 = vld [vmem:[%s4007_s1 + $0x350] ss:$12 sps:$4 sm:$0xff]  }
  0x8d   : > { %1847 = vmatpush2.bf16.msra.mxu0 %v2948_v2  ;;  %v3027_v2 = vld [vmem:[%s4007_s1 + $0x278] ss:$12 sps:$4 sm:$0xff]  }
  0x8e   : > { %1890 = vmatpush2.bf16.msra.mxu1 %v2951_v3  ;;  %1848 = vmatprep.subr.bf16.mxu0 %v2956_v6  ;;  %v3028_v3 = vld [vmem:[%s4007_s1 + $0x3f8] ss:$12 sps:$4 sm:$0xff]  }
  0x8f   : > { %1891 = vmatprep.subr.bf16.mxu1 %v2959_v7  ;;  %v3029_v6 = vld [vmem:[%s4007_s1 + $0x1b8] ss:$12 sps:$4 sm:$0xff]  }
  0x90   : > { %v3030_v7 = vld [vmem:[%s4007_s1 + $0x338] ss:$12 sps:$4 sm:$0xff]  }
  0x91   : > { %1849 = vmatpush2.bf16.msra.mxu0 %v2954_v8  ;;  %v3031_v8 = vld [vmem:[%s4007_s1 + $0x260] ss:$12 sps:$4 sm:$0xff]  }
  0x92   : > { %1892 = vmatpush2.bf16.msra.mxu1 %v2957_v9  ;;  %1904 = vmatprep.subr.bf16.mxu0 %v2968_v10  ;;  %v3032_v9 = vld [vmem:[%s4007_s1 + $0x3e0] ss:$12 sps:$4 sm:$0xff]  }
  0x93   : > { %2597 = vmatprep.subr.bf16.mxu1 %v2969_v13  ;;  %v3033_v10 = vld [vmem:[%s4007_s1 + $0x1a0] ss:$12 sps:$4 sm:$0xff]  }
  0x94   : > { %1851 = vmatmul.mubr.bf16.vlgmr.msra.gmra.mxu0 %v3629_v11  ;;  %v3034_v13 = vld [vmem:[%s4007_s1 + $0x320] ss:$12 sps:$4 sm:$0xff]  }
  0x95   : > { %1894 = vmatmul.mubr.bf16.vlgmr.msra.gmra.mxu1 %v3632_v12  ;;  %1905 = vmatpush1.bf16.msra.mxu0 %v2966_v14  ;;  %v3035_v14 = vld [vmem:[%s4007_s1 + $0x248] ss:$12 sps:$4 sm:$0xff]  }
  0x96   : > { %2598 = vmatpush3.bf16.msra.mxu1 %v2970_v15  ;;  %1906 = vmatprep.subr.bf16.mxu0 %v2973_v16  ;;  %v3036_v15 = vld [vmem:[%s4007_s1 + $0x3c8] ss:$12 sps:$4 sm:$0xff]  }
  0x97   : > { %2599 = vmatprep.subr.bf16.mxu1 %v2974_v17  ;;  %1936 = vmatprep.mubr.bf16.mxu0 %v3129_v23  ;;  %v3037_v16 = vld [vmem:[%s4007_s1 + $0x188] ss:$12 sps:$4 sm:$0xff]   ;;  %v3043_v23 = vld [vmem:[%s4007_s1 + $0x518] ss:$12 sps:$4 sm:$0xff]  }
  0x98   : > { %1979 = vmatprep.mubr.bf16.mxu1 %v3365_v49  ;;  %v2981_v49 = vld [vmem:[%s4007_s1 + $0x660] ss:$12 sps:$4 sm:$0xff]   ;;  %v3038_v17 = vld [vmem:[%s4007_s1 + $0x308] ss:$12 sps:$4 sm:$0xff]  }
  0x99   : > { %1907 = vmatpush1.bf16.msra.mxu0 %v2971_v18  ;;  %v3039_v18 = vld [vmem:[%s4007_s1 + $0x5f0] ss:$12 sps:$4 sm:$0xff]  }
  0x9a   : > { %2600 = vmatpush3.bf16.msra.mxu1 %v2975_v19  ;;  %1908 = vmatprep.subr.bf16.mxu0 %v2978_v20  ;;  %v3040_v19 = vld [vmem:[%s4007_s1 + $0x530] ss:$12 sps:$4 sm:$0xff]  }
  0x9b   : > { %2601 = vmatprep.subr.bf16.mxu1 %v2979_v21  ;;  %v3041_v20 = vld [vmem:[%s4007_s1 + $0x6b0] ss:$12 sps:$4 sm:$0xff]   ;;  %v3130_v21 = vmov 0.0  }
  0x9d   : > { %1909 = vmatpush1.bf16.msra.mxu0 %v2976_v22  ;;  %v3042_v22 = vld [vmem:[%s4007_s1 + $0x5d8] ss:$12 sps:$4 sm:$0xff]  }
  0x9e   : > { %2602 = vmatpush3.bf16.msra.mxu1 %v2980_v24  ;;  %1910 = vmatprep.subr.bf16.mxu0 %v2983_v25  ;;  %v3044_v24 = vld [vmem:[%s4007_s1 + $0x698] ss:$12 sps:$4 sm:$0xff]   ;;  %v3045_v25 = vld [vmem:[%s4007_s1 + $0x5c0] ss:$12 sps:$4 sm:$0xff]  }
  0x9f   : > { %2603 = vmatprep.subr.bf16.mxu1 %v2984_v26  ;;  %v3048_v26 = vld [vmem:[%s4007_s1 + $0x5a8] ss:$12 sps:$4 sm:$0xff]  }
  0xa1   : > { %1911 = vmatpush1.bf16.msra.mxu0 %v2981_v49  ;;  %v3050_v49 = vld [vmem:[%s4007_s1 + $0x668] ss:$12 sps:$4 sm:$0xff]  }
  0xa2   : > { %2604 = vmatpush3.bf16.msra.mxu1 %v2985_v27  ;;  %1912 = vmatprep.subr.bf16.mxu0 %v2988_v28  ;;  %v3051_v27 = vld [vmem:[%s4007_s1 + $0x590] ss:$12 sps:$4 sm:$0xff]  }
  0xa3   : > { %2605 = vmatprep.subr.bf16.mxu1 %v2989_v29  ;;  %v3052_v28 = vld [vmem:[%s4007_s1 + $0x4d0] ss:$12 sps:$4 sm:$0xff]  }
  0xa4   : > { %v3053_v29 = vld [vmem:[%s4007_s1 + $0x650] ss:$12 sps:$4 sm:$0xff]  }
  0xa5   : > { %1913 = vmatpush1.bf16.msra.mxu0 %v2986_v30  ;;  %v3054_v30 = vld [vmem:[%s4007_s1 + $0x578] ss:$12 sps:$4 sm:$0xff]  }
  0xa6   : > { %2606 = vmatpush3.bf16.msra.mxu1 %v2990_v31  ;;  %1914 = vmatprep.subr.bf16.mxu0 %v2993_v32  ;;  %v3055_v31 = vld [vmem:[%s4007_s1 + $0x4b8] ss:$12 sps:$4 sm:$0xff]  }
  0xa7   : > { %2607 = vmatprep.subr.bf16.mxu1 %v2994_v33  ;;  %v3056_v32 = vld [vmem:[%s4007_s1 + $0x638] ss:$12 sps:$4 sm:$0xff]   ;;  %v3057_v33 = vld [vmem:[%s4007_s1 + $0x560] ss:$12 sps:$4 sm:$0xff]  }
  0xa9   : > { %1915 = vmatpush1.bf16.msra.mxu0 %v2991_v36  ;;  %v3058_v36 = vld [vmem:[%s4007_s1 + $0x4a0] ss:$12 sps:$4 sm:$0xff]  }
  0xaa   : > { %2608 = vmatpush3.bf16.msra.mxu1 %v2995_v37  ;;  %1916 = vmatprep.subr.bf16.mxu0 %v2998_v38  ;;  %v3059_v37 = vld [vmem:[%s4007_s1 + $0x620] ss:$12 sps:$4 sm:$0xff]   ;;  %v3060_v38 = vld [vmem:[%s4007_s1 + $0x548] ss:$12 sps:$4 sm:$0xff]  }
  0xab   : > { %2609 = vmatprep.subr.bf16.mxu1 %v2999_v39  ;;  %v3061_v39 = vld [vmem:[%s4007_s1 + $0x488] ss:$12 sps:$4 sm:$0xff]  }
  0xad   : > { %1917 = vmatpush1.bf16.msra.mxu0 %v2996_v40  ;;  %v3062_v40 = vld [vmem:[%s4007_s1 + $0x608] ss:$12 sps:$4 sm:$0xff]  }
  0xae   : > { %2610 = vmatpush3.bf16.msra.mxu1 %v3000_v41  ;;  %1918 = vmatprep.subr.bf16.mxu0 %v3003_v42  ;;  %v519_v42 = vlaneseq }
  0xaf   : > { %2611 = vmatprep.subr.bf16.mxu1 %v3004_v43 }
  0xb1   : > { %1919 = vmatpush1.bf16.msra.mxu0 %v3001_v44 }
  0xb2   : > { %2612 = vmatpush3.bf16.msra.mxu1 %v3005_v45  ;;  %2619 = vmatprep.subr.bf16.mxu0 %v3007_v46  ;;  %v3910_v45 = vshrl.u32 %v519_v42, 7 }
  0xb3   : > { %2641 = vmatprep.subr.bf16.mxu1 %v3008_v48 }
  0xb4   : > { %1937 = vmatmul.mubr.bf16.vlgmr.msra.gmra.mxu0 %v3734_v47 }
  0xb5   : > { %1980 = vmatmul.mubr.bf16.vlgmr.msra.gmra.mxu1 %v3424_v4  ;;  %2620 = vmatpush3.bf16.msra.mxu0 %v3009_v50  ;;  %v3017_v4 = vld [vmem:[%s4007_s1 + $0x200] ss:$12 sps:$4 sm:$0xff]   ;;  %v521_v50 = vsub.s32 0, %v3910_v45 }
  0xb6   : > { %2642 = vmatpush3.bf16.msra.mxu1 %v3010_v52  ;;  %2621 = vmatprep.subr.bf16.mxu0 %v3011_v53  ;;  %v517_v52 = vld [vmem:[%s4008_s2] sm:$0x7]  ;;  %v525_v53 = vsub.s32 1, %v3910_v45 }
  0xb7   : > { %2643 = vmatprep.subr.bf16.mxu1 %v3012_v54  ;;  %2020 = vmatprep.mubr.bf16.mxu0 %v3371_v51  ;;  %v3021_v51 = vld [vmem:[%s4007_s1 + $0x1e8] ss:$12 sps:$4 sm:$0xff]  }
  0xb8   : > { %2061 = vmatprep.mubr.bf16.mxu1 %v3516_v34  ;;  %v3022_v34 = vld [vmem:[%s4007_s1 + $0x368] ss:$12 sps:$4 sm:$0xff]  }
  0xb9   : > { %2622 = vmatpush3.bf16.msra.mxu0 %v3013_v55  ;;  %v522_v55 = vrot.slane %v517_v52, %v521_v50 }
  0xba   : > { %2644 = vmatpush3.bf16.msra.mxu1 %v3014_v56  ;;  %2623 = vmatprep.subr.bf16.mxu0 %v3015_v57  ;;  %v526_v56 = vrot.slane %v517_v52, %v525_v53 }
  0xbb   : > { %2645 = vmatprep.subr.bf16.mxu1 %v3016_v58 }
  0xbd   : > { %2624 = vmatpush3.bf16.msra.mxu0 %v3017_v4 }
  0xbe   : > { %2646 = vmatpush3.bf16.msra.mxu1 %v3018_v59  ;;  %2625 = vmatprep.subr.bf16.mxu0 %v3019_v60 }
  0xbf   : > { %2647 = vmatprep.subr.bf16.mxu1 %v3020_v61 }
  0xc1   : > { %2626 = vmatpush3.bf16.msra.mxu0 %v3021_v51 }
  0xc2   : > { %2648 = vmatpush3.bf16.msra.mxu1 %v3022_v34  ;;  %2627 = vmatprep.subr.bf16.mxu0 %v3023_v62 }
  0xc3   : > { %2649 = vmatprep.subr.bf16.mxu1 %v3024_v63 }
  0xc5   : > { %2628 = vmatpush3.bf16.msra.mxu0 %v3025_v0 }
  0xc6   : > { %2650 = vmatpush3.bf16.msra.mxu1 %v3026_v1  ;;  %2629 = vmatprep.subr.bf16.mxu0 %v3027_v2 }
  0xc7   : > { %2651 = vmatprep.subr.bf16.mxu1 %v3028_v3 }
  0xc9   : > { %2630 = vmatpush3.bf16.msra.mxu0 %v3029_v6 }
  0xca   : > { %2652 = vmatpush3.bf16.msra.mxu1 %v3030_v7  ;;  %2631 = vmatprep.subr.bf16.mxu0 %v3031_v8 }
  0xcb   : > { %2653 = vmatprep.subr.bf16.mxu1 %v3032_v9 }
  0xcd   : > { %2632 = vmatpush3.bf16.msra.mxu0 %v3033_v10 }
  0xce   : > { %2654 = vmatpush3.bf16.msra.mxu1 %v3034_v13  ;;  %2633 = vmatprep.subr.bf16.mxu0 %v3035_v14 }
  0xcf   : > { %2655 = vmatprep.subr.bf16.mxu1 %v3036_v15 }
  0xd1   : > { %2634 = vmatpush3.bf16.msra.mxu0 %v3037_v16 }
  0xd2   : > { %2656 = vmatpush3.bf16.msra.mxu1 %v3038_v17  ;;  %2663 = vmatprep.subr.bf16.mxu0 %v3039_v18 }
  0xd3   : > { %2694 = vmatprep.subr.bf16.mxu1 %v3130_v21 }
  0xd4   : > { %2021 = vmatmul.mubr.bf16.vlgmr.msra.gmra.mxu0 %v3427_v5  ;;  %v3046_v5 = vld [vmem:[%s4007_s1 + $0x500] ss:$12 sps:$4 sm:$0xff]  }
  0xd5   : > { %2062 = vmatmul.mubr.bf16.vlgmr.msra.gmra.mxu1 %v3629_v11  ;;  %2664 = vmatpush3.bf16.msra.mxu0 %v3040_v19  ;;  %v3047_v11 = vld [vmem:[%s4007_s1 + $0x680] ss:$12 sps:$4 sm:$0xff]  }
  0xd6   : > { %2695 = vmatpush3.bf16.msra.mxu1 %v3041_v20  ;;  %2665 = vmatprep.subr.bf16.mxu0 %v3042_v22 }
  0xd7   : > { %2696 = vmatprep.subr.bf16.mxu1 %v3130_v21  ;;  %2102 = vmatprep.mubr.bf16.mxu0 %v3519_v35  ;;  %v3049_v35 = vld [vmem:[%s4007_s1 + $0x4e8] ss:$12 sps:$4 sm:$0xff]  }
  0xd8   : > { %2710 = vmatprep.mubr.msk.bf16.mxu1 %vm3131_vm0, %v3130_v21 }
  0xd9   : > { %2666 = vmatpush3.bf16.msra.mxu0 %v3043_v23 }
  0xda   : > { %2697 = vmatpush3.bf16.msra.mxu1 %v3044_v24  ;;  %2667 = vmatprep.subr.bf16.mxu0 %v3045_v25 }
  0xdb   : > { %2698 = vmatprep.subr.bf16.mxu1 %v3130_v21 }
  0xdd   : > { %2668 = vmatpush3.bf16.msra.mxu0 %v3046_v5 }
  0xde   : > { %2699 = vmatpush3.bf16.msra.mxu1 %v3047_v11  ;;  %2669 = vmatprep.subr.bf16.mxu0 %v3048_v26 }
  0xdf   : > { %2700 = vmatprep.subr.bf16.mxu1 %v3130_v21 }
  0xe1   : > { %2670 = vmatpush3.bf16.msra.mxu0 %v3049_v35 }
  0xe2   : > { %2701 = vmatpush3.bf16.msra.mxu1 %v3050_v49  ;;  %2671 = vmatprep.subr.bf16.mxu0 %v3051_v27 }
  0xe3   : > { %2702 = vmatprep.subr.bf16.mxu1 %v3130_v21 }
  0xe5   : > { %2672 = vmatpush3.bf16.msra.mxu0 %v3052_v28 }
  0xe6   : > { %2703 = vmatpush3.bf16.msra.mxu1 %v3053_v29  ;;  %2673 = vmatprep.subr.bf16.mxu0 %v3054_v30 }
  0xe7   : > { %2704 = vmatprep.subr.bf16.mxu1 %v3130_v21 }
  0xe9   : > { %2674 = vmatpush3.bf16.msra.mxu0 %v3055_v31 }
  0xea   : > { %2705 = vmatpush3.bf16.msra.mxu1 %v3056_v32  ;;  %2675 = vmatprep.subr.bf16.mxu0 %v3057_v33 }
  0xeb   : > { %2706 = vmatprep.subr.bf16.mxu1 %v3130_v21 }
  0xed   : > { %2676 = vmatpush3.bf16.msra.mxu0 %v3058_v36 }
  0xee   : > { %2707 = vmatpush3.bf16.msra.mxu1 %v3059_v37  ;;  %2677 = vmatprep.subr.bf16.mxu0 %v3060_v38  ;;  %v529_v37 = vsub.s32 2, %v3910_v45 }
  0xef   : > { %2708 = vmatprep.subr.bf16.mxu1 %v3130_v21 }
  0xf1   : > { %2678 = vmatpush3.bf16.msra.mxu0 %v3061_v39 }
  0xf2   : > { %2709 = vmatpush3.bf16.msra.mxu1 %v3062_v40  ;;  %v530_v40 = vrot.slane %v517_v52, %v529_v37 }
  0xf4   : > { %2103 = vmatmul.mubr.bf16.vlgmr.msra.gmra.mxu0 %v3632_v12 }
  0xf5   : > { %2711 = vmatmul.mubr.bf16.vlgmr.msra.gmra.mxu1 %v3734_v47 }
 0x114   : > { %v1766_v41 = vpop.f32.mrf.mxu0 }
 0x115   : > { %v1809_v43 = vpop.f32.mrf.mxu1  ;;  %v1767_v58 = vadd.f32 %v1766_v41, %v522_v55 }
 0x116   : > { %v1768_v44 = vpop.f32.mrf.mxu0 }
 0x117   : > { %v1811_v46 = vpop.f32.mrf.mxu1  ;;  %v1769_v60 = vadd.f32 %v1768_v44, %v526_v56  ;;  %v1810_v61 = vadd.f32 %v1809_v43, %v1767_v58 }
 0x118   : > { %v1770_v48 = vpop.f32.mrf.mxu0 }
 0x119   : > { %v1813_v54 = vpop.f32.mrf.mxu1  ;;  %v1771_v51 = vadd.f32 %v1770_v48, %v522_v55  ;;  %v1812_v63 = vadd.f32 %v1811_v46, %v1769_v60 }
 0x11a   : > { %v1772_v12 = vpop.f32.mrf.mxu0 }
 0x11b   : > { %v1815_v57 = vpop.f32.mrf.mxu1  ;;  %v1773_v0 = vadd.f32 %v1772_v12, %v526_v56  ;;  %v1814_v2 = vadd.f32 %v1813_v54, %v1771_v51 }
 0x11d   : > { %v1816_v8 = vadd.f32 %v1815_v57, %v1773_v0 }
 0x154   : > { %v1852_v47 = vpop.f32.mrf.mxu0 }
 0x155   : > { %v1895_v4 = vpop.f32.mrf.mxu1  ;;  %v1853_v1 = vadd.f32 %v1852_v47, %v1810_v61 }
 0x156   : > { %v1854_v59 = vpop.f32.mrf.mxu0 }
 0x157   : > { %v1897_v34 = vpop.f32.mrf.mxu1  ;;  %v1855_v3 = vadd.f32 %v1854_v59, %v1812_v63  ;;  %v1896_v9 = vadd.f32 %v1895_v4, %v1853_v1 }
 0x158   : > { %v1856_v62 = vpop.f32.mrf.mxu0 }
 0x159   : > { %v1899_v6 = vpop.f32.mrf.mxu1  ;;  %v1857_v10 = vadd.f32 %v1856_v62, %v1814_v2  ;;  %v1898_v14 = vadd.f32 %v1897_v34, %v1855_v3 }
 0x15a   : > { %v1858_v7 = vpop.f32.mrf.mxu0 }
 0x15b   : > { %v1859_v15 = vadd.f32 %v1858_v7, %v1816_v8  ;;  %v1901_v17 = vpop.f32.mrf.mxu1  ;;  %v1900_v19 = vadd.f32 %v1899_v6, %v1857_v10 }
 0x15d   : > { %v1902_v22 = vadd.f32 %v1901_v17, %v1859_v15 }
 0x174   : > { %v1938_v13 = vpop.f32.mrf.mxu0 }
 0x175   : > { %v1939_v16 = vadd.f32 %v1938_v13, %v1896_v9  ;;  %v2613_v28 = vpop.f32.mrf.mxu1 }
 0x176   : > { %v1940_v18 = vpop.f32.mrf.mxu0 }
 0x177   : > { %v1941_v20 = vadd.f32 %v1940_v18, %v1898_v14  ;;  %v3920_v23 = vmax.f32 %v1939_v16, 0.0  ;;  %v2614_v29 = vpop.f32.mrf.mxu1 }
 0x178   : > { %v1942_v21 = vpop.f32.mrf.mxu0  ;;  %v2615_v41 = vadd.f32 %v2614_v29, %v2613_v28 }
 0x179   : > { %v3922_v24 = vmax.f32 %v1941_v20, 0.0  ;;  %v1943_v25 = vadd.f32 %v1942_v21, %v1900_v19  ;;  %v2616_v30 = vpop.f32.mrf.mxu1  ;;  %v2182_v3 = vmul.f32 %v3920_v23, %v3920_v23 }
 0x17a   : > { %v1944_v5 = vpop.f32.mrf.mxu0  ;;  %v1982_v46 = vadd.f32 %v2615_v41, %v530_v40 }
 0x17b   : > { %v2589_v11 = vpack.c.bf16 %v3922_v24, %v3920_v23  ;;  %v1945_v26 = vadd.f32 %v1944_v5, %v1902_v22  ;;  %v3929_v35 = vmax.f32 %v1943_v25, 0.0  ;;  %v2617_v31 = vpop.f32.mrf.mxu1  ;;  %v2183_v63 = vmul.f32 %v3922_v24, %v3922_v24 }
 0x17c   : > { %v2618_v48 = vadd.f32 %v2617_v31, %v2616_v30 }
 0x17d   : > { %2178 = vst [vmem:[%s3926_s5] sm:$0xff] %v2589_v11  ;;  %v3931_v49 = vmax.f32 %v1945_v26, 0.0  ;;  %v2188_v8 = vadd.f32 %v2183_v63, %v2182_v3  ;;  %v2185_v17 = vmul.f32 %v3929_v35, %v3929_v35 }
 0x17e   : > { %v1985_v56 = vadd.f32 %v2618_v48, %v530_v40 }
 0x17f   : > { %v2591_v27 = vpack.c.bf16 %v3931_v49, %v3929_v35  ;;  %v2186_v14 = vmul.f32 %v3931_v49, %v3931_v49 }
 0x181   : > { %2180 = vst [vmem:[%s3926_s5 + $0xc] sm:$0xff] %v2591_v27  ;;  %v2192_v20 = vadd.f32 %v2186_v14, %v2185_v17 }
 0x194   : > { %v2635_v32 = vpop.f32.mrf.mxu0 }
 0x195   : > { %v2657_v33 = vpop.f32.mrf.mxu1 }
 0x196   : > { %v2636_v36 = vpop.f32.mrf.mxu0 }
 0x197   : > { %v2658_v38 = vpop.f32.mrf.mxu1  ;;  %v2637_v43 = vadd.f32 %v2636_v36, %v2635_v32 }
 0x198   : > { %v2638_v39 = vpop.f32.mrf.mxu0  ;;  %v2659_v54 = vadd.f32 %v2658_v38, %v2657_v33 }
 0x199   : > { %v2660_v42 = vpop.f32.mrf.mxu1  ;;  %v2023_v53 = vadd.f32 %v2637_v43, %v1982_v46 }
 0x19a   : > { %v2639_v44 = vpop.f32.mrf.mxu0 }
 0x19b   : > { %v2661_v50 = vpop.f32.mrf.mxu1  ;;  %v2640_v12 = vadd.f32 %v2639_v44, %v2638_v39  ;;  %v2064_v4 = vadd.f32 %v2659_v54, %v2023_v53 }
 0x19c   : > { %v2662_v59 = vadd.f32 %v2661_v50, %v2660_v42 }
 0x19d   : > { %v2026_v45 = vadd.f32 %v2640_v12, %v1985_v56 }
 0x19f   : > { %v2067_v0 = vadd.f32 %v2662_v59, %v2026_v45 }
 0x1b4   : > { %v2679_v55 = vpop.f32.mrf.mxu0 }
 0x1b5   : > { %v2145_v47 = vpop.f32.mrf.mxu1 }
 0x1b6   : > { %v2680_v57 = vpop.f32.mrf.mxu0 }
 0x1b7   : > { %v2712_v58 = vpop.f32.mrf.mxu1  ;;  %v2681_v60 = vadd.f32 %v2680_v57, %v2679_v55 }
 0x1b8   : > { %v2682_v52 = vpop.f32.mrf.mxu0 }
 0x1b9   : > { %v2148_v61 = vpop.f32.mrf.mxu1  ;;  %v2105_v51 = vadd.f32 %v2681_v60, %v2064_v4 }
 0x1ba   : > { %v2683_v34 = vpop.f32.mrf.mxu0 }
 0x1bb   : > { %v2713_v62 = vpop.f32.mrf.mxu1  ;;  %v2146_v1 = vadd.f32 %v2145_v47, %v2105_v51  ;;  %v2684_v2 = vadd.f32 %v2683_v34, %v2682_v52 }
 0x1bd   : > { %v2154_v6 = vmax.f32 %v2146_v1, 0.0  ;;  %v2108_v7 = vadd.f32 %v2684_v2, %v2067_v0 }
 0x1bf   : > { %v2590_v9 = vpack.c.bf16 %v2154_v6, %v2154_v6  ;;  %v2149_v10 = vadd.f32 %v2148_v61, %v2108_v7  ;;  %v2184_v13 = vmul.f32 %v2154_v6, %v2154_v6 }
 0x1c1   : > { %2179 = vst [vmem:[%s3926_s5 + $0x8] sm:$0xf] %v2590_v9  ;;  %v2157_v15 = vmax.f32 %v2149_v10, 0.0  ;;  %v2189_v16 = vadd.f32 %v2188_v8, %v2184_v13 }
 0x1c3   : > { %v2592_v18 = vpack.c.bf16 %v2157_v15, %v2157_v15  ;;  %2190 = vadd.xlane.f32.xlu0 %v2189_v16  ;;  %v2187_v19 = vmul.f32 %v2157_v15, %v2157_v15 }
 0x1c5   : > { %2181 = vst [vmem:[%s3926_s5 + $0x14] sm:$0xf] %v2592_v18  ;;  %v2193_v21 = vadd.f32 %v2192_v20, %v2187_v19 }
 0x1c7   : > { %2194 = vadd.xlane.f32.xlu0 %v2193_v21 }
 0x1c8   : > { %3080 = shalt.err (!%p3077_p3)
}
 0x1c9   : > { %s3081_s22 = scalar_lea.hbm %s3952_s11, 384  ;;  %s3085_s29 = scalar_lea.hbm %s4009_s3, 768 }
 0x1ca   : > { %p3082_p4 = scmp.ne.s32.totalorder %s3952_s11, %s3081_s22  ;;  %p3086_p9 = scmp.lt.s32.totalorder %s3952_s11, %s4009_s3 }
 0x1cb   : > { %p3087_p10 = scmp.lt.s32.totalorder %s3085_s29, %s3081_s22 }
 0x1cc   : > { %p3083_p7 = pnand %p3082_p4, %p3198_p5 }
 0x1cd   : > { %p3088_p11 = por %p3087_p10, %p3086_p9 }
 0x1ce   : > { %p3084_p8 = pneg %p3083_p7 }
 0x1d0   : > { %p3089_p12 = pnand %p3088_p11, %p3084_p8 }
 0x1d2   : > { %3092 = shalt.err (!%p3089_p12)
}
 0x1d3   : > { %s3133_s5 = smov 192   ;;  %s3134_s6 = smov 12  }
 0x1d4   : > { %2718 = dma.vmem_to_hbm [thread:$0]  (%p3198_p5), %s3954_s7, 384, %s3952_s11, %s3958_s12, %s3133_s5, %s3133_s5, %s3134_s6  }
 0x1d5   : > { %s2716_s8 = smul.u32 12, %s4018_s10 }
 0x1d7   : > { %s216_s19 = scalar_lea.vmem %s4010_s4, %s2716_s8 }
 0x24c   : > { %v2191_v22 = vpop.xlane.xlu0 %2190 }
 0x24d   : > { %v2196_v25 = vadd.f32 1e-08, %v2191_v22 }
 0x24f   : > { %3063 = vrsqrt.f32 %v2196_v25 }
 0x250   : > { %v2195_v5 = vpop.xlane.xlu0 %2194 }
 0x251   : > { %v2197_v11 = vadd.f32 1e-08, %v2195_v5 }
 0x253   : > { %3065 = vrsqrt.f32 %v2197_v11 }
 0x25c   : > { %v3064_v26 = vpop.eup %3063 }
 0x25d   : > { %v2200_v27 = vmul.f32 %v3064_v26, %v3920_v23  ;;  %v2201_v28 = vmul.f32 %v3064_v26, %v3922_v24  ;;  %v2202_v29 = vmul.f32 %v3064_v26, %v2154_v6 }
 0x25f   : > { %v2593_v30 = vpack.c.bf16 %v2201_v28, %v2200_v27  ;;  %v2594_v31 = vpack.c.bf16 %v2202_v29, %v2202_v29 }
 0x260   : > { %v3066_v32 = vpop.eup %3065 }
 0x261   : > { %2226 = vst [vmem:[%s216_s19] sm:$0xff] %v2593_v30  ;;  %2227 = vst [vmem:[%s216_s19 + $0x8] sm:$0xf] %v2594_v31  ;;  %v2203_v33 = vmul.f32 %v3066_v32, %v3929_v35  ;;  %v2204_v36 = vmul.f32 %v3066_v32, %v3931_v49  ;;  %v2205_v37 = vmul.f32 %v3066_v32, %v2157_v15 }
 0x263   : > { %v2595_v38 = vpack.c.bf16 %v2204_v36, %v2203_v33  ;;  %v2596_v39 = vpack.c.bf16 %v2205_v37, %v2205_v37 }
 0x265   : > { %2228 = vst [vmem:[%s216_s19 + $0xc] sm:$0xff] %v2595_v38  ;;  %2229 = vst [vmem:[%s216_s19 + $0x14] sm:$0xf] %v2596_v39 }
 0x266 PF: > { %p2724_p5 = scmp.ge.s32.totalorder %s3127_s18, 2  ;;  %s2270_s25 = sand.u32 1, %s3115_s15  }
 0x267   : > { %s2271_s10 = scalar_lea.sflag [#allocation3], %s2270_s25 }
 0x268   : > { %p2721_p13 = pnand %p2724_p5, %p3202_p6 }
 0x26a   : > { %p2722_p0 = pneg %p2721_p13 }
 0x26c   : > { %3110 = dma.done.wait (%p2722_p0), %s2271_s10, 384  }
 0x26d   : > { %3112 = vsyncadd (%p2722_p0), %s2271_s10, 4294966912  ;;  %p15_p1 = scmp.ge.s32.totalorder %s3185_s21, 4   ;;  %s4013_s15 = smov %s3119_s16 }
 0x26e   : > { %s4014_s16 = smov %s3123_s17  ;;  %s4015_s17 = smov %s3196_s24 }
 0x26f   : > { %s4016_s18 = smov %s3185_s21  ;;  %17 = sbr.rel (!%p15_p1) target bundleno = 3 (0x3), region = 79 }
 0x274   :  { %2285 = vsyncpa [#allocation3], 1 }
 0x275   :  { %2287 = vsyncpa [#allocation3 + $0x1], 1 }

</bundles_post_ra>
